<compile_context>
chip_gen: v6e
topology: v6e:2x2x1
jax: 0.10.0
libtpu: 0.0.40
codegen_flags: <defaults>
</compile_context>

<pallas_src>
import functools
import numpy as np

import jax
import jax.numpy as jnp
from jax.experimental import pallas as pl
from jax.experimental.pallas import tpu as pltpu

MATMUL_DTYPE = jnp.bfloat16            # MXU operand dtype (accumulation is f32)

_PAR = pltpu.CompilerParams(dimension_semantics=("parallel",))


# ----------------------------------------------------------------------------
# wrapper-side helpers (plain-JAX glue: padding, weight row-expansion, upsample)
# ----------------------------------------------------------------------------

def pad_flatten(x_nhwc):
    """NHWC -> spatially padded, row-flattened (B, H+2, (W+2)*C)."""
    B, H, W, C = x_nhwc.shape
    xp = jnp.pad(x_nhwc, ((0, 0), (1, 1), (1, 1), (0, 0)))
    return xp.reshape(B, H + 2, (W + 2) * C)


def upsample_nearest(x_nhwc, s):
    # nn.Upsample(scale_factor=s), default mode='nearest' -> pure replication
    x = jnp.repeat(x_nhwc, s, axis=1)
    return jnp.repeat(x, s, axis=2)


def _expand_core(w_hwio, W):
    """w (3,3,Cin,Cout) -> (3, W+2, Cin, W, Cout) row-expanded conv taps.

    We[dy, xi, ci, xo, co] = w[dy, xi-xo, ci, co] (zero outside the 3-tap band),
    so a same-padded 3x3 conv of a padded row-flattened image Xp becomes
        Y = sum_dy (Xp @ We[dy].reshape((W+2)*Cin, W*Cout))[dy:dy+H].
    """
    xi = jnp.arange(W + 2)[None, :, None]
    xo = jnp.arange(W)[None, None, :]
    dx = jnp.arange(3)[:, None, None]
    T = (xi == xo + dx).astype(w_hwio.dtype)              # (3, W+2, W)
    return jnp.einsum('dio,ydcf->yicof', T, w_hwio)       # (dy, x_in, Cin, x_out, Cout)


def expand_conv(w_hwio, b, W):
    """Standard layout: output column = x*Cout + co."""
    core = _expand_core(w_hwio, W)
    _, Wp2, Cin, Wo, Co = core.shape
    wexp = core.reshape(3, Wp2 * Cin, Wo * Co).astype(MATMUL_DTYPE)
    bexp = jnp.tile(b, Wo).reshape(1, Wo * Co).astype(jnp.float32)
    return wexp, bexp


def expand_conv_gates(w_hwio, b, W, n_gates=4):
    """Gate-grouped layout: column = gate*(W*gch) + x*gch + c (aligned gate slices)."""
    core = _expand_core(w_hwio, W)
    _, Wp2, Cin, Wo, Co = core.shape
    gch = Co // n_gates
    core = core.reshape(3, Wp2, Cin, Wo, n_gates, gch).transpose(0, 1, 2, 4, 3, 5)
    wexp = core.reshape(3, Wp2 * Cin, n_gates * Wo * gch).astype(MATMUL_DTYPE)
    bexp = jnp.tile(b.reshape(n_gates, 1, gch), (1, Wo, 1)).reshape(1, -1)
    return wexp, bexp.astype(jnp.float32)


def expand_conv_pool(w_hwio, b, W, s):
    """Pool-grouped layout: column = j*(Wp*Cout) + xp*Cout + co with x = xp*s + j,
    so W-direction max-pool = max over s contiguous lane slices."""
    core = _expand_core(w_hwio, W)
    _, Wp2, Cin, Wo, Co = core.shape
    Wp = Wo // s
    core = core.reshape(3, Wp2, Cin, Wp, s, Co).transpose(0, 1, 2, 4, 3, 5)
    wexp = core.reshape(3, Wp2 * Cin, s * Wp * Co).astype(MATMUL_DTYPE)
    bexp = jnp.tile(b, Wo).reshape(1, Wo * Co).astype(jnp.float32)
    return wexp, bexp


def _batch_spec(shape):
    nd = len(shape)

    def imap(b):
        return (b,) + (0,) * (nd - 1)

    return pl.BlockSpec((1,) + tuple(shape[1:]), imap)


def _full_spec(shape):
    nd = len(shape)

    def imap(b):
        return (0,) * nd

    return pl.BlockSpec(tuple(shape), imap)


# ----------------------------------------------------------------------------
# Pallas kernels
# ----------------------------------------------------------------------------

def _conv_accum(xp_ref, w_ref, H):
    """In-kernel 3x3 same conv: 3 matmuls + sublane-shifted adds -> (H, cols) f32."""
    x = xp_ref[0].astype(MATMUL_DTYPE)                       # (H+2, (W+2)*Cin)
    y = jnp.dot(x, w_ref[0], preferred_element_type=jnp.float32)[0:H]
    y = y + jnp.dot(x, w_ref[1], preferred_element_type=jnp.float32)[1:H + 1]
    y = y + jnp.dot(x, w_ref[2], preferred_element_type=jnp.float32)[2:H + 2]
    return y


def _conv_kernel(xp_ref, w_ref, b_ref, o_ref, *, H, act):
    y = _conv_accum(xp_ref, w_ref, H) + b_ref[...]
    if act == "relu":
        y = jnp.maximum(y, 0.0)
    elif act == "relu_sat":                                  # ReLU -> SatLU(0, 255)
        y = jnp.clip(y, 0.0, 255.0)
    o_ref[0] = y


def _conv_err_kernel(xp_ref, a_ref, w_ref, b_ref, ahat_ref, pos_ref, neg_ref,
                     *, H, satlu):
    # conv(R) + ReLU(+SatLU) and the error unit fused in one kernel.
    y = _conv_accum(xp_ref, w_ref, H) + b_ref[...]
    y = jnp.clip(y, 0.0, 255.0) if satlu else jnp.maximum(y, 0.0)
    a = a_ref[0]
    ahat_ref[0] = y
    pos_ref[0] = jnp.maximum(y - a, 0.0)
    neg_ref[0] = jnp.maximum(a - y, 0.0)


def _convlstm_kernel(zp_ref, c_ref, w_ref, b_ref, h_ref, cn_ref, *, H, G):
    # single fused conv over [input || hidden]; gate columns are grouped so the
    # i/f/g/o slices are contiguous, lane-aligned blocks of width G = W*ch.
    gates = _conv_accum(zp_ref, w_ref, H) + b_ref[...]        # (H, 4*G)
    i = jax.nn.sigmoid(gates[:, 0 * G:1 * G])
    f = jax.nn.sigmoid(gates[:, 1 * G:2 * G])
    g = jnp.tanh(gates[:, 2 * G:3 * G])
    o = jax.nn.sigmoid(gates[:, 3 * G:4 * G])
    c_new = f * c_ref[0] + i * g
    h_ref[0] = o * jnp.tanh(c_new)
    cn_ref[0] = c_new


def _conv_pool_kernel(xp_ref, w_ref, b_ref, o_ref, *, H, s, cpj):
    # update_A conv fused with the W-direction of MaxPool2d(s).
    y = _conv_accum(xp_ref, w_ref, H) + b_ref[...]            # (H, s*cpj)
    m = y[:, 0:cpj]
    for j in range(1, s):
        m = jnp.maximum(m, y[:, j * cpj:(j + 1) * cpj])
    o_ref[0] = m


# ----------------------------------------------------------------------------
# pallas_call wrappers
# ----------------------------------------------------------------------------

def conv3x3(wexp, bexp, x_nhwc, act=None):
    B, H, W, _ = x_nhwc.shape
    Cout = bexp.shape[-1] // W
    xp = pad_flatten(x_nhwc)
    out = pl.pallas_call(
        functools.partial(_conv_kernel, H=H, act=act),
        out_shape=jax.ShapeDtypeStruct((B, H, W * Cout), jnp.float32),
        grid=(B,),
        in_specs=[_batch_spec(xp.shape), _full_spec(wexp.shape),
                  _full_spec(bexp.shape)],
        out_specs=_batch_spec((B, H, W * Cout)),
        compiler_params=_PAR,
    )(xp, wexp, bexp)
    return out.reshape(B, H, W, Cout)


def conv3x3_error(wexp, bexp, r_nhwc, a_nhwc, satlu):
    B, H, W, C = a_nhwc.shape
    rp = pad_flatten(r_nhwc)
    af = a_nhwc.reshape(B, H, W * C)
    oshape = jax.ShapeDtypeStruct((B, H, W * C), jnp.float32)
    ahat, pos, neg = pl.pallas_call(
        functools.partial(_conv_err_kernel, H=H, satlu=satlu),
        out_shape=(oshape, oshape, oshape),
        grid=(B,),
        in_specs=[_batch_spec(rp.shape), _batch_spec(af.shape),
                  _full_spec(wexp.shape), _full_spec(bexp.shape)],
        out_specs=(_batch_spec((B, H, W * C)),) * 3,
        compiler_params=_PAR,
    )(rp, af, wexp, bexp)
    rs = lambda t: t.reshape(B, H, W, C)
    return rs(ahat), rs(pos), rs(neg)


def convlstm_cell(wexp, bexp, z_nhwc, c_prev, ch):
    B, H, W, _ = z_nhwc.shape
    zp = pad_flatten(z_nhwc)
    cf = c_prev.reshape(B, H, W * ch)
    G = W * ch
    oshape = jax.ShapeDtypeStruct((B, H, G), jnp.float32)
    h, c = pl.pallas_call(
        functools.partial(_convlstm_kernel, H=H, G=G),
        out_shape=(oshape, oshape),
        grid=(B,),
        in_specs=[_batch_spec(zp.shape), _batch_spec(cf.shape),
                  _full_spec(wexp.shape), _full_spec(bexp.shape)],
        out_specs=(_batch_spec((B, H, G)),) * 2,
        compiler_params=_PAR,
    )(zp, cf, wexp, bexp)
    return h.reshape(B, H, W, ch), c.reshape(B, H, W, ch)


def conv3x3_maxpool(wexp, bexp, e_nhwc, s):
    B, H, W, _ = e_nhwc.shape
    Cout = bexp.shape[-1] // W
    Hp, Wp = H // s, W // s
    ep = pad_flatten(e_nhwc)
    yw = pl.pallas_call(
        functools.partial(_conv_pool_kernel, H=H, s=s, cpj=Wp * Cout),
        out_shape=jax.ShapeDtypeStruct((B, H, Wp * Cout), jnp.float32),
        grid=(B,),
        in_specs=[_batch_spec(ep.shape), _full_spec(wexp.shape),
                  _full_spec(bexp.shape)],
        out_specs=_batch_spec((B, H, Wp * Cout)),
        compiler_params=_PAR,
    )(ep, wexp, bexp)
    # H-direction of the pool on the already W-pooled (4x smaller) tensor.
    # TODO(synk): fold the H-direction max into the kernel as well.
    return jnp.max(yw.reshape(B, Hp, s, Wp, Cout), axis=2)


# ----------------------------------------------------------------------------
# PredNet parameters + forward (structure mirrors the PyTorch module)
# ----------------------------------------------------------------------------

def init_prednet_params(key, a_channels, r_channels):
    r_ext = tuple(r_channels) + (0,)
    n_layers = len(r_channels)

    def unif(k, shape, fan_in):
        bound = 1.0 / np.sqrt(fan_in)
        return jax.random.uniform(k, shape, jnp.float32, -bound, bound)

    params = {"cell": [], "conv": [], "updA": []}
    for l in range(n_layers):
        cin = 2 * a_channels[l] + r_ext[l + 1]
        ch = r_channels[l]
        key, k1, k2, k3 = jax.random.split(key, 4)
        params["cell"].append({
            "wx": unif(k1, (3, 3, cin, 4 * ch), 9 * cin),      # HWIO
            "wh": unif(k2, (3, 3, ch, 4 * ch), 9 * ch),
            "b":  unif(k3, (4 * ch,), 9 * cin),
        })
    for l in range(n_layers):
        key, k1, k2 = jax.random.split(key, 3)
        params["conv"].append({
            "w": unif(k1, (3, 3, r_channels[l], a_channels[l]), 9 * r_channels[l]),
            "b": unif(k2, (a_channels[l],), 9 * r_channels[l]),
        })
    for l in range(n_layers - 1):
        key, k1, k2 = jax.random.split(key, 3)
        params["updA"].append({
            "w": unif(k1, (3, 3, 2 * a_channels[l], a_channels[l + 1]),
                      9 * 2 * a_channels[l]),
            "b": unif(k2, (a_channels[l + 1],), 9 * 2 * a_channels[l]),
        })
    return params


def prednet_forward(params, x, nt, a_channels, r_channels, scale=4,
                    t_extrap=float("inf")):
    """x: (B, nt, C, H, W) NCHW frames (PyTorch convention)."""
    n_layers = len(r_channels)
    B = x.shape[0]
    H0, W0 = x.shape[-2], x.shape[-1]

    sizes = []
    h_, w_ = H0, W0
    for l in range(n_layers):
        sizes.append((h_, w_))
        h_ //= scale
        w_ //= scale

    # Row-expanded, MXU-ready (bf16) weights: built once, outside the t-loop.
    cell_w, conv_w, updA_w = [], [], []
    for l in range(n_layers):
        _, Wl = sizes[l]
        pc = params["cell"][l]
        w_cat = jnp.concatenate([pc["wx"], pc["wh"]], axis=2)   # [input || hidden]
        cell_w.append(expand_conv_gates(w_cat, pc["b"], Wl))
        conv_w.append(expand_conv(params["conv"][l]["w"], params["conv"][l]["b"], Wl))
        if l < n_layers - 1:
            updA_w.append(expand_conv_pool(params["updA"][l]["w"],
                                           params["updA"][l]["b"], Wl, scale))

    # state init (E kept as (pos, neg) pair; channel order matches torch.cat)
    E_seq, R_seq, H_seq = [], [], [None] * n_layers
    for l in range(n_layers):
        Hl, Wl = sizes[l]
        zero_a = jnp.zeros((B, Hl, Wl, a_channels[l]), jnp.float32)
        E_seq.append((zero_a, zero_a))
        R_seq.append(jnp.zeros((B, Hl, Wl, r_channels[l]), jnp.float32))

    frame_preds = []
    latent_state = None
    A = None

    for t in range(nt):
        # ---- top-down ConvLSTM pass --------------------------------------
        for l in reversed(range(n_layers)):
            pos, neg = E_seq[l]
            h_prev, c_prev = (R_seq[l], R_seq[l]) if t == 0 else H_seq[l]
            parts = [pos, neg]
            if l < n_layers - 1:
                parts.append(upsample_nearest(R_seq[l + 1], scale))
            z = jnp.concatenate(parts + [h_prev], axis=-1)
            Rn, c_new = convlstm_cell(cell_w[l][0], cell_w[l][1], z, c_prev,
                                      r_channels[l])
            R_seq[l] = Rn
            H_seq[l] = (Rn, c_new)
            if l == n_layers - 1 and t == t_extrap:
                latent_state = jax.lax.stop_gradient(Rn)

        if t < t_extrap:
            A = jnp.transpose(x[:, t], (0, 2, 3, 1))             # NCHW -> NHWC

        # ---- bottom-up prediction / error pass ---------------------------
        for l in range(n_layers):
            if t < t_extrap:
                a_hat, pos, neg = conv3x3_error(conv_w[l][0], conv_w[l][1],
                                                R_seq[l], A, satlu=(l == 0))
                if l == 0:
                    frame_pred = a_hat
                E_seq[l] = (pos, neg)
                if l < n_layers - 1:
                    e = jnp.concatenate([pos, neg], axis=-1)
                    A = conv3x3_maxpool(updA_w[l][0], updA_w[l][1], e, scale)
            else:
                # A_hat of upper layers is unused in this regime (matches torch output).
                if l == 0:
                    frame_pred = conv3x3(conv_w[0][0], conv_w[0][1], R_seq[0],
                                         act="relu_sat")

        frame_preds.append(jnp.transpose(frame_pred, (0, 3, 1, 2)))   # -> NCHW

    if latent_state is not None:
        latent_state = jnp.transpose(latent_state, (0, 3, 1, 2))      # -> NCHW
    return frame_preds, latent_state


prednet_forward_jit = jax.jit(
    prednet_forward,
    static_argnames=("nt", "a_channels", "r_channels", "scale", "t_extrap"))


# ----------------------------------------------------------------------------

if __name__ == "__main__":
    A_channels = (4, 8)
    R_channels = (8, 8)
    scale = 4
    B, nt, H, W = 2, 4, 16, 16
    t_extrap = 2                      # finite so latent_state is produced

    key = jax.random.PRNGKey(0)
    pkey, xkey = jax.random.split(key)
    params = init_prednet_params(pkey, A_channels, R_channels)
    x = jax.random.uniform(xkey, (B, nt, A_channels[0], H, W),
                           jnp.float32, 0.0, 255.0)

    frame_preds, latent = prednet_forward_jit(
        params, x, nt=nt, a_channels=A_channels, r_channels=R_channels,
        scale=scale, t_extrap=t_extrap)

    frame_preds = [jax.block_until_ready(f) for f in frame_preds]
    latent = jax.block_until_ready(latent)

    assert len(frame_preds) == nt
    assert frame_preds[0].shape == (B, A_channels[0], H, W)
    assert latent.shape == (B, R_channels[-1], H // scale, W // scale)
    assert all(bool(jnp.all(jnp.isfinite(f))) for f in frame_preds)
    print("KERNEL_OK")
</pallas_src>

<mosaic_0001>
module attributes {stable_mosaic.version = 11 : i64} {
  func.func @_convlstm_kernel(%arg0: i32, %arg1: memref<1x6x144xf32, #tpu.memory_space<vmem>>, %arg2: memref<1x4x32xf32, #tpu.memory_space<vmem>>, %arg3: memref<3x144x128xbf16, #tpu.memory_space<vmem>>, %arg4: memref<1x128xf32, #tpu.memory_space<vmem>>, %arg5: memref<1x4x32xf32, #tpu.memory_space<vmem>>, %arg6: memref<1x4x32xf32, #tpu.memory_space<vmem>>) attributes {dimension_semantics = [#tpu.dimension_semantics<parallel>], iteration_bounds = array<i64: 2>, scalar_prefetch = 0 : i64, scratch_operands = 0 : i64, tpu.core_type = #tpu.core_type<tc>, window_params = [{transform_indices = @transform_0, window_bounds = array<i64: 1, 6, 144>}, {transform_indices = @transform_1, window_bounds = array<i64: 1, 4, 32>}, {pipeline_mode = #tpu.pipeline_mode<synchronous>, transform_indices = @transform_2, window_bounds = array<i64: 3, 144, 128>}, {pipeline_mode = #tpu.pipeline_mode<synchronous>, transform_indices = @transform_3, window_bounds = array<i64: 1, 128>}, {transform_indices = @transform_4, window_bounds = array<i64: 1, 4, 32>}, {transform_indices = @transform_5, window_bounds = array<i64: 1, 4, 32>}]} {
    %c0 = arith.constant 0 : index
    %c0_0 = arith.constant 0 : index
    %c0_1 = arith.constant 0 : index
    %0 = vector.load %arg1[%c0, %c0_0, %c0_1] : memref<1x6x144xf32, #tpu.memory_space<vmem>>, vector<1x6x144xf32>
    %1 = vector.shape_cast %0 : vector<1x6x144xf32> to vector<6x144xf32>
    %2 = arith.truncf %1 : vector<6x144xf32> to vector<6x144xbf16>
    %c0_2 = arith.constant 0 : index
    %c0_3 = arith.constant 0 : index
    %c0_4 = arith.constant 0 : index
    %3 = vector.load %arg3[%c0_2, %c0_3, %c0_4] : memref<3x144x128xbf16, #tpu.memory_space<vmem>>, vector<1x144x128xbf16>
    %4 = vector.shape_cast %3 : vector<1x144x128xbf16> to vector<144x128xbf16>
    %cst = arith.constant dense<0.000000e+00> : vector<6x128xf32>
    %5 = tpu.matmul %2, %4, %cst {dimension_numbers = #tpu.dot_dimension_numbers<[1], [0], [0], [1], [0, 0, 1, 1], [], []>} : vector<6x144xbf16>, vector<144x128xbf16>, vector<6x128xf32> -> vector<6x128xf32>
    %6 = vector.extract_strided_slice %5 {offsets = [0, 0], sizes = [4, 128], strides = [1, 1]} : vector<6x128xf32> to vector<4x128xf32>
    %c1 = arith.constant 1 : index
    %c0_5 = arith.constant 0 : index
    %c0_6 = arith.constant 0 : index
    %7 = vector.load %arg3[%c1, %c0_5, %c0_6] : memref<3x144x128xbf16, #tpu.memory_space<vmem>>, vector<1x144x128xbf16>
    %8 = vector.shape_cast %7 : vector<1x144x128xbf16> to vector<144x128xbf16>
    %cst_7 = arith.constant dense<0.000000e+00> : vector<6x128xf32>
    %9 = tpu.matmul %2, %8, %cst_7 {dimension_numbers = #tpu.dot_dimension_numbers<[1], [0], [0], [1], [0, 0, 1, 1], [], []>} : vector<6x144xbf16>, vector<144x128xbf16>, vector<6x128xf32> -> vector<6x128xf32>
    %10 = vector.extract_strided_slice %9 {offsets = [1, 0], sizes = [4, 128], strides = [1, 1]} : vector<6x128xf32> to vector<4x128xf32>
    %11 = arith.addf %6, %10 : vector<4x128xf32>
    %c2 = arith.constant 2 : index
    %c0_8 = arith.constant 0 : index
    %c0_9 = arith.constant 0 : index
    %12 = vector.load %arg3[%c2, %c0_8, %c0_9] : memref<3x144x128xbf16, #tpu.memory_space<vmem>>, vector<1x144x128xbf16>
    %13 = vector.shape_cast %12 : vector<1x144x128xbf16> to vector<144x128xbf16>
    %cst_10 = arith.constant dense<0.000000e+00> : vector<6x128xf32>
    %14 = tpu.matmul %2, %13, %cst_10 {dimension_numbers = #tpu.dot_dimension_numbers<[1], [0], [0], [1], [0, 0, 1, 1], [], []>} : vector<6x144xbf16>, vector<144x128xbf16>, vector<6x128xf32> -> vector<6x128xf32>
    %15 = vector.extract_strided_slice %14 {offsets = [2, 0], sizes = [4, 128], strides = [1, 1]} : vector<6x128xf32> to vector<4x128xf32>
    %16 = arith.addf %11, %15 : vector<4x128xf32>
    %c0_11 = arith.constant 0 : index
    %c0_12 = arith.constant 0 : index
    %17 = vector.load %arg4[%c0_11, %c0_12] : memref<1x128xf32, #tpu.memory_space<vmem>>, vector<1x128xf32>
    %18 = vector.broadcast %17 : vector<1x128xf32> to vector<4x128xf32>
    %19 = arith.addf %16, %18 : vector<4x128xf32>
    %20 = vector.extract_strided_slice %19 {offsets = [0, 0], sizes = [4, 32], strides = [1, 1]} : vector<4x128xf32> to vector<4x32xf32>
    %21 = arith.negf %20 : vector<4x32xf32>
    %22 = math.exp %21 : vector<4x32xf32>
    %cst_13 = arith.constant 1.000000e+00 : f32
    %23 = vector.broadcast %cst_13 : f32 to vector<4x32xf32>
    %24 = arith.addf %23, %22 : vector<4x32xf32>
    %25 = arith.divf %23, %24 : vector<4x32xf32>
    %26 = vector.extract_strided_slice %19 {offsets = [0, 32], sizes = [4, 32], strides = [1, 1]} : vector<4x128xf32> to vector<4x32xf32>
    %27 = arith.negf %26 : vector<4x32xf32>
    %28 = math.exp %27 : vector<4x32xf32>
    %cst_14 = arith.constant 1.000000e+00 : f32
    %29 = vector.broadcast %cst_14 : f32 to vector<4x32xf32>
    %30 = arith.addf %29, %28 : vector<4x32xf32>
    %31 = arith.divf %29, %30 : vector<4x32xf32>
    %32 = vector.extract_strided_slice %19 {offsets = [0, 64], sizes = [4, 32], strides = [1, 1]} : vector<4x128xf32> to vector<4x32xf32>
    %33 = math.tanh %32 : vector<4x32xf32>
    %34 = vector.extract_strided_slice %19 {offsets = [0, 96], sizes = [4, 32], strides = [1, 1]} : vector<4x128xf32> to vector<4x32xf32>
    %35 = arith.negf %34 : vector<4x32xf32>
    %36 = math.exp %35 : vector<4x32xf32>
    %cst_15 = arith.constant 1.000000e+00 : f32
    %37 = vector.broadcast %cst_15 : f32 to vector<4x32xf32>
    %38 = arith.addf %37, %36 : vector<4x32xf32>
    %39 = arith.divf %37, %38 : vector<4x32xf32>
    %c0_16 = arith.constant 0 : index
    %c0_17 = arith.constant 0 : index
    %c0_18 = arith.constant 0 : index
    %40 = vector.load %arg2[%c0_16, %c0_17, %c0_18] : memref<1x4x32xf32, #tpu.memory_space<vmem>>, vector<1x4x32xf32>
    %41 = vector.shape_cast %40 : vector<1x4x32xf32> to vector<4x32xf32>
    %42 = arith.mulf %31, %41 : vector<4x32xf32>
    %43 = arith.mulf %25, %33 : vector<4x32xf32>
    %44 = arith.addf %42, %43 : vector<4x32xf32>
    %45 = math.tanh %44 : vector<4x32xf32>
    %46 = arith.mulf %39, %45 : vector<4x32xf32>
    %c0_19 = arith.constant 0 : index
    %c0_20 = arith.constant 0 : index
    %c0_21 = arith.constant 0 : index
    %47 = vector.load %arg5[%c0_19, %c0_20, %c0_21] : memref<1x4x32xf32, #tpu.memory_space<vmem>>, vector<1x4x32xf32>
    %48 = vector.shape_cast %47 : vector<1x4x32xf32> to vector<4x32xf32>
    %49 = vector.shape_cast %46 : vector<4x32xf32> to vector<1x4x32xf32>
    tpu.vector_store %arg5[%c0_19, %c0_20, %c0_21], %49 {strides = array<i32>} : memref<1x4x32xf32, #tpu.memory_space<vmem>>, vector<1x4x32xf32>,
    %c0_22 = arith.constant 0 : index
    %c0_23 = arith.constant 0 : index
    %c0_24 = arith.constant 0 : index
    %50 = vector.load %arg6[%c0_22, %c0_23, %c0_24] : memref<1x4x32xf32, #tpu.memory_space<vmem>>, vector<1x4x32xf32>
    %51 = vector.shape_cast %50 : vector<1x4x32xf32> to vector<4x32xf32>
    %52 = vector.shape_cast %44 : vector<4x32xf32> to vector<1x4x32xf32>
    tpu.vector_store %arg6[%c0_22, %c0_23, %c0_24], %52 {strides = array<i32>} : memref<1x4x32xf32, #tpu.memory_space<vmem>>, vector<1x4x32xf32>,
    return
  }
  func.func @transform_0(%arg0: i32) -> (i32, i32, i32) {
    %c0_i32 = arith.constant 0 : i32
    %c0_i32_0 = arith.constant 0 : i32
    %c0_i32_1 = arith.constant 0 : i32
    return %arg0, %c0_i32, %c0_i32_0 : i32, i32, i32
  }
  func.func @transform_1(%arg0: i32) -> (i32, i32, i32) {
    %c0_i32 = arith.constant 0 : i32
    %c0_i32_0 = arith.constant 0 : i32
    %c0_i32_1 = arith.constant 0 : i32
    return %arg0, %c0_i32, %c0_i32_0 : i32, i32, i32
  }
  func.func @transform_2(%arg0: i32) -> (i32, i32, i32) {
    %c0_i32 = arith.constant 0 : i32
    %c0_i32_0 = arith.constant 0 : i32
    %c0_i32_1 = arith.constant 0 : i32
    %c0_i32_2 = arith.constant 0 : i32
    return %c0_i32, %c0_i32_0, %c0_i32_1 : i32, i32, i32
  }
  func.func @transform_3(%arg0: i32) -> (i32, i32) {
    %c0_i32 = arith.constant 0 : i32
    %c0_i32_0 = arith.constant 0 : i32
    %c0_i32_1 = arith.constant 0 : i32
    return %c0_i32, %c0_i32_0 : i32, i32
  }
  func.func @transform_4(%arg0: i32) -> (i32, i32, i32) {
    %c0_i32 = arith.constant 0 : i32
    %c0_i32_0 = arith.constant 0 : i32
    %c0_i32_1 = arith.constant 0 : i32
    return %arg0, %c0_i32, %c0_i32_0 : i32, i32, i32
  }
  func.func @transform_5(%arg0: i32) -> (i32, i32, i32) {
    %c0_i32 = arith.constant 0 : i32
    %c0_i32_0 = arith.constant 0 : i32
    %c0_i32_1 = arith.constant 0 : i32
    return %arg0, %c0_i32, %c0_i32_0 : i32, i32, i32
  }
}

module attributes {stable_mosaic.version = 11 : i64} {
  func.func @_convlstm_kernel(%arg0: i32, %arg1: memref<1x18x432xf32, #tpu.memory_space<vmem>>, %arg2: memref<1x16x128xf32, #tpu.memory_space<vmem>>, %arg3: memref<3x432x512xbf16, #tpu.memory_space<vmem>>, %arg4: memref<1x512xf32, #tpu.memory_space<vmem>>, %arg5: memref<1x16x128xf32, #tpu.memory_space<vmem>>, %arg6: memref<1x16x128xf32, #tpu.memory_space<vmem>>) attributes {dimension_semantics = [#tpu.dimension_semantics<parallel>], iteration_bounds = array<i64: 2>, scalar_prefetch = 0 : i64, scratch_operands = 0 : i64, tpu.core_type = #tpu.core_type<tc>, window_params = [{transform_indices = @transform_0, window_bounds = array<i64: 1, 18, 432>}, {transform_indices = @transform_1, window_bounds = array<i64: 1, 16, 128>}, {pipeline_mode = #tpu.pipeline_mode<synchronous>, transform_indices = @transform_2, window_bounds = array<i64: 3, 432, 512>}, {pipeline_mode = #tpu.pipeline_mode<synchronous>, transform_indices = @transform_3, window_bounds = array<i64: 1, 512>}, {transform_indices = @transform_4, window_bounds = array<i64: 1, 16, 128>}, {transform_indices = @transform_5, window_bounds = array<i64: 1, 16, 128>}]} {
    %c0 = arith.constant 0 : index
    %c0_0 = arith.constant 0 : index
    %c0_1 = arith.constant 0 : index
    %0 = vector.load %arg1[%c0, %c0_0, %c0_1] : memref<1x18x432xf32, #tpu.memory_space<vmem>>, vector<1x18x432xf32>
    %1 = vector.shape_cast %0 : vector<1x18x432xf32> to vector<18x432xf32>
    %2 = arith.truncf %1 : vector<18x432xf32> to vector<18x432xbf16>
    %c0_2 = arith.constant 0 : index
    %c0_3 = arith.constant 0 : index
    %c0_4 = arith.constant 0 : index
    %3 = vector.load %arg3[%c0_2, %c0_3, %c0_4] : memref<3x432x512xbf16, #tpu.memory_space<vmem>>, vector<1x432x512xbf16>
    %4 = vector.shape_cast %3 : vector<1x432x512xbf16> to vector<432x512xbf16>
    %cst = arith.constant dense<0.000000e+00> : vector<18x512xf32>
    %5 = tpu.matmul %2, %4, %cst {dimension_numbers = #tpu.dot_dimension_numbers<[1], [0], [0], [1], [0, 0, 1, 1], [], []>} : vector<18x432xbf16>, vector<432x512xbf16>, vector<18x512xf32> -> vector<18x512xf32>
    %6 = vector.extract_strided_slice %5 {offsets = [0, 0], sizes = [16, 512], strides = [1, 1]} : vector<18x512xf32> to vector<16x512xf32>
    %c1 = arith.constant 1 : index
    %c0_5 = arith.constant 0 : index
    %c0_6 = arith.constant 0 : index
    %7 = vector.load %arg3[%c1, %c0_5, %c0_6] : memref<3x432x512xbf16, #tpu.memory_space<vmem>>, vector<1x432x512xbf16>
    %8 = vector.shape_cast %7 : vector<1x432x512xbf16> to vector<432x512xbf16>
    %cst_7 = arith.constant dense<0.000000e+00> : vector<18x512xf32>
    %9 = tpu.matmul %2, %8, %cst_7 {dimension_numbers = #tpu.dot_dimension_numbers<[1], [0], [0], [1], [0, 0, 1, 1], [], []>} : vector<18x432xbf16>, vector<432x512xbf16>, vector<18x512xf32> -> vector<18x512xf32>
    %10 = vector.extract_strided_slice %9 {offsets = [1, 0], sizes = [16, 512], strides = [1, 1]} : vector<18x512xf32> to vector<16x512xf32>
    %11 = arith.addf %6, %10 : vector<16x512xf32>
    %c2 = arith.constant 2 : index
    %c0_8 = arith.constant 0 : index
    %c0_9 = arith.constant 0 : index
    %12 = vector.load %arg3[%c2, %c0_8, %c0_9] : memref<3x432x512xbf16, #tpu.memory_space<vmem>>, vector<1x432x512xbf16>
    %13 = vector.shape_cast %12 : vector<1x432x512xbf16> to vector<432x512xbf16>
    %cst_10 = arith.constant dense<0.000000e+00> : vector<18x512xf32>
    %14 = tpu.matmul %2, %13, %cst_10 {dimension_numbers = #tpu.dot_dimension_numbers<[1], [0], [0], [1], [0, 0, 1, 1], [], []>} : vector<18x432xbf16>, vector<432x512xbf16>, vector<18x512xf32> -> vector<18x512xf32>
    %15 = vector.extract_strided_slice %14 {offsets = [2, 0], sizes = [16, 512], strides = [1, 1]} : vector<18x512xf32> to vector<16x512xf32>
    %16 = arith.addf %11, %15 : vector<16x512xf32>
    %c0_11 = arith.constant 0 : index
    %c0_12 = arith.constant 0 : index
    %17 = vector.load %arg4[%c0_11, %c0_12] : memref<1x512xf32, #tpu.memory_space<vmem>>, vector<1x512xf32>
    %18 = vector.broadcast %17 : vector<1x512xf32> to vector<16x512xf32>
    %19 = arith.addf %16, %18 : vector<16x512xf32>
    %20 = vector.extract_strided_slice %19 {offsets = [0, 0], sizes = [16, 128], strides = [1, 1]} : vector<16x512xf32> to vector<16x128xf32>
    %21 = arith.negf %20 : vector<16x128xf32>
    %22 = math.exp %21 : vector<16x128xf32>
    %cst_13 = arith.constant 1.000000e+00 : f32
    %23 = vector.broadcast %cst_13 : f32 to vector<16x128xf32>
    %24 = arith.addf %23, %22 : vector<16x128xf32>
    %25 = arith.divf %23, %24 : vector<16x128xf32>
    %26 = vector.extract_strided_slice %19 {offsets = [0, 128], sizes = [16, 128], strides = [1, 1]} : vector<16x512xf32> to vector<16x128xf32>
    %27 = arith.negf %26 : vector<16x128xf32>
    %28 = math.exp %27 : vector<16x128xf32>
    %cst_14 = arith.constant 1.000000e+00 : f32
    %29 = vector.broadcast %cst_14 : f32 to vector<16x128xf32>
    %30 = arith.addf %29, %28 : vector<16x128xf32>
    %31 = arith.divf %29, %30 : vector<16x128xf32>
    %32 = vector.extract_strided_slice %19 {offsets = [0, 256], sizes = [16, 128], strides = [1, 1]} : vector<16x512xf32> to vector<16x128xf32>
    %33 = math.tanh %32 : vector<16x128xf32>
    %34 = vector.extract_strided_slice %19 {offsets = [0, 384], sizes = [16, 128], strides = [1, 1]} : vector<16x512xf32> to vector<16x128xf32>
    %35 = arith.negf %34 : vector<16x128xf32>
    %36 = math.exp %35 : vector<16x128xf32>
    %cst_15 = arith.constant 1.000000e+00 : f32
    %37 = vector.broadcast %cst_15 : f32 to vector<16x128xf32>
    %38 = arith.addf %37, %36 : vector<16x128xf32>
    %39 = arith.divf %37, %38 : vector<16x128xf32>
    %c0_16 = arith.constant 0 : index
    %c0_17 = arith.constant 0 : index
    %c0_18 = arith.constant 0 : index
    %40 = vector.load %arg2[%c0_16, %c0_17, %c0_18] : memref<1x16x128xf32, #tpu.memory_space<vmem>>, vector<1x16x128xf32>
    %41 = vector.shape_cast %40 : vector<1x16x128xf32> to vector<16x128xf32>
    %42 = arith.mulf %31, %41 : vector<16x128xf32>
    %43 = arith.mulf %25, %33 : vector<16x128xf32>
    %44 = arith.addf %42, %43 : vector<16x128xf32>
    %45 = math.tanh %44 : vector<16x128xf32>
    %46 = arith.mulf %39, %45 : vector<16x128xf32>
    %c0_19 = arith.constant 0 : index
    %c0_20 = arith.constant 0 : index
    %c0_21 = arith.constant 0 : index
    %47 = vector.load %arg5[%c0_19, %c0_20, %c0_21] : memref<1x16x128xf32, #tpu.memory_space<vmem>>, vector<1x16x128xf32>
    %48 = vector.shape_cast %47 : vector<1x16x128xf32> to vector<16x128xf32>
    %49 = vector.shape_cast %46 : vector<16x128xf32> to vector<1x16x128xf32>
    tpu.vector_store %arg5[%c0_19, %c0_20, %c0_21], %49 {strides = array<i32>} : memref<1x16x128xf32, #tpu.memory_space<vmem>>, vector<1x16x128xf32>,
    %c0_22 = arith.constant 0 : index
    %c0_23 = arith.constant 0 : index
    %c0_24 = arith.constant 0 : index
    %50 = vector.load %arg6[%c0_22, %c0_23, %c0_24] : memref<1x16x128xf32, #tpu.memory_space<vmem>>, vector<1x16x128xf32>
    %51 = vector.shape_cast %50 : vector<1x16x128xf32> to vector<16x128xf32>
    %52 = vector.shape_cast %44 : vector<16x128xf32> to vector<1x16x128xf32>
    tpu.vector_store %arg6[%c0_22, %c0_23, %c0_24], %52 {strides = array<i32>} : memref<1x16x128xf32, #tpu.memory_space<vmem>>, vector<1x16x128xf32>,
    return
  }
  func.func @transform_0(%arg0: i32) -> (i32, i32, i32) {
    %c0_i32 = arith.constant 0 : i32
    %c0_i32_0 = arith.constant 0 : i32
    %c0_i32_1 = arith.constant 0 : i32
    return %arg0, %c0_i32, %c0_i32_0 : i32, i32, i32
  }
  func.func @transform_1(%arg0: i32) -> (i32, i32, i32) {
    %c0_i32 = arith.constant 0 : i32
    %c0_i32_0 = arith.constant 0 : i32
    %c0_i32_1 = arith.constant 0 : i32
    return %arg0, %c0_i32, %c0_i32_0 : i32, i32, i32
  }
  func.func @transform_2(%arg0: i32) -> (i32, i32, i32) {
    %c0_i32 = arith.constant 0 : i32
    %c0_i32_0 = arith.constant 0 : i32
    %c0_i32_1 = arith.constant 0 : i32
    %c0_i32_2 = arith.constant 0 : i32
    return %c0_i32, %c0_i32_0, %c0_i32_1 : i32, i32, i32
  }
  func.func @transform_3(%arg0: i32) -> (i32, i32) {
    %c0_i32 = arith.constant 0 : i32
    %c0_i32_0 = arith.constant 0 : i32
    %c0_i32_1 = arith.constant 0 : i32
    return %c0_i32, %c0_i32_0 : i32, i32
  }
  func.func @transform_4(%arg0: i32) -> (i32, i32, i32) {
    %c0_i32 = arith.constant 0 : i32
    %c0_i32_0 = arith.constant 0 : i32
    %c0_i32_1 = arith.constant 0 : i32
    return %arg0, %c0_i32, %c0_i32_0 : i32, i32, i32
  }
  func.func @transform_5(%arg0: i32) -> (i32, i32, i32) {
    %c0_i32 = arith.constant 0 : i32
    %c0_i32_0 = arith.constant 0 : i32
    %c0_i32_1 = arith.constant 0 : i32
    return %arg0, %c0_i32, %c0_i32_0 : i32, i32, i32
  }
}

module attributes {stable_mosaic.version = 11 : i64} {
  func.func @_conv_err_kernel(%arg0: i32, %arg1: memref<1x18x144xf32, #tpu.memory_space<vmem>>, %arg2: memref<1x16x64xf32, #tpu.memory_space<vmem>>, %arg3: memref<3x144x64xbf16, #tpu.memory_space<vmem>>, %arg4: memref<1x64xf32, #tpu.memory_space<vmem>>, %arg5: memref<1x16x64xf32, #tpu.memory_space<vmem>>, %arg6: memref<1x16x64xf32, #tpu.memory_space<vmem>>, %arg7: memref<1x16x64xf32, #tpu.memory_space<vmem>>) attributes {dimension_semantics = [#tpu.dimension_semantics<parallel>], iteration_bounds = array<i64: 2>, scalar_prefetch = 0 : i64, scratch_operands = 0 : i64, tpu.core_type = #tpu.core_type<tc>, window_params = [{transform_indices = @transform_0, window_bounds = array<i64: 1, 18, 144>}, {transform_indices = @transform_1, window_bounds = array<i64: 1, 16, 64>}, {pipeline_mode = #tpu.pipeline_mode<synchronous>, transform_indices = @transform_2, window_bounds = array<i64: 3, 144, 64>}, {pipeline_mode = #tpu.pipeline_mode<synchronous>, transform_indices = @transform_3, window_bounds = array<i64: 1, 64>}, {transform_indices = @transform_4, window_bounds = array<i64: 1, 16, 64>}, {transform_indices = @transform_5, window_bounds = array<i64: 1, 16, 64>}, {transform_indices = @transform_6, window_bounds = array<i64: 1, 16, 64>}]} {
    %c0 = arith.constant 0 : index
    %c0_0 = arith.constant 0 : index
    %c0_1 = arith.constant 0 : index
    %0 = vector.load %arg1[%c0, %c0_0, %c0_1] : memref<1x18x144xf32, #tpu.memory_space<vmem>>, vector<1x18x144xf32>
    %1 = vector.shape_cast %0 : vector<1x18x144xf32> to vector<18x144xf32>
    %2 = arith.truncf %1 : vector<18x144xf32> to vector<18x144xbf16>
    %c0_2 = arith.constant 0 : index
    %c0_3 = arith.constant 0 : index
    %c0_4 = arith.constant 0 : index
    %3 = vector.load %arg3[%c0_2, %c0_3, %c0_4] : memref<3x144x64xbf16, #tpu.memory_space<vmem>>, vector<1x144x64xbf16>
    %4 = vector.shape_cast %3 : vector<1x144x64xbf16> to vector<144x64xbf16>
    %cst = arith.constant dense<0.000000e+00> : vector<18x64xf32>
    %5 = tpu.matmul %2, %4, %cst {dimension_numbers = #tpu.dot_dimension_numbers<[1], [0], [0], [1], [0, 0, 1, 1], [], []>} : vector<18x144xbf16>, vector<144x64xbf16>, vector<18x64xf32> -> vector<18x64xf32>
    %6 = vector.extract_strided_slice %5 {offsets = [0, 0], sizes = [16, 64], strides = [1, 1]} : vector<18x64xf32> to vector<16x64xf32>
    %c1 = arith.constant 1 : index
    %c0_5 = arith.constant 0 : index
    %c0_6 = arith.constant 0 : index
    %7 = vector.load %arg3[%c1, %c0_5, %c0_6] : memref<3x144x64xbf16, #tpu.memory_space<vmem>>, vector<1x144x64xbf16>
    %8 = vector.shape_cast %7 : vector<1x144x64xbf16> to vector<144x64xbf16>
    %cst_7 = arith.constant dense<0.000000e+00> : vector<18x64xf32>
    %9 = tpu.matmul %2, %8, %cst_7 {dimension_numbers = #tpu.dot_dimension_numbers<[1], [0], [0], [1], [0, 0, 1, 1], [], []>} : vector<18x144xbf16>, vector<144x64xbf16>, vector<18x64xf32> -> vector<18x64xf32>
    %10 = vector.extract_strided_slice %9 {offsets = [1, 0], sizes = [16, 64], strides = [1, 1]} : vector<18x64xf32> to vector<16x64xf32>
    %11 = arith.addf %6, %10 : vector<16x64xf32>
    %c2 = arith.constant 2 : index
    %c0_8 = arith.constant 0 : index
    %c0_9 = arith.constant 0 : index
    %12 = vector.load %arg3[%c2, %c0_8, %c0_9] : memref<3x144x64xbf16, #tpu.memory_space<vmem>>, vector<1x144x64xbf16>
    %13 = vector.shape_cast %12 : vector<1x144x64xbf16> to vector<144x64xbf16>
    %cst_10 = arith.constant dense<0.000000e+00> : vector<18x64xf32>
    %14 = tpu.matmul %2, %13, %cst_10 {dimension_numbers = #tpu.dot_dimension_numbers<[1], [0], [0], [1], [0, 0, 1, 1], [], []>} : vector<18x144xbf16>, vector<144x64xbf16>, vector<18x64xf32> -> vector<18x64xf32>
    %15 = vector.extract_strided_slice %14 {offsets = [2, 0], sizes = [16, 64], strides = [1, 1]} : vector<18x64xf32> to vector<16x64xf32>
    %16 = arith.addf %11, %15 : vector<16x64xf32>
    %c0_11 = arith.constant 0 : index
    %c0_12 = arith.constant 0 : index
    %17 = vector.load %arg4[%c0_11, %c0_12] : memref<1x64xf32, #tpu.memory_space<vmem>>, vector<1x64xf32>
    %18 = vector.broadcast %17 : vector<1x64xf32> to vector<16x64xf32>
    %19 = arith.addf %16, %18 : vector<16x64xf32>
    %cst_13 = arith.constant 0.000000e+00 : f32
    %cst_14 = arith.constant 2.550000e+02 : f32
    %20 = vector.broadcast %cst_13 : f32 to vector<16x64xf32>
    %21 = arith.maximumf %20, %19 : vector<16x64xf32>
    %22 = vector.broadcast %cst_14 : f32 to vector<16x64xf32>
    %23 = arith.minimumf %22, %21 : vector<16x64xf32>
    %c0_15 = arith.constant 0 : index
    %c0_16 = arith.constant 0 : index
    %c0_17 = arith.constant 0 : index
    %24 = vector.load %arg2[%c0_15, %c0_16, %c0_17] : memref<1x16x64xf32, #tpu.memory_space<vmem>>, vector<1x16x64xf32>
    %25 = vector.shape_cast %24 : vector<1x16x64xf32> to vector<16x64xf32>
    %c0_18 = arith.constant 0 : index
    %c0_19 = arith.constant 0 : index
    %c0_20 = arith.constant 0 : index
    %26 = vector.load %arg5[%c0_18, %c0_19, %c0_20] : memref<1x16x64xf32, #tpu.memory_space<vmem>>, vector<1x16x64xf32>
    %27 = vector.shape_cast %26 : vector<1x16x64xf32> to vector<16x64xf32>
    %28 = vector.shape_cast %23 : vector<16x64xf32> to vector<1x16x64xf32>
    tpu.vector_store %arg5[%c0_18, %c0_19, %c0_20], %28 {strides = array<i32>} : memref<1x16x64xf32, #tpu.memory_space<vmem>>, vector<1x16x64xf32>,
    %29 = arith.subf %23, %25 : vector<16x64xf32>
    %cst_21 = arith.constant 0.000000e+00 : f32
    %30 = vector.broadcast %cst_21 : f32 to vector<16x64xf32>
    %31 = arith.maximumf %29, %30 : vector<16x64xf32>
    %c0_22 = arith.constant 0 : index
    %c0_23 = arith.constant 0 : index
    %c0_24 = arith.constant 0 : index
    %32 = vector.load %arg6[%c0_22, %c0_23, %c0_24] : memref<1x16x64xf32, #tpu.memory_space<vmem>>, vector<1x16x64xf32>
    %33 = vector.shape_cast %32 : vector<1x16x64xf32> to vector<16x64xf32>
    %34 = vector.shape_cast %31 : vector<16x64xf32> to vector<1x16x64xf32>
    tpu.vector_store %arg6[%c0_22, %c0_23, %c0_24], %34 {strides = array<i32>} : memref<1x16x64xf32, #tpu.memory_space<vmem>>, vector<1x16x64xf32>,
    %35 = arith.subf %25, %23 : vector<16x64xf32>
    %cst_25 = arith.constant 0.000000e+00 : f32
    %36 = vector.broadcast %cst_25 : f32 to vector<16x64xf32>
    %37 = arith.maximumf %35, %36 : vector<16x64xf32>
    %c0_26 = arith.constant 0 : index
    %c0_27 = arith.constant 0 : index
    %c0_28 = arith.constant 0 : index
    %38 = vector.load %arg7[%c0_26, %c0_27, %c0_28] : memref<1x16x64xf32, #tpu.memory_space<vmem>>, vector<1x16x64xf32>
    %39 = vector.shape_cast %38 : vector<1x16x64xf32> to vector<16x64xf32>
    %40 = vector.shape_cast %37 : vector<16x64xf32> to vector<1x16x64xf32>
    tpu.vector_store %arg7[%c0_26, %c0_27, %c0_28], %40 {strides = array<i32>} : memref<1x16x64xf32, #tpu.memory_space<vmem>>, vector<1x16x64xf32>,
    return
  }
  func.func @transform_0(%arg0: i32) -> (i32, i32, i32) {
    %c0_i32 = arith.constant 0 : i32
    %c0_i32_0 = arith.constant 0 : i32
    %c0_i32_1 = arith.constant 0 : i32
    return %arg0, %c0_i32, %c0_i32_0 : i32, i32, i32
  }
  func.func @transform_1(%arg0: i32) -> (i32, i32, i32) {
    %c0_i32 = arith.constant 0 : i32
    %c0_i32_0 = arith.constant 0 : i32
    %c0_i32_1 = arith.constant 0 : i32
    return %arg0, %c0_i32, %c0_i32_0 : i32, i32, i32
  }
  func.func @transform_2(%arg0: i32) -> (i32, i32, i32) {
    %c0_i32 = arith.constant 0 : i32
    %c0_i32_0 = arith.constant 0 : i32
    %c0_i32_1 = arith.constant 0 : i32
    %c0_i32_2 = arith.constant 0 : i32
    return %c0_i32, %c0_i32_0, %c0_i32_1 : i32, i32, i32
  }
  func.func @transform_3(%arg0: i32) -> (i32, i32) {
    %c0_i32 = arith.constant 0 : i32
    %c0_i32_0 = arith.constant 0 : i32
    %c0_i32_1 = arith.constant 0 : i32
    return %c0_i32, %c0_i32_0 : i32, i32
  }
  func.func @transform_4(%arg0: i32) -> (i32, i32, i32) {
    %c0_i32 = arith.constant 0 : i32
    %c0_i32_0 = arith.constant 0 : i32
    %c0_i32_1 = arith.constant 0 : i32
    return %arg0, %c0_i32, %c0_i32_0 : i32, i32, i32
  }
  func.func @transform_5(%arg0: i32) -> (i32, i32, i32) {
    %c0_i32 = arith.constant 0 : i32
    %c0_i32_0 = arith.constant 0 : i32
    %c0_i32_1 = arith.constant 0 : i32
    return %arg0, %c0_i32, %c0_i32_0 : i32, i32, i32
  }
  func.func @transform_6(%arg0: i32) -> (i32, i32, i32) {
    %c0_i32 = arith.constant 0 : i32
    %c0_i32_0 = arith.constant 0 : i32
    %c0_i32_1 = arith.constant 0 : i32
    return %arg0, %c0_i32, %c0_i32_0 : i32, i32, i32
  }
}

module attributes {stable_mosaic.version = 11 : i64} {
  func.func @_conv_pool_kernel(%arg0: i32, %arg1: memref<1x18x144xf32, #tpu.memory_space<vmem>>, %arg2: memref<3x144x128xbf16, #tpu.memory_space<vmem>>, %arg3: memref<1x128xf32, #tpu.memory_space<vmem>>, %arg4: memref<1x16x32xf32, #tpu.memory_space<vmem>>) attributes {dimension_semantics = [#tpu.dimension_semantics<parallel>], iteration_bounds = array<i64: 2>, scalar_prefetch = 0 : i64, scratch_operands = 0 : i64, tpu.core_type = #tpu.core_type<tc>, window_params = [{transform_indices = @transform_0, window_bounds = array<i64: 1, 18, 144>}, {pipeline_mode = #tpu.pipeline_mode<synchronous>, transform_indices = @transform_1, window_bounds = array<i64: 3, 144, 128>}, {pipeline_mode = #tpu.pipeline_mode<synchronous>, transform_indices = @transform_2, window_bounds = array<i64: 1, 128>}, {transform_indices = @transform_3, window_bounds = array<i64: 1, 16, 32>}]} {
    %c0 = arith.constant 0 : index
    %c0_0 = arith.constant 0 : index
    %c0_1 = arith.constant 0 : index
    %0 = vector.load %arg1[%c0, %c0_0, %c0_1] : memref<1x18x144xf32, #tpu.memory_space<vmem>>, vector<1x18x144xf32>
    %1 = vector.shape_cast %0 : vector<1x18x144xf32> to vector<18x144xf32>
    %2 = arith.truncf %1 : vector<18x144xf32> to vector<18x144xbf16>
    %c0_2 = arith.constant 0 : index
    %c0_3 = arith.constant 0 : index
    %c0_4 = arith.constant 0 : index
    %3 = vector.load %arg2[%c0_2, %c0_3, %c0_4] : memref<3x144x128xbf16, #tpu.memory_space<vmem>>, vector<1x144x128xbf16>
    %4 = vector.shape_cast %3 : vector<1x144x128xbf16> to vector<144x128xbf16>
    %cst = arith.constant dense<0.000000e+00> : vector<18x128xf32>
    %5 = tpu.matmul %2, %4, %cst {dimension_numbers = #tpu.dot_dimension_numbers<[1], [0], [0], [1], [0, 0, 1, 1], [], []>} : vector<18x144xbf16>, vector<144x128xbf16>, vector<18x128xf32> -> vector<18x128xf32>
    %6 = vector.extract_strided_slice %5 {offsets = [0, 0], sizes = [16, 128], strides = [1, 1]} : vector<18x128xf32> to vector<16x128xf32>
    %c1 = arith.constant 1 : index
    %c0_5 = arith.constant 0 : index
    %c0_6 = arith.constant 0 : index
    %7 = vector.load %arg2[%c1, %c0_5, %c0_6] : memref<3x144x128xbf16, #tpu.memory_space<vmem>>, vector<1x144x128xbf16>
    %8 = vector.shape_cast %7 : vector<1x144x128xbf16> to vector<144x128xbf16>
    %cst_7 = arith.constant dense<0.000000e+00> : vector<18x128xf32>
    %9 = tpu.matmul %2, %8, %cst_7 {dimension_numbers = #tpu.dot_dimension_numbers<[1], [0], [0], [1], [0, 0, 1, 1], [], []>} : vector<18x144xbf16>, vector<144x128xbf16>, vector<18x128xf32> -> vector<18x128xf32>
    %10 = vector.extract_strided_slice %9 {offsets = [1, 0], sizes = [16, 128], strides = [1, 1]} : vector<18x128xf32> to vector<16x128xf32>
    %11 = arith.addf %6, %10 : vector<16x128xf32>
    %c2 = arith.constant 2 : index
    %c0_8 = arith.constant 0 : index
    %c0_9 = arith.constant 0 : index
    %12 = vector.load %arg2[%c2, %c0_8, %c0_9] : memref<3x144x128xbf16, #tpu.memory_space<vmem>>, vector<1x144x128xbf16>
    %13 = vector.shape_cast %12 : vector<1x144x128xbf16> to vector<144x128xbf16>
    %cst_10 = arith.constant dense<0.000000e+00> : vector<18x128xf32>
    %14 = tpu.matmul %2, %13, %cst_10 {dimension_numbers = #tpu.dot_dimension_numbers<[1], [0], [0], [1], [0, 0, 1, 1], [], []>} : vector<18x144xbf16>, vector<144x128xbf16>, vector<18x128xf32> -> vector<18x128xf32>
    %15 = vector.extract_strided_slice %14 {offsets = [2, 0], sizes = [16, 128], strides = [1, 1]} : vector<18x128xf32> to vector<16x128xf32>
    %16 = arith.addf %11, %15 : vector<16x128xf32>
    %c0_11 = arith.constant 0 : index
    %c0_12 = arith.constant 0 : index
    %17 = vector.load %arg3[%c0_11, %c0_12] : memref<1x128xf32, #tpu.memory_space<vmem>>, vector<1x128xf32>
    %18 = vector.broadcast %17 : vector<1x128xf32> to vector<16x128xf32>
    %19 = arith.addf %16, %18 : vector<16x128xf32>
    %20 = vector.extract_strided_slice %19 {offsets = [0, 0], sizes = [16, 32], strides = [1, 1]} : vector<16x128xf32> to vector<16x32xf32>
    %21 = vector.extract_strided_slice %19 {offsets = [0, 32], sizes = [16, 32], strides = [1, 1]} : vector<16x128xf32> to vector<16x32xf32>
    %22 = arith.maximumf %20, %21 : vector<16x32xf32>
    %23 = vector.extract_strided_slice %19 {offsets = [0, 64], sizes = [16, 32], strides = [1, 1]} : vector<16x128xf32> to vector<16x32xf32>
    %24 = arith.maximumf %22, %23 : vector<16x32xf32>
    %25 = vector.extract_strided_slice %19 {offsets = [0, 96], sizes = [16, 32], strides = [1, 1]} : vector<16x128xf32> to vector<16x32xf32>
    %26 = arith.maximumf %24, %25 : vector<16x32xf32>
    %c0_13 = arith.constant 0 : index
    %c0_14 = arith.constant 0 : index
    %c0_15 = arith.constant 0 : index
    %27 = vector.load %arg4[%c0_13, %c0_14, %c0_15] : memref<1x16x32xf32, #tpu.memory_space<vmem>>, vector<1x16x32xf32>
    %28 = vector.shape_cast %27 : vector<1x16x32xf32> to vector<16x32xf32>
    %29 = vector.shape_cast %26 : vector<16x32xf32> to vector<1x16x32xf32>
    tpu.vector_store %arg4[%c0_13, %c0_14, %c0_15], %29 {strides = array<i32>} : memref<1x16x32xf32, #tpu.memory_space<vmem>>, vector<1x16x32xf32>,
    return
  }
  func.func @transform_0(%arg0: i32) -> (i32, i32, i32) {
    %c0_i32 = arith.constant 0 : i32
    %c0_i32_0 = arith.constant 0 : i32
    %c0_i32_1 = arith.constant 0 : i32
    return %arg0, %c0_i32, %c0_i32_0 : i32, i32, i32
  }
  func.func @transform_1(%arg0: i32) -> (i32, i32, i32) {
    %c0_i32 = arith.constant 0 : i32
    %c0_i32_0 = arith.constant 0 : i32
    %c0_i32_1 = arith.constant 0 : i32
    %c0_i32_2 = arith.constant 0 : i32
    return %c0_i32, %c0_i32_0, %c0_i32_1 : i32, i32, i32
  }
  func.func @transform_2(%arg0: i32) -> (i32, i32) {
    %c0_i32 = arith.constant 0 : i32
    %c0_i32_0 = arith.constant 0 : i32
    %c0_i32_1 = arith.constant 0 : i32
    return %c0_i32, %c0_i32_0 : i32, i32
  }
  func.func @transform_3(%arg0: i32) -> (i32, i32, i32) {
    %c0_i32 = arith.constant 0 : i32
    %c0_i32_0 = arith.constant 0 : i32
    %c0_i32_1 = arith.constant 0 : i32
    return %arg0, %c0_i32, %c0_i32_0 : i32, i32, i32
  }
}

module attributes {stable_mosaic.version = 11 : i64} {
  func.func @_conv_err_kernel(%arg0: i32, %arg1: memref<1x6x48xf32, #tpu.memory_space<vmem>>, %arg2: memref<1x4x32xf32, #tpu.memory_space<vmem>>, %arg3: memref<3x48x32xbf16, #tpu.memory_space<vmem>>, %arg4: memref<1x32xf32, #tpu.memory_space<vmem>>, %arg5: memref<1x4x32xf32, #tpu.memory_space<vmem>>, %arg6: memref<1x4x32xf32, #tpu.memory_space<vmem>>, %arg7: memref<1x4x32xf32, #tpu.memory_space<vmem>>) attributes {dimension_semantics = [#tpu.dimension_semantics<parallel>], iteration_bounds = array<i64: 2>, scalar_prefetch = 0 : i64, scratch_operands = 0 : i64, tpu.core_type = #tpu.core_type<tc>, window_params = [{transform_indices = @transform_0, window_bounds = array<i64: 1, 6, 48>}, {transform_indices = @transform_1, window_bounds = array<i64: 1, 4, 32>}, {pipeline_mode = #tpu.pipeline_mode<synchronous>, transform_indices = @transform_2, window_bounds = array<i64: 3, 48, 32>}, {pipeline_mode = #tpu.pipeline_mode<synchronous>, transform_indices = @transform_3, window_bounds = array<i64: 1, 32>}, {transform_indices = @transform_4, window_bounds = array<i64: 1, 4, 32>}, {transform_indices = @transform_5, window_bounds = array<i64: 1, 4, 32>}, {transform_indices = @transform_6, window_bounds = array<i64: 1, 4, 32>}]} {
    %c0 = arith.constant 0 : index
    %c0_0 = arith.constant 0 : index
    %c0_1 = arith.constant 0 : index
    %0 = vector.load %arg1[%c0, %c0_0, %c0_1] : memref<1x6x48xf32, #tpu.memory_space<vmem>>, vector<1x6x48xf32>
    %1 = vector.shape_cast %0 : vector<1x6x48xf32> to vector<6x48xf32>
    %2 = arith.truncf %1 : vector<6x48xf32> to vector<6x48xbf16>
    %c0_2 = arith.constant 0 : index
    %c0_3 = arith.constant 0 : index
    %c0_4 = arith.constant 0 : index
    %3 = vector.load %arg3[%c0_2, %c0_3, %c0_4] : memref<3x48x32xbf16, #tpu.memory_space<vmem>>, vector<1x48x32xbf16>
    %4 = vector.shape_cast %3 : vector<1x48x32xbf16> to vector<48x32xbf16>
    %cst = arith.constant dense<0.000000e+00> : vector<6x32xf32>
    %5 = tpu.matmul %2, %4, %cst {dimension_numbers = #tpu.dot_dimension_numbers<[1], [0], [0], [1], [0, 0, 1, 1], [], []>} : vector<6x48xbf16>, vector<48x32xbf16>, vector<6x32xf32> -> vector<6x32xf32>
    %6 = vector.extract_strided_slice %5 {offsets = [0, 0], sizes = [4, 32], strides = [1, 1]} : vector<6x32xf32> to vector<4x32xf32>
    %c1 = arith.constant 1 : index
    %c0_5 = arith.constant 0 : index
    %c0_6 = arith.constant 0 : index
    %7 = vector.load %arg3[%c1, %c0_5, %c0_6] : memref<3x48x32xbf16, #tpu.memory_space<vmem>>, vector<1x48x32xbf16>
    %8 = vector.shape_cast %7 : vector<1x48x32xbf16> to vector<48x32xbf16>
    %cst_7 = arith.constant dense<0.000000e+00> : vector<6x32xf32>
    %9 = tpu.matmul %2, %8, %cst_7 {dimension_numbers = #tpu.dot_dimension_numbers<[1], [0], [0], [1], [0, 0, 1, 1], [], []>} : vector<6x48xbf16>, vector<48x32xbf16>, vector<6x32xf32> -> vector<6x32xf32>
    %10 = vector.extract_strided_slice %9 {offsets = [1, 0], sizes = [4, 32], strides = [1, 1]} : vector<6x32xf32> to vector<4x32xf32>
    %11 = arith.addf %6, %10 : vector<4x32xf32>
    %c2 = arith.constant 2 : index
    %c0_8 = arith.constant 0 : index
    %c0_9 = arith.constant 0 : index
    %12 = vector.load %arg3[%c2, %c0_8, %c0_9] : memref<3x48x32xbf16, #tpu.memory_space<vmem>>, vector<1x48x32xbf16>
    %13 = vector.shape_cast %12 : vector<1x48x32xbf16> to vector<48x32xbf16>
    %cst_10 = arith.constant dense<0.000000e+00> : vector<6x32xf32>
    %14 = tpu.matmul %2, %13, %cst_10 {dimension_numbers = #tpu.dot_dimension_numbers<[1], [0], [0], [1], [0, 0, 1, 1], [], []>} : vector<6x48xbf16>, vector<48x32xbf16>, vector<6x32xf32> -> vector<6x32xf32>
    %15 = vector.extract_strided_slice %14 {offsets = [2, 0], sizes = [4, 32], strides = [1, 1]} : vector<6x32xf32> to vector<4x32xf32>
    %16 = arith.addf %11, %15 : vector<4x32xf32>
    %c0_11 = arith.constant 0 : index
    %c0_12 = arith.constant 0 : index
    %17 = vector.load %arg4[%c0_11, %c0_12] : memref<1x32xf32, #tpu.memory_space<vmem>>, vector<1x32xf32>
    %18 = vector.broadcast %17 : vector<1x32xf32> to vector<4x32xf32>
    %19 = arith.addf %16, %18 : vector<4x32xf32>
    %cst_13 = arith.constant 0.000000e+00 : f32
    %20 = vector.broadcast %cst_13 : f32 to vector<4x32xf32>
    %21 = arith.maximumf %19, %20 : vector<4x32xf32>
    %c0_14 = arith.constant 0 : index
    %c0_15 = arith.constant 0 : index
    %c0_16 = arith.constant 0 : index
    %22 = vector.load %arg2[%c0_14, %c0_15, %c0_16] : memref<1x4x32xf32, #tpu.memory_space<vmem>>, vector<1x4x32xf32>
    %23 = vector.shape_cast %22 : vector<1x4x32xf32> to vector<4x32xf32>
    %c0_17 = arith.constant 0 : index
    %c0_18 = arith.constant 0 : index
    %c0_19 = arith.constant 0 : index
    %24 = vector.load %arg5[%c0_17, %c0_18, %c0_19] : memref<1x4x32xf32, #tpu.memory_space<vmem>>, vector<1x4x32xf32>
    %25 = vector.shape_cast %24 : vector<1x4x32xf32> to vector<4x32xf32>
    %26 = vector.shape_cast %21 : vector<4x32xf32> to vector<1x4x32xf32>
    tpu.vector_store %arg5[%c0_17, %c0_18, %c0_19], %26 {strides = array<i32>} : memref<1x4x32xf32, #tpu.memory_space<vmem>>, vector<1x4x32xf32>,
    %27 = arith.subf %21, %23 : vector<4x32xf32>
    %cst_20 = arith.constant 0.000000e+00 : f32
    %28 = vector.broadcast %cst_20 : f32 to vector<4x32xf32>
    %29 = arith.maximumf %27, %28 : vector<4x32xf32>
    %c0_21 = arith.constant 0 : index
    %c0_22 = arith.constant 0 : index
    %c0_23 = arith.constant 0 : index
    %30 = vector.load %arg6[%c0_21, %c0_22, %c0_23] : memref<1x4x32xf32, #tpu.memory_space<vmem>>, vector<1x4x32xf32>
    %31 = vector.shape_cast %30 : vector<1x4x32xf32> to vector<4x32xf32>
    %32 = vector.shape_cast %29 : vector<4x32xf32> to vector<1x4x32xf32>
    tpu.vector_store %arg6[%c0_21, %c0_22, %c0_23], %32 {strides = array<i32>} : memref<1x4x32xf32, #tpu.memory_space<vmem>>, vector<1x4x32xf32>,
    %33 = arith.subf %23, %21 : vector<4x32xf32>
    %cst_24 = arith.constant 0.000000e+00 : f32
    %34 = vector.broadcast %cst_24 : f32 to vector<4x32xf32>
    %35 = arith.maximumf %33, %34 : vector<4x32xf32>
    %c0_25 = arith.constant 0 : index
    %c0_26 = arith.constant 0 : index
    %c0_27 = arith.constant 0 : index
    %36 = vector.load %arg7[%c0_25, %c0_26, %c0_27] : memref<1x4x32xf32, #tpu.memory_space<vmem>>, vector<1x4x32xf32>
    %37 = vector.shape_cast %36 : vector<1x4x32xf32> to vector<4x32xf32>
    %38 = vector.shape_cast %35 : vector<4x32xf32> to vector<1x4x32xf32>
    tpu.vector_store %arg7[%c0_25, %c0_26, %c0_27], %38 {strides = array<i32>} : memref<1x4x32xf32, #tpu.memory_space<vmem>>, vector<1x4x32xf32>,
    return
  }
  func.func @transform_0(%arg0: i32) -> (i32, i32, i32) {
    %c0_i32 = arith.constant 0 : i32
    %c0_i32_0 = arith.constant 0 : i32
    %c0_i32_1 = arith.constant 0 : i32
    return %arg0, %c0_i32, %c0_i32_0 : i32, i32, i32
  }
  func.func @transform_1(%arg0: i32) -> (i32, i32, i32) {
    %c0_i32 = arith.constant 0 : i32
    %c0_i32_0 = arith.constant 0 : i32
    %c0_i32_1 = arith.constant 0 : i32
    return %arg0, %c0_i32, %c0_i32_0 : i32, i32, i32
  }
  func.func @transform_2(%arg0: i32) -> (i32, i32, i32) {
    %c0_i32 = arith.constant 0 : i32
    %c0_i32_0 = arith.constant 0 : i32
    %c0_i32_1 = arith.constant 0 : i32
    %c0_i32_2 = arith.constant 0 : i32
    return %c0_i32, %c0_i32_0, %c0_i32_1 : i32, i32, i32
  }
  func.func @transform_3(%arg0: i32) -> (i32, i32) {
    %c0_i32 = arith.constant 0 : i32
    %c0_i32_0 = arith.constant 0 : i32
    %c0_i32_1 = arith.constant 0 : i32
    return %c0_i32, %c0_i32_0 : i32, i32
  }
  func.func @transform_4(%arg0: i32) -> (i32, i32, i32) {
    %c0_i32 = arith.constant 0 : i32
    %c0_i32_0 = arith.constant 0 : i32
    %c0_i32_1 = arith.constant 0 : i32
    return %arg0, %c0_i32, %c0_i32_0 : i32, i32, i32
  }
  func.func @transform_5(%arg0: i32) -> (i32, i32, i32) {
    %c0_i32 = arith.constant 0 : i32
    %c0_i32_0 = arith.constant 0 : i32
    %c0_i32_1 = arith.constant 0 : i32
    return %arg0, %c0_i32, %c0_i32_0 : i32, i32, i32
  }
  func.func @transform_6(%arg0: i32) -> (i32, i32, i32) {
    %c0_i32 = arith.constant 0 : i32
    %c0_i32_0 = arith.constant 0 : i32
    %c0_i32_1 = arith.constant 0 : i32
    return %arg0, %c0_i32, %c0_i32_0 : i32, i32, i32
  }
}

module attributes {stable_mosaic.version = 11 : i64} {
  func.func @_convlstm_kernel(%arg0: i32, %arg1: memref<1x6x144xf32, #tpu.memory_space<vmem>>, %arg2: memref<1x4x32xf32, #tpu.memory_space<vmem>>, %arg3: memref<3x144x128xbf16, #tpu.memory_space<vmem>>, %arg4: memref<1x128xf32, #tpu.memory_space<vmem>>, %arg5: memref<1x4x32xf32, #tpu.memory_space<vmem>>, %arg6: memref<1x4x32xf32, #tpu.memory_space<vmem>>) attributes {dimension_semantics = [#tpu.dimension_semantics<parallel>], iteration_bounds = array<i64: 2>, scalar_prefetch = 0 : i64, scratch_operands = 0 : i64, tpu.core_type = #tpu.core_type<tc>, window_params = [{transform_indices = @transform_0, window_bounds = array<i64: 1, 6, 144>}, {transform_indices = @transform_1, window_bounds = array<i64: 1, 4, 32>}, {pipeline_mode = #tpu.pipeline_mode<synchronous>, transform_indices = @transform_2, window_bounds = array<i64: 3, 144, 128>}, {pipeline_mode = #tpu.pipeline_mode<synchronous>, transform_indices = @transform_3, window_bounds = array<i64: 1, 128>}, {transform_indices = @transform_4, window_bounds = array<i64: 1, 4, 32>}, {transform_indices = @transform_5, window_bounds = array<i64: 1, 4, 32>}]} {
    %c0 = arith.constant 0 : index
    %c0_0 = arith.constant 0 : index
    %c0_1 = arith.constant 0 : index
    %0 = vector.load %arg1[%c0, %c0_0, %c0_1] : memref<1x6x144xf32, #tpu.memory_space<vmem>>, vector<1x6x144xf32>
    %1 = vector.shape_cast %0 : vector<1x6x144xf32> to vector<6x144xf32>
    %2 = arith.truncf %1 : vector<6x144xf32> to vector<6x144xbf16>
    %c0_2 = arith.constant 0 : index
    %c0_3 = arith.constant 0 : index
    %c0_4 = arith.constant 0 : index
    %3 = vector.load %arg3[%c0_2, %c0_3, %c0_4] : memref<3x144x128xbf16, #tpu.memory_space<vmem>>, vector<1x144x128xbf16>
    %4 = vector.shape_cast %3 : vector<1x144x128xbf16> to vector<144x128xbf16>
    %cst = arith.constant dense<0.000000e+00> : vector<6x128xf32>
    %5 = tpu.matmul %2, %4, %cst {dimension_numbers = #tpu.dot_dimension_numbers<[1], [0], [0], [1], [0, 0, 1, 1], [], []>} : vector<6x144xbf16>, vector<144x128xbf16>, vector<6x128xf32> -> vector<6x128xf32>
    %6 = vector.extract_strided_slice %5 {offsets = [0, 0], sizes = [4, 128], strides = [1, 1]} : vector<6x128xf32> to vector<4x128xf32>
    %c1 = arith.constant 1 : index
    %c0_5 = arith.constant 0 : index
    %c0_6 = arith.constant 0 : index
    %7 = vector.load %arg3[%c1, %c0_5, %c0_6] : memref<3x144x128xbf16, #tpu.memory_space<vmem>>, vector<1x144x128xbf16>
    %8 = vector.shape_cast %7 : vector<1x144x128xbf16> to vector<144x128xbf16>
    %cst_7 = arith.constant dense<0.000000e+00> : vector<6x128xf32>
    %9 = tpu.matmul %2, %8, %cst_7 {dimension_numbers = #tpu.dot_dimension_numbers<[1], [0], [0], [1], [0, 0, 1, 1], [], []>} : vector<6x144xbf16>, vector<144x128xbf16>, vector<6x128xf32> -> vector<6x128xf32>
    %10 = vector.extract_strided_slice %9 {offsets = [1, 0], sizes = [4, 128], strides = [1, 1]} : vector<6x128xf32> to vector<4x128xf32>
    %11 = arith.addf %6, %10 : vector<4x128xf32>
    %c2 = arith.constant 2 : index
    %c0_8 = arith.constant 0 : index
    %c0_9 = arith.constant 0 : index
    %12 = vector.load %arg3[%c2, %c0_8, %c0_9] : memref<3x144x128xbf16, #tpu.memory_space<vmem>>, vector<1x144x128xbf16>
    %13 = vector.shape_cast %12 : vector<1x144x128xbf16> to vector<144x128xbf16>
    %cst_10 = arith.constant dense<0.000000e+00> : vector<6x128xf32>
    %14 = tpu.matmul %2, %13, %cst_10 {dimension_numbers = #tpu.dot_dimension_numbers<[1], [0], [0], [1], [0, 0, 1, 1], [], []>} : vector<6x144xbf16>, vector<144x128xbf16>, vector<6x128xf32> -> vector<6x128xf32>
    %15 = vector.extract_strided_slice %14 {offsets = [2, 0], sizes = [4, 128], strides = [1, 1]} : vector<6x128xf32> to vector<4x128xf32>
    %16 = arith.addf %11, %15 : vector<4x128xf32>
    %c0_11 = arith.constant 0 : index
    %c0_12 = arith.constant 0 : index
    %17 = vector.load %arg4[%c0_11, %c0_12] : memref<1x128xf32, #tpu.memory_space<vmem>>, vector<1x128xf32>
    %18 = vector.broadcast %17 : vector<1x128xf32> to vector<4x128xf32>
    %19 = arith.addf %16, %18 : vector<4x128xf32>
    %20 = vector.extract_strided_slice %19 {offsets = [0, 0], sizes = [4, 32], strides = [1, 1]} : vector<4x128xf32> to vector<4x32xf32>
    %21 = arith.negf %20 : vector<4x32xf32>
    %22 = math.exp %21 : vector<4x32xf32>
    %cst_13 = arith.constant 1.000000e+00 : f32
    %23 = vector.broadcast %cst_13 : f32 to vector<4x32xf32>
    %24 = arith.addf %23, %22 : vector<4x32xf32>
    %25 = arith.divf %23, %24 : vector<4x32xf32>
    %26 = vector.extract_strided_slice %19 {offsets = [0, 32], sizes = [4, 32], strides = [1, 1]} : vector<4x128xf32> to vector<4x32xf32>
    %27 = arith.negf %26 : vector<4x32xf32>
    %28 = math.exp %27 : vector<4x32xf32>
    %cst_14 = arith.constant 1.000000e+00 : f32
    %29 = vector.broadcast %cst_14 : f32 to vector<4x32xf32>
    %30 = arith.addf %29, %28 : vector<4x32xf32>
    %31 = arith.divf %29, %30 : vector<4x32xf32>
    %32 = vector.extract_strided_slice %19 {offsets = [0, 64], sizes = [4, 32], strides = [1, 1]} : vector<4x128xf32> to vector<4x32xf32>
    %33 = math.tanh %32 : vector<4x32xf32>
    %34 = vector.extract_strided_slice %19 {offsets = [0, 96], sizes = [4, 32], strides = [1, 1]} : vector<4x128xf32> to vector<4x32xf32>
    %35 = arith.negf %34 : vector<4x32xf32>
    %36 = math.exp %35 : vector<4x32xf32>
    %cst_15 = arith.constant 1.000000e+00 : f32
    %37 = vector.broadcast %cst_15 : f32 to vector<4x32xf32>
    %38 = arith.addf %37, %36 : vector<4x32xf32>
    %39 = arith.divf %37, %38 : vector<4x32xf32>
    %c0_16 = arith.constant 0 : index
    %c0_17 = arith.constant 0 : index
    %c0_18 = arith.constant 0 : index
    %40 = vector.load %arg2[%c0_16, %c0_17, %c0_18] : memref<1x4x32xf32, #tpu.memory_space<vmem>>, vector<1x4x32xf32>
    %41 = vector.shape_cast %40 : vector<1x4x32xf32> to vector<4x32xf32>
    %42 = arith.mulf %31, %41 : vector<4x32xf32>
    %43 = arith.mulf %25, %33 : vector<4x32xf32>
    %44 = arith.addf %42, %43 : vector<4x32xf32>
    %45 = math.tanh %44 : vector<4x32xf32>
    %46 = arith.mulf %39, %45 : vector<4x32xf32>
    %c0_19 = arith.constant 0 : index
    %c0_20 = arith.constant 0 : index
    %c0_21 = arith.constant 0 : index
    %47 = vector.load %arg5[%c0_19, %c0_20, %c0_21] : memref<1x4x32xf32, #tpu.memory_space<vmem>>, vector<1x4x32xf32>
    %48 = vector.shape_cast %47 : vector<1x4x32xf32> to vector<4x32xf32>
    %49 = vector.shape_cast %46 : vector<4x32xf32> to vector<1x4x32xf32>
    tpu.vector_store %arg5[%c0_19, %c0_20, %c0_21], %49 {strides = array<i32>} : memref<1x4x32xf32, #tpu.memory_space<vmem>>, vector<1x4x32xf32>,
    %c0_22 = arith.constant 0 : index
    %c0_23 = arith.constant 0 : index
    %c0_24 = arith.constant 0 : index
    %50 = vector.load %arg6[%c0_22, %c0_23, %c0_24] : memref<1x4x32xf32, #tpu.memory_space<vmem>>, vector<1x4x32xf32>
    %51 = vector.shape_cast %50 : vector<1x4x32xf32> to vector<4x32xf32>
    %52 = vector.shape_cast %44 : vector<4x32xf32> to vector<1x4x32xf32>
    tpu.vector_store %arg6[%c0_22, %c0_23, %c0_24], %52 {strides = array<i32>} : memref<1x4x32xf32, #tpu.memory_space<vmem>>, vector<1x4x32xf32>,
    return
  }
  func.func @transform_0(%arg0: i32) -> (i32, i32, i32) {
    %c0_i32 = arith.constant 0 : i32
    %c0_i32_0 = arith.constant 0 : i32
    %c0_i32_1 = arith.constant 0 : i32
    return %arg0, %c0_i32, %c0_i32_0 : i32, i32, i32
  }
  func.func @transform_1(%arg0: i32) -> (i32, i32, i32) {
    %c0_i32 = arith.constant 0 : i32
    %c0_i32_0 = arith.constant 0 : i32
    %c0_i32_1 = arith.constant 0 : i32
    return %arg0, %c0_i32, %c0_i32_0 : i32, i32, i32
  }
  func.func @transform_2(%arg0: i32) -> (i32, i32, i32) {
    %c0_i32 = arith.constant 0 : i32
    %c0_i32_0 = arith.constant 0 : i32
    %c0_i32_1 = arith.constant 0 : i32
    %c0_i32_2 = arith.constant 0 : i32
    return %c0_i32, %c0_i32_0, %c0_i32_1 : i32, i32, i32
  }
  func.func @transform_3(%arg0: i32) -> (i32, i32) {
    %c0_i32 = arith.constant 0 : i32
    %c0_i32_0 = arith.constant 0 : i32
    %c0_i32_1 = arith.constant 0 : i32
    return %c0_i32, %c0_i32_0 : i32, i32
  }
  func.func @transform_4(%arg0: i32) -> (i32, i32, i32) {
    %c0_i32 = arith.constant 0 : i32
    %c0_i32_0 = arith.constant 0 : i32
    %c0_i32_1 = arith.constant 0 : i32
    return %arg0, %c0_i32, %c0_i32_0 : i32, i32, i32
  }
  func.func @transform_5(%arg0: i32) -> (i32, i32, i32) {
    %c0_i32 = arith.constant 0 : i32
    %c0_i32_0 = arith.constant 0 : i32
    %c0_i32_1 = arith.constant 0 : i32
    return %arg0, %c0_i32, %c0_i32_0 : i32, i32, i32
  }
}

module attributes {stable_mosaic.version = 11 : i64} {
  func.func @_convlstm_kernel(%arg0: i32, %arg1: memref<1x18x432xf32, #tpu.memory_space<vmem>>, %arg2: memref<1x16x128xf32, #tpu.memory_space<vmem>>, %arg3: memref<3x432x512xbf16, #tpu.memory_space<vmem>>, %arg4: memref<1x512xf32, #tpu.memory_space<vmem>>, %arg5: memref<1x16x128xf32, #tpu.memory_space<vmem>>, %arg6: memref<1x16x128xf32, #tpu.memory_space<vmem>>) attributes {dimension_semantics = [#tpu.dimension_semantics<parallel>], iteration_bounds = array<i64: 2>, scalar_prefetch = 0 : i64, scratch_operands = 0 : i64, tpu.core_type = #tpu.core_type<tc>, window_params = [{transform_indices = @transform_0, window_bounds = array<i64: 1, 18, 432>}, {transform_indices = @transform_1, window_bounds = array<i64: 1, 16, 128>}, {pipeline_mode = #tpu.pipeline_mode<synchronous>, transform_indices = @transform_2, window_bounds = array<i64: 3, 432, 512>}, {pipeline_mode = #tpu.pipeline_mode<synchronous>, transform_indices = @transform_3, window_bounds = array<i64: 1, 512>}, {transform_indices = @transform_4, window_bounds = array<i64: 1, 16, 128>}, {transform_indices = @transform_5, window_bounds = array<i64: 1, 16, 128>}]} {
    %c0 = arith.constant 0 : index
    %c0_0 = arith.constant 0 : index
    %c0_1 = arith.constant 0 : index
    %0 = vector.load %arg1[%c0, %c0_0, %c0_1] : memref<1x18x432xf32, #tpu.memory_space<vmem>>, vector<1x18x432xf32>
    %1 = vector.shape_cast %0 : vector<1x18x432xf32> to vector<18x432xf32>
    %2 = arith.truncf %1 : vector<18x432xf32> to vector<18x432xbf16>
    %c0_2 = arith.constant 0 : index
    %c0_3 = arith.constant 0 : index
    %c0_4 = arith.constant 0 : index
    %3 = vector.load %arg3[%c0_2, %c0_3, %c0_4] : memref<3x432x512xbf16, #tpu.memory_space<vmem>>, vector<1x432x512xbf16>
    %4 = vector.shape_cast %3 : vector<1x432x512xbf16> to vector<432x512xbf16>
    %cst = arith.constant dense<0.000000e+00> : vector<18x512xf32>
    %5 = tpu.matmul %2, %4, %cst {dimension_numbers = #tpu.dot_dimension_numbers<[1], [0], [0], [1], [0, 0, 1, 1], [], []>} : vector<18x432xbf16>, vector<432x512xbf16>, vector<18x512xf32> -> vector<18x512xf32>
    %6 = vector.extract_strided_slice %5 {offsets = [0, 0], sizes = [16, 512], strides = [1, 1]} : vector<18x512xf32> to vector<16x512xf32>
    %c1 = arith.constant 1 : index
    %c0_5 = arith.constant 0 : index
    %c0_6 = arith.constant 0 : index
    %7 = vector.load %arg3[%c1, %c0_5, %c0_6] : memref<3x432x512xbf16, #tpu.memory_space<vmem>>, vector<1x432x512xbf16>
    %8 = vector.shape_cast %7 : vector<1x432x512xbf16> to vector<432x512xbf16>
    %cst_7 = arith.constant dense<0.000000e+00> : vector<18x512xf32>
    %9 = tpu.matmul %2, %8, %cst_7 {dimension_numbers = #tpu.dot_dimension_numbers<[1], [0], [0], [1], [0, 0, 1, 1], [], []>} : vector<18x432xbf16>, vector<432x512xbf16>, vector<18x512xf32> -> vector<18x512xf32>
    %10 = vector.extract_strided_slice %9 {offsets = [1, 0], sizes = [16, 512], strides = [1, 1]} : vector<18x512xf32> to vector<16x512xf32>
    %11 = arith.addf %6, %10 : vector<16x512xf32>
    %c2 = arith.constant 2 : index
    %c0_8 = arith.constant 0 : index
    %c0_9 = arith.constant 0 : index
    %12 = vector.load %arg3[%c2, %c0_8, %c0_9] : memref<3x432x512xbf16, #tpu.memory_space<vmem>>, vector<1x432x512xbf16>
    %13 = vector.shape_cast %12 : vector<1x432x512xbf16> to vector<432x512xbf16>
    %cst_10 = arith.constant dense<0.000000e+00> : vector<18x512xf32>
    %14 = tpu.matmul %2, %13, %cst_10 {dimension_numbers = #tpu.dot_dimension_numbers<[1], [0], [0], [1], [0, 0, 1, 1], [], []>} : vector<18x432xbf16>, vector<432x512xbf16>, vector<18x512xf32> -> vector<18x512xf32>
    %15 = vector.extract_strided_slice %14 {offsets = [2, 0], sizes = [16, 512], strides = [1, 1]} : vector<18x512xf32> to vector<16x512xf32>
    %16 = arith.addf %11, %15 : vector<16x512xf32>
    %c0_11 = arith.constant 0 : index
    %c0_12 = arith.constant 0 : index
    %17 = vector.load %arg4[%c0_11, %c0_12] : memref<1x512xf32, #tpu.memory_space<vmem>>, vector<1x512xf32>
    %18 = vector.broadcast %17 : vector<1x512xf32> to vector<16x512xf32>
    %19 = arith.addf %16, %18 : vector<16x512xf32>
    %20 = vector.extract_strided_slice %19 {offsets = [0, 0], sizes = [16, 128], strides = [1, 1]} : vector<16x512xf32> to vector<16x128xf32>
    %21 = arith.negf %20 : vector<16x128xf32>
    %22 = math.exp %21 : vector<16x128xf32>
    %cst_13 = arith.constant 1.000000e+00 : f32
    %23 = vector.broadcast %cst_13 : f32 to vector<16x128xf32>
    %24 = arith.addf %23, %22 : vector<16x128xf32>
    %25 = arith.divf %23, %24 : vector<16x128xf32>
    %26 = vector.extract_strided_slice %19 {offsets = [0, 128], sizes = [16, 128], strides = [1, 1]} : vector<16x512xf32> to vector<16x128xf32>
    %27 = arith.negf %26 : vector<16x128xf32>
    %28 = math.exp %27 : vector<16x128xf32>
    %cst_14 = arith.constant 1.000000e+00 : f32
    %29 = vector.broadcast %cst_14 : f32 to vector<16x128xf32>
    %30 = arith.addf %29, %28 : vector<16x128xf32>
    %31 = arith.divf %29, %30 : vector<16x128xf32>
    %32 = vector.extract_strided_slice %19 {offsets = [0, 256], sizes = [16, 128], strides = [1, 1]} : vector<16x512xf32> to vector<16x128xf32>
    %33 = math.tanh %32 : vector<16x128xf32>
    %34 = vector.extract_strided_slice %19 {offsets = [0, 384], sizes = [16, 128], strides = [1, 1]} : vector<16x512xf32> to vector<16x128xf32>
    %35 = arith.negf %34 : vector<16x128xf32>
    %36 = math.exp %35 : vector<16x128xf32>
    %cst_15 = arith.constant 1.000000e+00 : f32
    %37 = vector.broadcast %cst_15 : f32 to vector<16x128xf32>
    %38 = arith.addf %37, %36 : vector<16x128xf32>
    %39 = arith.divf %37, %38 : vector<16x128xf32>
    %c0_16 = arith.constant 0 : index
    %c0_17 = arith.constant 0 : index
    %c0_18 = arith.constant 0 : index
    %40 = vector.load %arg2[%c0_16, %c0_17, %c0_18] : memref<1x16x128xf32, #tpu.memory_space<vmem>>, vector<1x16x128xf32>
    %41 = vector.shape_cast %40 : vector<1x16x128xf32> to vector<16x128xf32>
    %42 = arith.mulf %31, %41 : vector<16x128xf32>
    %43 = arith.mulf %25, %33 : vector<16x128xf32>
    %44 = arith.addf %42, %43 : vector<16x128xf32>
    %45 = math.tanh %44 : vector<16x128xf32>
    %46 = arith.mulf %39, %45 : vector<16x128xf32>
    %c0_19 = arith.constant 0 : index
    %c0_20 = arith.constant 0 : index
    %c0_21 = arith.constant 0 : index
    %47 = vector.load %arg5[%c0_19, %c0_20, %c0_21] : memref<1x16x128xf32, #tpu.memory_space<vmem>>, vector<1x16x128xf32>
    %48 = vector.shape_cast %47 : vector<1x16x128xf32> to vector<16x128xf32>
    %49 = vector.shape_cast %46 : vector<16x128xf32> to vector<1x16x128xf32>
    tpu.vector_store %arg5[%c0_19, %c0_20, %c0_21], %49 {strides = array<i32>} : memref<1x16x128xf32, #tpu.memory_space<vmem>>, vector<1x16x128xf32>,
    %c0_22 = arith.constant 0 : index
    %c0_23 = arith.constant 0 : index
    %c0_24 = arith.constant 0 : index
    %50 = vector.load %arg6[%c0_22, %c0_23, %c0_24] : memref<1x16x128xf32, #tpu.memory_space<vmem>>, vector<1x16x128xf32>
    %51 = vector.shape_cast %50 : vector<1x16x128xf32> to vector<16x128xf32>
    %52 = vector.shape_cast %44 : vector<16x128xf32> to vector<1x16x128xf32>
    tpu.vector_store %arg6[%c0_22, %c0_23, %c0_24], %52 {strides = array<i32>} : memref<1x16x128xf32, #tpu.memory_space<vmem>>, vector<1x16x128xf32>,
    return
  }
  func.func @transform_0(%arg0: i32) -> (i32, i32, i32) {
    %c0_i32 = arith.constant 0 : i32
    %c0_i32_0 = arith.constant 0 : i32
    %c0_i32_1 = arith.constant 0 : i32
    return %arg0, %c0_i32, %c0_i32_0 : i32, i32, i32
  }
  func.func @transform_1(%arg0: i32) -> (i32, i32, i32) {
    %c0_i32 = arith.constant 0 : i32
    %c0_i32_0 = arith.constant 0 : i32
    %c0_i32_1 = arith.constant 0 : i32
    return %arg0, %c0_i32, %c0_i32_0 : i32, i32, i32
  }
  func.func @transform_2(%arg0: i32) -> (i32, i32, i32) {
    %c0_i32 = arith.constant 0 : i32
    %c0_i32_0 = arith.constant 0 : i32
    %c0_i32_1 = arith.constant 0 : i32
    %c0_i32_2 = arith.constant 0 : i32
    return %c0_i32, %c0_i32_0, %c0_i32_1 : i32, i32, i32
  }
  func.func @transform_3(%arg0: i32) -> (i32, i32) {
    %c0_i32 = arith.constant 0 : i32
    %c0_i32_0 = arith.constant 0 : i32
    %c0_i32_1 = arith.constant 0 : i32
    return %c0_i32, %c0_i32_0 : i32, i32
  }
  func.func @transform_4(%arg0: i32) -> (i32, i32, i32) {
    %c0_i32 = arith.constant 0 : i32
    %c0_i32_0 = arith.constant 0 : i32
    %c0_i32_1 = arith.constant 0 : i32
    return %arg0, %c0_i32, %c0_i32_0 : i32, i32, i32
  }
  func.func @transform_5(%arg0: i32) -> (i32, i32, i32) {
    %c0_i32 = arith.constant 0 : i32
    %c0_i32_0 = arith.constant 0 : i32
    %c0_i32_1 = arith.constant 0 : i32
    return %arg0, %c0_i32, %c0_i32_0 : i32, i32, i32
  }
}

module attributes {stable_mosaic.version = 11 : i64} {
  func.func @_conv_kernel(%arg0: i32, %arg1: memref<1x18x144xf32, #tpu.memory_space<vmem>>, %arg2: memref<3x144x64xbf16, #tpu.memory_space<vmem>>, %arg3: memref<1x64xf32, #tpu.memory_space<vmem>>, %arg4: memref<1x16x64xf32, #tpu.memory_space<vmem>>) attributes {dimension_semantics = [#tpu.dimension_semantics<parallel>], iteration_bounds = array<i64: 2>, scalar_prefetch = 0 : i64, scratch_operands = 0 : i64, tpu.core_type = #tpu.core_type<tc>, window_params = [{transform_indices = @transform_0, window_bounds = array<i64: 1, 18, 144>}, {pipeline_mode = #tpu.pipeline_mode<synchronous>, transform_indices = @transform_1, window_bounds = array<i64: 3, 144, 64>}, {pipeline_mode = #tpu.pipeline_mode<synchronous>, transform_indices = @transform_2, window_bounds = array<i64: 1, 64>}, {transform_indices = @transform_3, window_bounds = array<i64: 1, 16, 64>}]} {
    %c0 = arith.constant 0 : index
    %c0_0 = arith.constant 0 : index
    %c0_1 = arith.constant 0 : index
    %0 = vector.load %arg1[%c0, %c0_0, %c0_1] : memref<1x18x144xf32, #tpu.memory_space<vmem>>, vector<1x18x144xf32>
    %1 = vector.shape_cast %0 : vector<1x18x144xf32> to vector<18x144xf32>
    %2 = arith.truncf %1 : vector<18x144xf32> to vector<18x144xbf16>
    %c0_2 = arith.constant 0 : index
    %c0_3 = arith.constant 0 : index
    %c0_4 = arith.constant 0 : index
    %3 = vector.load %arg2[%c0_2, %c0_3, %c0_4] : memref<3x144x64xbf16, #tpu.memory_space<vmem>>, vector<1x144x64xbf16>
    %4 = vector.shape_cast %3 : vector<1x144x64xbf16> to vector<144x64xbf16>
    %cst = arith.constant dense<0.000000e+00> : vector<18x64xf32>
    %5 = tpu.matmul %2, %4, %cst {dimension_numbers = #tpu.dot_dimension_numbers<[1], [0], [0], [1], [0, 0, 1, 1], [], []>} : vector<18x144xbf16>, vector<144x64xbf16>, vector<18x64xf32> -> vector<18x64xf32>
    %6 = vector.extract_strided_slice %5 {offsets = [0, 0], sizes = [16, 64], strides = [1, 1]} : vector<18x64xf32> to vector<16x64xf32>
    %c1 = arith.constant 1 : index
    %c0_5 = arith.constant 0 : index
    %c0_6 = arith.constant 0 : index
    %7 = vector.load %arg2[%c1, %c0_5, %c0_6] : memref<3x144x64xbf16, #tpu.memory_space<vmem>>, vector<1x144x64xbf16>
    %8 = vector.shape_cast %7 : vector<1x144x64xbf16> to vector<144x64xbf16>
    %cst_7 = arith.constant dense<0.000000e+00> : vector<18x64xf32>
    %9 = tpu.matmul %2, %8, %cst_7 {dimension_numbers = #tpu.dot_dimension_numbers<[1], [0], [0], [1], [0, 0, 1, 1], [], []>} : vector<18x144xbf16>, vector<144x64xbf16>, vector<18x64xf32> -> vector<18x64xf32>
    %10 = vector.extract_strided_slice %9 {offsets = [1, 0], sizes = [16, 64], strides = [1, 1]} : vector<18x64xf32> to vector<16x64xf32>
    %11 = arith.addf %6, %10 : vector<16x64xf32>
    %c2 = arith.constant 2 : index
    %c0_8 = arith.constant 0 : index
    %c0_9 = arith.constant 0 : index
    %12 = vector.load %arg2[%c2, %c0_8, %c0_9] : memref<3x144x64xbf16, #tpu.memory_space<vmem>>, vector<1x144x64xbf16>
    %13 = vector.shape_cast %12 : vector<1x144x64xbf16> to vector<144x64xbf16>
    %cst_10 = arith.constant dense<0.000000e+00> : vector<18x64xf32>
    %14 = tpu.matmul %2, %13, %cst_10 {dimension_numbers = #tpu.dot_dimension_numbers<[1], [0], [0], [1], [0, 0, 1, 1], [], []>} : vector<18x144xbf16>, vector<144x64xbf16>, vector<18x64xf32> -> vector<18x64xf32>
    %15 = vector.extract_strided_slice %14 {offsets = [2, 0], sizes = [16, 64], strides = [1, 1]} : vector<18x64xf32> to vector<16x64xf32>
    %16 = arith.addf %11, %15 : vector<16x64xf32>
    %c0_11 = arith.constant 0 : index
    %c0_12 = arith.constant 0 : index
    %17 = vector.load %arg3[%c0_11, %c0_12] : memref<1x64xf32, #tpu.memory_space<vmem>>, vector<1x64xf32>
    %18 = vector.broadcast %17 : vector<1x64xf32> to vector<16x64xf32>
    %19 = arith.addf %16, %18 : vector<16x64xf32>
    %cst_13 = arith.constant 0.000000e+00 : f32
    %cst_14 = arith.constant 2.550000e+02 : f32
    %20 = vector.broadcast %cst_13 : f32 to vector<16x64xf32>
    %21 = arith.maximumf %20, %19 : vector<16x64xf32>
    %22 = vector.broadcast %cst_14 : f32 to vector<16x64xf32>
    %23 = arith.minimumf %22, %21 : vector<16x64xf32>
    %c0_15 = arith.constant 0 : index
    %c0_16 = arith.constant 0 : index
    %c0_17 = arith.constant 0 : index
    %24 = vector.load %arg4[%c0_15, %c0_16, %c0_17] : memref<1x16x64xf32, #tpu.memory_space<vmem>>, vector<1x16x64xf32>
    %25 = vector.shape_cast %24 : vector<1x16x64xf32> to vector<16x64xf32>
    %26 = vector.shape_cast %23 : vector<16x64xf32> to vector<1x16x64xf32>
    tpu.vector_store %arg4[%c0_15, %c0_16, %c0_17], %26 {strides = array<i32>} : memref<1x16x64xf32, #tpu.memory_space<vmem>>, vector<1x16x64xf32>,
    return
  }
  func.func @transform_0(%arg0: i32) -> (i32, i32, i32) {
    %c0_i32 = arith.constant 0 : i32
    %c0_i32_0 = arith.constant 0 : i32
    %c0_i32_1 = arith.constant 0 : i32
    return %arg0, %c0_i32, %c0_i32_0 : i32, i32, i32
  }
  func.func @transform_1(%arg0: i32) -> (i32, i32, i32) {
    %c0_i32 = arith.constant 0 : i32
    %c0_i32_0 = arith.constant 0 : i32
    %c0_i32_1 = arith.constant 0 : i32
    %c0_i32_2 = arith.constant 0 : i32
    return %c0_i32, %c0_i32_0, %c0_i32_1 : i32, i32, i32
  }
  func.func @transform_2(%arg0: i32) -> (i32, i32) {
    %c0_i32 = arith.constant 0 : i32
    %c0_i32_0 = arith.constant 0 : i32
    %c0_i32_1 = arith.constant 0 : i32
    return %c0_i32, %c0_i32_0 : i32, i32
  }
  func.func @transform_3(%arg0: i32) -> (i32, i32, i32) {
    %c0_i32 = arith.constant 0 : i32
    %c0_i32_0 = arith.constant 0 : i32
    %c0_i32_1 = arith.constant 0 : i32
    return %arg0, %c0_i32, %c0_i32_0 : i32, i32, i32
  }
}

</mosaic_0001>

<bundles_post_ra>
// kernel: prednet_forward.16
= control target key start
LH: loop header
LB: loop body
LE: loop exit
PB: predicated region body
PF: predicated region fallthrough
CT: control target
= control target key end

     0   :  { %s920_s18 = smov 0   ;;  %s1066_s0 = inlined_call_operand.vmem [shape: f32[2,6,144], index: 0, kind: input, shape index: {}]   ;;  %s1067_s1 = inlined_call_operand.vmem [shape: f32[2,4,32], index: 1, kind: input, shape index: {}]   ;;  %s1068_s2 = inlined_call_operand.vmem [shape: bf16[3,144,128], index: 2, kind: input, shape index: {}]   ;;  %s1069_s3 = inlined_call_operand.vmem [shape: f32[1,128], index: 3, kind: input, shape index: {}]   ;;  %s1070_s4 = inlined_call_operand.vmem [shape: f32[2,4,32], index: 4, kind: output, shape index: {0}]   ;;  %s1071_s5 = inlined_call_operand.vmem [shape: f32[2,4,32], index: 5, kind: output, shape index: {1}]  }
   0x1 LB: > { %s750_s19 = sadd.s32 4294967295, %s884_s18   ;;  %p754_p0 = scmp.ge.s32.totalorder %s884_s18, 1  ;;  %s884_s18 = sphi %s920_s18, %s16_s18  }
   0x2   : > { %p199_p1 = scmp.lt.s32.totalorder %s884_s18, 3 }
   0x4   : > { %p200_p2 = pnand %p754_p0, %p199_p1 }
   0x5   : > { %p234_p3 = scmp.lt.s32.totalorder (!%p200_p2), %s750_s19, 1  ;;  %s887_s13 = smov (!%p200_p2), 64  }
   0x6   : > { %203 = sbr.rel (%p200_p2) target bundleno = 778 (0x30a), region = 36  ;;  %s888_s14 = smov (!%p200_p2), 32  }
   0xb   : > { %v843_v0 = vld [vmem:[%s1068_s2 + $0x38] sm:$0xff]   ;;  %v886_v1 = vmov 0   ;;  %v844_v2 = vld [vmem:[%s1068_s2 + $0x80] sm:$0xff]   ;;  %v845_v3 = vld [vmem:[%s1068_s2 + $0x30] sm:$0xff]   ;;  %s1073_s19 = smov (!%p234_p3, %s750_s19), 1  ;;  %vm328_vm0 = vcmask 130048  }
   0xc   : > { %332 = vmatprep.subr.bf16.mxu0 %v886_v1  ;;  %445 = vmatprep.subr.bf16.mxu1 %v886_v1  ;;  %v846_v4 = vld [vmem:[%s1068_s2 + $0x78] sm:$0xff]   ;;  %v847_v5 = vld [vmem:[%s1068_s2 + $0x28] sm:$0xff]   ;;  %v848_v6 = vld [vmem:[%s1068_s2 + $0x70] sm:$0xff]   ;;  %s830_s11 = sshll.u32 %s1073_s19, 4  ;;  %s1049_s9 = sshll.u32 %s1073_s19, 2  ;;  %vm647_vm1 = vcmask 257024  }
   0xd   : > { %333 = vmatpush1.bf16.msra.mxu0 %v843_v0  ;;  %446 = vmatpush1.bf16.msra.mxu1 %v844_v2  ;;  %v849_v7 = vld [vmem:[%s1068_s2 + $0x20] sm:$0xff]   ;;  %v850_v8 = vld [vmem:[%s1068_s2 + $0x68] sm:$0xff]   ;;  %v851_v9 = vld [vmem:[%s1068_s2 + $0x18] sm:$0xff]   ;;  %s238_s20 = scalar_lea.vmem %s1066_s0, %s830_s11  ;;  %s242_s12 = scalar_lea.vmem %s1067_s1, %s1049_s9 }
   0xe   : > { %334 = vmatprep.subr.bf16.mxu0 %v886_v1  ;;  %447 = vmatprep.subr.bf16.mxu1 %v886_v1  ;;  %v852_v10 = vld [vmem:[%s1068_s2 + $0x60] sm:$0xff]   ;;  %v853_v11 = vld [vmem:[%s1068_s2 + $0x10] sm:$0xff]   ;;  %v253_v12 = vld [vmem:[%s238_s20 + $0x8] sm:$0x3f]  ;;  %s889_s19 = smov 96   ;;  %s250_s17 = scalar_lea.vmem %s1071_s5, %s1049_s9 }
   0xf   : > { %v854_v13 = vld [vmem:[%s1068_s2 + $0x58] sm:$0xff]   ;;  %v255_v14 = vpack.c.bf16 %v253_v12, %v253_v12  ;;  %v855_v15 = vld [vmem:[%s1068_s2 + $0x8] sm:$0xff]   ;;  %v856_v16 = vld [vmem:[%s1068_s2 + $0x50] sm:$0xff]   ;;  %s246_s22 = scalar_lea.vmem %s1070_s4, %s1049_s9 }
  0x10   : > { %v857_v17 = vld [vmem:[%s1068_s2] sm:$0xff]   ;;  %v858_v18 = vld [vmem:[%s1068_s2 + $0x48] sm:$0xff]   ;;  %v863_v25 = vld [vmem:[%s1068_s2 + $0xb8] sm:$0xff]  }
  0x11   : > { %335 = vmatpush1.bf16.msra.mxu0 %v845_v3  ;;  %448 = vmatpush1.bf16.msra.mxu1 %v846_v4  ;;  %v859_v19 = vld [vmem:[%s1068_s2 + $0x40] sm:$0xff]   ;;  %v860_v21 = vld [vmem:[%s1068_s2 + $0x88] sm:$0xff]   ;;  %v864_v26 = vld [vmem:[%s1068_s2 + $0xb0] sm:$0xff]  }
  0x12   : > { %336 = vmatprep.subr.bf16.mxu0 %v886_v1  ;;  %449 = vmatprep.subr.bf16.mxu1 %v886_v1  ;;  %v252_v20 = vld [vmem:[%s238_s20] sm:$0x3f]  ;;  %v861_v23 = vld [vmem:[%s1068_s2 + $0xc8] sm:$0xff]   ;;  %v867_v29 = vld [vmem:[%s1068_s2 + $0x98] sm:$0xff]  }
  0x13   : > { %769 = vmatprep.mubr.msk.bf16.mxu0 %vm328_vm0, %v255_v14  ;;  %797 = vmatprep.mubr.msk.bf16.mxu1 %vm328_vm0, %v255_v14  ;;  %v254_v22 = vpack.c.bf16 %v252_v20, %v252_v20  ;;  %v862_v24 = vld [vmem:[%s1068_s2 + $0xc0] sm:$0xff]   ;;  %v865_v27 = vld [vmem:[%s1068_s2 + $0xa8] sm:$0xff]   ;;  %v868_v30 = vld [vmem:[%s1068_s2 + $0x90] sm:$0xff]  }
  0x14   : > { %v866_v28 = vld [vmem:[%s1068_s2 + $0xa0] sm:$0xff]   ;;  %v869_v31 = vld [vmem:[%s1068_s2 + $0xd0] sm:$0xff]  }
  0x15   : > { %337 = vmatpush1.bf16.msra.mxu0 %v847_v5  ;;  %450 = vmatpush1.bf16.msra.mxu1 %v848_v6  ;;  %v826_v44 = vld [vmem:[%s1069_s3] ss:$0 sm:$0xff] }
  0x16   : > { %338 = vmatprep.subr.bf16.mxu0 %v886_v1  ;;  %451 = vmatprep.subr.bf16.mxu1 %v886_v1  ;;  %v621_v51 = vld [vmem:[%s242_s12] sm:$0xf] }
  0x19   : > { %339 = vmatpush1.bf16.msra.mxu0 %v849_v7  ;;  %452 = vmatpush1.bf16.msra.mxu1 %v850_v8 }
  0x1a   : > { %340 = vmatprep.subr.bf16.mxu0 %v886_v1  ;;  %453 = vmatprep.subr.bf16.mxu1 %v886_v1 }
  0x1d   : > { %341 = vmatpush1.bf16.msra.mxu0 %v851_v9  ;;  %454 = vmatpush1.bf16.msra.mxu1 %v852_v10 }
  0x1e   : > { %342 = vmatprep.subr.bf16.mxu0 %v886_v1  ;;  %455 = vmatprep.subr.bf16.mxu1 %v886_v1 }
  0x21   : > { %343 = vmatpush1.bf16.msra.mxu0 %v853_v11  ;;  %456 = vmatpush1.bf16.msra.mxu1 %v854_v13 }
  0x22   : > { %344 = vmatprep.subr.bf16.mxu0 %v886_v1  ;;  %457 = vmatprep.subr.bf16.mxu1 %v886_v1 }
  0x25   : > { %345 = vmatpush1.bf16.msra.mxu0 %v855_v15  ;;  %458 = vmatpush1.bf16.msra.mxu1 %v856_v16 }
  0x26   : > { %346 = vmatprep.subr.bf16.mxu0 %v886_v1  ;;  %459 = vmatprep.subr.bf16.mxu1 %v886_v1 }
  0x29   : > { %347 = vmatpush1.bf16.msra.mxu0 %v857_v17  ;;  %460 = vmatpush1.bf16.msra.mxu1 %v858_v18 }
  0x2a   : > { %362 = vmatprep.subr.bf16.mxu0 %v886_v1  ;;  %475 = vmatprep.subr.bf16.mxu1 %v886_v1 }
  0x2d   : > { %363 = vmatpush2.bf16.msra.mxu0 %v859_v19  ;;  %476 = vmatpush2.bf16.msra.mxu1 %v860_v21 }
  0x2e   : > { %562 = vmatprep.subr.bf16.mxu0 %v886_v1 }
  0x30   : > { %365 = vmatmul.mubr.bf16.vlgmr.msra.gmra.mxu0 %v254_v22  ;;  %478 = vmatmul.mubr.bf16.vlgmr.msra.gmra.mxu1 %v254_v22 }
  0x31   : > { %563 = vmatpush1.bf16.msra.mxu0 %v861_v23  ;;  %825 = vmatprep.mubr.msk.bf16.mxu0 %vm328_vm0, %v255_v14 }
  0x32   : > { %564 = vmatprep.subr.bf16.mxu0 %v886_v1 }
  0x35   : > { %565 = vmatpush1.bf16.msra.mxu0 %v862_v24 }
  0x36   : > { %566 = vmatprep.subr.bf16.mxu0 %v886_v1 }
  0x39   : > { %567 = vmatpush1.bf16.msra.mxu0 %v863_v25 }
  0x3a   : > { %568 = vmatprep.subr.bf16.mxu0 %v886_v1 }
  0x3d   : > { %569 = vmatpush1.bf16.msra.mxu0 %v864_v26 }
  0x3e   : > { %570 = vmatprep.subr.bf16.mxu0 %v886_v1 }
  0x41   : > { %571 = vmatpush1.bf16.msra.mxu0 %v865_v27 }
  0x42   : > { %572 = vmatprep.subr.bf16.mxu0 %v886_v1 }
  0x45   : > { %573 = vmatpush1.bf16.msra.mxu0 %v866_v28 }
  0x46   : > { %574 = vmatprep.subr.bf16.mxu0 %v886_v1 }
  0x49   : > { %575 = vmatpush1.bf16.msra.mxu0 %v867_v29 }
  0x4a   : > { %576 = vmatprep.subr.bf16.mxu0 %v886_v1 }
  0x4d   : > { %577 = vmatpush1.bf16.msra.mxu0 %v868_v30 }
  0x4e   : > { %592 = vmatprep.subr.bf16.mxu0 %v886_v1 }
  0x51   : > { %593 = vmatpush2.bf16.msra.mxu0 %v869_v31 }
  0x54   : > { %595 = vmatmul.mubr.bf16.vlgmr.msra.gmra.mxu0 %v254_v22 }
  0xf0   : > { %v366_v32 = vpop.f32.mrf.mxu0  ;;  %v479_v33 = vpop.f32.mrf.mxu1 }
  0xf1   : > { %v486_v40 = vrot.slane %v479_v33, 1 }
  0xf2   : > { %v368_v34 = vpop.f32.mrf.mxu0  ;;  %v481_v35 = vpop.f32.mrf.mxu1 }
  0xf3   : > { %v488_v42 = vadd.f32 %v486_v40, %v366_v32 }
  0xf4   : > { %v369_v36 = vpop.f32.mrf.mxu0  ;;  %v482_v37 = vpop.f32.mrf.mxu1 }
  0xf6   : > { %v370_v38 = vpop.f32.mrf.mxu0  ;;  %v483_v39 = vpop.f32.mrf.mxu1 }
 0x114   : > { %v596_v41 = vpop.f32.mrf.mxu0 }
 0x115   : > { %v603_v43 = vrot.slane %v596_v41, 2 }
 0x116   : > { %v598_v45 = vpop.f32.mrf.mxu0 }
 0x117   : > { %v605_v46 = vadd.f32 %v603_v43, %v488_v42 }
 0x118   : > { %v599_v47 = vpop.f32.mrf.mxu0 }
 0x119   : > { %v613_v48 = vadd.f32 %v826_v44, %v605_v46 }
 0x11a   : > { %v600_v49 = vpop.f32.mrf.mxu0 }
 0x11b   : > { %870 = vtanh.f32 %v613_v48  ;;  %v827_v52 = vmul.f32 -1.442695, %v613_v48 }
 0x11d   : > { %872 = vpow2.f32 %v827_v52 }
 0x128   : > { %v871_v50 = vpop.eup %870 }
 0x129   : > { %628 = vrot.lane.b32.xlu0 %v871_v50, %s887_s13 }
 0x12a   : > { %v873_v53 = vpop.eup %872 }
 0x12b   : > { %v617_v54 = vadd.f32 1.0, %v873_v53 }
 0x12d   : > { %623 = vrot.lane.b32.xlu0 %v621_v51, %s888_s14  ;;  %874 = vrcp.f32 %v617_v54 }
 0x13a   : > { %v875_v55 = vpop.eup %874 }
 0x19b   : > { %v629_v56 = vpop.permute.xlu0 %628 }
 0x19c   : > { %v631_v57 = vmul.f32 %v875_v55, %v629_v56 }
 0x19e   : > { %633 = vrot.lane.b32.xlu1 %v631_v57, %s888_s14 }
 0x19f   : > { %v624_v58 = vpop.permute.xlu0 %623 }
 0x1a0   : > { %v626_v59 = vmul.f32 %v875_v55, %v624_v58 }
 0x210   : > { %v634_v60 = vpop.permute.xlu1 %633 }
 0x211   : > { %v636_v61 = vadd.f32 %v634_v60, %v626_v59 }
 0x213   : > { %876 = vtanh.f32 %v636_v61 }
 0x220   : > { %v877_v62 = vpop.eup %876 }
 0x221   : > { %639 = vrot.lane.b32.xlu1 %v877_v62, %s887_s13 }
 0x225   : > { %650 = vrot.lane.b32.xlu1 %v636_v61, %s889_s19 }
 0x293   : > { %v640_v63 = vpop.permute.xlu1 %639 }
 0x294   : > { %v642_v0 = vmul.f32 %v875_v55, %v640_v63 }
 0x296   : > { %644 = vrot.lane.b32.xlu0 %v642_v0, %s888_s14 }
 0x297   : > { %v651_v1 = vpop.permute.xlu1 %650 }
 0x298   : > { %653 = vst.msk [vmem:[%s250_s17] sm:$0xf] %vm647_vm1, %v651_v1 }
 0x308   : > { %v645_v2 = vpop.permute.xlu0 %644 }
 0x309   : > { %648 = vst.msk [vmem:[%s246_s22] sm:$0xf] %vm647_vm1, %v645_v2 }
 0x30a PF: > { %s16_s18 = sadd.s32 1, %s884_s18  }
 0x30b   : > { %p13_p4 = scmp.ge.s32.totalorder %s16_s18, 4  }
 0x30d   :  { %15 = sbr.rel (!%p13_p4) target bundleno = 1 (0x1), region = 83 }

// kernel: prednet_forward.17
= control target key start
LH: loop header
LB: loop body
LE: loop exit
PB: predicated region body
PF: predicated region fallthrough
CT: control target
= control target key end

     0   :  { %s4258_s18 = smov 0   ;;  %s5429_s0 = inlined_call_operand.vmem [shape: f32[2,18,432], index: 0, kind: input, shape index: {}]   ;;  %s5430_s1 = inlined_call_operand.vmem [shape: f32[2,16,128], index: 1, kind: input, shape index: {}]   ;;  %s5431_s2 = inlined_call_operand.vmem [shape: bf16[3,432,512], index: 2, kind: input, shape index: {}]   ;;  %s5432_s3 = inlined_call_operand.vmem [shape: f32[1,512], index: 3, kind: input, shape index: {}]   ;;  %s5433_s4 = inlined_call_operand.vmem [shape: f32[2,16,128], index: 4, kind: output, shape index: {0}]   ;;  %s5434_s5 = inlined_call_operand.vmem [shape: f32[2,16,128], index: 5, kind: output, shape index: {1}]  }
   0x1 LB: > { %s3118_s19 = sadd.s32 4294967295, %s4226_s18   ;;  %p3122_p0 = scmp.ge.s32.totalorder %s4226_s18, 1  ;;  %s4226_s18 = sphi %s4258_s18, %s16_s18  }
   0x2   : > { %p200_p1 = scmp.lt.s32.totalorder %s4226_s18, 3 }
   0x4   : > { %p201_p2 = pnand %p3122_p0, %p200_p1 }
   0x5   : > { %p238_p3 = scmp.lt.s32.totalorder (!%p201_p2), %s3118_s19, 1 }
   0x6   : > { %204 = sbr.rel (%p201_p2) target bundleno = 584 (0x248), region = 36 }
   0xb   : > { %v3702_v0 = vld [vmem:[%s5431_s2 + $0xe4] ss:$16 sps:$4 sm:$0xff]   ;;  %v3706_v2 = vld [vmem:[%s5431_s2 + $0xe0] ss:$16 sps:$4 sm:$0xff]   ;;  %s5436_s19 = smov (!%p238_p3, %s3118_s19), 1  ;;  %vm927_vm0 = vcmask 392192  }
   0xc   : > { %v3704_v1 = vld [vmem:[%s5431_s2 + $0x2e4] ss:$16 sps:$4 sm:$0xff]   ;;  %934 = vmatprep.subr.bf16.mxu0 %v3702_v0  ;;  %v3707_v3 = vld [vmem:[%s5431_s2 + $0x2e0] ss:$16 sps:$4 sm:$0xff]   ;;  %s3693_s26 = smul.u32 96, %s5436_s19  ;;  %vm1995_vm1 = vcmask 1046528  }
   0xd   : > { %983 = vmatprep.subr.bf16.mxu1 %v3704_v1  ;;  %v3708_v4 = vld [vmem:[%s5431_s2 + $0xc4] ss:$16 sps:$4 sm:$0xff]   ;;  %935 = vmatpush1.bf16.msra.mxu0 %v3706_v2  ;;  %v3712_v6 = vld [vmem:[%s5431_s2 + $0xc0] ss:$16 sps:$4 sm:$0xff]   ;;  %v3772_v50 = vld [vmem:[%s5431_s2 + $0xec] ss:$16 sps:$4 sm:$0xff]  }
   0xe   : > { %984 = vmatpush1.bf16.msra.mxu1 %v3707_v3  ;;  %v3710_v5 = vld [vmem:[%s5431_s2 + $0x2c4] ss:$16 sps:$4 sm:$0xff]   ;;  %936 = vmatprep.subr.bf16.mxu0 %v3708_v4  ;;  %v3713_v7 = vld [vmem:[%s5431_s2 + $0x2c0] ss:$16 sps:$4 sm:$0xff]   ;;  %s4366_s12 = scalar_lea.vmem %s5429_s0, %s3693_s26  ;;  %v3770_v52 = vld [vmem:[%s5431_s2 + $0xe8] ss:$16 sps:$4 sm:$0xff]  }
   0xf   : > { %985 = vmatprep.subr.bf16.mxu1 %v3710_v5  ;;  %v3714_v8 = vld [vmem:[%s5431_s2 + $0xa4] ss:$16 sps:$4 sm:$0xff]   ;;  %v3718_v10 = vld [vmem:[%s5431_s2 + $0xa0] ss:$16 sps:$4 sm:$0xff]   ;;  %v262_v34 = vld [vmem:[%s4366_s12 + $0x18] sm:$0xff]  ;;  %vm2897_vm2 = vcmask 1045504  }
  0x10   : > { %v3716_v9 = vld [vmem:[%s5431_s2 + $0x2a4] ss:$16 sps:$4 sm:$0xff]   ;;  %v3719_v11 = vld [vmem:[%s5431_s2 + $0x2a0] ss:$16 sps:$4 sm:$0xff]   ;;  %v266_v35 = vld [vmem:[%s4366_s12 + $0x38] sm:$0xff]  ;;  %s5412_s8 = sshll.u32 %s5436_s19, 4 }
  0x11   : > { %937 = vmatpush1.bf16.msra.mxu0 %v3712_v6  ;;  %v3720_v12 = vld [vmem:[%s5431_s2 + $0x84] ss:$16 sps:$4 sm:$0xff]   ;;  %v3724_v14 = vld [vmem:[%s5431_s2 + $0x80] ss:$16 sps:$4 sm:$0xff]   ;;  %v4382_v36 = vpack.c.bf16 %v266_v35, %v262_v34  ;;  %v260_v55 = vld [vmem:[%s4366_s12 + $0x8] sm:$0xff]  ;;  %s247_s11 = scalar_lea.vmem %s5430_s1, %s5412_s8  ;;  %s257_s19 = scalar_lea.vmem %s5434_s5, %s5412_s8 }
  0x12   : > { %986 = vmatpush1.bf16.msra.mxu1 %v3713_v7  ;;  %938 = vmatprep.subr.bf16.mxu0 %v3714_v8  ;;  %v3722_v13 = vld [vmem:[%s5431_s2 + $0x284] ss:$16 sps:$4 sm:$0xff]   ;;  %v3725_v15 = vld [vmem:[%s5431_s2 + $0x280] ss:$16 sps:$4 sm:$0xff]   ;;  %v264_v56 = vld [vmem:[%s4366_s12 + $0x28] sm:$0xff] }
  0x13   : > { %987 = vmatprep.subr.bf16.mxu1 %v3716_v9  ;;  %v3726_v16 = vld [vmem:[%s5431_s2 + $0x64] ss:$16 sps:$4 sm:$0xff]   ;;  %v3730_v18 = vld [vmem:[%s5431_s2 + $0x60] ss:$16 sps:$4 sm:$0xff]   ;;  %3238 = vmatprep.mubr.msk.bf16.mxu1 %vm927_vm0, %v4382_v36  ;;  %v3778_v57 = vld [vmem:[%s5431_s2 + $0xcc] ss:$16 sps:$4 sm:$0xff]   ;;  %v4440_v58 = vpack.c.bf16 %v264_v56, %v260_v55 }
  0x14   : > { %v3728_v17 = vld [vmem:[%s5431_s2 + $0x264] ss:$16 sps:$4 sm:$0xff]   ;;  %v3731_v19 = vld [vmem:[%s5431_s2 + $0x260] ss:$16 sps:$4 sm:$0xff]   ;;  %v3776_v59 = vld [vmem:[%s5431_s2 + $0xc8] ss:$16 sps:$4 sm:$0xff]  }
  0x15   : > { %939 = vmatpush1.bf16.msra.mxu0 %v3718_v10  ;;  %v3732_v20 = vld [vmem:[%s5431_s2 + $0x44] ss:$16 sps:$4 sm:$0xff]   ;;  %v3736_v22 = vld [vmem:[%s5431_s2 + $0x40] ss:$16 sps:$4 sm:$0xff]   ;;  %966 = vmatprep.mubr.bf16.mxu0 %v4440_v58  ;;  %v3784_v62 = vld [vmem:[%s5431_s2 + $0xac] ss:$16 sps:$4 sm:$0xff]  }
  0x16   : > { %988 = vmatpush1.bf16.msra.mxu1 %v3719_v11  ;;  %940 = vmatprep.subr.bf16.mxu0 %v3720_v12  ;;  %v3734_v21 = vld [vmem:[%s5431_s2 + $0x244] ss:$16 sps:$4 sm:$0xff]   ;;  %v3737_v23 = vld [vmem:[%s5431_s2 + $0x240] ss:$16 sps:$4 sm:$0xff]   ;;  %v3782_v63 = vld [vmem:[%s5431_s2 + $0xa8] ss:$16 sps:$4 sm:$0xff]  }
  0x17   : > { %989 = vmatprep.subr.bf16.mxu1 %v3722_v13  ;;  %v3738_v24 = vld [vmem:[%s5431_s2 + $0x24] ss:$16 sps:$4 sm:$0xff]   ;;  %v3742_v26 = vld [vmem:[%s5431_s2 + $0x20] ss:$16 sps:$4 sm:$0xff]   ;;  %v3790_v2 = vld [vmem:[%s5431_s2 + $0x8c] ss:$16 sps:$4 sm:$0xff]  }
  0x18   : > { %v3740_v25 = vld [vmem:[%s5431_s2 + $0x224] ss:$16 sps:$4 sm:$0xff]   ;;  %v3743_v27 = vld [vmem:[%s5431_s2 + $0x220] ss:$16 sps:$4 sm:$0xff]   ;;  %v3788_v3 = vld [vmem:[%s5431_s2 + $0x88] ss:$16 sps:$4 sm:$0xff]  }
  0x19   : > { %941 = vmatpush1.bf16.msra.mxu0 %v3724_v14  ;;  %v3744_v28 = vld [vmem:[%s5431_s2 + $0x4] ss:$16 sps:$4 sm:$0xff]   ;;  %v3748_v30 = vld [vmem:[%s5431_s2] ss:$16 sps:$4 sm:$0xff]   ;;  %v3796_v6 = vld [vmem:[%s5431_s2 + $0x6c] ss:$16 sps:$4 sm:$0xff]  }
  0x1a   : > { %990 = vmatpush1.bf16.msra.mxu1 %v3725_v15  ;;  %942 = vmatprep.subr.bf16.mxu0 %v3726_v16  ;;  %v3746_v29 = vld [vmem:[%s5431_s2 + $0x204] ss:$16 sps:$4 sm:$0xff]   ;;  %v3749_v31 = vld [vmem:[%s5431_s2 + $0x200] ss:$16 sps:$4 sm:$0xff]   ;;  %v3794_v7 = vld [vmem:[%s5431_s2 + $0x68] ss:$16 sps:$4 sm:$0xff]  }
  0x1b   : > { %991 = vmatprep.subr.bf16.mxu1 %v3728_v17  ;;  %v3750_v32 = vld [vmem:[%s5431_s2 + $0x1e4] ss:$16 sps:$4 sm:$0xff]   ;;  %v3754_v37 = vld [vmem:[%s5431_s2 + $0x1e0] ss:$16 sps:$4 sm:$0xff]   ;;  %v3800_v11 = vld [vmem:[%s5431_s2 + $0x4c] ss:$16 sps:$4 sm:$0xff]  }
  0x1c   : > { %v3752_v33 = vld [vmem:[%s5431_s2 + $0x344] ss:$16 sps:$4 sm:$0xff]   ;;  %v3755_v38 = vld [vmem:[%s5431_s2 + $0x340] ss:$16 sps:$4 sm:$0xff]   ;;  %v3803_v12 = vld [vmem:[%s5431_s2 + $0x2ec] ss:$16 sps:$4 sm:$0xff]  }
  0x1d   : > { %943 = vmatpush1.bf16.msra.mxu0 %v3730_v18  ;;  %v3756_v39 = vld [vmem:[%s5431_s2 + $0x1c4] ss:$16 sps:$4 sm:$0xff]   ;;  %v3760_v41 = vld [vmem:[%s5431_s2 + $0x1c0] ss:$16 sps:$4 sm:$0xff]   ;;  %v3798_v14 = vld [vmem:[%s5431_s2 + $0x48] ss:$16 sps:$4 sm:$0xff]  }
  0x1e   : > { %992 = vmatpush1.bf16.msra.mxu1 %v3731_v19  ;;  %944 = vmatprep.subr.bf16.mxu0 %v3732_v20  ;;  %v3758_v40 = vld [vmem:[%s5431_s2 + $0x324] ss:$16 sps:$4 sm:$0xff]   ;;  %v3761_v42 = vld [vmem:[%s5431_s2 + $0x320] ss:$16 sps:$4 sm:$0xff]   ;;  %v3801_v15 = vld [vmem:[%s5431_s2 + $0x2e8] ss:$16 sps:$4 sm:$0xff]  }
  0x1f   : > { %993 = vmatprep.subr.bf16.mxu1 %v3734_v21  ;;  %v3762_v43 = vld [vmem:[%s5431_s2 + $0x1a4] ss:$16 sps:$4 sm:$0xff]   ;;  %v3766_v45 = vld [vmem:[%s5431_s2 + $0x1a0] ss:$16 sps:$4 sm:$0xff]   ;;  %v3806_v16 = vld [vmem:[%s5431_s2 + $0x2c] ss:$16 sps:$4 sm:$0xff]  }
  0x20   : > { %v3764_v44 = vld [vmem:[%s5431_s2 + $0x304] ss:$16 sps:$4 sm:$0xff]   ;;  %v3767_v46 = vld [vmem:[%s5431_s2 + $0x300] ss:$16 sps:$4 sm:$0xff]   ;;  %v3809_v17 = vld [vmem:[%s5431_s2 + $0x2cc] ss:$16 sps:$4 sm:$0xff]  }
  0x21   : > { %945 = vmatpush1.bf16.msra.mxu0 %v3736_v22  ;;  %v3768_v47 = vld [vmem:[%s5431_s2 + $0x184] ss:$16 sps:$4 sm:$0xff]   ;;  %v3773_v53 = vld [vmem:[%s5431_s2 + $0x180] ss:$16 sps:$4 sm:$0xff]   ;;  %v3804_v18 = vld [vmem:[%s5431_s2 + $0x28] ss:$16 sps:$4 sm:$0xff]  }
  0x22   : > { %994 = vmatpush1.bf16.msra.mxu1 %v3737_v23  ;;  %946 = vmatprep.subr.bf16.mxu0 %v3738_v24  ;;  %v261_v48 = vld [vmem:[%s4366_s12 + $0x10] sm:$0xff]  ;;  %v259_v9 = vld [vmem:[%s4366_s12] sm:$0xff]  ;;  %v3807_v19 = vld [vmem:[%s5431_s2 + $0x2c8] ss:$16 sps:$4 sm:$0xff]  }
  0x23   : > { %995 = vmatprep.subr.bf16.mxu1 %v3740_v25  ;;  %v265_v49 = vld [vmem:[%s4366_s12 + $0x30] sm:$0xff]  ;;  %v263_v10 = vld [vmem:[%s4366_s12 + $0x20] sm:$0xff]  ;;  %v268_v20 = vld [vmem:[%s4366_s12 + $0x48] sm:$0x3] }
  0x24   : > { %v4424_v51 = vpack.c.bf16 %v265_v49, %v261_v48  ;;  %v3774_v54 = vld [vmem:[%s5431_s2 + $0x164] ss:$16 sps:$4 sm:$0xff]   ;;  %v3779_v60 = vld [vmem:[%s5431_s2 + $0x160] ss:$16 sps:$4 sm:$0xff]   ;;  %v4494_v13 = vpack.c.bf16 %v263_v10, %v259_v9  ;;  %v3812_v21 = vld [vmem:[%s5431_s2 + $0xc] ss:$16 sps:$4 sm:$0xff]   ;;  %v4519_v22 = vpack.c.bf16 %v268_v20, %v268_v20 }
  0x25   : > { %947 = vmatpush1.bf16.msra.mxu0 %v3742_v26  ;;  %v3780_v61 = vld [vmem:[%s5431_s2 + $0x144] ss:$16 sps:$4 sm:$0xff]   ;;  %v3785_v0 = vld [vmem:[%s5431_s2 + $0x140] ss:$16 sps:$4 sm:$0xff]   ;;  %v270_v23 = vld [vmem:[%s4366_s12 + $0x58] sm:$0x3] }
  0x26   : > { %996 = vmatpush1.bf16.msra.mxu1 %v3743_v27  ;;  %948 = vmatprep.subr.bf16.mxu0 %v3744_v28  ;;  %v3786_v1 = vld [vmem:[%s5431_s2 + $0x124] ss:$16 sps:$4 sm:$0xff]   ;;  %v3791_v4 = vld [vmem:[%s5431_s2 + $0x120] ss:$16 sps:$4 sm:$0xff]   ;;  %v4523_v25 = vpack.c.bf16 %v270_v23, %v270_v23  ;;  %v3815_v28 = vld [vmem:[%s5431_s2 + $0x2ac] ss:$16 sps:$4 sm:$0xff]  }
  0x27   : > { %997 = vmatprep.subr.bf16.mxu1 %v3746_v29  ;;  %v3792_v5 = vld [vmem:[%s5431_s2 + $0x104] ss:$16 sps:$4 sm:$0xff]   ;;  %v3797_v8 = vld [vmem:[%s5431_s2 + $0x100] ss:$16 sps:$4 sm:$0xff]   ;;  %v3810_v29 = vld [vmem:[%s5431_s2 + $0x8] ss:$16 sps:$4 sm:$0xff]  }
  0x28   : > { %v269_v24 = vld [vmem:[%s4366_s12 + $0x50] sm:$0x3]  ;;  %v267_v26 = vld [vmem:[%s4366_s12 + $0x40] sm:$0x3]  ;;  %v3816_v34 = vld [vmem:[%s5431_s2 + $0x1e8] ss:$16 sps:$4 sm:$0xff]   ;;  %s252_s12 = scalar_lea.vmem %s5433_s4, %s5412_s8 }
  0x29   : > { %949 = vmatpush1.bf16.msra.mxu0 %v3748_v30  ;;  %v4526_v27 = vpack.c.bf16 %v269_v24, %v269_v24  ;;  %v3813_v30 = vld [vmem:[%s5431_s2 + $0x2a8] ss:$16 sps:$4 sm:$0xff]   ;;  %v3842_v49 = vld [vmem:[%s5431_s2 + $0x16c] ss:$16 sps:$4 sm:$0xff]   ;;  %v3870_v9 = vld [vmem:[%s5431_s2 + $0x420] ss:$16 sps:$4 sm:$0xff]  }
  0x2a   : > { %998 = vmatpush1.bf16.msra.mxu1 %v3749_v31  ;;  %950 = vmatprep.subr.bf16.mxu0 %v3750_v32  ;;  %v4540_v31 = vpack.c.bf16 %v267_v26, %v267_v26  ;;  %v3818_v32 = vld [vmem:[%s5431_s2 + $0x1ec] ss:$16 sps:$4 sm:$0xff]   ;;  %v3819_v35 = vld [vmem:[%s5431_s2 + $0x288] ss:$16 sps:$4 sm:$0xff]   ;;  %v3873_v10 = vld [vmem:[%s5431_s2 + $0x620] ss:$16 sps:$4 sm:$0xff]  }
  0x2b   : > { %1009 = vmatprep.subr.bf16.mxu1 %v3752_v33  ;;  %v3821_v33 = vld [vmem:[%s5431_s2 + $0x28c] ss:$16 sps:$4 sm:$0xff]   ;;  %v3837_v48 = vld [vmem:[%s5431_s2 + $0x228] ss:$16 sps:$4 sm:$0xff]   ;;  %v3890_v20 = vld [vmem:[%s5431_s2 + $0x3c4] ss:$16 sps:$4 sm:$0xff]  }
  0x2c   : > { %v3851_v55 = vld [vmem:[%s5431_s2 + $0x34c] ss:$16 sps:$4 sm:$0xff]   ;;  %v3846_v56 = vld [vmem:[%s5431_s2 + $0x148] ss:$16 sps:$4 sm:$0xff]   ;;  %v3888_v23 = vld [vmem:[%s5431_s2 + $0x3c0] ss:$16 sps:$4 sm:$0xff]  }
  0x2d   : > { %951 = vmatpush2.bf16.msra.mxu0 %v3754_v37  ;;  %v3824_v37 = vld [vmem:[%s5431_s2 + $0x1cc] ss:$16 sps:$4 sm:$0xff]   ;;  %v3891_v24 = vld [vmem:[%s5431_s2 + $0x5c0] ss:$16 sps:$4 sm:$0xff]   ;;  %v3896_v26 = vld [vmem:[%s5431_s2 + $0x3a4] ss:$16 sps:$4 sm:$0xff]  }
  0x2e   : > { %1010 = vmatpush2.bf16.msra.mxu1 %v3755_v38  ;;  %952 = vmatprep.subr.bf16.mxu0 %v3756_v39  ;;  %v3827_v38 = vld [vmem:[%s5431_s2 + $0x26c] ss:$16 sps:$4 sm:$0xff]   ;;  %v3822_v39 = vld [vmem:[%s5431_s2 + $0x1c8] ss:$16 sps:$4 sm:$0xff]  }
  0x2f   : > { %1011 = vmatprep.subr.bf16.mxu1 %v3758_v40  ;;  %v3825_v40 = vld [vmem:[%s5431_s2 + $0x268] ss:$16 sps:$4 sm:$0xff]  }
  0x31   : > { %953 = vmatpush2.bf16.msra.mxu0 %v3760_v41  ;;  %v3830_v41 = vld [vmem:[%s5431_s2 + $0x1ac] ss:$16 sps:$4 sm:$0xff]  }
  0x32   : > { %1012 = vmatpush2.bf16.msra.mxu1 %v3761_v42  ;;  %954 = vmatprep.subr.bf16.mxu0 %v3762_v43  ;;  %v3833_v42 = vld [vmem:[%s5431_s2 + $0x24c] ss:$16 sps:$4 sm:$0xff]   ;;  %v3828_v43 = vld [vmem:[%s5431_s2 + $0x1a8] ss:$16 sps:$4 sm:$0xff]  }
  0x33   : > { %1013 = vmatprep.subr.bf16.mxu1 %v3764_v44  ;;  %v3831_v44 = vld [vmem:[%s5431_s2 + $0x248] ss:$16 sps:$4 sm:$0xff]  }
  0x35   : > { %955 = vmatpush2.bf16.msra.mxu0 %v3766_v45  ;;  %v3836_v45 = vld [vmem:[%s5431_s2 + $0x18c] ss:$16 sps:$4 sm:$0xff]  }
  0x36   : > { %1014 = vmatpush2.bf16.msra.mxu1 %v3767_v46  ;;  %956 = vmatprep.subr.bf16.mxu0 %v3768_v47  ;;  %v3839_v46 = vld [vmem:[%s5431_s2 + $0x22c] ss:$16 sps:$4 sm:$0xff]   ;;  %v3834_v47 = vld [vmem:[%s5431_s2 + $0x188] ss:$16 sps:$4 sm:$0xff]  }
  0x37   : > { %1032 = vmatprep.subr.bf16.mxu1 %v3772_v50  ;;  %v3845_v50 = vld [vmem:[%s5431_s2 + $0x20c] ss:$16 sps:$4 sm:$0xff]  }
  0x39   : > { %1016 = vmatmul.mubr.bf16.vlgmr.msra.gmra.mxu1 %v4424_v51  ;;  %957 = vmatpush2.bf16.msra.mxu0 %v3773_v53  ;;  %v3843_v53 = vld [vmem:[%s5431_s2 + $0x208] ss:$16 sps:$4 sm:$0xff]  }
  0x3a   : > { %1033 = vmatpush1.bf16.msra.mxu1 %v3770_v52  ;;  %958 = vmatprep.subr.bf16.mxu0 %v3774_v54  ;;  %v3840_v52 = vld [vmem:[%s5431_s2 + $0x168] ss:$16 sps:$4 sm:$0xff]   ;;  %v3848_v54 = vld [vmem:[%s5431_s2 + $0x14c] ss:$16 sps:$4 sm:$0xff]  }
  0x3b   : > { %1034 = vmatprep.subr.bf16.mxu1 %v3778_v57  ;;  %3239 = vmatprep.mubr.msk.bf16.mxu1 %vm927_vm0, %v4523_v25  ;;  %v3849_v57 = vld [vmem:[%s5431_s2 + $0x348] ss:$16 sps:$4 sm:$0xff]  }
  0x3d   : > { %959 = vmatpush2.bf16.msra.mxu0 %v3779_v60  ;;  %v3857_v60 = vld [vmem:[%s5431_s2 + $0x32c] ss:$16 sps:$4 sm:$0xff]  }
  0x3e   : > { %1035 = vmatpush1.bf16.msra.mxu1 %v3776_v59  ;;  %960 = vmatprep.subr.bf16.mxu0 %v3780_v61  ;;  %v3854_v59 = vld [vmem:[%s5431_s2 + $0x12c] ss:$16 sps:$4 sm:$0xff]   ;;  %v3852_v61 = vld [vmem:[%s5431_s2 + $0x128] ss:$16 sps:$4 sm:$0xff]  }
  0x3f   : > { %1036 = vmatprep.subr.bf16.mxu1 %v3784_v62  ;;  %v3855_v62 = vld [vmem:[%s5431_s2 + $0x328] ss:$16 sps:$4 sm:$0xff]  }
  0x41   : > { %961 = vmatpush2.bf16.msra.mxu0 %v3785_v0  ;;  %1026 = vmatmul.mubr.bf16.gmra.mxu1 %v4526_v27  ;;  %v3863_v0 = vld [vmem:[%s5431_s2 + $0x30c] ss:$16 sps:$4 sm:$0xff]  }
  0x42   : > { %1037 = vmatpush1.bf16.msra.mxu1 %v3782_v63  ;;  %962 = vmatprep.subr.bf16.mxu0 %v3786_v1  ;;  %v3860_v63 = vld [vmem:[%s5431_s2 + $0x10c] ss:$16 sps:$4 sm:$0xff]   ;;  %v3858_v1 = vld [vmem:[%s5431_s2 + $0x108] ss:$16 sps:$4 sm:$0xff]  }
  0x43   : > { %1038 = vmatprep.subr.bf16.mxu1 %v3790_v2  ;;  %1064 = vmatprep.mubr.bf16.mxu1 %v4440_v58  ;;  %v3861_v2 = vld [vmem:[%s5431_s2 + $0x308] ss:$16 sps:$4 sm:$0xff]  }
  0x45   : > { %963 = vmatpush2.bf16.msra.mxu0 %v3791_v4  ;;  %v3869_v4 = vld [vmem:[%s5431_s2 + $0x644] ss:$16 sps:$4 sm:$0xff]  }
  0x46   : > { %1039 = vmatpush1.bf16.msra.mxu1 %v3788_v3  ;;  %964 = vmatprep.subr.bf16.mxu0 %v3792_v5  ;;  %v3866_v3 = vld [vmem:[%s5431_s2 + $0x444] ss:$16 sps:$4 sm:$0xff]   ;;  %v3864_v5 = vld [vmem:[%s5431_s2 + $0x440] ss:$16 sps:$4 sm:$0xff]  }
  0x47   : > { %1040 = vmatprep.subr.bf16.mxu1 %v3796_v6  ;;  %v3867_v6 = vld [vmem:[%s5431_s2 + $0x640] ss:$16 sps:$4 sm:$0xff]  }
  0x49   : > { %965 = vmatpush2.bf16.msra.mxu0 %v3797_v8  ;;  %v3875_v8 = vld [vmem:[%s5431_s2 + $0x624] ss:$16 sps:$4 sm:$0xff]  }
  0x4a   : > { %1041 = vmatpush1.bf16.msra.mxu1 %v3794_v7  ;;  %1081 = vmatprep.subr.bf16.mxu0 %v3803_v12  ;;  %v3872_v7 = vld [vmem:[%s5431_s2 + $0x424] ss:$16 sps:$4 sm:$0xff]  }
  0x4b   : > { %1042 = vmatprep.subr.bf16.mxu1 %v3800_v11  ;;  %v3878_v11 = vld [vmem:[%s5431_s2 + $0x404] ss:$16 sps:$4 sm:$0xff]  }
  0x4c   : > { %967 = vmatmul.mubr.bf16.vlgmr.msra.gmra.mxu0 %v4494_v13  ;;  %v3881_v12 = vld [vmem:[%s5431_s2 + $0x604] ss:$16 sps:$4 sm:$0xff]  }
  0x4d   : > { %1082 = vmatpush1.bf16.msra.mxu0 %v3801_v15  ;;  %976 = vmatprep.mubr.bf16.mxu0 %v4519_v22  ;;  %v3879_v15 = vld [vmem:[%s5431_s2 + $0x600] ss:$16 sps:$4 sm:$0xff]  }
  0x4e   : > { %1043 = vmatpush1.bf16.msra.mxu1 %v3798_v14  ;;  %1083 = vmatprep.subr.bf16.mxu0 %v3809_v17  ;;  %v3876_v14 = vld [vmem:[%s5431_s2 + $0x400] ss:$16 sps:$4 sm:$0xff]   ;;  %v3887_v17 = vld [vmem:[%s5431_s2 + $0x5e4] ss:$16 sps:$4 sm:$0xff]  }
  0x4f   : > { %1044 = vmatprep.subr.bf16.mxu1 %v3806_v16  ;;  %v3884_v16 = vld [vmem:[%s5431_s2 + $0x3e4] ss:$16 sps:$4 sm:$0xff]  }
  0x51   : > { %1084 = vmatpush1.bf16.msra.mxu0 %v3807_v19  ;;  %v3885_v19 = vld [vmem:[%s5431_s2 + $0x5e0] ss:$16 sps:$4 sm:$0xff]  }
  0x52   : > { %1045 = vmatpush1.bf16.msra.mxu1 %v3804_v18  ;;  %1085 = vmatprep.subr.bf16.mxu0 %v3815_v28  ;;  %v3882_v18 = vld [vmem:[%s5431_s2 + $0x3e0] ss:$16 sps:$4 sm:$0xff]   ;;  %v3899_v28 = vld [vmem:[%s5431_s2 + $0x5a4] ss:$16 sps:$4 sm:$0xff]  }
  0x53   : > { %1046 = vmatprep.subr.bf16.mxu1 %v3812_v21  ;;  %v3893_v21 = vld [vmem:[%s5431_s2 + $0x5c4] ss:$16 sps:$4 sm:$0xff]  }
  0x54   : > { %977 = vmatmul.mubr.bf16.gmra.mxu0 %v4540_v31 }
  0x55   : > { %1086 = vmatpush1.bf16.msra.mxu0 %v3813_v30  ;;  %3240 = vmatprep.mubr.msk.bf16.mxu0 %vm927_vm0, %v4382_v36  ;;  %v3897_v30 = vld [vmem:[%s5431_s2 + $0x5a0] ss:$16 sps:$4 sm:$0xff]  }
  0x56   : > { %1047 = vmatpush1.bf16.msra.mxu1 %v3810_v29  ;;  %1087 = vmatprep.subr.bf16.mxu0 %v3821_v33  ;;  %v3894_v29 = vld [vmem:[%s5431_s2 + $0x3a0] ss:$16 sps:$4 sm:$0xff]   ;;  %v3905_v33 = vld [vmem:[%s5431_s2 + $0x584] ss:$16 sps:$4 sm:$0xff]  }
  0x57   : > { %1048 = vmatprep.subr.bf16.mxu1 %v3818_v32  ;;  %v3902_v32 = vld [vmem:[%s5431_s2 + $0x384] ss:$16 sps:$4 sm:$0xff]  }
  0x59   : > { %1088 = vmatpush1.bf16.msra.mxu0 %v3819_v35  ;;  %v3903_v35 = vld [vmem:[%s5431_s2 + $0x580] ss:$16 sps:$4 sm:$0xff]  }
  0x5a   : > { %1049 = vmatpush2.bf16.msra.mxu1 %v3816_v34  ;;  %1089 = vmatprep.subr.bf16.mxu0 %v3827_v38  ;;  %v3900_v34 = vld [vmem:[%s5431_s2 + $0x380] ss:$16 sps:$4 sm:$0xff]   ;;  %v3911_v38 = vld [vmem:[%s5431_s2 + $0x564] ss:$16 sps:$4 sm:$0xff]  }
  0x5b   : > { %1050 = vmatprep.subr.bf16.mxu1 %v3824_v37  ;;  %v3908_v37 = vld [vmem:[%s5431_s2 + $0x364] ss:$16 sps:$4 sm:$0xff]  }
  0x5d   : > { %1090 = vmatpush1.bf16.msra.mxu0 %v3825_v40  ;;  %v3909_v40 = vld [vmem:[%s5431_s2 + $0x560] ss:$16 sps:$4 sm:$0xff]  }
  0x5e   : > { %1051 = vmatpush2.bf16.msra.mxu1 %v3822_v39  ;;  %1091 = vmatprep.subr.bf16.mxu0 %v3833_v42  ;;  %v3906_v39 = vld [vmem:[%s5431_s2 + $0x360] ss:$16 sps:$4 sm:$0xff]   ;;  %v3917_v42 = vld [vmem:[%s5431_s2 + $0x6a4] ss:$16 sps:$4 sm:$0xff]  }
  0x5f   : > { %1052 = vmatprep.subr.bf16.mxu1 %v3830_v41  ;;  %v3914_v41 = vld [vmem:[%s5431_s2 + $0x544] ss:$16 sps:$4 sm:$0xff]  }
  0x61   : > { %1092 = vmatpush1.bf16.msra.mxu0 %v3831_v44  ;;  %v3915_v44 = vld [vmem:[%s5431_s2 + $0x6a0] ss:$16 sps:$4 sm:$0xff]  }
  0x62   : > { %1053 = vmatpush2.bf16.msra.mxu1 %v3828_v43  ;;  %1093 = vmatprep.subr.bf16.mxu0 %v3839_v46  ;;  %v3912_v43 = vld [vmem:[%s5431_s2 + $0x540] ss:$16 sps:$4 sm:$0xff]   ;;  %v3923_v46 = vld [vmem:[%s5431_s2 + $0x684] ss:$16 sps:$4 sm:$0xff]  }
  0x63   : > { %1054 = vmatprep.subr.bf16.mxu1 %v3836_v45  ;;  %v3920_v45 = vld [vmem:[%s5431_s2 + $0x524] ss:$16 sps:$4 sm:$0xff]  }
  0x65   : > { %1094 = vmatpush1.bf16.msra.mxu0 %v3837_v48  ;;  %v3921_v48 = vld [vmem:[%s5431_s2 + $0x680] ss:$16 sps:$4 sm:$0xff]  }
  0x66   : > { %1055 = vmatpush2.bf16.msra.mxu1 %v3834_v47  ;;  %1095 = vmatprep.subr.bf16.mxu0 %v3845_v50  ;;  %v3918_v47 = vld [vmem:[%s5431_s2 + $0x520] ss:$16 sps:$4 sm:$0xff]   ;;  %v3929_v50 = vld [vmem:[%s5431_s2 + $0x664] ss:$16 sps:$4 sm:$0xff]  }
  0x67   : > { %1056 = vmatprep.subr.bf16.mxu1 %v3842_v49  ;;  %v3926_v49 = vld [vmem:[%s5431_s2 + $0x504] ss:$16 sps:$4 sm:$0xff]  }
  0x69   : > { %1096 = vmatpush1.bf16.msra.mxu0 %v3843_v53  ;;  %v3927_v53 = vld [vmem:[%s5431_s2 + $0x660] ss:$16 sps:$4 sm:$0xff]  }
  0x6a   : > { %1057 = vmatpush2.bf16.msra.mxu1 %v3840_v52  ;;  %1107 = vmatprep.subr.bf16.mxu0 %v3851_v55  ;;  %v3924_v52 = vld [vmem:[%s5431_s2 + $0x500] ss:$16 sps:$4 sm:$0xff]   ;;  %v3935_v55 = vld [vmem:[%s5431_s2 + $0x44c] ss:$16 sps:$4 sm:$0xff]  }
  0x6b   : > { %1058 = vmatprep.subr.bf16.mxu1 %v3848_v54  ;;  %v3932_v54 = vld [vmem:[%s5431_s2 + $0x4e4] ss:$16 sps:$4 sm:$0xff]  }
  0x6d   : > { %1108 = vmatpush2.bf16.msra.mxu0 %v3849_v57  ;;  %v3933_v57 = vld [vmem:[%s5431_s2 + $0x448] ss:$16 sps:$4 sm:$0xff]  }
  0x6e   : > { %1059 = vmatpush2.bf16.msra.mxu1 %v3846_v56  ;;  %1109 = vmatprep.subr.bf16.mxu0 %v3857_v60  ;;  %v3930_v56 = vld [vmem:[%s5431_s2 + $0x4e0] ss:$16 sps:$4 sm:$0xff]   ;;  %v3941_v60 = vld [vmem:[%s5431_s2 + $0x42c] ss:$16 sps:$4 sm:$0xff]  }
  0x6f   : > { %1060 = vmatprep.subr.bf16.mxu1 %v3854_v59  ;;  %v3938_v59 = vld [vmem:[%s5431_s2 + $0x4c4] ss:$16 sps:$4 sm:$0xff]  }
  0x71   : > { %1110 = vmatpush2.bf16.msra.mxu0 %v3855_v62  ;;  %v3939_v62 = vld [vmem:[%s5431_s2 + $0x428] ss:$16 sps:$4 sm:$0xff]  }
  0x72   : > { %1061 = vmatpush2.bf16.msra.mxu1 %v3852_v61  ;;  %1111 = vmatprep.subr.bf16.mxu0 %v3863_v0  ;;  %v3936_v61 = vld [vmem:[%s5431_s2 + $0x4c0] ss:$16 sps:$4 sm:$0xff]   ;;  %v3947_v0 = vld [vmem:[%s5431_s2 + $0x40c] ss:$16 sps:$4 sm:$0xff]  }
  0x73   : > { %1062 = vmatprep.subr.bf16.mxu1 %v3860_v63  ;;  %v3944_v63 = vld [vmem:[%s5431_s2 + $0x4a4] ss:$16 sps:$4 sm:$0xff]  }
  0x75   : > { %1112 = vmatpush2.bf16.msra.mxu0 %v3861_v2  ;;  %v3945_v2 = vld [vmem:[%s5431_s2 + $0x408] ss:$16 sps:$4 sm:$0xff]  }
  0x76   : > { %1063 = vmatpush2.bf16.msra.mxu1 %v3858_v1  ;;  %1779 = vmatprep.subr.bf16.mxu0 %v3866_v3  ;;  %v3942_v1 = vld [vmem:[%s5431_s2 + $0x4a0] ss:$16 sps:$4 sm:$0xff]   ;;  %v3950_v3 = vld [vmem:[%s5431_s2 + $0x484] ss:$16 sps:$4 sm:$0xff]  }
  0x77   : > { %1830 = vmatprep.subr.bf16.mxu1 %v3869_v4  ;;  %v3953_v4 = vld [vmem:[%s5431_s2 + $0x3ec] ss:$16 sps:$4 sm:$0xff]  }
  0x78   : > { %1114 = vmatmul.mubr.bf16.vlgmr.msra.gmra.mxu0 %v4424_v51 }
  0x79   : > { %1065 = vmatmul.mubr.bf16.vlgmr.msra.gmra.mxu1 %v4494_v13  ;;  %1780 = vmatpush1.bf16.msra.mxu0 %v3864_v5  ;;  %v3948_v5 = vld [vmem:[%s5431_s2 + $0x480] ss:$16 sps:$4 sm:$0xff]  }
  0x7a   : > { %1831 = vmatpush1.bf16.msra.mxu1 %v3867_v6  ;;  %1781 = vmatprep.subr.bf16.mxu0 %v3872_v7  ;;  %v3951_v6 = vld [vmem:[%s5431_s2 + $0x3e8] ss:$16 sps:$4 sm:$0xff]   ;;  %v3956_v7 = vld [vmem:[%s5431_s2 + $0x464] ss:$16 sps:$4 sm:$0xff]  }
  0x7b   : > { %1832 = vmatprep.subr.bf16.mxu1 %v3875_v8  ;;  %1074 = vmatprep.mubr.bf16.mxu1 %v4519_v22  ;;  %v3959_v8 = vld [vmem:[%s5431_s2 + $0x3cc] ss:$16 sps:$4 sm:$0xff]  }
  0x7c   : > { %3241 = vmatprep.mubr.msk.bf16.mxu0 %vm927_vm0, %v4523_v25 }
  0x7d   : > { %1782 = vmatpush1.bf16.msra.mxu0 %v3870_v9  ;;  %v3954_v9 = vld [vmem:[%s5431_s2 + $0x460] ss:$16 sps:$4 sm:$0xff]  }
  0x7e   : > { %1833 = vmatpush1.bf16.msra.mxu1 %v3873_v10  ;;  %1783 = vmatprep.subr.bf16.mxu0 %v3878_v11  ;;  %v3957_v10 = vld [vmem:[%s5431_s2 + $0x3c8] ss:$16 sps:$4 sm:$0xff]   ;;  %v3962_v11 = vld [vmem:[%s5431_s2 + $0x3ac] ss:$16 sps:$4 sm:$0xff]  }
  0x7f   : > { %1834 = vmatprep.subr.bf16.mxu1 %v3881_v12  ;;  %v3965_v12 = vld [vmem:[%s5431_s2 + $0x64c] ss:$16 sps:$4 sm:$0xff]  }
  0x80   : > { %1124 = vmatmul.mubr.bf16.gmra.mxu0 %v4526_v27 }
  0x81   : > { %1075 = vmatmul.mubr.bf16.gmra.mxu1 %v4540_v31  ;;  %1784 = vmatpush1.bf16.msra.mxu0 %v3876_v14  ;;  %v3960_v14 = vld [vmem:[%s5431_s2 + $0x3a8] ss:$16 sps:$4 sm:$0xff]  }
  0x82   : > { %1835 = vmatpush1.bf16.msra.mxu1 %v3879_v15  ;;  %1785 = vmatprep.subr.bf16.mxu0 %v3884_v16  ;;  %v3963_v15 = vld [vmem:[%s5431_s2 + $0x648] ss:$16 sps:$4 sm:$0xff]   ;;  %v3968_v16 = vld [vmem:[%s5431_s2 + $0x38c] ss:$16 sps:$4 sm:$0xff]  }
  0x83   : > { %1836 = vmatprep.subr.bf16.mxu1 %v3887_v17  ;;  %3458 = vmatprep.mubr.msk.bf16.mxu1 %vm927_vm0, %v4382_v36  ;;  %v3971_v17 = vld [vmem:[%s5431_s2 + $0x62c] ss:$16 sps:$4 sm:$0xff]  }
  0x84   : > { %1811 = vmatprep.mubr.bf16.mxu0 %v4440_v58 }
  0x85   : > { %1786 = vmatpush1.bf16.msra.mxu0 %v3882_v18  ;;  %v3966_v18 = vld [vmem:[%s5431_s2 + $0x388] ss:$16 sps:$4 sm:$0xff]  }
  0x86   : > { %1837 = vmatpush1.bf16.msra.mxu1 %v3885_v19  ;;  %1787 = vmatprep.subr.bf16.mxu0 %v3890_v20  ;;  %v3969_v19 = vld [vmem:[%s5431_s2 + $0x628] ss:$16 sps:$4 sm:$0xff]   ;;  %v3974_v20 = vld [vmem:[%s5431_s2 + $0x36c] ss:$16 sps:$4 sm:$0xff]  }
  0x87   : > { %1838 = vmatprep.subr.bf16.mxu1 %v3893_v21  ;;  %v3977_v21 = vld [vmem:[%s5431_s2 + $0x60c] ss:$16 sps:$4 sm:$0xff]  }
  0x89   : > { %1788 = vmatpush1.bf16.msra.mxu0 %v3888_v23  ;;  %v3972_v23 = vld [vmem:[%s5431_s2 + $0x368] ss:$16 sps:$4 sm:$0xff]  }
  0x8a   : > { %1839 = vmatpush1.bf16.msra.mxu1 %v3891_v24  ;;  %1789 = vmatprep.subr.bf16.mxu0 %v3896_v26  ;;  %v3975_v24 = vld [vmem:[%s5431_s2 + $0x608] ss:$16 sps:$4 sm:$0xff]   ;;  %v3980_v26 = vld [vmem:[%s5431_s2 + $0x54c] ss:$16 sps:$4 sm:$0xff]  }
  0x8b   : > { %1840 = vmatprep.subr.bf16.mxu1 %v3899_v28  ;;  %v3983_v28 = vld [vmem:[%s5431_s2 + $0x5ec] ss:$16 sps:$4 sm:$0xff]  }
  0x8d   : > { %1790 = vmatpush1.bf16.msra.mxu0 %v3894_v29  ;;  %v3978_v29 = vld [vmem:[%s5431_s2 + $0x548] ss:$16 sps:$4 sm:$0xff]  }
  0x8e   : > { %1841 = vmatpush1.bf16.msra.mxu1 %v3897_v30  ;;  %1791 = vmatprep.subr.bf16.mxu0 %v3902_v32  ;;  %v3981_v30 = vld [vmem:[%s5431_s2 + $0x5e8] ss:$16 sps:$4 sm:$0xff]   ;;  %v3986_v32 = vld [vmem:[%s5431_s2 + $0x52c] ss:$16 sps:$4 sm:$0xff]  }
  0x8f   : > { %1842 = vmatprep.subr.bf16.mxu1 %v3905_v33  ;;  %v3989_v33 = vld [vmem:[%s5431_s2 + $0x5cc] ss:$16 sps:$4 sm:$0xff]  }
  0x91   : > { %1792 = vmatpush1.bf16.msra.mxu0 %v3900_v34  ;;  %v3984_v34 = vld [vmem:[%s5431_s2 + $0x528] ss:$16 sps:$4 sm:$0xff]  }
  0x92   : > { %1843 = vmatpush1.bf16.msra.mxu1 %v3903_v35  ;;  %1793 = vmatprep.subr.bf16.mxu0 %v3908_v37  ;;  %v3987_v35 = vld [vmem:[%s5431_s2 + $0x5c8] ss:$16 sps:$4 sm:$0xff]   ;;  %v3992_v37 = vld [vmem:[%s5431_s2 + $0x50c] ss:$16 sps:$4 sm:$0xff]  }
  0x93   : > { %1844 = vmatprep.subr.bf16.mxu1 %v3911_v38  ;;  %v3995_v38 = vld [vmem:[%s5431_s2 + $0x5ac] ss:$16 sps:$4 sm:$0xff]  }
  0x95   : > { %1794 = vmatpush1.bf16.msra.mxu0 %v3906_v39  ;;  %v3990_v39 = vld [vmem:[%s5431_s2 + $0x508] ss:$16 sps:$4 sm:$0xff]  }
  0x96   : > { %1845 = vmatpush1.bf16.msra.mxu1 %v3909_v40  ;;  %1795 = vmatprep.subr.bf16.mxu0 %v3914_v41  ;;  %v3993_v40 = vld [vmem:[%s5431_s2 + $0x5a8] ss:$16 sps:$4 sm:$0xff]   ;;  %v3998_v41 = vld [vmem:[%s5431_s2 + $0x4ec] ss:$16 sps:$4 sm:$0xff]  }
  0x97   : > { %1856 = vmatprep.subr.bf16.mxu1 %v3917_v42  ;;  %v4001_v42 = vld [vmem:[%s5431_s2 + $0x58c] ss:$16 sps:$4 sm:$0xff]  }
  0x99   : > { %1796 = vmatpush2.bf16.msra.mxu0 %v3912_v43  ;;  %v3996_v43 = vld [vmem:[%s5431_s2 + $0x4e8] ss:$16 sps:$4 sm:$0xff]  }
  0x9a   : > { %1857 = vmatpush2.bf16.msra.mxu1 %v3915_v44  ;;  %1797 = vmatprep.subr.bf16.mxu0 %v3920_v45  ;;  %v3999_v44 = vld [vmem:[%s5431_s2 + $0x588] ss:$16 sps:$4 sm:$0xff]   ;;  %v4004_v45 = vld [vmem:[%s5431_s2 + $0x4cc] ss:$16 sps:$4 sm:$0xff]  }
  0x9b   : > { %1858 = vmatprep.subr.bf16.mxu1 %v3923_v46  ;;  %v4007_v46 = vld [vmem:[%s5431_s2 + $0x56c] ss:$16 sps:$4 sm:$0xff]  }
  0x9d   : > { %1798 = vmatpush2.bf16.msra.mxu0 %v3918_v47  ;;  %v4002_v47 = vld [vmem:[%s5431_s2 + $0x4c8] ss:$16 sps:$4 sm:$0xff]  }
  0x9e   : > { %1859 = vmatpush2.bf16.msra.mxu1 %v3921_v48  ;;  %1799 = vmatprep.subr.bf16.mxu0 %v3926_v49  ;;  %v4005_v48 = vld [vmem:[%s5431_s2 + $0x568] ss:$16 sps:$4 sm:$0xff]   ;;  %v4010_v49 = vld [vmem:[%s5431_s2 + $0x4ac] ss:$16 sps:$4 sm:$0xff]  }
  0x9f   : > { %1860 = vmatprep.subr.bf16.mxu1 %v3929_v50  ;;  %v4013_v50 = vld [vmem:[%s5431_s2 + $0x6ac] ss:$16 sps:$4 sm:$0xff]  }
  0xa1   : > { %1800 = vmatpush2.bf16.msra.mxu0 %v3924_v52  ;;  %v4008_v52 = vld [vmem:[%s5431_s2 + $0x4a8] ss:$16 sps:$4 sm:$0xff]  }
  0xa2   : > { %1861 = vmatpush2.bf16.msra.mxu1 %v3927_v53  ;;  %1801 = vmatprep.subr.bf16.mxu0 %v3932_v54  ;;  %v4011_v53 = vld [vmem:[%s5431_s2 + $0x6a8] ss:$16 sps:$4 sm:$0xff]   ;;  %v4016_v54 = vld [vmem:[%s5431_s2 + $0x48c] ss:$16 sps:$4 sm:$0xff]  }
  0xa3   : > { %1881 = vmatprep.subr.bf16.mxu1 %v3935_v55  ;;  %v4019_v55 = vld [vmem:[%s5431_s2 + $0x68c] ss:$16 sps:$4 sm:$0xff]  }
  0xa5   : > { %1863 = vmatmul.mubr.bf16.vlgmr.msra.gmra.mxu1 %v4424_v51  ;;  %1802 = vmatpush2.bf16.msra.mxu0 %v3930_v56  ;;  %v4014_v56 = vld [vmem:[%s5431_s2 + $0x488] ss:$16 sps:$4 sm:$0xff]  }
  0xa6   : > { %1882 = vmatpush1.bf16.msra.mxu1 %v3933_v57  ;;  %1803 = vmatprep.subr.bf16.mxu0 %v3938_v59  ;;  %v4017_v57 = vld [vmem:[%s5431_s2 + $0x688] ss:$16 sps:$4 sm:$0xff]   ;;  %v4022_v59 = vld [vmem:[%s5431_s2 + $0x46c] ss:$16 sps:$4 sm:$0xff]  }
  0xa7   : > { %1883 = vmatprep.subr.bf16.mxu1 %v3941_v60  ;;  %3459 = vmatprep.mubr.msk.bf16.mxu1 %vm927_vm0, %v4523_v25  ;;  %v4025_v60 = vld [vmem:[%s5431_s2 + $0x66c] ss:$16 sps:$4 sm:$0xff]  }
  0xa9   : > { %1804 = vmatpush2.bf16.msra.mxu0 %v3936_v61  ;;  %v4020_v61 = vld [vmem:[%s5431_s2 + $0x468] ss:$16 sps:$4 sm:$0xff]  }
  0xaa   : > { %1884 = vmatpush1.bf16.msra.mxu1 %v3939_v62  ;;  %1805 = vmatprep.subr.bf16.mxu0 %v3944_v63  ;;  %v4023_v62 = vld [vmem:[%s5431_s2 + $0x668] ss:$16 sps:$4 sm:$0xff]   ;;  %v4028_v63 = vld [vmem:[%s5431_s2 + $0x7a4] ss:$16 sps:$4 sm:$0xff]  }
  0xab   : > { %1885 = vmatprep.subr.bf16.mxu1 %v3947_v0  ;;  %v4031_v0 = vld [vmem:[%s5431_s2 + $0x9a4] ss:$16 sps:$4 sm:$0xff]  }
  0xad   : > { %1873 = vmatmul.mubr.bf16.gmra.mxu1 %v4526_v27  ;;  %1806 = vmatpush2.bf16.msra.mxu0 %v3942_v1  ;;  %v4026_v1 = vld [vmem:[%s5431_s2 + $0x7a0] ss:$16 sps:$4 sm:$0xff]  }
  0xae   : > { %1886 = vmatpush1.bf16.msra.mxu1 %v3945_v2  ;;  %1807 = vmatprep.subr.bf16.mxu0 %v3950_v3  ;;  %v4029_v2 = vld [vmem:[%s5431_s2 + $0x9a0] ss:$16 sps:$4 sm:$0xff]   ;;  %v4034_v3 = vld [vmem:[%s5431_s2 + $0x784] ss:$16 sps:$4 sm:$0xff]  }
  0xaf   : > { %1887 = vmatprep.subr.bf16.mxu1 %v3953_v4  ;;  %1913 = vmatprep.mubr.bf16.mxu1 %v4440_v58  ;;  %v4037_v4 = vld [vmem:[%s5431_s2 + $0x984] ss:$16 sps:$4 sm:$0xff]  }
  0xb1   : > { %1808 = vmatpush2.bf16.msra.mxu0 %v3948_v5  ;;  %v4032_v5 = vld [vmem:[%s5431_s2 + $0x780] ss:$16 sps:$4 sm:$0xff]  }
  0xb2   : > { %1888 = vmatpush1.bf16.msra.mxu1 %v3951_v6  ;;  %1809 = vmatprep.subr.bf16.mxu0 %v3956_v7  ;;  %v4035_v6 = vld [vmem:[%s5431_s2 + $0x980] ss:$16 sps:$4 sm:$0xff]   ;;  %v4040_v7 = vld [vmem:[%s5431_s2 + $0x764] ss:$16 sps:$4 sm:$0xff]  }
  0xb3   : > { %1889 = vmatprep.subr.bf16.mxu1 %v3959_v8  ;;  %v4043_v8 = vld [vmem:[%s5431_s2 + $0x964] ss:$16 sps:$4 sm:$0xff]  }
  0xb5   : > { %1810 = vmatpush2.bf16.msra.mxu0 %v3954_v9  ;;  %v4038_v9 = vld [vmem:[%s5431_s2 + $0x760] ss:$16 sps:$4 sm:$0xff]  }
  0xb6   : > { %1890 = vmatpush1.bf16.msra.mxu1 %v3957_v10  ;;  %1932 = vmatprep.subr.bf16.mxu0 %v3965_v12  ;;  %v4041_v10 = vld [vmem:[%s5431_s2 + $0x960] ss:$16 sps:$4 sm:$0xff]   ;;  %v4049_v12 = vld [vmem:[%s5431_s2 + $0x944] ss:$16 sps:$4 sm:$0xff]  }
  0xb7   : > { %1891 = vmatprep.subr.bf16.mxu1 %v3962_v11  ;;  %v4046_v11 = vld [vmem:[%s5431_s2 + $0x744] ss:$16 sps:$4 sm:$0xff]  }
  0xb8   : > { %1812 = vmatmul.mubr.bf16.vlgmr.msra.gmra.mxu0 %v4494_v13 }
  0xb9   : > { %1933 = vmatpush1.bf16.msra.mxu0 %v3963_v15  ;;  %1821 = vmatprep.mubr.bf16.mxu0 %v4519_v22  ;;  %v4047_v15 = vld [vmem:[%s5431_s2 + $0x940] ss:$16 sps:$4 sm:$0xff]  }
  0xba   : > { %1892 = vmatpush1.bf16.msra.mxu1 %v3960_v14  ;;  %1934 = vmatprep.subr.bf16.mxu0 %v3971_v17  ;;  %v4044_v14 = vld [vmem:[%s5431_s2 + $0x740] ss:$16 sps:$4 sm:$0xff]   ;;  %v4055_v17 = vld [vmem:[%s5431_s2 + $0x924] ss:$16 sps:$4 sm:$0xff]  }
  0xbb   : > { %1893 = vmatprep.subr.bf16.mxu1 %v3968_v16  ;;  %v4052_v16 = vld [vmem:[%s5431_s2 + $0x724] ss:$16 sps:$4 sm:$0xff]  }
  0xbd   : > { %1935 = vmatpush1.bf16.msra.mxu0 %v3969_v19  ;;  %v4053_v19 = vld [vmem:[%s5431_s2 + $0x920] ss:$16 sps:$4 sm:$0xff]  }
  0xbe   : > { %1894 = vmatpush1.bf16.msra.mxu1 %v3966_v18  ;;  %1936 = vmatprep.subr.bf16.mxu0 %v3977_v21  ;;  %v4050_v18 = vld [vmem:[%s5431_s2 + $0x720] ss:$16 sps:$4 sm:$0xff]   ;;  %v4061_v21 = vld [vmem:[%s5431_s2 + $0x904] ss:$16 sps:$4 sm:$0xff]  }
  0xbf   : > { %1895 = vmatprep.subr.bf16.mxu1 %v3974_v20  ;;  %v4058_v20 = vld [vmem:[%s5431_s2 + $0x704] ss:$16 sps:$4 sm:$0xff]  }
  0xc0   : > { %1822 = vmatmul.mubr.bf16.gmra.mxu0 %v4540_v31 }
  0xc1   : > { %1937 = vmatpush1.bf16.msra.mxu0 %v3975_v24  ;;  %3460 = vmatprep.mubr.msk.bf16.mxu0 %vm927_vm0, %v4382_v36  ;;  %v4059_v24 = vld [vmem:[%s5431_s2 + $0x900] ss:$16 sps:$4 sm:$0xff]  }
  0xc2   : > { %1896 = vmatpush1.bf16.msra.mxu1 %v3972_v23  ;;  %1938 = vmatprep.subr.bf16.mxu0 %v3983_v28  ;;  %v4056_v23 = vld [vmem:[%s5431_s2 + $0x700] ss:$16 sps:$4 sm:$0xff]   ;;  %v4067_v28 = vld [vmem:[%s5431_s2 + $0x8e4] ss:$16 sps:$4 sm:$0xff]  }
  0xc3   : > { %1897 = vmatprep.subr.bf16.mxu1 %v3980_v26  ;;  %v4064_v26 = vld [vmem:[%s5431_s2 + $0x6e4] ss:$16 sps:$4 sm:$0xff]  }
  0xc5   : > { %1939 = vmatpush1.bf16.msra.mxu0 %v3981_v30  ;;  %v4065_v30 = vld [vmem:[%s5431_s2 + $0x8e0] ss:$16 sps:$4 sm:$0xff]  }
  0xc6   : > { %1898 = vmatpush2.bf16.msra.mxu1 %v3978_v29  ;;  %1940 = vmatprep.subr.bf16.mxu0 %v3989_v33  ;;  %v4062_v29 = vld [vmem:[%s5431_s2 + $0x6e0] ss:$16 sps:$4 sm:$0xff]   ;;  %v4073_v33 = vld [vmem:[%s5431_s2 + $0x8c4] ss:$16 sps:$4 sm:$0xff]  }
  0xc7   : > { %1899 = vmatprep.subr.bf16.mxu1 %v3986_v32  ;;  %v4070_v32 = vld [vmem:[%s5431_s2 + $0x6c4] ss:$16 sps:$4 sm:$0xff]  }
  0xc9   : > { %1941 = vmatpush1.bf16.msra.mxu0 %v3987_v35  ;;  %v4071_v35 = vld [vmem:[%s5431_s2 + $0x8c0] ss:$16 sps:$4 sm:$0xff]  }
  0xca   : > { %1900 = vmatpush2.bf16.msra.mxu1 %v3984_v34  ;;  %1942 = vmatprep.subr.bf16.mxu0 %v3995_v38  ;;  %v4068_v34 = vld [vmem:[%s5431_s2 + $0x6c0] ss:$16 sps:$4 sm:$0xff]   ;;  %v4079_v38 = vld [vmem:[%s5431_s2 + $0xa04] ss:$16 sps:$4 sm:$0xff]  }
  0xcb   : > { %1901 = vmatprep.subr.bf16.mxu1 %v3992_v37  ;;  %v4076_v37 = vld [vmem:[%s5431_s2 + $0x8a4] ss:$16 sps:$4 sm:$0xff]  }
  0xcd   : > { %1943 = vmatpush1.bf16.msra.mxu0 %v3993_v40  ;;  %v4077_v40 = vld [vmem:[%s5431_s2 + $0xa00] ss:$16 sps:$4 sm:$0xff]  }
  0xce   : > { %1902 = vmatpush2.bf16.msra.mxu1 %v3990_v39  ;;  %1944 = vmatprep.subr.bf16.mxu0 %v4001_v42  ;;  %v4074_v39 = vld [vmem:[%s5431_s2 + $0x8a0] ss:$16 sps:$4 sm:$0xff]   ;;  %v4082_v42 = vld [vmem:[%s5431_s2 + $0x884] ss:$16 sps:$4 sm:$0xff]  }
  0xcf   : > { %1903 = vmatprep.subr.bf16.mxu1 %v3998_v41 }
  0xd1   : > { %1945 = vmatpush1.bf16.msra.mxu0 %v3999_v44  ;;  %v4080_v44 = vld [vmem:[%s5431_s2 + $0x880] ss:$16 sps:$4 sm:$0xff]  }
  0xd2   : > { %1904 = vmatpush2.bf16.msra.mxu1 %v3996_v43  ;;  %1946 = vmatprep.subr.bf16.mxu0 %v4007_v46  ;;  %v4085_v43 = vld [vmem:[%s5431_s2 + $0x9e4] ss:$16 sps:$4 sm:$0xff]  }
  0xd3   : > { %1905 = vmatprep.subr.bf16.mxu1 %v4004_v45  ;;  %v4083_v45 = vld [vmem:[%s5431_s2 + $0x9e0] ss:$16 sps:$4 sm:$0xff]  }
  0xd5   : > { %1947 = vmatpush1.bf16.msra.mxu0 %v4005_v48  ;;  %v4091_v48 = vld [vmem:[%s5431_s2 + $0x9c4] ss:$16 sps:$4 sm:$0xff]  }
  0xd6   : > { %1906 = vmatpush2.bf16.msra.mxu1 %v4002_v47  ;;  %1958 = vmatprep.subr.bf16.mxu0 %v4013_v50  ;;  %v4088_v47 = vld [vmem:[%s5431_s2 + $0x864] ss:$16 sps:$4 sm:$0xff]   ;;  %v4089_v50 = vld [vmem:[%s5431_s2 + $0x9c0] ss:$16 sps:$4 sm:$0xff]  }
  0xd7   : > { %1907 = vmatprep.subr.bf16.mxu1 %v4010_v49  ;;  %v4086_v49 = vld [vmem:[%s5431_s2 + $0x860] ss:$16 sps:$4 sm:$0xff]  }
  0xd9   : > { %1959 = vmatpush2.bf16.msra.mxu0 %v4011_v53  ;;  %v4094_v53 = vld [vmem:[%s5431_s2 + $0x844] ss:$16 sps:$4 sm:$0xff]  }
  0xda   : > { %1908 = vmatpush2.bf16.msra.mxu1 %v4008_v52  ;;  %1960 = vmatprep.subr.bf16.mxu0 %v4019_v55 }
  0xdb   : > { %1909 = vmatprep.subr.bf16.mxu1 %v4016_v54  ;;  %v4097_v54 = vld [vmem:[%s5431_s2 + $0x7ac] ss:$16 sps:$4 sm:$0xff]  }
  0xdd   : > { %1961 = vmatpush2.bf16.msra.mxu0 %v4017_v57  ;;  %v4092_v57 = vld [vmem:[%s5431_s2 + $0x840] ss:$16 sps:$4 sm:$0xff]  }
  0xde   : > { %1910 = vmatpush2.bf16.msra.mxu1 %v4014_v56  ;;  %1962 = vmatprep.subr.bf16.mxu0 %v4025_v60 }
  0xdf   : > { %1911 = vmatprep.subr.bf16.mxu1 %v4022_v59  ;;  %v4095_v59 = vld [vmem:[%s5431_s2 + $0x7a8] ss:$16 sps:$4 sm:$0xff]  }
  0xe1   : > { %1963 = vmatpush2.bf16.msra.mxu0 %v4023_v62  ;;  %v4100_v62 = vld [vmem:[%s5431_s2 + $0x824] ss:$16 sps:$4 sm:$0xff]  }
  0xe2   : > { %1912 = vmatpush2.bf16.msra.mxu1 %v4020_v61  ;;  %2681 = vmatprep.subr.bf16.mxu0 %v4028_v63  ;;  %v4103_v63 = vld [vmem:[%s5431_s2 + $0x78c] ss:$16 sps:$4 sm:$0xff]  }
  0xe3   : > { %2732 = vmatprep.subr.bf16.mxu1 %v4031_v0 }
  0xe4   : > { %1965 = vmatmul.mubr.bf16.vlgmr.msra.gmra.mxu0 %v4424_v51 }
  0xe5   : > { %1914 = vmatmul.mubr.bf16.vlgmr.msra.gmra.mxu1 %v4494_v13  ;;  %2682 = vmatpush1.bf16.msra.mxu0 %v4026_v1 }
  0xe6   : > { %2733 = vmatpush1.bf16.msra.mxu1 %v4029_v2  ;;  %2683 = vmatprep.subr.bf16.mxu0 %v4034_v3 }
  0xe7   : > { %2734 = vmatprep.subr.bf16.mxu1 %v4037_v4  ;;  %1923 = vmatprep.mubr.bf16.mxu1 %v4519_v22  ;;  %v4098_v4 = vld [vmem:[%s5431_s2 + $0x820] ss:$16 sps:$4 sm:$0xff]  }
  0xe8   : > { %3461 = vmatprep.mubr.msk.bf16.mxu0 %vm927_vm0, %v4523_v25 }
  0xe9   : > { %2684 = vmatpush1.bf16.msra.mxu0 %v4032_v5  ;;  %v4101_v5 = vld [vmem:[%s5431_s2 + $0x788] ss:$16 sps:$4 sm:$0xff]  }
  0xea   : > { %2735 = vmatpush1.bf16.msra.mxu1 %v4035_v6  ;;  %2685 = vmatprep.subr.bf16.mxu0 %v4040_v7  ;;  %v4106_v7 = vld [vmem:[%s5431_s2 + $0x804] ss:$16 sps:$4 sm:$0xff]  }
  0xeb   : > { %2736 = vmatprep.subr.bf16.mxu1 %v4043_v8  ;;  %v4109_v8 = vld [vmem:[%s5431_s2 + $0x76c] ss:$16 sps:$4 sm:$0xff]  }
  0xec   : > { %1975 = vmatmul.mubr.bf16.gmra.mxu0 %v4526_v27 }
  0xed   : > { %1924 = vmatmul.mubr.bf16.gmra.mxu1 %v4540_v31  ;;  %2686 = vmatpush1.bf16.msra.mxu0 %v4038_v9 }
  0xee   : > { %2737 = vmatpush1.bf16.msra.mxu1 %v4041_v10  ;;  %2687 = vmatprep.subr.bf16.mxu0 %v4046_v11 }
  0xef   : > { %2738 = vmatprep.subr.bf16.mxu1 %v4049_v12  ;;  %3678 = vmatprep.mubr.msk.bf16.mxu1 %vm927_vm0, %v4382_v36 }
  0xf0   : > { %2713 = vmatprep.mubr.bf16.mxu0 %v4440_v58 }
  0xf1   : > { %2688 = vmatpush1.bf16.msra.mxu0 %v4044_v14  ;;  %v4104_v14 = vld [vmem:[%s5431_s2 + $0x800] ss:$16 sps:$4 sm:$0xff]  }
  0xf2   : > { %2739 = vmatpush1.bf16.msra.mxu1 %v4047_v15  ;;  %2689 = vmatprep.subr.bf16.mxu0 %v4052_v16  ;;  %v4107_v15 = vld [vmem:[%s5431_s2 + $0x768] ss:$16 sps:$4 sm:$0xff]   ;;  %v4112_v16 = vld [vmem:[%s5431_s2 + $0x7e4] ss:$16 sps:$4 sm:$0xff]  }
  0xf3   : > { %2740 = vmatprep.subr.bf16.mxu1 %v4055_v17  ;;  %v4115_v17 = vld [vmem:[%s5431_s2 + $0x74c] ss:$16 sps:$4 sm:$0xff]  }
  0xf5   : > { %2690 = vmatpush1.bf16.msra.mxu0 %v4050_v18 }
  0xf6   : > { %2741 = vmatpush1.bf16.msra.mxu1 %v4053_v19  ;;  %2691 = vmatprep.subr.bf16.mxu0 %v4058_v20 }
  0xf7   : > { %2742 = vmatprep.subr.bf16.mxu1 %v4061_v21  ;;  %v4110_v21 = vld [vmem:[%s5431_s2 + $0x7e0] ss:$16 sps:$4 sm:$0xff]  }
  0xf9   : > { %2692 = vmatpush1.bf16.msra.mxu0 %v4056_v23  ;;  %v1017_v41 = vpop.f32.mrf.mxu1  ;;  %v4113_v23 = vld [vmem:[%s5431_s2 + $0x748] ss:$16 sps:$4 sm:$0xff]  }
  0xfa   : > { %2743 = vmatpush1.bf16.msra.mxu1 %v4059_v24  ;;  %2693 = vmatprep.subr.bf16.mxu0 %v4064_v26  ;;  %v4118_v24 = vld [vmem:[%s5431_s2 + $0x7c4] ss:$16 sps:$4 sm:$0xff]   ;;  %v4121_v26 = vld [vmem:[%s5431_s2 + $0x72c] ss:$16 sps:$4 sm:$0xff]  }
  0xfb   : > { %2744 = vmatprep.subr.bf16.mxu1 %v4067_v28  ;;  %v1019_v46 = vpop.f32.mrf.mxu1 }
  0xfd   : > { %2694 = vmatpush1.bf16.msra.mxu0 %v4062_v29  ;;  %v1021_v52 = vpop.f32.mrf.mxu1  ;;  %v4116_v29 = vld [vmem:[%s5431_s2 + $0x7c0] ss:$16 sps:$4 sm:$0xff]  }
  0xfe   : > { %2745 = vmatpush1.bf16.msra.mxu1 %v4065_v30  ;;  %2695 = vmatprep.subr.bf16.mxu0 %v4070_v32  ;;  %v4119_v30 = vld [vmem:[%s5431_s2 + $0x728] ss:$16 sps:$4 sm:$0xff]   ;;  %v4124_v32 = vld [vmem:[%s5431_s2 + $0x70c] ss:$16 sps:$4 sm:$0xff]  }
  0xff   : > { %2746 = vmatprep.subr.bf16.mxu1 %v4073_v33  ;;  %v1023_v60 = vpop.f32.mrf.mxu1  ;;  %v4122_v33 = vld [vmem:[%s5431_s2 + $0x708] ss:$16 sps:$4 sm:$0xff]  }
 0x101   : > { %2696 = vmatpush1.bf16.msra.mxu0 %v4068_v34  ;;  %v1027_v2 = vpop.f32.mrf.mxu1  ;;  %v4125_v34 = vld [vmem:[%s5431_s2 + $0x9a8] ss:$16 sps:$4 sm:$0xff]  }
 0x102   : > { %2747 = vmatpush1.bf16.msra.mxu1 %v4071_v35  ;;  %2697 = vmatprep.subr.bf16.mxu0 %v4076_v37  ;;  %v4130_v35 = vld [vmem:[%s5431_s2 + $0x6ec] ss:$16 sps:$4 sm:$0xff]  }
 0x103   : > { %2758 = vmatprep.subr.bf16.mxu1 %v4079_v38  ;;  %v1028_v9 = vpop.f32.mrf.mxu1  ;;  %v4133_v37 = vld [vmem:[%s5431_s2 + $0x98c] ss:$16 sps:$4 sm:$0xff]   ;;  %v4128_v38 = vld [vmem:[%s5431_s2 + $0x6e8] ss:$16 sps:$4 sm:$0xff]  }
 0x105   : > { %2698 = vmatpush2.bf16.msra.mxu0 %v4074_v39  ;;  %v1029_v12 = vpop.f32.mrf.mxu1  ;;  %v4131_v39 = vld [vmem:[%s5431_s2 + $0x988] ss:$16 sps:$4 sm:$0xff]  }
 0x106   : > { %2759 = vmatpush2.bf16.msra.mxu1 %v4077_v40  ;;  %2699 = vmatprep.subr.bf16.mxu0 %v4082_v42  ;;  %v4136_v40 = vld [vmem:[%s5431_s2 + $0x6cc] ss:$16 sps:$4 sm:$0xff]   ;;  %v4134_v42 = vld [vmem:[%s5431_s2 + $0x6c8] ss:$16 sps:$4 sm:$0xff]  }
 0x107   : > { %2760 = vmatprep.subr.bf16.mxu1 %v4085_v43  ;;  %v1030_v19 = vpop.f32.mrf.mxu1  ;;  %v4137_v43 = vld [vmem:[%s5431_s2 + $0x968] ss:$16 sps:$4 sm:$0xff]  }
 0x108   : > { %v4164_v12 = vld [vmem:[%s5431_s2 + $0x828] ss:$16 sps:$4 sm:$0xff]  }
 0x109   : > { %2700 = vmatpush2.bf16.msra.mxu0 %v4080_v44  ;;  %v4142_v44 = vld [vmem:[%s5431_s2 + $0x8ac] ss:$16 sps:$4 sm:$0xff]  }
 0x10a   : > { %2761 = vmatpush2.bf16.msra.mxu1 %v4083_v45  ;;  %2701 = vmatprep.subr.bf16.mxu0 %v4088_v47  ;;  %v4145_v45 = vld [vmem:[%s5431_s2 + $0x94c] ss:$16 sps:$4 sm:$0xff]   ;;  %v4143_v47 = vld [vmem:[%s5431_s2 + $0x948] ss:$16 sps:$4 sm:$0xff]  }
 0x10b   : > { %2762 = vmatprep.subr.bf16.mxu1 %v4091_v48  ;;  %v4148_v48 = vld [vmem:[%s5431_s2 + $0x88c] ss:$16 sps:$4 sm:$0xff]  }
 0x10c   : > { %v968_v55 = vpop.f32.mrf.mxu0 }
 0x10d   : > { %v5135_v56 = vadd.f32 %v1017_v41, %v968_v55  ;;  %2702 = vmatpush2.bf16.msra.mxu0 %v4086_v49  ;;  %v4139_v41 = vld [vmem:[%s5431_s2 + $0x96c] ss:$16 sps:$4 sm:$0xff]   ;;  %v4155_v55 = vld [vmem:[%s5431_s2 + $0x908] ss:$16 sps:$4 sm:$0xff]  }
 0x10e   : > { %2763 = vmatpush2.bf16.msra.mxu1 %v4089_v50  ;;  %v970_v61 = vpop.f32.mrf.mxu0  ;;  %2703 = vmatprep.subr.bf16.mxu0 %v4094_v53  ;;  %v4151_v49 = vld [vmem:[%s5431_s2 + $0x92c] ss:$16 sps:$4 sm:$0xff]   ;;  %v4146_v50 = vld [vmem:[%s5431_s2 + $0x888] ss:$16 sps:$4 sm:$0xff]  }
 0x10f   : > { %2783 = vmatprep.subr.bf16.mxu1 %v4097_v54  ;;  %v5149_v0 = vadd.f32 %v1019_v46, %v970_v61  ;;  %v4140_v46 = vld [vmem:[%s5431_s2 + $0x8a8] ss:$16 sps:$4 sm:$0xff]   ;;  %v4154_v53 = vld [vmem:[%s5431_s2 + $0x86c] ss:$16 sps:$4 sm:$0xff]  }
 0x110   : > { %v972_v1 = vpop.f32.mrf.mxu0  ;;  %v4152_v54 = vld [vmem:[%s5431_s2 + $0x868] ss:$16 sps:$4 sm:$0xff]  }
 0x111   : > { %2765 = vmatmul.mubr.bf16.vlgmr.msra.gmra.mxu1 %v4424_v51  ;;  %v5152_v3 = vadd.f32 %v1021_v52, %v972_v1  ;;  %2704 = vmatpush2.bf16.msra.mxu0 %v4092_v57  ;;  %v4149_v52 = vld [vmem:[%s5431_s2 + $0x928] ss:$16 sps:$4 sm:$0xff]   ;;  %v4160_v57 = vld [vmem:[%s5431_s2 + $0x84c] ss:$16 sps:$4 sm:$0xff]  }
 0x112   : > { %2784 = vmatpush1.bf16.msra.mxu1 %v4095_v59  ;;  %v974_v6 = vpop.f32.mrf.mxu0  ;;  %2705 = vmatprep.subr.bf16.mxu0 %v4100_v62  ;;  %v4163_v59 = vld [vmem:[%s5431_s2 + $0x8ec] ss:$16 sps:$4 sm:$0xff]   ;;  %v4161_v1 = vld [vmem:[%s5431_s2 + $0x8e8] ss:$16 sps:$4 sm:$0xff]  }
 0x113   : > { %2785 = vmatprep.subr.bf16.mxu1 %v4103_v63  ;;  %v5166_v10 = vadd.f32 %v1023_v60, %v974_v6  ;;  %3679 = vmatprep.mubr.msk.bf16.mxu1 %vm927_vm0, %v4523_v25  ;;  %v4158_v63 = vld [vmem:[%s5431_s2 + $0x848] ss:$16 sps:$4 sm:$0xff]   ;;  %v4169_v6 = vld [vmem:[%s5431_s2 + $0x8cc] ss:$16 sps:$4 sm:$0xff]  }
 0x114   : > { %v978_v11 = vpop.f32.mrf.mxu0 }
 0x115   : > { %2706 = vmatpush2.bf16.msra.mxu0 %v4098_v4 }
 0x116   : > { %2786 = vmatpush1.bf16.msra.mxu1 %v4101_v5  ;;  %2707 = vmatprep.subr.bf16.mxu0 %v4106_v7  ;;  %v979_v18 = vpop.f32.mrf.mxu0  ;;  %v4166_v5 = vld [vmem:[%s5431_s2 + $0x82c] ss:$16 sps:$4 sm:$0xff]  }
 0x117   : > { %2787 = vmatprep.subr.bf16.mxu1 %v4109_v8  ;;  %v4175_v18 = vld [vmem:[%s5431_s2 + $0xa0c] ss:$16 sps:$4 sm:$0xff]  }
 0x118   : > { %v980_v20 = vpop.f32.mrf.mxu0 }
 0x119   : > { %2775 = vmatmul.mubr.bf16.gmra.mxu1 %v4526_v27  ;;  %2708 = vmatpush2.bf16.msra.mxu0 %v4104_v14  ;;  %v4167_v14 = vld [vmem:[%s5431_s2 + $0x8c8] ss:$16 sps:$4 sm:$0xff]  }
 0x11a   : > { %2788 = vmatpush1.bf16.msra.mxu1 %v4107_v15  ;;  %2709 = vmatprep.subr.bf16.mxu0 %v4112_v16  ;;  %v981_v28 = vpop.f32.mrf.mxu0 }
 0x11b   : > { %2789 = vmatprep.subr.bf16.mxu1 %v4115_v17  ;;  %2815 = vmatprep.mubr.bf16.mxu1 %v4440_v58  ;;  %v4127_v58 = vld [vmem:[%s5431_s2 + $0x9ac] ss:$16 sps:$4 sm:$0xff]  }
 0x11c   : > { %v4172_v17 = vld [vmem:[%s5431_s2 + $0x80c] ss:$16 sps:$4 sm:$0xff]  }
 0x11d   : > { %2710 = vmatpush2.bf16.msra.mxu0 %v4110_v21  ;;  %v4181_v28 = vld [vmem:[%s5431_s2 + $0x9ec] ss:$16 sps:$4 sm:$0xff]  }
 0x11e   : > { %2790 = vmatpush1.bf16.msra.mxu1 %v4113_v23  ;;  %2711 = vmatprep.subr.bf16.mxu0 %v4118_v24  ;;  %v4170_v23 = vld [vmem:[%s5431_s2 + $0x808] ss:$16 sps:$4 sm:$0xff]  }
 0x11f   : > { %2791 = vmatprep.subr.bf16.mxu1 %v4121_v26  ;;  %v4173_v24 = vld [vmem:[%s5431_s2 + $0xa08] ss:$16 sps:$4 sm:$0xff]   ;;  %v4178_v26 = vld [vmem:[%s5431_s2 + $0x7ec] ss:$16 sps:$4 sm:$0xff]  }
 0x121   : > { %2712 = vmatpush2.bf16.msra.mxu0 %v4116_v29 }
 0x122   : > { %2792 = vmatpush1.bf16.msra.mxu1 %v4119_v30  ;;  %2834 = vmatprep.subr.bf16.mxu0 %v4127_v58 }
 0x123   : > { %2793 = vmatprep.subr.bf16.mxu1 %v4124_v32 }
 0x124   : > { %2714 = vmatmul.mubr.bf16.vlgmr.msra.gmra.mxu0 %v4494_v13 }
 0x125   : > { %2835 = vmatpush1.bf16.msra.mxu0 %v4125_v34  ;;  %2723 = vmatprep.mubr.bf16.mxu0 %v4519_v22  ;;  %v4179_v34 = vld [vmem:[%s5431_s2 + $0x9e8] ss:$16 sps:$4 sm:$0xff]  }
 0x126   : > { %2794 = vmatpush1.bf16.msra.mxu1 %v4122_v33  ;;  %2836 = vmatprep.subr.bf16.mxu0 %v4133_v37  ;;  %v4176_v33 = vld [vmem:[%s5431_s2 + $0x7e8] ss:$16 sps:$4 sm:$0xff]   ;;  %v4187_v37 = vld [vmem:[%s5431_s2 + $0x9cc] ss:$16 sps:$4 sm:$0xff]  }
 0x127   : > { %2795 = vmatprep.subr.bf16.mxu1 %v4130_v35  ;;  %v4184_v35 = vld [vmem:[%s5431_s2 + $0x7cc] ss:$16 sps:$4 sm:$0xff]  }
 0x129   : > { %2837 = vmatpush1.bf16.msra.mxu0 %v4131_v39 }
 0x12a   : > { %2796 = vmatpush1.bf16.msra.mxu1 %v4128_v38  ;;  %2838 = vmatprep.subr.bf16.mxu0 %v4139_v41  ;;  %v4185_v41 = vld [vmem:[%s5431_s2 + $0x9c8] ss:$16 sps:$4 sm:$0xff]  }
 0x12b   : > { %2797 = vmatprep.subr.bf16.mxu1 %v4136_v40  ;;  %v4182_v40 = vld [vmem:[%s5431_s2 + $0x7c8] ss:$16 sps:$4 sm:$0xff]  }
 0x12c   : > { %2724 = vmatmul.mubr.bf16.gmra.mxu0 %v4540_v31 }
 0x12d   : > { %2839 = vmatpush1.bf16.msra.mxu0 %v4137_v43  ;;  %3680 = vmatprep.mubr.msk.bf16.mxu0 %vm927_vm0, %v4382_v36  ;;  %v4157_v36 = vld [vmem:[%s5431_s2 + $0x90c] ss:$16 sps:$4 sm:$0xff]  }
 0x12e   : > { %2798 = vmatpush1.bf16.msra.mxu1 %v4134_v42  ;;  %2840 = vmatprep.subr.bf16.mxu0 %v4145_v45 }
 0x12f   : > { %2799 = vmatprep.subr.bf16.mxu1 %v4142_v44 }
 0x131   : > { %2841 = vmatpush1.bf16.msra.mxu0 %v4143_v47 }
 0x132   : > { %2800 = vmatpush2.bf16.msra.mxu1 %v4140_v46  ;;  %2842 = vmatprep.subr.bf16.mxu0 %v4151_v49 }
 0x133   : > { %2801 = vmatprep.subr.bf16.mxu1 %v4148_v48 }
 0x135   : > { %2843 = vmatpush1.bf16.msra.mxu0 %v4149_v52 }
 0x136   : > { %2802 = vmatpush2.bf16.msra.mxu1 %v4146_v50  ;;  %2844 = vmatprep.subr.bf16.mxu0 %v4157_v36 }
 0x137   : > { %2803 = vmatprep.subr.bf16.mxu1 %v4154_v53 }
 0x138   : > { %v1115_v61 = vpop.f32.mrf.mxu0 }
 0x139   : > { %v1066_v60 = vpop.f32.mrf.mxu1  ;;  %2845 = vmatpush1.bf16.msra.mxu0 %v4155_v55 }
 0x13a   : > { %v5285_v62 = vadd.f32 %v1115_v61, %v1066_v60  ;;  %2804 = vmatpush2.bf16.msra.mxu1 %v4152_v54  ;;  %v1117_v4 = vpop.f32.mrf.mxu0  ;;  %2846 = vmatprep.subr.bf16.mxu0 %v4163_v59 }
 0x13b   : > { %v1068_v2 = vpop.f32.mrf.mxu1  ;;  %2805 = vmatprep.subr.bf16.mxu1 %v4160_v57 }
 0x13c   : > { %v5299_v7 = vadd.f32 %v1117_v4, %v1068_v2  ;;  %v1119_v9 = vpop.f32.mrf.mxu0 }
 0x13d   : > { %v1070_v8 = vpop.f32.mrf.mxu1  ;;  %2847 = vmatpush1.bf16.msra.mxu0 %v4161_v1 }
 0x13e   : > { %v5301_v11 = vadd.f32 %v1119_v9, %v1070_v8  ;;  %2806 = vmatpush2.bf16.msra.mxu1 %v4158_v63  ;;  %v1121_v16 = vpop.f32.mrf.mxu0  ;;  %2848 = vmatprep.subr.bf16.mxu0 %v4169_v6 }
 0x13f   : > { %v1072_v15 = vpop.f32.mrf.mxu1  ;;  %2807 = vmatprep.subr.bf16.mxu1 %v4166_v5 }
 0x140   : > { %v5315_v19 = vadd.f32 %v1121_v16, %v1072_v15  ;;  %v1125_v21 = vpop.f32.mrf.mxu0 }
 0x141   : > { %v1076_v20 = vpop.f32.mrf.mxu1  ;;  %2849 = vmatpush1.bf16.msra.mxu0 %v4167_v14 }
 0x142   : > { %2808 = vmatpush2.bf16.msra.mxu1 %v4164_v12  ;;  %2860 = vmatprep.subr.bf16.mxu0 %v4175_v18  ;;  %v1126_v30 = vpop.f32.mrf.mxu0 }
 0x143   : > { %2809 = vmatprep.subr.bf16.mxu1 %v4172_v17  ;;  %v1077_v29 = vpop.f32.mrf.mxu1 }
 0x144   : > { %v1127_v58 = vpop.f32.mrf.mxu0 }
 0x145   : > { %v1078_v32 = vpop.f32.mrf.mxu1  ;;  %2861 = vmatpush2.bf16.msra.mxu0 %v4173_v24 }
 0x146   : > { %2810 = vmatpush2.bf16.msra.mxu1 %v4170_v23  ;;  %2862 = vmatprep.subr.bf16.mxu0 %v4181_v28  ;;  %v1128_v39 = vpop.f32.mrf.mxu0 }
 0x147   : > { %2811 = vmatprep.subr.bf16.mxu1 %v4178_v26  ;;  %v1079_v38 = vpop.f32.mrf.mxu1 }
 0x149   : > { %2863 = vmatpush2.bf16.msra.mxu0 %v4179_v34 }
 0x14a   : > { %2812 = vmatpush2.bf16.msra.mxu1 %v4176_v33  ;;  %2864 = vmatprep.subr.bf16.mxu0 %v4187_v37 }
 0x14b   : > { %2813 = vmatprep.subr.bf16.mxu1 %v4184_v35 }
 0x14d   : > { %2865 = vmatpush2.bf16.msra.mxu0 %v4185_v41 }
 0x14e   : > { %2814 = vmatpush2.bf16.msra.mxu1 %v4182_v40 }
 0x150   : > { %2867 = vmatmul.mubr.bf16.vlgmr.msra.gmra.mxu0 %v4424_v51 }
 0x151   : > { %2816 = vmatmul.mubr.bf16.vlgmr.msra.gmra.mxu1 %v4494_v13  ;;  %3681 = vmatprep.mubr.msk.bf16.mxu0 %vm927_vm0, %v4523_v25 }
 0x152   : > { %2825 = vmatprep.mubr.bf16.mxu1 %v4519_v22 }
 0x158   : > { %2877 = vmatmul.mubr.bf16.gmra.mxu0 %v4526_v27 }
 0x159   : > { %2826 = vmatmul.mubr.bf16.gmra.mxu1 %v4540_v31 }
 0x165   : > { %v1864_v42 = vpop.f32.mrf.mxu1 }
 0x167   : > { %v1866_v43 = vpop.f32.mrf.mxu1 }
 0x169   : > { %v1868_v44 = vpop.f32.mrf.mxu1 }
 0x16b   : > { %v1870_v45 = vpop.f32.mrf.mxu1 }
 0x16d   : > { %v1874_v46 = vpop.f32.mrf.mxu1 }
 0x16f   : > { %v1876_v47 = vpop.f32.mrf.mxu1 }
 0x171   : > { %v1878_v48 = vpop.f32.mrf.mxu1 }
 0x173   : > { %v1879_v49 = vpop.f32.mrf.mxu1 }
 0x178   : > { %v1813_v13 = vpop.f32.mrf.mxu0 }
 0x179   : > { %v1865_v50 = vadd.f32 %v1864_v42, %v1813_v13 }
 0x17a   : > { %v1815_v51 = vpop.f32.mrf.mxu0 }
 0x17b   : > { %v1867_v52 = vadd.f32 %v1866_v43, %v1815_v51  ;;  %v1996_v36 = vrot.slane %v1865_v50, 1 }
 0x17c   : > { %v1817_v22 = vpop.f32.mrf.mxu0 }
 0x17d   : > { %v1869_v53 = vadd.f32 %v1868_v44, %v1817_v22  ;;  %v1999_v55 = vrot.slane %v1867_v52, 1 }
 0x17e   : > { %v1819_v25 = vpop.f32.mrf.mxu0 }
 0x17f   : > { %v1997_v31 = vrot.slane %v1869_v53, 1  ;;  %v1871_v54 = vadd.f32 %v1870_v45, %v1819_v25 }
 0x180   : > { %v1823_v27 = vpop.f32.mrf.mxu0 }
 0x181   : > { %v1998_v57 = vsel %vm1995_vm1, %v1996_v36, %v1997_v31  ;;  %v2000_v59 = vrot.slane %v1871_v54, 1  ;;  %v1875_v60 = vadd.f32 %v1874_v46, %v1823_v27 }
 0x182   : > { %v5356_v61 = vadd.f32 %v1998_v57, %v5135_v56  ;;  %v1825_v63 = vpop.f32.mrf.mxu0 }
 0x183   : > { %v2001_v1 = vsel %vm1995_vm1, %v1999_v55, %v2000_v59  ;;  %v2008_v2 = vrot.slane %v1875_v60, 1  ;;  %v1877_v4 = vadd.f32 %v1876_v47, %v1825_v63  ;;  %v2936_v63 = vlaneseq }
 0x184   : > { %v5360_v5 = vadd.f32 %v2001_v1, %v5149_v0  ;;  %v1827_v6 = vpop.f32.mrf.mxu0 }
 0x185   : > { %v2009_v8 = vsel %vm1995_vm1, %v1997_v31, %v2008_v2  ;;  %v2010_v9 = vrot.slane %v1877_v4, 1 }
 0x186   : > { %v5364_v12 = vadd.f32 %v2009_v8, %v5152_v3  ;;  %v1828_v14 = vpop.f32.mrf.mxu0 }
 0x187   : > { %v2011_v15 = vsel %vm1995_vm1, %v2000_v59, %v2010_v9  ;;  %v5386_v9 = vshrl.u32 %v2936_v63, 7 }
 0x188   : > { %v5368_v56 = vadd.f32 %v2011_v15, %v5166_v10 }
 0x1a4   : > { %v1966_v17 = vpop.f32.mrf.mxu0 }
 0x1a5   : > { %v1915_v16 = vpop.f32.mrf.mxu1 }
 0x1a6   : > { %v1967_v18 = vadd.f32 %v1966_v17, %v1915_v16  ;;  %v1968_v21 = vpop.f32.mrf.mxu0 }
 0x1a7   : > { %v1917_v20 = vpop.f32.mrf.mxu1 }
 0x1a8   : > { %v1969_v0 = vadd.f32 %v1968_v21, %v1917_v20  ;;  %v1970_v24 = vpop.f32.mrf.mxu0  ;;  %v2002_v30 = vrot.slane %v1967_v18, 1  ;;  %v2938_v21 = vsub.s32 0, %v5386_v9 }
 0x1a9   : > { %v1919_v23 = vpop.f32.mrf.mxu1 }
 0x1aa   : > { %v1971_v26 = vadd.f32 %v1970_v24, %v1919_v23  ;;  %v1972_v29 = vpop.f32.mrf.mxu0  ;;  %v2005_v34 = vrot.slane %v1969_v0, 1  ;;  %v2934_v23 = vld [vmem:[%s5432_s3] sm:$0xf]  ;;  %v2942_v24 = vsub.s32 1, %v5386_v9 }
 0x1ab   : > { %v1921_v28 = vpop.f32.mrf.mxu1 }
 0x1ac   : > { %v2003_v3 = vrot.slane %v1971_v26, 1  ;;  %v1973_v32 = vadd.f32 %v1972_v29, %v1921_v28  ;;  %v1976_v33 = vpop.f32.mrf.mxu0 }
 0x1ad   : > { %v1925_v58 = vpop.f32.mrf.mxu1 }
 0x1ae   : > { %v2004_v10 = vsel %vm1995_vm1, %v2002_v30, %v2003_v3  ;;  %v2006_v35 = vrot.slane %v1973_v32, 1  ;;  %v1977_v37 = vadd.f32 %v1976_v33, %v1925_v58  ;;  %v1978_v40 = vpop.f32.mrf.mxu0  ;;  %v2943_v58 = vrot.slane %v2934_v23, %v2942_v24 }
 0x1af   : > { %v5372_v38 = vadd.f32 %v2004_v10, %v5285_v62  ;;  %v1927_v39 = vpop.f32.mrf.mxu1 }
 0x1b0   : > { %v2007_v41 = vsel %vm1995_vm1, %v2005_v34, %v2006_v35  ;;  %v2012_v42 = vrot.slane %v1977_v37, 1  ;;  %v1979_v43 = vadd.f32 %v1978_v40, %v1927_v39  ;;  %v1980_v46 = vpop.f32.mrf.mxu0 }
 0x1b1   : > { %v5376_v44 = vadd.f32 %v2007_v41, %v5299_v7  ;;  %v1929_v45 = vpop.f32.mrf.mxu1 }
 0x1b2   : > { %v2013_v47 = vsel %vm1995_vm1, %v2003_v3, %v2012_v42  ;;  %v2014_v48 = vrot.slane %v1979_v43, 1  ;;  %v1981_v62 = vpop.f32.mrf.mxu0  ;;  %v2939_v3 = vrot.slane %v2934_v23, %v2938_v21 }
 0x1b3   : > { %v5380_v49 = vadd.f32 %v2013_v47, %v5301_v11  ;;  %v1930_v13 = vpop.f32.mrf.mxu1 }
 0x1b4   : > { %v2015_v50 = vsel %vm1995_vm1, %v2006_v35, %v2014_v48 }
 0x1b5   : > { %v5384_v51 = vadd.f32 %v2015_v50, %v5315_v19 }
 0x1d1   : > { %v2766_v52 = vpop.f32.mrf.mxu1 }
 0x1d3   : > { %v2768_v22 = vpop.f32.mrf.mxu1 }
 0x1d5   : > { %v2770_v53 = vpop.f32.mrf.mxu1 }
 0x1d7   : > { %v2772_v7 = vpop.f32.mrf.mxu1 }
 0x1d9   : > { %v2776_v25 = vpop.f32.mrf.mxu1 }
 0x1db   : > { %v2778_v36 = vpop.f32.mrf.mxu1 }
 0x1dd   : > { %v2780_v31 = vpop.f32.mrf.mxu1 }
 0x1df   : > { %v2781_v54 = vpop.f32.mrf.mxu1 }
 0x1e4   : > { %v2715_v27 = vpop.f32.mrf.mxu0 }
 0x1e5   : > { %v2767_v19 = vadd.f32 %v2766_v52, %v2715_v27 }
 0x1e6   : > { %v2717_v55 = vpop.f32.mrf.mxu0 }
 0x1e7   : > { %v2769_v8 = vadd.f32 %v2768_v22, %v2717_v55  ;;  %v2898_v17 = vrot.slane %v2767_v19, 2 }
 0x1e8   : > { %v2719_v57 = vpop.f32.mrf.mxu0 }
 0x1e9   : > { %v2771_v1 = vadd.f32 %v2770_v53, %v2719_v57  ;;  %v2901_v20 = vrot.slane %v2769_v8, 2 }
 0x1ea   : > { %v2721_v11 = vpop.f32.mrf.mxu0 }
 0x1eb   : > { %v2773_v4 = vadd.f32 %v2772_v7, %v2721_v11  ;;  %v2899_v14 = vrot.slane %v2771_v1, 2 }
 0x1ec   : > { %v2725_v59 = vpop.f32.mrf.mxu0 }
 0x1ed   : > { %v2902_v15 = vrot.slane %v2773_v4, 2  ;;  %v2777_v16 = vadd.f32 %v2776_v25, %v2725_v59  ;;  %v2900_v0 = vsel %vm2897_vm2, %v2898_v17, %v2899_v14 }
 0x1ee   : > { %v2727_v60 = vpop.f32.mrf.mxu0  ;;  %v2926_v30 = vadd.f32 %v2900_v0, %v5356_v61 }
 0x1ef   : > { %v2779_v18 = vadd.f32 %v2778_v36, %v2727_v60  ;;  %v2903_v26 = vsel %vm2897_vm2, %v2901_v20, %v2902_v15  ;;  %v2910_v28 = vrot.slane %v2777_v16, 2  ;;  %v2950_v36 = vsub.s32 3, %v5386_v9 }
 0x1f0   : > { %v2729_v2 = vpop.f32.mrf.mxu0  ;;  %v2927_v32 = vadd.f32 %v2903_v26, %v5360_v5  ;;  %v2956_v10 = vadd.f32 %v2939_v3, %v2926_v30 }
 0x1f1   : > { %v2912_v29 = vrot.slane %v2779_v18, 2  ;;  %v2911_v33 = vsel %vm2897_vm2, %v2899_v14, %v2910_v28  ;;  %v2951_v14 = vrot.slane %v2934_v23, %v2950_v36 }
 0x1f2   : > { %v2730_v6 = vpop.f32.mrf.mxu0  ;;  %v2957_v35 = vadd.f32 %v2943_v58, %v2927_v32  ;;  %v2930_v37 = vadd.f32 %v2911_v33, %v5364_v12  ;;  %v3682_v40 = vmul.f32 -1.442695, %v2956_v10 }
 0x1f3   : > { %v2913_v34 = vsel %vm2897_vm2, %v2902_v15, %v2912_v29 }
 0x1f4   : > { %v2931_v39 = vadd.f32 %v2913_v34, %v5368_v56  ;;  %v3684_v41 = vmul.f32 -1.442695, %v2957_v35  ;;  %v2960_v42 = vadd.f32 %v2939_v3, %v2930_v37  ;;  %4188 = vpow2.f32 %v3682_v40  ;;  %v3002_v37 = vld [vmem:[%s247_s11] sm:$0xff] }
 0x1f5   : > { %v2946_v56 = vsub.s32 2, %v5386_v9 }
 0x1f6   : > { %v2961_v43 = vadd.f32 %v2943_v58, %v2931_v39  ;;  %4190 = vpow2.f32 %v3684_v41  ;;  %v3683_v61 = vmul.f32 -1.442695, %v2960_v42 }
 0x1f7   : > { %v2947_v11 = vrot.slane %v2934_v23, %v2946_v56 }
 0x1f8   : > { %v3685_v45 = vmul.f32 -1.442695, %v2961_v43  ;;  %4192 = vpow2.f32 %v3683_v61 }
 0x1fa   : > { %4194 = vpow2.f32 %v3685_v45  ;;  %v3003_v45 = vld [vmem:[%s247_s11 + $0x8] sm:$0xff] }
 0x201   : > { %v4189_v62 = vpop.eup %4188 }
 0x202   : > { %v2970_v55 = vadd.f32 1.0, %v4189_v62 }
 0x203   : > { %v4191_v52 = vpop.eup %4190 }
 0x204   : > { %v2982_v57 = vadd.f32 1.0, %v4191_v52 }
 0x205   : > { %v4193_v63 = vpop.eup %4192 }
 0x206   : > { %4196 = vrcp.f32 %v2982_v57  ;;  %v2971_v20 = vadd.f32 1.0, %v4193_v63 }
 0x207   : > { %v4195_v6 = vpop.eup %4194  ;;  %4198 = vrcp.f32 %v2970_v55 }
 0x208   : > { %v2983_v28 = vadd.f32 1.0, %v4195_v6 }
 0x210   : > { %v2868_v46 = vpop.f32.mrf.mxu0 }
 0x211   : > { %v2817_v5 = vpop.f32.mrf.mxu1 }
 0x212   : > { %v2870_v48 = vpop.f32.mrf.mxu0  ;;  %v2869_v13 = vadd.f32 %v2868_v46, %v2817_v5 }
 0x213   : > { %v2819_v47 = vpop.f32.mrf.mxu1 }
 0x214   : > { %v2872_v12 = vpop.f32.mrf.mxu0  ;;  %v2871_v22 = vadd.f32 %v2870_v48, %v2819_v47  ;;  %v2904_v31 = vrot.slane %v2869_v13, 2 }
 0x215   : > { %v2821_v50 = vpop.f32.mrf.mxu1 }
 0x216   : > { %v2873_v53 = vadd.f32 %v2872_v12, %v2821_v50  ;;  %v2874_v25 = vpop.f32.mrf.mxu0  ;;  %v2907_v1 = vrot.slane %v2871_v22, 2 }
 0x217   : > { %v2823_v7 = vpop.f32.mrf.mxu1 }
 0x218   : > { %v2905_v54 = vrot.slane %v2873_v53, 2  ;;  %v2875_v27 = vadd.f32 %v2874_v25, %v2823_v7  ;;  %v2878_v60 = vpop.f32.mrf.mxu0 }
 0x219   : > { %v2827_v59 = vpop.f32.mrf.mxu1 }
 0x21a   : > { %v2906_v2 = vsel %vm2897_vm2, %v2904_v31, %v2905_v54  ;;  %v2908_v4 = vrot.slane %v2875_v27, 2  ;;  %v2879_v19 = vadd.f32 %v2878_v60, %v2827_v59  ;;  %v2880_v9 = vpop.f32.mrf.mxu0 }
 0x21b   : > { %v2928_v8 = vadd.f32 %v2906_v2, %v5372_v38  ;;  %v2829_v15 = vpop.f32.mrf.mxu1 }
 0x21c   : > { %v2909_v16 = vsel %vm2897_vm2, %v2907_v1, %v2908_v4  ;;  %v2914_v17 = vrot.slane %v2879_v19, 2  ;;  %v2881_v18 = vadd.f32 %v2880_v9, %v2829_v15  ;;  %v2882_v26 = vpop.f32.mrf.mxu0 }
 0x21d   : > { %v2958_v21 = vadd.f32 %v2947_v11, %v2928_v8  ;;  %v2929_v0 = vadd.f32 %v2909_v16, %v5376_v44  ;;  %v2831_v24 = vpop.f32.mrf.mxu1 }
 0x21e   : > { %v2915_v29 = vsel %vm2897_vm2, %v2905_v54, %v2914_v17  ;;  %v2916_v38 = vrot.slane %v2881_v18, 2  ;;  %v2883_v32 = vpop.f32.mrf.mxu0 }
 0x21f   : > { %4200 = vtanh.f32 %v2958_v21  ;;  %v2959_v23 = vadd.f32 %v2951_v14, %v2929_v0  ;;  %v2932_v30 = vadd.f32 %v2915_v29, %v5380_v49  ;;  %v2832_v3 = vpop.f32.mrf.mxu1  ;;  %v4197_v49 = vpop.eup %4196 }
 0x220   : > { %v2917_v58 = vsel %vm2897_vm2, %v2908_v4, %v2916_v38  ;;  %4202 = vrcp.f32 %v2971_v20  ;;  %v4199_v39 = vpop.eup %4198  ;;  %v3004_v41 = vmul.f32 %v4197_v49, %v3002_v37 }
 0x221   : > { %v3686_v33 = vmul.f32 -1.442695, %v2959_v23  ;;  %v2962_v34 = vadd.f32 %v2947_v11, %v2932_v30  ;;  %v2933_v44 = vadd.f32 %v2917_v58, %v5384_v51  ;;  %4204 = vrcp.f32 %v2983_v28 }
 0x223   : > { %4206 = vpow2.f32 %v3686_v33  ;;  %v2963_v10 = vadd.f32 %v2951_v14, %v2933_v44 }
 0x224   : > { %4208 = vtanh.f32 %v2962_v34 }
 0x225   : > { %v3687_v35 = vmul.f32 -1.442695, %v2963_v10 }
 0x227   : > { %4210 = vpow2.f32 %v3687_v35 }
 0x22c   : > { %v4201_v40 = vpop.eup %4200 }
 0x22d   : > { %v3006_v51 = vmul.f32 %v4201_v40, %v4199_v39  ;;  %v4203_v42 = vpop.eup %4202 }
 0x22e   : > { %v4205_v43 = vpop.eup %4204 }
 0x22f   : > { %v3008_v61 = vadd.f32 %v3006_v51, %v3004_v41  ;;  %v3005_v48 = vmul.f32 %v4205_v43, %v3003_v45 }
 0x230   : > { %v4207_v5 = vpop.eup %4206 }
 0x231   : > { %v4209_v46 = vpop.eup %4208  ;;  %3016 = vst [vmem:[%s257_s19] sm:$0xff] %v3008_v61  ;;  %v2996_v47 = vadd.f32 1.0, %v4207_v5  ;;  %4212 = vtanh.f32 %v3008_v61 }
 0x232   : > { %v3007_v13 = vmul.f32 %v4209_v46, %v4203_v42 }
 0x233   : > { %4214 = vrcp.f32 %v2996_v47 }
 0x234   : > { %v4211_v62 = vpop.eup %4210  ;;  %v3009_v50 = vadd.f32 %v3007_v13, %v3005_v48 }
 0x235   : > { %v2997_v12 = vadd.f32 1.0, %v4211_v62 }
 0x236   : > { %4216 = vtanh.f32 %v3009_v50  ;;  %3017 = vst [vmem:[%s257_s19 + $0x8] sm:$0xff] %v3009_v50 }
 0x237   : > { %4218 = vrcp.f32 %v2997_v12 }
 0x23e   : > { %v4213_v56 = vpop.eup %4212 }
 0x240   : > { %v4215_v52 = vpop.eup %4214 }
 0x241   : > { %v3012_v22 = vmul.f32 %v4215_v52, %v4213_v56 }
 0x243   : > { %v4217_v53 = vpop.eup %4216  ;;  %3014 = vst [vmem:[%s252_s12] sm:$0xff] %v3012_v22 }
 0x244   : > { %v4219_v7 = vpop.eup %4218 }
 0x245   : > { %v3013_v25 = vmul.f32 %v4219_v7, %v4217_v53 }
 0x247   : > { %3015 = vst [vmem:[%s252_s12 + $0x8] sm:$0xff] %v3013_v25 }
 0x248 PF: > { %s16_s18 = sadd.s32 1, %s4226_s18  }
 0x249   : > { %p13_p4 = scmp.ge.s32.totalorder %s16_s18, 4  }
 0x24b   :  { %15 = sbr.rel (!%p13_p4) target bundleno = 1 (0x1), region = 83 }

// kernel: tile.30
= control target key start
LH: loop header
LB: loop body
LE: loop exit
PB: predicated region body
PF: predicated region fallthrough
CT: control target
= control target key end

     0   :  { %s28_s0 = inlined_call_operand.vmem [shape: f32[4], index: 0, kind: input, shape index: {}]   ;;  %s29_s1 = inlined_call_operand.vmem [shape: f32[16,4], index: 1, kind: output, shape index: {}]  }
   0x1   :  { %v4_v0 = vld [vmem:[%s28_s0] ss:$0 sm:$0xff] }
   0x2   :  { %5 = vst [vmem:[%s29_s1] sm:$0xff] %v4_v0  ;;  %8 = vst [vmem:[%s29_s1 + $0x8] sm:$0xff] %v4_v0 }

// kernel: tile.31
= control target key start
LH: loop header
LB: loop body
LE: loop exit
PB: predicated region body
PF: predicated region fallthrough
CT: control target
= control target key end

     0   :  { %s133_s10 = smov 60   ;;  %s134_s11 = smov 52   ;;  %vm3_vm0 = vcmask 31744   ;;  %vm9_vm1 = vcmask 523744   ;;  %vm15_vm2 = vcmask 490944   ;;  %vm21_vm3 = vcmask 458144   ;;  %s209_s0 = inlined_call_operand.vmem [shape: f32[16,4], index: 0, kind: input, shape index: {}]   ;;  %s210_s1 = inlined_call_operand.vmem [shape: f32[1,64], index: 1, kind: output, shape index: {}]  }
   0x1   :  { %v103_v0 = vld [vmem:[%s209_s0 + $0xf] sm:$0x1]   ;;  %v105_v1 = vld [vmem:[%s209_s0 + $0xd] sm:$0x1]   ;;  %v104_v2 = vld [vmem:[%s209_s0 + $0xe] sm:$0x1]  }
   0x2   :  { %7 = vrot.lane.b32.xlu0 %v103_v0, %s133_s10  ;;  %19 = vrot.lane.b32.xlu1 %v105_v1, %s134_s11  ;;  %v106_v3 = vld [vmem:[%s209_s0 + $0xc] sm:$0x1]   ;;  %s135_s16 = smov 56   ;;  %s136_s17 = smov 48   ;;  %v107_v4 = vld [vmem:[%s209_s0 + $0xb] sm:$0x1]  }
   0x3   :  { %v108_v5 = vld [vmem:[%s209_s0 + $0xa] sm:$0x1]   ;;  %v2_v6 = vld [vmem:[%s209_s0] sm:$0x1]   ;;  %s137_s24 = smov 44   ;;  %s138_s25 = smov 40  }
   0x4   :  { %4 = vst.msk [vmem:[#allocation0] sm:$0x1] %vm3_vm0, %v2_v6   ;;  %v109_v7 = vld [vmem:[%s209_s0 + $0x9] sm:$0x1]   ;;  %v110_v8 = vld [vmem:[%s209_s0 + $0x8] sm:$0x1]  }
   0x5   :  { %s139_s30 = smov 36   ;;  %s140_s2 = smov 32   ;;  %v111_v9 = vld [vmem:[%s209_s0 + $0x7] sm:$0x1]   ;;  %v112_v10 = vld [vmem:[%s209_s0 + $0x6] sm:$0x1]  }
   0x6   :  { %13 = vrot.lane.b32.xlu0 %v104_v2, %s135_s16  ;;  %25 = vrot.lane.b32.xlu1 %v106_v3, %s136_s17  ;;  %s141_s7 = smov 28   ;;  %s142_s8 = smov 24   ;;  %v113_v11 = vld [vmem:[%s209_s0 + $0x5] sm:$0x1]   ;;  %v114_v12 = vld [vmem:[%s209_s0 + $0x4] sm:$0x1]  }
   0x7   :  { %s143_s13 = smov 20   ;;  %s144_s14 = smov 16   ;;  %v115_v13 = vld [vmem:[%s209_s0 + $0x3] sm:$0x1]   ;;  %v116_v14 = vld [vmem:[%s209_s0 + $0x2] sm:$0x1]  }
   0x8   :  { %s145_s19 = smov 12   ;;  %s146_s20 = smov 8   ;;  %v117_v15 = vld [vmem:[%s209_s0 + $0x1] sm:$0x1]   ;;  %vm27_vm4 = vcmask 425344   ;;  %vm33_vm5 = vcmask 392544  }
   0x9   :  { %s147_s0 = smov 4   ;;  %vm39_vm6 = vcmask 359744   ;;  %vm45_vm7 = vcmask 326944   ;;  %vm51_vm8 = vcmask 294144   ;;  %vm57_vm9 = vcmask 261344  }
   0xa   :  { %31 = vrot.lane.b32.xlu0 %v107_v4, %s137_s24  ;;  %37 = vrot.lane.b32.xlu1 %v108_v5, %s138_s25  ;;  %vm63_vm10 = vcmask 228544   ;;  %vm69_vm11 = vcmask 195744   ;;  %vm75_vm12 = vcmask 162944   ;;  %vm81_vm13 = vcmask 130144  }
   0xb   :  { %vm87_vm14 = vcmask 97344   ;;  %vm93_vm15 = vcmask 64544  }
   0xe   :  { %43 = vrot.lane.b32.xlu0 %v109_v7, %s139_s30  ;;  %49 = vrot.lane.b32.xlu1 %v110_v8, %s140_s2 }
  0x12   :  { %55 = vrot.lane.b32.xlu0 %v111_v9, %s141_s7  ;;  %61 = vrot.lane.b32.xlu1 %v112_v10, %s142_s8 }
  0x16   :  { %67 = vrot.lane.b32.xlu0 %v113_v11, %s143_s13  ;;  %73 = vrot.lane.b32.xlu1 %v114_v12, %s144_s14 }
  0x1a   :  { %79 = vrot.lane.b32.xlu0 %v115_v13, %s145_s19  ;;  %85 = vrot.lane.b32.xlu1 %v116_v14, %s146_s20 }
  0x1e   :  { %91 = vrot.lane.b32.xlu0 %v117_v15, %s147_s0 }
  0x74   :  { %v8_v16 = vpop.permute.xlu0 %7   ;;  %v20_v17 = vpop.permute.xlu1 %19  }
  0x75   :  { %10 = vst.msk [vmem:[#allocation0] sm:$0x1] %vm9_vm1, %v8_v16  }
  0x78   :  { %v14_v18 = vpop.permute.xlu0 %13   ;;  %v26_v19 = vpop.permute.xlu1 %25  }
  0x79   :  { %16 = vst.msk [vmem:[#allocation0] sm:$0x1] %vm15_vm2, %v14_v18  }
  0x7a   :  { %22 = vst.msk [vmem:[#allocation0] sm:$0x1] %vm21_vm3, %v20_v17  }
  0x7b   :  { %28 = vst.msk [vmem:[#allocation0] sm:$0x1] %vm27_vm4, %v26_v19  }
  0x7c   :  { %v32_v20 = vpop.permute.xlu0 %31   ;;  %v38_v21 = vpop.permute.xlu1 %37  }
  0x7d   :  { %34 = vst.msk [vmem:[#allocation0] sm:$0x1] %vm33_vm5, %v32_v20  }
  0x7e   :  { %40 = vst.msk [vmem:[#allocation0] sm:$0x1] %vm39_vm6, %v38_v21  }
  0x80   :  { %v44_v22 = vpop.permute.xlu0 %43   ;;  %v50_v23 = vpop.permute.xlu1 %49  }
  0x81   :  { %46 = vst.msk [vmem:[#allocation0] sm:$0x1] %vm45_vm7, %v44_v22  }
  0x82   :  { %52 = vst.msk [vmem:[#allocation0] sm:$0x1] %vm51_vm8, %v50_v23  }
  0x84   :  { %v56_v24 = vpop.permute.xlu0 %55   ;;  %v62_v25 = vpop.permute.xlu1 %61  }
  0x85   :  { %58 = vst.msk [vmem:[#allocation0] sm:$0x1] %vm57_vm9, %v56_v24  }
  0x86   :  { %64 = vst.msk [vmem:[#allocation0] sm:$0x1] %vm63_vm10, %v62_v25  }
  0x88   :  { %v68_v26 = vpop.permute.xlu0 %67   ;;  %v74_v27 = vpop.permute.xlu1 %73  }
  0x89   :  { %70 = vst.msk [vmem:[#allocation0] sm:$0x1] %vm69_vm11, %v68_v26  }
  0x8a   :  { %76 = vst.msk [vmem:[#allocation0] sm:$0x1] %vm75_vm12, %v74_v27  }
  0x8c   :  { %v80_v28 = vpop.permute.xlu0 %79   ;;  %v86_v29 = vpop.permute.xlu1 %85  }
  0x8d   :  { %82 = vst.msk [vmem:[#allocation0] sm:$0x1] %vm81_vm13, %v80_v28  }
  0x8e   :  { %88 = vst.msk [vmem:[#allocation0] sm:$0x1] %vm87_vm14, %v86_v29  }
  0x90   :  { %v92_v30 = vpop.permute.xlu0 %91  }
  0x91   :  { %94 = vst.msk [vmem:[#allocation0] sm:$0x1] %vm93_vm15, %v92_v30  }
  0x98   :  { %v99_v31 = vld [vmem:[#allocation0] sm:$0x1] }
  0x99   :  { %102 = vst [vmem:[%s210_s1] sm:$0x1] %v99_v31 }

// kernel: prednet_forward.18
= control target key start
LH: loop header
LB: loop body
LE: loop exit
PB: predicated region body
PF: predicated region fallthrough
CT: control target
= control target key end

     0   :  { %s1054_s21 = smov 0   ;;  %s1224_s0 = inlined_call_operand.vmem [shape: f32[2,18,144], index: 0, kind: input, shape index: {}]   ;;  %s1225_s1 = inlined_call_operand.vmem [shape: f32[2,16,64], index: 1, kind: input, shape index: {}]   ;;  %s1226_s2 = inlined_call_operand.vmem [shape: bf16[3,144,64], index: 2, kind: input, shape index: {}]   ;;  %s1227_s3 = inlined_call_operand.vmem [shape: f32[1,64], index: 3, kind: input, shape index: {}]   ;;  %s1228_s4 = inlined_call_operand.vmem [shape: f32[2,16,64], index: 4, kind: output, shape index: {0}]   ;;  %s1229_s5 = inlined_call_operand.vmem [shape: f32[2,16,64], index: 5, kind: output, shape index: {1}]   ;;  %s1230_s6 = inlined_call_operand.vmem [shape: f32[2,16,64], index: 6, kind: output, shape index: {2}]  }
   0x1 LB: > { %s865_s22 = sadd.s32 4294967295, %s1016_s21   ;;  %p869_p0 = scmp.ge.s32.totalorder %s1016_s21, 1  ;;  %s1016_s21 = sphi %s1054_s21, %s17_s21  }
   0x2   : > { %p227_p1 = scmp.lt.s32.totalorder %s1016_s21, 3 }
   0x4   : > { %p228_p2 = pnand %p869_p0, %p227_p1 }
   0x5   : > { %p272_p3 = scmp.lt.s32.totalorder (!%p228_p2), %s865_s22, 1 }
   0x6   : > { %231 = sbr.rel (%p228_p2) target bundleno = 298 (0x12a), region = 36 }
   0xb   : > { %v983_v0 = vld [vmem:[%s1226_s2 + $0x38] sm:$0xff]   ;;  %v1018_v1 = vmov 0   ;;  %v984_v2 = vld [vmem:[%s1226_s2 + $0x80] sm:$0xff]   ;;  %v985_v3 = vld [vmem:[%s1226_s2 + $0x30] sm:$0xff]   ;;  %s1232_s22 = smov (!%p272_p3, %s865_s22), 1  ;;  %vm380_vm0 = vcmask 130048  }
   0xc   : > { %387 = vmatprep.subr.bf16.mxu0 %v1018_v1  ;;  %507 = vmatprep.subr.bf16.mxu1 %v1018_v1  ;;  %v986_v4 = vld [vmem:[%s1226_s2 + $0x78] sm:$0xff]   ;;  %v987_v5 = vld [vmem:[%s1226_s2 + $0x28] sm:$0xff]   ;;  %v988_v6 = vld [vmem:[%s1226_s2 + $0x70] sm:$0xff]   ;;  %s973_s15 = smul.u32 48, %s1232_s22  ;;  %vm558_vm1 = vcmask 1046528   ;;  %vm692_vm2 = vcmask 1045504  }
   0xd   : > { %388 = vmatpush1.bf16.msra.mxu0 %v983_v0  ;;  %508 = vmatpush1.bf16.msra.mxu1 %v984_v2  ;;  %v989_v7 = vld [vmem:[%s1226_s2 + $0x20] sm:$0xff]   ;;  %v990_v8 = vld [vmem:[%s1226_s2 + $0x68] sm:$0xff]   ;;  %v991_v9 = vld [vmem:[%s1226_s2 + $0x18] sm:$0xff]   ;;  %s951_s13 = sshll.u32 %s1232_s22, 4  ;;  %vm717_vm3 = vcmask 523264  }
   0xe   : > { %389 = vmatprep.subr.bf16.mxu0 %v1018_v1  ;;  %509 = vmatprep.subr.bf16.mxu1 %v1018_v1  ;;  %v992_v10 = vld [vmem:[%s1226_s2 + $0x60] sm:$0xff]   ;;  %s1107_s24 = scalar_lea.vmem %s1224_s0, %s973_s15  ;;  %v993_v11 = vld [vmem:[%s1226_s2 + $0x10] sm:$0xff]   ;;  %v994_v14 = vld [vmem:[%s1226_s2 + $0x58] sm:$0xff]   ;;  %s281_s18 = scalar_lea.vmem %s1225_s1, %s951_s13 }
   0xf   : > { %v299_v12 = vld [vmem:[%s1107_s24 + $0x8] sm:$0xff]  ;;  %v301_v13 = vld [vmem:[%s1107_s24 + $0x18] sm:$0xff]  ;;  %v996_v17 = vld [vmem:[%s1226_s2 + $0x50] sm:$0xff]   ;;  %s286_s22 = scalar_lea.vmem %s1228_s4, %s951_s13  ;;  %s296_s28 = scalar_lea.vmem %s1230_s6, %s951_s13 }
  0x10   : > { %v305_v15 = vpack.c.bf16 %v301_v13, %v299_v12  ;;  %v995_v16 = vld [vmem:[%s1226_s2 + $0x8] sm:$0xff]   ;;  %v997_v18 = vld [vmem:[%s1226_s2] sm:$0xff]   ;;  %v300_v22 = vld [vmem:[%s1107_s24 + $0x10] sm:$0xff] }
  0x11   : > { %390 = vmatpush1.bf16.msra.mxu0 %v985_v3  ;;  %510 = vmatpush1.bf16.msra.mxu1 %v986_v4  ;;  %v998_v19 = vld [vmem:[%s1226_s2 + $0x48] sm:$0xff]   ;;  %v999_v20 = vld [vmem:[%s1226_s2 + $0x40] sm:$0xff]   ;;  %v1003_v31 = vld [vmem:[%s1226_s2 + $0xb8] sm:$0xff]  }
  0x12   : > { %391 = vmatprep.subr.bf16.mxu0 %v1018_v1  ;;  %511 = vmatprep.subr.bf16.mxu1 %v1018_v1  ;;  %v298_v21 = vld [vmem:[%s1107_s24] sm:$0xff]  ;;  %v1000_v23 = vld [vmem:[%s1226_s2 + $0x88] sm:$0xff]   ;;  %v1004_v32 = vld [vmem:[%s1226_s2 + $0xb0] sm:$0xff]  }
  0x13   : > { %888 = vmatprep.mubr.msk.bf16.mxu0 %vm380_vm0, %v305_v15  ;;  %917 = vmatprep.mubr.msk.bf16.mxu1 %vm380_vm0, %v305_v15  ;;  %v304_v24 = vpack.c.bf16 %v300_v22, %v298_v21  ;;  %v303_v25 = vld [vmem:[%s1107_s24 + $0x28] sm:$0x3]  ;;  %v1002_v28 = vld [vmem:[%s1226_s2 + $0xc0] sm:$0xff]   ;;  %v1007_v35 = vld [vmem:[%s1226_s2 + $0x98] sm:$0xff]  }
  0x14   : > { %v1001_v26 = vld [vmem:[%s1226_s2 + $0xc8] sm:$0xff]   ;;  %v307_v27 = vpack.c.bf16 %v303_v25, %v303_v25  ;;  %v302_v29 = vld [vmem:[%s1107_s24 + $0x20] sm:$0x3]  ;;  %v1008_v36 = vld [vmem:[%s1226_s2 + $0x90] sm:$0xff]   ;;  %s291_s24 = scalar_lea.vmem %s1229_s5, %s951_s13 }
  0x15   : > { %392 = vmatpush1.bf16.msra.mxu0 %v987_v5  ;;  %512 = vmatpush1.bf16.msra.mxu1 %v988_v6  ;;  %v306_v30 = vpack.c.bf16 %v302_v29, %v302_v29  ;;  %v1005_v33 = vld [vmem:[%s1226_s2 + $0xa8] sm:$0xff]   ;;  %v1006_v34 = vld [vmem:[%s1226_s2 + $0xa0] sm:$0xff]   ;;  %v1009_v37 = vld [vmem:[%s1226_s2 + $0xd0] sm:$0xff]  }
  0x16   : > { %393 = vmatprep.subr.bf16.mxu0 %v1018_v1  ;;  %513 = vmatprep.subr.bf16.mxu1 %v1018_v1 }
  0x19   : > { %394 = vmatpush1.bf16.msra.mxu0 %v989_v7  ;;  %514 = vmatpush1.bf16.msra.mxu1 %v990_v8 }
  0x1a   : > { %395 = vmatprep.subr.bf16.mxu0 %v1018_v1  ;;  %515 = vmatprep.subr.bf16.mxu1 %v1018_v1 }
  0x1d   : > { %396 = vmatpush1.bf16.msra.mxu0 %v991_v9  ;;  %516 = vmatpush1.bf16.msra.mxu1 %v992_v10  ;;  %v948_v9 = vld [vmem:[%s1227_s3] ss:$0 sm:$0xff] }
  0x1e   : > { %397 = vmatprep.subr.bf16.mxu0 %v1018_v1  ;;  %517 = vmatprep.subr.bf16.mxu1 %v1018_v1 }
  0x21   : > { %398 = vmatpush1.bf16.msra.mxu0 %v993_v11  ;;  %518 = vmatpush1.bf16.msra.mxu1 %v994_v14 }
  0x22   : > { %399 = vmatprep.subr.bf16.mxu0 %v1018_v1  ;;  %519 = vmatprep.subr.bf16.mxu1 %v1018_v1 }
  0x25   : > { %400 = vmatpush1.bf16.msra.mxu0 %v995_v16  ;;  %520 = vmatpush1.bf16.msra.mxu1 %v996_v17  ;;  %v715_v17 = vld [vmem:[%s281_s18] sm:$0xff] }
  0x26   : > { %401 = vmatprep.subr.bf16.mxu0 %v1018_v1  ;;  %521 = vmatprep.subr.bf16.mxu1 %v1018_v1 }
  0x29   : > { %402 = vmatpush1.bf16.msra.mxu0 %v997_v18  ;;  %522 = vmatpush1.bf16.msra.mxu1 %v998_v19  ;;  %v716_v18 = vld [vmem:[%s281_s18 + $0x8] sm:$0xff] }
  0x2a   : > { %417 = vmatprep.subr.bf16.mxu0 %v1018_v1  ;;  %537 = vmatprep.subr.bf16.mxu1 %v1018_v1 }
  0x2d   : > { %418 = vmatpush2.bf16.msra.mxu0 %v999_v20  ;;  %538 = vmatpush2.bf16.msra.mxu1 %v1000_v23 }
  0x2e   : > { %641 = vmatprep.subr.bf16.mxu0 %v1018_v1  ;;  %955 = vmatprep.subr.bf16.mxu1 %v1018_v1 }
  0x30   : > { %420 = vmatmul.mubr.bf16.vlgmr.msra.gmra.mxu0 %v304_v24  ;;  %540 = vmatmul.mubr.bf16.vlgmr.msra.gmra.mxu1 %v304_v24 }
  0x31   : > { %642 = vmatpush1.bf16.msra.mxu0 %v1001_v26  ;;  %964 = vmatpush1.bf16.msra.mxu1 %v1001_v26 }
  0x32   : > { %643 = vmatprep.subr.bf16.mxu0 %v1018_v1  ;;  %956 = vmatprep.subr.bf16.mxu1 %v1018_v1 }
  0x33   : > { %918 = vmatprep.mubr.msk.bf16.mxu1 %vm380_vm0, %v307_v27  ;;  %889 = vmatprep.mubr.msk.bf16.mxu0 %vm380_vm0, %v307_v27 }
  0x35   : > { %644 = vmatpush1.bf16.msra.mxu0 %v1002_v28  ;;  %965 = vmatpush1.bf16.msra.mxu1 %v1002_v28 }
  0x36   : > { %645 = vmatprep.subr.bf16.mxu0 %v1018_v1  ;;  %957 = vmatprep.subr.bf16.mxu1 %v1018_v1 }
  0x38   : > { %428 = vmatmul.mubr.bf16.gmra.mxu0 %v306_v30  ;;  %548 = vmatmul.mubr.bf16.gmra.mxu1 %v306_v30 }
  0x39   : > { %646 = vmatpush1.bf16.msra.mxu0 %v1003_v31  ;;  %966 = vmatpush1.bf16.msra.mxu1 %v1003_v31 }
  0x3a   : > { %647 = vmatprep.subr.bf16.mxu0 %v1018_v1  ;;  %958 = vmatprep.subr.bf16.mxu1 %v1018_v1 }
  0x3b   : > { %946 = vmatprep.mubr.msk.bf16.mxu0 %vm380_vm0, %v305_v15  ;;  %947 = vmatprep.mubr.msk.bf16.mxu1 %vm380_vm0, %v307_v27 }
  0x3d   : > { %648 = vmatpush1.bf16.msra.mxu0 %v1004_v32  ;;  %967 = vmatpush1.bf16.msra.mxu1 %v1004_v32 }
  0x3e   : > { %649 = vmatprep.subr.bf16.mxu0 %v1018_v1  ;;  %959 = vmatprep.subr.bf16.mxu1 %v1018_v1 }
  0x41   : > { %650 = vmatpush1.bf16.msra.mxu0 %v1005_v33  ;;  %968 = vmatpush1.bf16.msra.mxu1 %v1005_v33 }
  0x42   : > { %651 = vmatprep.subr.bf16.mxu0 %v1018_v1  ;;  %960 = vmatprep.subr.bf16.mxu1 %v1018_v1 }
  0x45   : > { %652 = vmatpush1.bf16.msra.mxu0 %v1006_v34  ;;  %969 = vmatpush1.bf16.msra.mxu1 %v1006_v34 }
  0x46   : > { %653 = vmatprep.subr.bf16.mxu0 %v1018_v1  ;;  %961 = vmatprep.subr.bf16.mxu1 %v1018_v1 }
  0x49   : > { %654 = vmatpush1.bf16.msra.mxu0 %v1007_v35  ;;  %970 = vmatpush1.bf16.msra.mxu1 %v1007_v35 }
  0x4a   : > { %655 = vmatprep.subr.bf16.mxu0 %v1018_v1  ;;  %962 = vmatprep.subr.bf16.mxu1 %v1018_v1 }
  0x4d   : > { %656 = vmatpush1.bf16.msra.mxu0 %v1008_v36  ;;  %971 = vmatpush1.bf16.msra.mxu1 %v1008_v36 }
  0x4e   : > { %671 = vmatprep.subr.bf16.mxu0 %v1018_v1  ;;  %963 = vmatprep.subr.bf16.mxu1 %v1018_v1 }
  0x51   : > { %672 = vmatpush2.bf16.msra.mxu0 %v1009_v37  ;;  %972 = vmatpush2.bf16.msra.mxu1 %v1009_v37 }
  0x54   : > { %674 = vmatmul.mubr.bf16.vlgmr.msra.gmra.mxu0 %v304_v24  ;;  %682 = vmatmul.mubr.bf16.vlgmr.msra.gmra.mxu1 %v306_v30 }
  0xf0   : > { %v421_v38 = vpop.f32.mrf.mxu0  ;;  %v541_v39 = vpop.f32.mrf.mxu1 }
  0xf1   : > { %v559_v54 = vrot.slane %v541_v39, 1 }
  0xf2   : > { %v423_v40 = vpop.f32.mrf.mxu0  ;;  %v543_v41 = vpop.f32.mrf.mxu1 }
  0xf4   : > { %v424_v42 = vpop.f32.mrf.mxu0  ;;  %v544_v43 = vpop.f32.mrf.mxu1 }
  0xf5   : > { %v560_v55 = vrot.slane %v544_v43, 1 }
  0xf6   : > { %v426_v44 = vpop.f32.mrf.mxu0  ;;  %v546_v45 = vpop.f32.mrf.mxu1 }
  0xf7   : > { %v561_v60 = vsel %vm558_vm1, %v559_v54, %v560_v55 }
  0xf8   : > { %v429_v46 = vpop.f32.mrf.mxu0  ;;  %v549_v47 = vpop.f32.mrf.mxu1  ;;  %v566_v4 = vadd.f32 %v561_v60, %v421_v38 }
  0xf9   : > { %v562_v56 = vrot.slane %v549_v47, 1 }
  0xfa   : > { %v430_v48 = vpop.f32.mrf.mxu0  ;;  %v551_v49 = vpop.f32.mrf.mxu1 }
  0xfb   : > { %v563_v61 = vsel %vm558_vm1, %v560_v55, %v562_v56 }
  0xfc   : > { %v431_v50 = vpop.f32.mrf.mxu0  ;;  %v552_v51 = vpop.f32.mrf.mxu1  ;;  %v567_v5 = vadd.f32 %v563_v61, %v424_v42 }
  0xfe   : > { %v432_v52 = vpop.f32.mrf.mxu0  ;;  %v553_v53 = vpop.f32.mrf.mxu1 }
 0x114   : > { %v675_v57 = vpop.f32.mrf.mxu0  ;;  %v683_v58 = vpop.f32.mrf.mxu1 }
 0x115   : > { %v696_v62 = vrot.slane %v683_v58, 2  ;;  %v693_v1 = vrot.slane %v675_v57, 2 }
 0x116   : > { %v677_v59 = vpop.f32.mrf.mxu0  ;;  %v685_v63 = vpop.f32.mrf.mxu1 }
 0x118   : > { %v678_v0 = vpop.f32.mrf.mxu0  ;;  %v686_v3 = vpop.f32.mrf.mxu1 }
 0x119   : > { %v694_v2 = vrot.slane %v678_v0, 2 }
 0x11a   : > { %v680_v6 = vpop.f32.mrf.mxu0  ;;  %v687_v10 = vpop.f32.mrf.mxu1 }
 0x11b   : > { %v695_v7 = vsel %vm692_vm2, %v693_v1, %v694_v2  ;;  %v697_v8 = vsel %vm692_vm2, %v694_v2, %v696_v62 }
 0x11c   : > { %v700_v11 = vadd.f32 %v695_v7, %v566_v4  ;;  %v701_v12 = vadd.f32 %v697_v8, %v567_v5 }
 0x11e   : > { %v709_v13 = vadd.f32 %v948_v9, %v700_v11  ;;  %v710_v14 = vadd.f32 %v948_v9, %v701_v12 }
 0x120   : > { %v711_v15 = vmax.f32 %v709_v13, 0.0  ;;  %v712_v16 = vmax.f32 %v710_v14, 0.0 }
 0x122   : > { %v713_v19 = vmin.f32 %v711_v15, 255.0  ;;  %v714_v20 = vmin.f32 %v712_v16, 255.0 }
 0x124   : > { %718 = vst.msk [vmem:[%s286_s22] sm:$0xff] %vm717_vm3, %v713_v19  ;;  %719 = vst.msk [vmem:[%s286_s22 + $0x8] sm:$0xff] %vm717_vm3, %v714_v20  ;;  %v720_v21 = vsub.f32 %v713_v19, %v715_v17  ;;  %v721_v22 = vsub.f32 %v714_v20, %v716_v18  ;;  %v726_v23 = vsub.f32 %v715_v17, %v713_v19 }
 0x125   : > { %v727_v24 = vsub.f32 %v716_v18, %v714_v20 }
 0x126   : > { %v722_v25 = vmax.f32 %v720_v21, 0.0  ;;  %v723_v26 = vmax.f32 %v721_v22, 0.0  ;;  %v728_v27 = vmax.f32 %v726_v23, 0.0 }
 0x127   : > { %v729_v28 = vmax.f32 %v727_v24, 0.0 }
 0x128   : > { %724 = vst.msk [vmem:[%s291_s24] sm:$0xff] %vm717_vm3, %v722_v25  ;;  %725 = vst.msk [vmem:[%s291_s24 + $0x8] sm:$0xff] %vm717_vm3, %v723_v26 }
 0x129   : > { %730 = vst.msk [vmem:[%s296_s28] sm:$0xff] %vm717_vm3, %v728_v27  ;;  %731 = vst.msk [vmem:[%s296_s28 + $0x8] sm:$0xff] %vm717_vm3, %v729_v28 }
 0x12a PF: > { %s17_s21 = sadd.s32 1, %s1016_s21  }
 0x12b   : > { %p14_p4 = scmp.ge.s32.totalorder %s17_s21, 4  }
 0x12d   :  { %16 = sbr.rel (!%p14_p4) target bundleno = 1 (0x1), region = 95 }

// kernel: tile.35
= control target key start
LH: loop header
LB: loop body
LE: loop exit
PB: predicated region body
PF: predicated region fallthrough
CT: control target
= control target key end

     0   :  { %s28_s0 = inlined_call_operand.vmem [shape: f32[8], index: 0, kind: input, shape index: {}]   ;;  %s29_s1 = inlined_call_operand.vmem [shape: f32[16,8], index: 1, kind: output, shape index: {}]  }
   0x1   :  { %v4_v0 = vld [vmem:[%s28_s0] ss:$0 sm:$0xff] }
   0x2   :  { %5 = vst [vmem:[%s29_s1] sm:$0xff] %v4_v0  ;;  %8 = vst [vmem:[%s29_s1 + $0x8] sm:$0xff] %v4_v0 }

// kernel: tile.36
= control target key start
LH: loop header
LB: loop body
LE: loop exit
PB: predicated region body
PF: predicated region fallthrough
CT: control target
= control target key end

     0   :  { %s133_s10 = smov 120   ;;  %s134_s11 = smov 104   ;;  %vm3_vm0 = vcmask 64512   ;;  %vm9_vm1 = vcmask 1048512   ;;  %vm15_vm2 = vcmask 982912   ;;  %vm21_vm3 = vcmask 917312   ;;  %s209_s0 = inlined_call_operand.vmem [shape: f32[16,8], index: 0, kind: input, shape index: {}]   ;;  %s210_s1 = inlined_call_operand.vmem [shape: f32[1,128], index: 1, kind: output, shape index: {}]  }
   0x1   :  { %v103_v0 = vld [vmem:[%s209_s0 + $0xf] sm:$0x1]   ;;  %v105_v1 = vld [vmem:[%s209_s0 + $0xd] sm:$0x1]   ;;  %v104_v2 = vld [vmem:[%s209_s0 + $0xe] sm:$0x1]  }
   0x2   :  { %7 = vrot.lane.b32.xlu0 %v103_v0, %s133_s10  ;;  %19 = vrot.lane.b32.xlu1 %v105_v1, %s134_s11  ;;  %v106_v3 = vld [vmem:[%s209_s0 + $0xc] sm:$0x1]   ;;  %s135_s16 = smov 112   ;;  %s136_s17 = smov 96   ;;  %v107_v4 = vld [vmem:[%s209_s0 + $0xb] sm:$0x1]  }
   0x3   :  { %v108_v5 = vld [vmem:[%s209_s0 + $0xa] sm:$0x1]   ;;  %v2_v6 = vld [vmem:[%s209_s0] sm:$0x1]   ;;  %s137_s24 = smov 88   ;;  %s138_s25 = smov 80  }
   0x4   :  { %4 = vst.msk [vmem:[#allocation0] sm:$0x1] %vm3_vm0, %v2_v6   ;;  %v109_v7 = vld [vmem:[%s209_s0 + $0x9] sm:$0x1]   ;;  %v110_v8 = vld [vmem:[%s209_s0 + $0x8] sm:$0x1]  }
   0x5   :  { %s139_s30 = smov 72   ;;  %s140_s2 = smov 64   ;;  %v111_v9 = vld [vmem:[%s209_s0 + $0x7] sm:$0x1]   ;;  %v112_v10 = vld [vmem:[%s209_s0 + $0x6] sm:$0x1]  }
   0x6   :  { %13 = vrot.lane.b32.xlu0 %v104_v2, %s135_s16  ;;  %25 = vrot.lane.b32.xlu1 %v106_v3, %s136_s17  ;;  %s141_s7 = smov 56   ;;  %s142_s8 = smov 48   ;;  %v113_v11 = vld [vmem:[%s209_s0 + $0x5] sm:$0x1]   ;;  %v114_v12 = vld [vmem:[%s209_s0 + $0x4] sm:$0x1]  }
   0x7   :  { %s143_s13 = smov 40   ;;  %s144_s14 = smov 32   ;;  %v115_v13 = vld [vmem:[%s209_s0 + $0x3] sm:$0x1]   ;;  %v116_v14 = vld [vmem:[%s209_s0 + $0x2] sm:$0x1]  }
   0x8   :  { %s145_s19 = smov 24   ;;  %s146_s20 = smov 16   ;;  %v117_v15 = vld [vmem:[%s209_s0 + $0x1] sm:$0x1]   ;;  %vm27_vm4 = vcmask 851712   ;;  %vm33_vm5 = vcmask 786112  }
   0x9   :  { %s147_s0 = smov 8   ;;  %vm39_vm6 = vcmask 720512   ;;  %vm45_vm7 = vcmask 654912   ;;  %vm51_vm8 = vcmask 589312   ;;  %vm57_vm9 = vcmask 523712  }
   0xa   :  { %31 = vrot.lane.b32.xlu0 %v107_v4, %s137_s24  ;;  %37 = vrot.lane.b32.xlu1 %v108_v5, %s138_s25  ;;  %vm63_vm10 = vcmask 458112   ;;  %vm69_vm11 = vcmask 392512   ;;  %vm75_vm12 = vcmask 326912   ;;  %vm81_vm13 = vcmask 261312  }
   0xb   :  { %vm87_vm14 = vcmask 195712   ;;  %vm93_vm15 = vcmask 130112  }
   0xe   :  { %43 = vrot.lane.b32.xlu0 %v109_v7, %s139_s30  ;;  %49 = vrot.lane.b32.xlu1 %v110_v8, %s140_s2 }
  0x12   :  { %55 = vrot.lane.b32.xlu0 %v111_v9, %s141_s7  ;;  %61 = vrot.lane.b32.xlu1 %v112_v10, %s142_s8 }
  0x16   :  { %67 = vrot.lane.b32.xlu0 %v113_v11, %s143_s13  ;;  %73 = vrot.lane.b32.xlu1 %v114_v12, %s144_s14 }
  0x1a   :  { %79 = vrot.lane.b32.xlu0 %v115_v13, %s145_s19  ;;  %85 = vrot.lane.b32.xlu1 %v116_v14, %s146_s20 }
  0x1e   :  { %91 = vrot.lane.b32.xlu0 %v117_v15, %s147_s0 }
  0x74   :  { %v8_v16 = vpop.permute.xlu0 %7   ;;  %v20_v17 = vpop.permute.xlu1 %19  }
  0x75   :  { %10 = vst.msk [vmem:[#allocation0] sm:$0x1] %vm9_vm1, %v8_v16  }
  0x78   :  { %v14_v18 = vpop.permute.xlu0 %13   ;;  %v26_v19 = vpop.permute.xlu1 %25  }
  0x79   :  { %16 = vst.msk [vmem:[#allocation0] sm:$0x1] %vm15_vm2, %v14_v18  }
  0x7a   :  { %22 = vst.msk [vmem:[#allocation0] sm:$0x1] %vm21_vm3, %v20_v17  }
  0x7b   :  { %28 = vst.msk [vmem:[#allocation0] sm:$0x1] %vm27_vm4, %v26_v19  }
  0x7c   :  { %v32_v20 = vpop.permute.xlu0 %31   ;;  %v38_v21 = vpop.permute.xlu1 %37  }
  0x7d   :  { %34 = vst.msk [vmem:[#allocation0] sm:$0x1] %vm33_vm5, %v32_v20  }
  0x7e   :  { %40 = vst.msk [vmem:[#allocation0] sm:$0x1] %vm39_vm6, %v38_v21  }
  0x80   :  { %v44_v22 = vpop.permute.xlu0 %43   ;;  %v50_v23 = vpop.permute.xlu1 %49  }
  0x81   :  { %46 = vst.msk [vmem:[#allocation0] sm:$0x1] %vm45_vm7, %v44_v22  }
  0x82   :  { %52 = vst.msk [vmem:[#allocation0] sm:$0x1] %vm51_vm8, %v50_v23  }
  0x84   :  { %v56_v24 = vpop.permute.xlu0 %55   ;;  %v62_v25 = vpop.permute.xlu1 %61  }
  0x85   :  { %58 = vst.msk [vmem:[#allocation0] sm:$0x1] %vm57_vm9, %v56_v24  }
  0x86   :  { %64 = vst.msk [vmem:[#allocation0] sm:$0x1] %vm63_vm10, %v62_v25  }
  0x88   :  { %v68_v26 = vpop.permute.xlu0 %67   ;;  %v74_v27 = vpop.permute.xlu1 %73  }
  0x89   :  { %70 = vst.msk [vmem:[#allocation0] sm:$0x1] %vm69_vm11, %v68_v26  }
  0x8a   :  { %76 = vst.msk [vmem:[#allocation0] sm:$0x1] %vm75_vm12, %v74_v27  }
  0x8c   :  { %v80_v28 = vpop.permute.xlu0 %79   ;;  %v86_v29 = vpop.permute.xlu1 %85  }
  0x8d   :  { %82 = vst.msk [vmem:[#allocation0] sm:$0x1] %vm81_vm13, %v80_v28  }
  0x8e   :  { %88 = vst.msk [vmem:[#allocation0] sm:$0x1] %vm87_vm14, %v86_v29  }
  0x90   :  { %v92_v30 = vpop.permute.xlu0 %91  }
  0x91   :  { %94 = vst.msk [vmem:[#allocation0] sm:$0x1] %vm93_vm15, %v92_v30  }
  0x98   :  { %v99_v31 = vld [vmem:[#allocation0] sm:$0x1] }
  0x99   :  { %102 = vst [vmem:[%s210_s1] sm:$0x1] %v99_v31 }

// kernel: prednet_forward.19
= control target key start
LH: loop header
LB: loop body
LE: loop exit
PB: predicated region body
PF: predicated region fallthrough
CT: control target
= control target key end

     0   :  { %s840_s12 = smov 0   ;;  %s995_s0 = inlined_call_operand.vmem [shape: f32[2,18,144], index: 0, kind: input, shape index: {}]   ;;  %s996_s1 = inlined_call_operand.vmem [shape: bf16[3,144,128], index: 1, kind: input, shape index: {}]   ;;  %s997_s2 = inlined_call_operand.vmem [shape: f32[1,128], index: 2, kind: input, shape index: {}]   ;;  %s998_s3 = inlined_call_operand.vmem [shape: f32[2,16,32], index: 3, kind: output, shape index: {}]  }
   0x1 LB: > { %s669_s13 = sadd.s32 4294967295, %s814_s12   ;;  %p673_p0 = scmp.ge.s32.totalorder %s814_s12, 1  ;;  %s814_s12 = sphi %s840_s12, %s13_s12  }
   0x2   : > { %p137_p1 = scmp.lt.s32.totalorder %s814_s12, 3 }
   0x4   : > { %p138_p2 = pnand %p673_p0, %p137_p1 }
   0x5   : > { %p161_p3 = scmp.lt.s32.totalorder (!%p138_p2), %s669_s13, 1  ;;  %s817_s24 = smov (!%p138_p2), 64  }
   0x6   : > { %141 = sbr.rel (%p138_p2) target bundleno = 414 (0x19e), region = 32  ;;  %s818_s25 = smov (!%p138_p2), 96  }
   0x7   : > { %s819_s26 = smov (!%p138_p2), 32  }
   0xb   : > { %v781_v0 = vld [vmem:[%s996_s1 + $0x38] sm:$0xff]   ;;  %v816_v1 = vmov 0   ;;  %v782_v2 = vld [vmem:[%s996_s1 + $0x80] sm:$0xff]   ;;  %v783_v3 = vld [vmem:[%s996_s1 + $0x30] sm:$0xff]   ;;  %s1000_s13 = smov (!%p161_p3, %s669_s13), 1  ;;  %vm254_vm0 = vcmask 130048  }
   0xc   : > { %261 = vmatprep.subr.bf16.mxu0 %v816_v1  ;;  %381 = vmatprep.subr.bf16.mxu1 %v816_v1  ;;  %v784_v4 = vld [vmem:[%s996_s1 + $0x78] sm:$0xff]   ;;  %v785_v5 = vld [vmem:[%s996_s1 + $0x28] sm:$0xff]   ;;  %v786_v6 = vld [vmem:[%s996_s1 + $0x70] sm:$0xff]   ;;  %s768_s30 = smul.u32 48, %s1000_s13  ;;  %vm432_vm1 = vcmask 1046528   ;;  %vm566_vm2 = vcmask 1045504  }
   0xd   : > { %262 = vmatpush1.bf16.msra.mxu0 %v781_v0  ;;  %382 = vmatpush1.bf16.msra.mxu1 %v782_v2  ;;  %v787_v7 = vld [vmem:[%s996_s1 + $0x20] sm:$0xff]   ;;  %v788_v8 = vld [vmem:[%s996_s1 + $0x68] sm:$0xff]   ;;  %v789_v9 = vld [vmem:[%s996_s1 + $0x18] sm:$0xff]   ;;  %s749_s27 = sshll.u32 %s1000_s13, 4  ;;  %vm611_vm3 = vcmask 261120  }
   0xe   : > { %263 = vmatprep.subr.bf16.mxu0 %v816_v1  ;;  %383 = vmatprep.subr.bf16.mxu1 %v816_v1  ;;  %v790_v10 = vld [vmem:[%s996_s1 + $0x60] sm:$0xff]   ;;  %s893_s10 = scalar_lea.vmem %s995_s0, %s768_s30  ;;  %v791_v11 = vld [vmem:[%s996_s1 + $0x10] sm:$0xff]   ;;  %v792_v14 = vld [vmem:[%s996_s1 + $0x58] sm:$0xff]   ;;  %s170_s30 = scalar_lea.vmem %s998_s3, %s749_s27 }
   0xf   : > { %v173_v12 = vld [vmem:[%s893_s10 + $0x8] sm:$0xff]  ;;  %v175_v13 = vld [vmem:[%s893_s10 + $0x18] sm:$0xff]  ;;  %v794_v17 = vld [vmem:[%s996_s1 + $0x50] sm:$0xff]  }
  0x10   : > { %v179_v15 = vpack.c.bf16 %v175_v13, %v173_v12  ;;  %v793_v16 = vld [vmem:[%s996_s1 + $0x8] sm:$0xff]   ;;  %v795_v18 = vld [vmem:[%s996_s1] sm:$0xff]   ;;  %v174_v22 = vld [vmem:[%s893_s10 + $0x10] sm:$0xff] }
  0x11   : > { %264 = vmatpush1.bf16.msra.mxu0 %v783_v3  ;;  %384 = vmatpush1.bf16.msra.mxu1 %v784_v4  ;;  %v796_v19 = vld [vmem:[%s996_s1 + $0x48] sm:$0xff]   ;;  %v797_v20 = vld [vmem:[%s996_s1 + $0x40] sm:$0xff]   ;;  %v801_v31 = vld [vmem:[%s996_s1 + $0xb8] sm:$0xff]  }
  0x12   : > { %265 = vmatprep.subr.bf16.mxu0 %v816_v1  ;;  %385 = vmatprep.subr.bf16.mxu1 %v816_v1  ;;  %v172_v21 = vld [vmem:[%s893_s10] sm:$0xff]  ;;  %v798_v23 = vld [vmem:[%s996_s1 + $0x88] sm:$0xff]   ;;  %v802_v32 = vld [vmem:[%s996_s1 + $0xb0] sm:$0xff]  }
  0x13   : > { %686 = vmatprep.mubr.msk.bf16.mxu0 %vm254_vm0, %v179_v15  ;;  %715 = vmatprep.mubr.msk.bf16.mxu1 %vm254_vm0, %v179_v15  ;;  %v178_v24 = vpack.c.bf16 %v174_v22, %v172_v21  ;;  %v177_v25 = vld [vmem:[%s893_s10 + $0x28] sm:$0x3]  ;;  %v800_v28 = vld [vmem:[%s996_s1 + $0xc0] sm:$0xff]   ;;  %v805_v35 = vld [vmem:[%s996_s1 + $0x98] sm:$0xff]  }
  0x14   : > { %v799_v26 = vld [vmem:[%s996_s1 + $0xc8] sm:$0xff]   ;;  %v181_v27 = vpack.c.bf16 %v177_v25, %v177_v25  ;;  %v176_v29 = vld [vmem:[%s893_s10 + $0x20] sm:$0x3]  ;;  %v806_v36 = vld [vmem:[%s996_s1 + $0x90] sm:$0xff]  }
  0x15   : > { %266 = vmatpush1.bf16.msra.mxu0 %v785_v5  ;;  %386 = vmatpush1.bf16.msra.mxu1 %v786_v6  ;;  %v180_v30 = vpack.c.bf16 %v176_v29, %v176_v29  ;;  %v803_v33 = vld [vmem:[%s996_s1 + $0xa8] sm:$0xff]   ;;  %v804_v34 = vld [vmem:[%s996_s1 + $0xa0] sm:$0xff]   ;;  %v807_v37 = vld [vmem:[%s996_s1 + $0xd0] sm:$0xff]  }
  0x16   : > { %267 = vmatprep.subr.bf16.mxu0 %v816_v1  ;;  %387 = vmatprep.subr.bf16.mxu1 %v816_v1 }
  0x19   : > { %268 = vmatpush1.bf16.msra.mxu0 %v787_v7  ;;  %388 = vmatpush1.bf16.msra.mxu1 %v788_v8 }
  0x1a   : > { %269 = vmatprep.subr.bf16.mxu0 %v816_v1  ;;  %389 = vmatprep.subr.bf16.mxu1 %v816_v1 }
  0x1d   : > { %270 = vmatpush1.bf16.msra.mxu0 %v789_v9  ;;  %390 = vmatpush1.bf16.msra.mxu1 %v790_v10  ;;  %v746_v9 = vld [vmem:[%s997_s2] ss:$0 sm:$0xff] }
  0x1e   : > { %271 = vmatprep.subr.bf16.mxu0 %v816_v1  ;;  %391 = vmatprep.subr.bf16.mxu1 %v816_v1 }
  0x21   : > { %272 = vmatpush1.bf16.msra.mxu0 %v791_v11  ;;  %392 = vmatpush1.bf16.msra.mxu1 %v792_v14 }
  0x22   : > { %273 = vmatprep.subr.bf16.mxu0 %v816_v1  ;;  %393 = vmatprep.subr.bf16.mxu1 %v816_v1 }
  0x25   : > { %274 = vmatpush1.bf16.msra.mxu0 %v793_v16  ;;  %394 = vmatpush1.bf16.msra.mxu1 %v794_v17 }
  0x26   : > { %275 = vmatprep.subr.bf16.mxu0 %v816_v1  ;;  %395 = vmatprep.subr.bf16.mxu1 %v816_v1 }
  0x29   : > { %276 = vmatpush1.bf16.msra.mxu0 %v795_v18  ;;  %396 = vmatpush1.bf16.msra.mxu1 %v796_v19 }
  0x2a   : > { %291 = vmatprep.subr.bf16.mxu0 %v816_v1  ;;  %411 = vmatprep.subr.bf16.mxu1 %v816_v1 }
  0x2d   : > { %292 = vmatpush2.bf16.msra.mxu0 %v797_v20  ;;  %412 = vmatpush2.bf16.msra.mxu1 %v798_v23 }
  0x2e   : > { %515 = vmatprep.subr.bf16.mxu0 %v816_v1  ;;  %750 = vmatprep.subr.bf16.mxu1 %v816_v1 }
  0x30   : > { %294 = vmatmul.mubr.bf16.vlgmr.msra.gmra.mxu0 %v178_v24  ;;  %414 = vmatmul.mubr.bf16.vlgmr.msra.gmra.mxu1 %v178_v24 }
  0x31   : > { %516 = vmatpush1.bf16.msra.mxu0 %v799_v26  ;;  %759 = vmatpush1.bf16.msra.mxu1 %v799_v26 }
  0x32   : > { %517 = vmatprep.subr.bf16.mxu0 %v816_v1  ;;  %751 = vmatprep.subr.bf16.mxu1 %v816_v1 }
  0x33   : > { %716 = vmatprep.mubr.msk.bf16.mxu1 %vm254_vm0, %v181_v27  ;;  %687 = vmatprep.mubr.msk.bf16.mxu0 %vm254_vm0, %v181_v27 }
  0x35   : > { %518 = vmatpush1.bf16.msra.mxu0 %v800_v28  ;;  %760 = vmatpush1.bf16.msra.mxu1 %v800_v28 }
  0x36   : > { %519 = vmatprep.subr.bf16.mxu0 %v816_v1  ;;  %752 = vmatprep.subr.bf16.mxu1 %v816_v1 }
  0x38   : > { %302 = vmatmul.mubr.bf16.gmra.mxu0 %v180_v30  ;;  %422 = vmatmul.mubr.bf16.gmra.mxu1 %v180_v30 }
  0x39   : > { %520 = vmatpush1.bf16.msra.mxu0 %v801_v31  ;;  %761 = vmatpush1.bf16.msra.mxu1 %v801_v31 }
  0x3a   : > { %521 = vmatprep.subr.bf16.mxu0 %v816_v1  ;;  %753 = vmatprep.subr.bf16.mxu1 %v816_v1 }
  0x3b   : > { %744 = vmatprep.mubr.msk.bf16.mxu0 %vm254_vm0, %v179_v15  ;;  %745 = vmatprep.mubr.msk.bf16.mxu1 %vm254_vm0, %v181_v27 }
  0x3d   : > { %522 = vmatpush1.bf16.msra.mxu0 %v802_v32  ;;  %762 = vmatpush1.bf16.msra.mxu1 %v802_v32 }
  0x3e   : > { %523 = vmatprep.subr.bf16.mxu0 %v816_v1  ;;  %754 = vmatprep.subr.bf16.mxu1 %v816_v1 }
  0x41   : > { %524 = vmatpush1.bf16.msra.mxu0 %v803_v33  ;;  %763 = vmatpush1.bf16.msra.mxu1 %v803_v33 }
  0x42   : > { %525 = vmatprep.subr.bf16.mxu0 %v816_v1  ;;  %755 = vmatprep.subr.bf16.mxu1 %v816_v1 }
  0x45   : > { %526 = vmatpush1.bf16.msra.mxu0 %v804_v34  ;;  %764 = vmatpush1.bf16.msra.mxu1 %v804_v34 }
  0x46   : > { %527 = vmatprep.subr.bf16.mxu0 %v816_v1  ;;  %756 = vmatprep.subr.bf16.mxu1 %v816_v1 }
  0x49   : > { %528 = vmatpush1.bf16.msra.mxu0 %v805_v35  ;;  %765 = vmatpush1.bf16.msra.mxu1 %v805_v35 }
  0x4a   : > { %529 = vmatprep.subr.bf16.mxu0 %v816_v1  ;;  %757 = vmatprep.subr.bf16.mxu1 %v816_v1 }
  0x4d   : > { %530 = vmatpush1.bf16.msra.mxu0 %v806_v36  ;;  %766 = vmatpush1.bf16.msra.mxu1 %v806_v36 }
  0x4e   : > { %545 = vmatprep.subr.bf16.mxu0 %v816_v1  ;;  %758 = vmatprep.subr.bf16.mxu1 %v816_v1 }
  0x51   : > { %546 = vmatpush2.bf16.msra.mxu0 %v807_v37  ;;  %767 = vmatpush2.bf16.msra.mxu1 %v807_v37 }
  0x54   : > { %548 = vmatmul.mubr.bf16.vlgmr.msra.gmra.mxu0 %v178_v24  ;;  %556 = vmatmul.mubr.bf16.vlgmr.msra.gmra.mxu1 %v180_v30 }
  0xf0   : > { %v295_v38 = vpop.f32.mrf.mxu0  ;;  %v415_v39 = vpop.f32.mrf.mxu1 }
  0xf1   : > { %v433_v54 = vrot.slane %v415_v39, 1 }
  0xf2   : > { %v297_v40 = vpop.f32.mrf.mxu0  ;;  %v417_v41 = vpop.f32.mrf.mxu1 }
  0xf4   : > { %v298_v42 = vpop.f32.mrf.mxu0  ;;  %v418_v43 = vpop.f32.mrf.mxu1 }
  0xf5   : > { %v434_v55 = vrot.slane %v418_v43, 1 }
  0xf6   : > { %v300_v44 = vpop.f32.mrf.mxu0  ;;  %v420_v45 = vpop.f32.mrf.mxu1 }
  0xf7   : > { %v435_v60 = vsel %vm432_vm1, %v433_v54, %v434_v55 }
  0xf8   : > { %v303_v46 = vpop.f32.mrf.mxu0  ;;  %v423_v47 = vpop.f32.mrf.mxu1  ;;  %v440_v4 = vadd.f32 %v435_v60, %v295_v38 }
  0xf9   : > { %v436_v57 = vrot.slane %v423_v47, 1 }
  0xfa   : > { %v304_v48 = vpop.f32.mrf.mxu0  ;;  %v425_v49 = vpop.f32.mrf.mxu1 }
  0xfb   : > { %v437_v0 = vsel %vm432_vm1, %v434_v55, %v436_v57 }
  0xfc   : > { %v305_v50 = vpop.f32.mrf.mxu0  ;;  %v426_v51 = vpop.f32.mrf.mxu1  ;;  %v441_v10 = vadd.f32 %v437_v0, %v298_v42 }
  0xfe   : > { %v306_v52 = vpop.f32.mrf.mxu0  ;;  %v427_v53 = vpop.f32.mrf.mxu1 }
 0x114   : > { %v549_v56 = vpop.f32.mrf.mxu0  ;;  %v557_v58 = vpop.f32.mrf.mxu1 }
 0x115   : > { %v570_v61 = vrot.slane %v557_v58, 2  ;;  %v567_v1 = vrot.slane %v549_v56, 2 }
 0x116   : > { %v551_v59 = vpop.f32.mrf.mxu0  ;;  %v559_v62 = vpop.f32.mrf.mxu1 }
 0x118   : > { %v552_v63 = vpop.f32.mrf.mxu0  ;;  %v560_v3 = vpop.f32.mrf.mxu1 }
 0x119   : > { %v568_v2 = vrot.slane %v552_v63, 2 }
 0x11a   : > { %v554_v5 = vpop.f32.mrf.mxu0  ;;  %v561_v8 = vpop.f32.mrf.mxu1 }
 0x11b   : > { %v569_v6 = vsel %vm566_vm2, %v567_v1, %v568_v2  ;;  %v571_v7 = vsel %vm566_vm2, %v568_v2, %v570_v61 }
 0x11c   : > { %v574_v11 = vadd.f32 %v569_v6, %v440_v4  ;;  %v575_v12 = vadd.f32 %v571_v7, %v441_v10 }
 0x11e   : > { %v583_v13 = vadd.f32 %v746_v9, %v574_v11  ;;  %v584_v14 = vadd.f32 %v746_v9, %v575_v12 }
 0x120   : > { %595 = vrot.lane.b32.xlu1 %v583_v13, %s817_s24  ;;  %587 = vrot.lane.b32.xlu0 %v583_v13, %s818_s25 }
 0x124   : > { %597 = vrot.lane.b32.xlu1 %v584_v14, %s817_s24  ;;  %589 = vrot.lane.b32.xlu0 %v584_v14, %s818_s25 }
 0x128   : > { %605 = vrot.lane.b32.xlu1 %v584_v14, %s819_s26  ;;  %603 = vrot.lane.b32.xlu0 %v583_v13, %s819_s26 }
 0x192   : > { %v596_v15 = vpop.permute.xlu1 %595  ;;  %v588_v16 = vpop.permute.xlu0 %587 }
 0x193   : > { %v593_v17 = vmax.f32 %v583_v13, %v588_v16 }
 0x195   : > { %v601_v22 = vmax.f32 %v593_v17, %v596_v15 }
 0x196   : > { %v598_v18 = vpop.permute.xlu1 %597  ;;  %v590_v19 = vpop.permute.xlu0 %589 }
 0x197   : > { %v594_v20 = vmax.f32 %v584_v14, %v590_v19 }
 0x199   : > { %v602_v21 = vmax.f32 %v594_v20, %v598_v18 }
 0x19a   : > { %v606_v23 = vpop.permute.xlu1 %605  ;;  %v604_v24 = vpop.permute.xlu0 %603 }
 0x19b   : > { %v610_v25 = vmax.f32 %v602_v21, %v606_v23  ;;  %v609_v26 = vmax.f32 %v601_v22, %v604_v24 }
 0x19d   : > { %613 = vst.msk [vmem:[%s170_s30 + $0x8] sm:$0xff] %vm611_vm3, %v610_v25  ;;  %612 = vst.msk [vmem:[%s170_s30] sm:$0xff] %vm611_vm3, %v609_v26 }
 0x19e PF: > { %s13_s12 = sadd.s32 1, %s814_s12  }
 0x19f   : > { %p10_p4 = scmp.ge.s32.totalorder %s13_s12, 4  }
 0x1a1   :  { %12 = sbr.rel (!%p10_p4) target bundleno = 1 (0x1), region = 64 }

// kernel: tile.44
= control target key start
LH: loop header
LB: loop body
LE: loop exit
PB: predicated region body
PF: predicated region fallthrough
CT: control target
= control target key end

     0   :  { %s22_s0 = inlined_call_operand.vmem [shape: f32[8], index: 0, kind: input, shape index: {}]   ;;  %s23_s1 = inlined_call_operand.vmem [shape: f32[4,8], index: 1, kind: output, shape index: {}]  }
   0x1   :  { %v4_v0 = vld [vmem:[%s22_s0] ss:$0 sm:$0xff] }
   0x2   :  { %5 = vst [vmem:[%s23_s1] sm:$0xf] %v4_v0 }

// kernel: tile.45
= control target key start
LH: loop header
LB: loop body
LE: loop exit
PB: predicated region body
PF: predicated region fallthrough
CT: control target
= control target key end

     0   :  { %vm8_vm0 = vcmask 64512   ;;  %s40_s8 = smov 8   ;;  %s41_s9 = smov 16   ;;  %vm14_vm1 = vcmask 261312   ;;  %vm20_vm2 = vcmask 195712   ;;  %vm26_vm3 = vcmask 130112   ;;  %s58_s0 = inlined_call_operand.vmem [shape: f32[4,8], index: 0, kind: input, shape index: {}]   ;;  %s59_s1 = inlined_call_operand.vmem [shape: f32[1,32], index: 1, kind: output, shape index: {}]  }
   0x1   :  { %v5_v0 = vld [vmem:[%s58_s0] sm:$0xf]  ;;  %s39_s0 = smov 24  }
   0x2   :  { %6 = vst [vmem:[#allocation1] sm:$0xf] %v5_v0 }
   0x9   :  { %v11_v1 = vld [vmem:[#allocation1 + $0x3] sm:$0x1]   ;;  %v23_v2 = vld [vmem:[#allocation1 + $0x1] sm:$0x1]   ;;  %v7_v3 = vld [vmem:[#allocation1] sm:$0x1]  }
   0xa   :  { %12 = vrot.lane.b32.xlu0 %v11_v1, %s39_s0  ;;  %24 = vrot.lane.b32.xlu1 %v23_v2, %s40_s8  ;;  %v17_v4 = vld [vmem:[#allocation1 + $0x2] sm:$0x1]   ;;  %9 = vst.msk [vmem:[#allocation0] sm:$0x1] %vm8_vm0, %v7_v3  }
   0xe   :  { %18 = vrot.lane.b32.xlu0 %v17_v4, %s41_s9 }
  0x7c   :  { %v13_v5 = vpop.permute.xlu0 %12   ;;  %v25_v6 = vpop.permute.xlu1 %24  }
  0x7d   :  { %15 = vst.msk [vmem:[#allocation0] sm:$0x1] %vm14_vm1, %v13_v5  }
  0x80   :  { %v19_v7 = vpop.permute.xlu0 %18  }
  0x81   :  { %21 = vst.msk [vmem:[#allocation0] sm:$0x1] %vm20_vm2, %v19_v7  }
  0x82   :  { %27 = vst.msk [vmem:[#allocation0] sm:$0x1] %vm26_vm3, %v25_v6  }
  0x89   :  { %v32_v8 = vld [vmem:[#allocation0] sm:$0x1] }
  0x8a   :  { %35 = vst [vmem:[%s59_s1] sm:$0x1] %v32_v8 }

// kernel: prednet_forward.20
= control target key start
LH: loop header
LB: loop body
LE: loop exit
PB: predicated region body
PF: predicated region fallthrough
CT: control target
= control target key end

     0   :  { %12 = vsyncpa [#allocation3], 0  ;;  %s1052_s0 = inlined_call_operand.vmem [shape: f32[2,6,48], index: 0, kind: input, shape index: {}]   ;;  %s1053_s1 = inlined_call_operand.vmem [shape: f32[2,4,32], index: 1, kind: input, shape index: {}]   ;;  %s1054_s2 = inlined_call_operand.vmem [shape: bf16[3,48,32], index: 2, kind: input, shape index: {}]   ;;  %s1055_s3 = inlined_call_operand.vmem [shape: f32[1,32], index: 3, kind: input, shape index: {}]   ;;  %s1056_s4 = inlined_call_operand.hbm [shape: f32[2,4,32], index: 4, kind: output, shape index: {0}]   ;;  %s1057_s5 = inlined_call_operand.vmem [shape: f32[2,4,32], index: 5, kind: output, shape index: {1}]   ;;  %s1058_s6 = inlined_call_operand.vmem [shape: f32[2,4,32], index: 6, kind: output, shape index: {2}]  }
   0x1   :  { %14 = vsyncpa [#allocation3 + $0x1], 0  ;;  %s889_s21 = smov 0   ;;  %s891_s22 = smov 0  }
   0x2   :  { %s893_s23 = smov 0   ;;  %s895_s24 = smov 0  }
   0x3 LB: > { %s910_s25 = sadd.s32 4294967295, %s849_s24   ;;  %s659_s26 = sadd.s32 4294967294, %s849_s24   ;;  %s849_s24 = sphi %s895_s24, %s1064_s24   ;;  %s845_s23 = sphi %s893_s23, %s1063_s23   ;;  %s841_s22 = sphi %s891_s22, %s1062_s22   ;;  %s837_s21 = sphi %s889_s21, %s1061_s21  }
   0x4   : > { %s914_s27 = sadd.s32 1, %s849_s24   ;;  %s121_s28 = sadd.s32 1, %s845_s23 }
   0x5   : > { %s118_s29 = ssub.s32 %s849_s24, %s914_s27  ;;  %p131_p0 = scmp.ne.s32.totalorder %s845_s23, %s841_s22 }
   0x6   : > { %p119_p1 = scmp.eq.s32.totalorder %s118_s29, 0  ;;  %p132_p2 = scmp.eq.s32.totalorder %s910_s25, 1 }
   0x7   : > { %p137_p3 = scmp.ne.s32.totalorder %s841_s22, %s837_s21  ;;  %p138_p4 = scmp.eq.s32.totalorder %s659_s26, 1 }
   0x8   : > { %s925_s30 = scalar_select %p119_p1, %s845_s23, %s121_s28  }
   0x9   : > { %p927_p5 = por %p132_p2, %p131_p0  ;;  %p931_p6 = por %p138_p4, %p137_p3 }
   0xa   : > { %p662_p7 = scmp.ge.s32.totalorder %s849_s24, 1  ;;  %p228_p8 = scmp.lt.s32.totalorder %s849_s24, 3 }
   0xc   : > { %p229_p9 = pnand %p662_p7, %p228_p8 }
   0xd   : > { %p269_p10 = scmp.lt.s32.totalorder (!%p229_p9), %s910_s25, 1  ;;  %s254_s18 = sand.u32 (!%p229_p9), 1, %s841_s22  }
   0xe   : > { %232 = sbr.rel (%p229_p9) target bundleno = 260 (0x104), region = 36  ;;  %s513_s9 = scalar_lea.sflag (!%p229_p9), [#allocation3], %s254_s18 }
  0x13   : > { %v780_v0 = vld [vmem:[%s1054_s2 + $0x10] sm:$0xff]   ;;  %v851_v1 = vmov 0.0   ;;  %v781_v2 = vld [vmem:[%s1054_s2 + $0x28] sm:$0xff]   ;;  %vm852_vm0 = vmmov 0   ;;  %v783_v4 = vld [vmem:[%s1054_s2 + $0x20] sm:$0xff]   ;;  %s953_s17 = scalar_select %p269_p10, %s910_s25, 1 }
  0x14   : > { %709 = vmatprep.subr.bf16.mxu0 %v851_v1  ;;  %719 = vmatprep.subr.bf16.mxu1 %v851_v1  ;;  %v782_v3 = vld [vmem:[%s1054_s2 + $0x8] sm:$0xff]   ;;  %v784_v5 = vld [vmem:[%s1054_s2] sm:$0xff]   ;;  %v785_v6 = vld [vmem:[%s1054_s2 + $0x18] sm:$0xff]   ;;  %vm312_vm1 = vcmask 392192   ;;  %vm504_vm2 = vcmask 257024  }
  0x15   : > { %710 = vmatpush3.bf16.msra.mxu0 %v780_v0  ;;  %715 = vmatprep.mubr.msk.bf16.mxu0 %vm852_vm0, %v851_v1  ;;  %s664_s20 = sshll.u32 %s953_s17, 3  ;;  %v786_v9 = vld [vmem:[%s1054_s2 + $0x40] sm:$0xff]   ;;  %v787_v10 = vld [vmem:[%s1054_s2 + $0x38] sm:$0xff]   ;;  %v788_v11 = vld [vmem:[%s1054_s2 + $0x30] sm:$0xff]   ;;  %s977_s19 = sshll.u32 %s953_s17, 2 }
  0x16   : > { %720 = vmatpush3.bf16.msra.mxu1 %v781_v2  ;;  %711 = vmatprep.subr.bf16.mxu0 %v851_v1  ;;  %s272_s10 = scalar_lea.vmem %s1052_s0, %s664_s20  ;;  %s663_s20 = sshll.u32 %s254_s18, 2  ;;  %v692_v24 = vld [vmem:[%s1055_s3] ss:$0 sm:$0xff] }
  0x17   : > { %721 = vmatprep.subr.bf16.mxu1 %v851_v1  ;;  %725 = vmatprep.mubr.msk.bf16.mxu1 %vm852_vm0, %v851_v1  ;;  %v286_v7 = vld [vmem:[%s272_s10] sm:$0x3f]  ;;  %s276_s10 = scalar_lea.vmem %s1053_s1, %s977_s19  ;;  %s694_s17 = sshll.u32 %s910_s25, 6 }
  0x18   : > { %v287_v8 = vpack.c.bf16 %v286_v7, %v286_v7  ;;  %s256_s11 = scalar_lea.vmem [#allocation2], %s663_s20  ;;  %v503_v29 = vld [vmem:[%s276_s10] sm:$0xf]  ;;  %s990_s15 = scalar_lea.hbm %s1056_s4, %s694_s17 }
  0x19   : > { %712 = vmatpush3.bf16.msra.mxu0 %v782_v3  ;;  %s534_s12 = sshll.u32 %s256_s11, 4  ;;  %s280_s20 = scalar_lea.vmem %s1057_s5, %s977_s19  ;;  %s992_s12 = int_to_ptr.vmem [resolvable:$true] %s534_s12 }
  0x1a   : > { %722 = vmatpush3.bf16.msra.mxu1 %v783_v4  ;;  %713 = vmatprep.subr.bf16.mxu0 %v851_v1  ;;  %s284_s29 = scalar_lea.vmem %s1058_s6, %s977_s19  ;;  %s789_s10 = scalar_lea.vmem %s992_s12, 64 }
  0x1b   : > { %723 = vmatprep.subr.bf16.mxu1 %v851_v1  ;;  %p790_p11 = scmp.ne.s32.totalorder %s992_s12, %s789_s10  ;;  %s853_s17 = smov [#allocation2]  }
  0x1c   : > { %s793_s13 = sshll.u32 %s853_s17, 4  ;;  %s794_s13 = int_to_ptr.vmem [resolvable:$false] %s793_s13 }
  0x1d   : > { %714 = vmatpush3.bf16.msra.mxu0 %v784_v5  ;;  %p791_p12 = pnand %p790_p11, %p927_p5  ;;  %s795_s14 = scalar_lea.vmem %s794_s13, 128 }
  0x1e   : > { %724 = vmatpush3.bf16.msra.mxu1 %v785_v6  ;;  %729 = vmatprep.subr.bf16.mxu0 %v851_v1  ;;  %p796_p0 = scmp.lt.s32.totalorder %s992_s12, %s794_s13  ;;  %p797_p1 = scmp.lt.s32.totalorder %s795_s14, %s789_s10 }
  0x1f   : > { %p792_p13 = pneg %p791_p12 }
  0x20   : > { %716 = vmatmul.mubr.msk.bf16.vlgmr.msra.gmra.mxu0 %vm312_vm1, %v287_v8  ;;  %p798_p2 = por %p797_p1, %p796_p0 }
  0x21   : > { %726 = vmatmul.mubr.msk.bf16.vlgmr.msra.gmra.mxu1 %vm312_vm1, %v287_v8  ;;  %730 = vmatpush3.bf16.msra.mxu0 %v786_v9 }
  0x22   : > { %731 = vmatprep.subr.bf16.mxu0 %v851_v1  ;;  %735 = vmatprep.mubr.msk.bf16.mxu0 %vm852_vm0, %v851_v1  ;;  %p799_p3 = pnand %p798_p2, %p792_p13 }
  0x25   : > { %732 = vmatpush3.bf16.msra.mxu0 %v787_v10 }
  0x26   : > { %733 = vmatprep.subr.bf16.mxu0 %v851_v1 }
  0x29   : > { %734 = vmatpush3.bf16.msra.mxu0 %v788_v11 }
  0x2c   : > { %736 = vmatmul.mubr.msk.bf16.vlgmr.msra.gmra.mxu0 %vm312_vm1, %v287_v8 }
  0xe0   : > { %v350_v12 = vpop.f32.mrf.mxu0 }
  0xe1   : > { %v415_v13 = vpop.f32.mrf.mxu1 }
  0xe2   : > { %v717_v14 = vpop.f32.mrf.mxu0  ;;  %v422_v20 = vrot.slane %v415_v13, 1 }
  0xe3   : > { %v727_v15 = vpop.f32.mrf.mxu1 }
  0xe4   : > { %v353_v16 = vpop.f32.mrf.mxu0  ;;  %v424_v22 = vadd.f32 %v422_v20, %v350_v12 }
  0xe5   : > { %v418_v17 = vpop.f32.mrf.mxu1 }
  0xe6   : > { %v718_v18 = vpop.f32.mrf.mxu0 }
  0xe7   : > { %v728_v19 = vpop.f32.mrf.mxu1 }
  0xec   : > { %v484_v21 = vpop.f32.mrf.mxu0 }
  0xed   : > { %v491_v23 = vrot.slane %v484_v21, 2 }
  0xee   : > { %v737_v25 = vpop.f32.mrf.mxu0 }
  0xef   : > { %v493_v26 = vadd.f32 %v491_v23, %v424_v22 }
  0xf0   : > { %v487_v27 = vpop.f32.mrf.mxu0 }
  0xf1   : > { %v501_v28 = vadd.f32 %v692_v24, %v493_v26 }
  0xf2   : > { %v738_v30 = vpop.f32.mrf.mxu0 }
  0xf3   : > { %v502_v31 = vmax.f32 %v501_v28, 0.0 }
  0xf5   : > { %v506_v32 = vsub.f32 %v502_v31, %v503_v29  ;;  %v509_v33 = vsub.f32 %v503_v29, %v502_v31  ;;  %505 = vst.msk [vmem:[%s256_s11] sm:$0xf] %vm504_vm2, %v502_v31 }
  0xf6   : > { %802 = shalt.err (!%p799_p3)
}
  0xf7   : > { %s803_s11 = scalar_lea.hbm %s990_s15, 64  ;;  %s807_s16 = scalar_lea.hbm %s1056_s4, 128 }
  0xf8   : > { %p804_p4 = scmp.ne.s32.totalorder %s990_s15, %s803_s11  ;;  %p808_p9 = scmp.lt.s32.totalorder %s990_s15, %s1056_s4 }
  0xf9   : > { %p809_p10 = scmp.lt.s32.totalorder %s807_s16, %s803_s11 }
  0xfa   : > { %p805_p7 = pnand %p804_p4, %p927_p5 }
  0xfb   : > { %p810_p11 = por %p809_p10, %p808_p9 }
  0xfc   : > { %p806_p8 = pneg %p805_p7 }
  0xfe   : > { %p811_p12 = pnand %p810_p11, %p806_p8 }
 0x100   : > { %814 = shalt.err (!%p811_p12)
}
 0x101   : > { %739 = dma.vmem_to_hbm [thread:$0]  (%p927_p5), %s992_s12, 64, %s990_s15, %s513_s9   ;;  %v507_v34 = vmax.f32 %v506_v32, 0.0  ;;  %v510_v35 = vmax.f32 %v509_v33, 0.0 }
 0x103   : > { %508 = vst.msk [vmem:[%s280_s20] sm:$0xf] %vm504_vm2, %v507_v34  ;;  %511 = vst.msk [vmem:[%s284_s29] sm:$0xf] %vm504_vm2, %v510_v35 }
 0x104 PF: > { %p745_p13 = scmp.ge.s32.totalorder %s849_s24, 2  ;;  %s552_s7 = sand.u32 1, %s837_s21  }
 0x105   : > { %s553_s12 = scalar_lea.sflag [#allocation3], %s552_s7 }
 0x106   : > { %p742_p5 = pnand %p745_p13, %p931_p6 }
 0x108   : > { %p743_p0 = pneg %p742_p5 }
 0x10a   : > { %832 = dma.done.wait (%p743_p0), %s553_s12, 64  }
 0x10b   : > { %834 = vsyncadd (%p743_p0), %s553_s12, 4294967232  ;;  %p17_p1 = scmp.ge.s32.totalorder %s914_s27, 4   ;;  %s1061_s21 = smov %s841_s22 }
 0x10c   : > { %s1062_s22 = smov %s845_s23  ;;  %s1063_s23 = smov %s925_s30 }
 0x10d   : > { %s1064_s24 = smov %s914_s27  ;;  %19 = sbr.rel (!%p17_p1) target bundleno = 3 (0x3), region = 100 }
 0x112   :  { %572 = vsyncpa [#allocation3], 1 }
 0x113   :  { %574 = vsyncpa [#allocation3 + $0x1], 1 }

// kernel: prednet_forward.29
= control target key start
LH: loop header
LB: loop body
LE: loop exit
PB: predicated region body
PF: predicated region fallthrough
CT: control target
= control target key end

     0   :  { %11 = vsyncpa [#allocation3], 0  ;;  %s1247_s0 = inlined_call_operand.vmem [shape: f32[2,6,144], index: 0, kind: input, shape index: {}]   ;;  %s1248_s1 = inlined_call_operand.vmem [shape: f32[2,4,32], index: 1, kind: input, shape index: {}]   ;;  %s1249_s2 = inlined_call_operand.vmem [shape: bf16[3,144,128], index: 2, kind: input, shape index: {}]   ;;  %s1250_s3 = inlined_call_operand.vmem [shape: f32[1,128], index: 3, kind: input, shape index: {}]   ;;  %s1251_s4 = inlined_call_operand.vmem [shape: f32[2,4,32], index: 4, kind: output, shape index: {0}]   ;;  %s1252_s5 = inlined_call_operand.hbm [shape: f32[2,4,32], index: 5, kind: output, shape index: {1}]  }
   0x1   :  { %13 = vsyncpa [#allocation3 + $0x1], 0  ;;  %s1027_s18 = smov 0   ;;  %s1029_s19 = smov 0  }
   0x2   :  { %s1031_s20 = smov 0   ;;  %s1033_s21 = smov 0  }
   0x3 LB: > { %s1048_s22 = sadd.s32 4294967295, %s990_s21   ;;  %s770_s23 = sadd.s32 4294967294, %s990_s21   ;;  %s990_s21 = sphi %s1033_s21, %s1258_s21   ;;  %s986_s20 = sphi %s1031_s20, %s1257_s20   ;;  %s982_s19 = sphi %s1029_s19, %s1256_s19   ;;  %s978_s18 = sphi %s1027_s18, %s1255_s18  }
   0x4   : > { %s1052_s24 = sadd.s32 1, %s990_s21   ;;  %s146_s25 = sadd.s32 1, %s986_s20 }
   0x5   : > { %s143_s26 = ssub.s32 %s990_s21, %s1052_s24  ;;  %p156_p0 = scmp.ne.s32.totalorder %s986_s20, %s982_s19 }
   0x6   : > { %p144_p1 = scmp.eq.s32.totalorder %s143_s26, 0  ;;  %p157_p2 = scmp.eq.s32.totalorder %s1048_s22, 1 }
   0x7   : > { %p162_p3 = scmp.ne.s32.totalorder %s982_s19, %s978_s18  ;;  %p163_p4 = scmp.eq.s32.totalorder %s770_s23, 1 }
   0x8   : > { %s1063_s27 = scalar_select %p144_p1, %s986_s20, %s146_s25  }
   0x9   : > { %p1065_p5 = por %p157_p2, %p156_p0  ;;  %p1069_p6 = por %p163_p4, %p162_p3 }
   0xa   : > { %p773_p7 = scmp.ge.s32.totalorder %s990_s21, 1  ;;  %p202_p8 = scmp.lt.s32.totalorder %s990_s21, 3 }
   0xc   : > { %p203_p9 = pnand %p773_p7, %p202_p8 }
   0xd   : > { %p238_p10 = scmp.lt.s32.totalorder (!%p203_p9), %s1048_s22, 1  ;;  %s993_s9 = smov (!%p203_p9), 64  }
   0xe   : > { %206 = sbr.rel (%p203_p9) target bundleno = 786 (0x312), region = 36  ;;  %s994_s10 = smov (!%p203_p9), 32  }
   0xf   : > { %s995_s11 = smov (!%p203_p9), 96   ;;  %s235_s12 = sand.u32 (!%p203_p9), 1, %s982_s19  }
  0x10   : > { %s774_s14 = sshll.u32 (!%p203_p9), %s235_s12, 2  ;;  %s848_s16 = sshll.u32 (!%p203_p9), %s1048_s22, 6 }
  0x11   : > { %s237_s15 = scalar_lea.vmem (!%p203_p9), [#allocation2], %s774_s14  ;;  %s673_s26 = scalar_lea.hbm (!%p203_p9), %s1252_s5, %s848_s16 }
  0x12   : > { %s675_s23 = sshll.u32 (!%p203_p9), %s237_s15, 4  ;;  %s676_s23 = int_to_ptr.vmem [resolvable:$true] %s675_s23 }
  0x13   : > { %v895_v0 = vld [vmem:[%s1249_s2 + $0x38] sm:$0xff]   ;;  %v992_v1 = vmov 0   ;;  %v896_v2 = vld [vmem:[%s1249_s2 + $0x80] sm:$0xff]   ;;  %v897_v3 = vld [vmem:[%s1249_s2 + $0x30] sm:$0xff]   ;;  %s1101_s17 = scalar_select %p238_p10, %s1048_s22, 1  ;;  %vm328_vm0 = vcmask 130048  }
  0x14   : > { %332 = vmatprep.subr.bf16.mxu0 %v992_v1  ;;  %445 = vmatprep.subr.bf16.mxu1 %v992_v1  ;;  %v898_v4 = vld [vmem:[%s1249_s2 + $0x78] sm:$0xff]   ;;  %v899_v5 = vld [vmem:[%s1249_s2 + $0x28] sm:$0xff]   ;;  %v900_v6 = vld [vmem:[%s1249_s2 + $0x70] sm:$0xff]   ;;  %vm647_vm1 = vcmask 257024   ;;  %s930_s7 = scalar_lea.vmem %s676_s23, 64 }
  0x15   : > { %333 = vmatpush1.bf16.msra.mxu0 %v895_v0  ;;  %446 = vmatpush1.bf16.msra.mxu1 %v896_v2  ;;  %v901_v7 = vld [vmem:[%s1249_s2 + $0x20] sm:$0xff]   ;;  %v902_v8 = vld [vmem:[%s1249_s2 + $0x68] sm:$0xff]   ;;  %s851_s6 = sshll.u32 %s1101_s17, 4  ;;  %v903_v9 = vld [vmem:[%s1249_s2 + $0x18] sm:$0xff]   ;;  %s777_s30 = sshll.u32 %s1101_s17, 2 }
  0x16   : > { %334 = vmatprep.subr.bf16.mxu0 %v992_v1  ;;  %447 = vmatprep.subr.bf16.mxu1 %v992_v1  ;;  %v904_v10 = vld [vmem:[%s1249_s2 + $0x60] sm:$0xff]   ;;  %s242_s13 = scalar_lea.vmem %s1247_s0, %s851_s6  ;;  %v905_v11 = vld [vmem:[%s1249_s2 + $0x10] sm:$0xff]   ;;  %v906_v13 = vld [vmem:[%s1249_s2 + $0x58] sm:$0xff]   ;;  %s246_s8 = scalar_lea.vmem %s1248_s1, %s777_s30 }
  0x17   : > { %v253_v12 = vld [vmem:[%s242_s13 + $0x8] sm:$0x3f]  ;;  %v908_v16 = vld [vmem:[%s1249_s2 + $0x50] sm:$0xff]   ;;  %v909_v17 = vld [vmem:[%s1249_s2] sm:$0xff]   ;;  %s659_s6 = scalar_lea.sflag [#allocation3], %s235_s12  ;;  %p931_p11 = scmp.ne.s32.totalorder %s676_s23, %s930_s7 }
  0x18   : > { %v255_v14 = vpack.c.bf16 %v253_v12, %v253_v12  ;;  %v907_v15 = vld [vmem:[%s1249_s2 + $0x8] sm:$0xff]   ;;  %v911_v19 = vld [vmem:[%s1249_s2 + $0x40] sm:$0xff]   ;;  %v915_v25 = vld [vmem:[%s1249_s2 + $0xb8] sm:$0xff]  }
  0x19   : > { %335 = vmatpush1.bf16.msra.mxu0 %v897_v3  ;;  %448 = vmatpush1.bf16.msra.mxu1 %v898_v4  ;;  %v910_v18 = vld [vmem:[%s1249_s2 + $0x48] sm:$0xff]   ;;  %v252_v20 = vld [vmem:[%s242_s13] sm:$0x3f]  ;;  %v916_v26 = vld [vmem:[%s1249_s2 + $0xb0] sm:$0xff]   ;;  %p932_p12 = pnand %p931_p11, %p1065_p5 }
  0x1a   : > { %336 = vmatprep.subr.bf16.mxu0 %v992_v1  ;;  %449 = vmatprep.subr.bf16.mxu1 %v992_v1  ;;  %v912_v21 = vld [vmem:[%s1249_s2 + $0x88] sm:$0xff]   ;;  %v254_v22 = vpack.c.bf16 %v252_v20, %v252_v20  ;;  %v914_v24 = vld [vmem:[%s1249_s2 + $0xc0] sm:$0xff]   ;;  %v919_v29 = vld [vmem:[%s1249_s2 + $0x98] sm:$0xff]  }
  0x1b   : > { %788 = vmatprep.mubr.msk.bf16.mxu0 %vm328_vm0, %v255_v14  ;;  %816 = vmatprep.mubr.msk.bf16.mxu1 %vm328_vm0, %v255_v14  ;;  %v913_v23 = vld [vmem:[%s1249_s2 + $0xc8] sm:$0xff]   ;;  %v918_v28 = vld [vmem:[%s1249_s2 + $0xa0] sm:$0xff]   ;;  %v920_v30 = vld [vmem:[%s1249_s2 + $0x90] sm:$0xff]   ;;  %p933_p13 = pneg %p932_p12 }
  0x1c   : > { %v917_v27 = vld [vmem:[%s1249_s2 + $0xa8] sm:$0xff]   ;;  %v921_v31 = vld [vmem:[%s1249_s2 + $0xd0] sm:$0xff]   ;;  %v845_v44 = vld [vmem:[%s1250_s3] ss:$0 sm:$0xff] }
  0x1d   : > { %337 = vmatpush1.bf16.msra.mxu0 %v899_v5  ;;  %450 = vmatpush1.bf16.msra.mxu1 %v900_v6  ;;  %v621_v51 = vld [vmem:[%s246_s8] sm:$0xf]  ;;  %s996_s8 = smov [#allocation2]  }
  0x1e   : > { %338 = vmatprep.subr.bf16.mxu0 %v992_v1  ;;  %451 = vmatprep.subr.bf16.mxu1 %v992_v1 }
  0x21   : > { %339 = vmatpush1.bf16.msra.mxu0 %v901_v7  ;;  %452 = vmatpush1.bf16.msra.mxu1 %v902_v8 }
  0x22   : > { %340 = vmatprep.subr.bf16.mxu0 %v992_v1  ;;  %453 = vmatprep.subr.bf16.mxu1 %v992_v1 }
  0x25   : > { %341 = vmatpush1.bf16.msra.mxu0 %v903_v9  ;;  %454 = vmatpush1.bf16.msra.mxu1 %v904_v10 }
  0x26   : > { %342 = vmatprep.subr.bf16.mxu0 %v992_v1  ;;  %455 = vmatprep.subr.bf16.mxu1 %v992_v1 }
  0x29   : > { %343 = vmatpush1.bf16.msra.mxu0 %v905_v11  ;;  %456 = vmatpush1.bf16.msra.mxu1 %v906_v13 }
  0x2a   : > { %344 = vmatprep.subr.bf16.mxu0 %v992_v1  ;;  %457 = vmatprep.subr.bf16.mxu1 %v992_v1 }
  0x2d   : > { %345 = vmatpush1.bf16.msra.mxu0 %v907_v15  ;;  %458 = vmatpush1.bf16.msra.mxu1 %v908_v16 }
  0x2e   : > { %346 = vmatprep.subr.bf16.mxu0 %v992_v1  ;;  %459 = vmatprep.subr.bf16.mxu1 %v992_v1 }
  0x31   : > { %347 = vmatpush1.bf16.msra.mxu0 %v909_v17  ;;  %460 = vmatpush1.bf16.msra.mxu1 %v910_v18 }
  0x32   : > { %362 = vmatprep.subr.bf16.mxu0 %v992_v1  ;;  %475 = vmatprep.subr.bf16.mxu1 %v992_v1 }
  0x35   : > { %363 = vmatpush2.bf16.msra.mxu0 %v911_v19  ;;  %476 = vmatpush2.bf16.msra.mxu1 %v912_v21 }
  0x36   : > { %562 = vmatprep.subr.bf16.mxu0 %v992_v1 }
  0x38   : > { %365 = vmatmul.mubr.bf16.vlgmr.msra.gmra.mxu0 %v254_v22  ;;  %478 = vmatmul.mubr.bf16.vlgmr.msra.gmra.mxu1 %v254_v22 }
  0x39   : > { %563 = vmatpush1.bf16.msra.mxu0 %v913_v23  ;;  %844 = vmatprep.mubr.msk.bf16.mxu0 %vm328_vm0, %v255_v14 }
  0x3a   : > { %564 = vmatprep.subr.bf16.mxu0 %v992_v1 }
  0x3d   : > { %565 = vmatpush1.bf16.msra.mxu0 %v914_v24 }
  0x3e   : > { %566 = vmatprep.subr.bf16.mxu0 %v992_v1 }
  0x41   : > { %567 = vmatpush1.bf16.msra.mxu0 %v915_v25 }
  0x42   : > { %568 = vmatprep.subr.bf16.mxu0 %v992_v1 }
  0x45   : > { %569 = vmatpush1.bf16.msra.mxu0 %v916_v26 }
  0x46   : > { %570 = vmatprep.subr.bf16.mxu0 %v992_v1 }
  0x49   : > { %571 = vmatpush1.bf16.msra.mxu0 %v917_v27 }
  0x4a   : > { %572 = vmatprep.subr.bf16.mxu0 %v992_v1 }
  0x4d   : > { %573 = vmatpush1.bf16.msra.mxu0 %v918_v28 }
  0x4e   : > { %574 = vmatprep.subr.bf16.mxu0 %v992_v1 }
  0x51   : > { %575 = vmatpush1.bf16.msra.mxu0 %v919_v29 }
  0x52   : > { %576 = vmatprep.subr.bf16.mxu0 %v992_v1 }
  0x55   : > { %577 = vmatpush1.bf16.msra.mxu0 %v920_v30 }
  0x56   : > { %592 = vmatprep.subr.bf16.mxu0 %v992_v1 }
  0x59   : > { %593 = vmatpush2.bf16.msra.mxu0 %v921_v31 }
  0x5c   : > { %595 = vmatmul.mubr.bf16.vlgmr.msra.gmra.mxu0 %v254_v22 }
  0xf8   : > { %v366_v32 = vpop.f32.mrf.mxu0  ;;  %v479_v33 = vpop.f32.mrf.mxu1 }
  0xf9   : > { %v486_v40 = vrot.slane %v479_v33, 1 }
  0xfa   : > { %v368_v34 = vpop.f32.mrf.mxu0  ;;  %v481_v35 = vpop.f32.mrf.mxu1 }
  0xfb   : > { %v488_v42 = vadd.f32 %v486_v40, %v366_v32 }
  0xfc   : > { %v369_v36 = vpop.f32.mrf.mxu0  ;;  %v482_v37 = vpop.f32.mrf.mxu1 }
  0xfe   : > { %v370_v38 = vpop.f32.mrf.mxu0  ;;  %v483_v39 = vpop.f32.mrf.mxu1 }
 0x11c   : > { %v596_v41 = vpop.f32.mrf.mxu0 }
 0x11d   : > { %v603_v43 = vrot.slane %v596_v41, 2 }
 0x11e   : > { %v598_v45 = vpop.f32.mrf.mxu0 }
 0x11f   : > { %v605_v46 = vadd.f32 %v603_v43, %v488_v42 }
 0x120   : > { %v599_v47 = vpop.f32.mrf.mxu0 }
 0x121   : > { %v613_v48 = vadd.f32 %v845_v44, %v605_v46 }
 0x122   : > { %v600_v49 = vpop.f32.mrf.mxu0 }
 0x123   : > { %922 = vtanh.f32 %v613_v48  ;;  %v846_v52 = vmul.f32 -1.442695, %v613_v48 }
 0x125   : > { %924 = vpow2.f32 %v846_v52 }
 0x130   : > { %v923_v50 = vpop.eup %922 }
 0x131   : > { %628 = vrot.lane.b32.xlu0 %v923_v50, %s993_s9 }
 0x132   : > { %v925_v53 = vpop.eup %924 }
 0x133   : > { %v617_v54 = vadd.f32 1.0, %v925_v53 }
 0x135   : > { %623 = vrot.lane.b32.xlu0 %v621_v51, %s994_s10  ;;  %926 = vrcp.f32 %v617_v54 }
 0x142   : > { %v927_v55 = vpop.eup %926 }
 0x1a3   : > { %v629_v56 = vpop.permute.xlu0 %628 }
 0x1a4   : > { %v631_v57 = vmul.f32 %v927_v55, %v629_v56 }
 0x1a6   : > { %633 = vrot.lane.b32.xlu1 %v631_v57, %s994_s10 }
 0x1a7   : > { %v624_v58 = vpop.permute.xlu0 %623 }
 0x1a8   : > { %v626_v59 = vmul.f32 %v927_v55, %v624_v58 }
 0x218   : > { %v634_v60 = vpop.permute.xlu1 %633 }
 0x219   : > { %v636_v61 = vadd.f32 %v634_v60, %v626_v59 }
 0x21b   : > { %928 = vtanh.f32 %v636_v61  ;;  %650 = vrot.lane.b32.xlu0 %v636_v61, %s995_s11 }
 0x228   : > { %v929_v62 = vpop.eup %928 }
 0x229   : > { %639 = vrot.lane.b32.xlu1 %v929_v62, %s993_s9  ;;  %s934_s9 = sshll.u32 %s996_s8, 4  ;;  %s935_s9 = int_to_ptr.vmem [resolvable:$false] %s934_s9 }
 0x22a   : > { %s936_s11 = scalar_lea.vmem %s935_s9, 128  ;;  %p937_p0 = scmp.lt.s32.totalorder %s676_s23, %s935_s9 }
 0x22b   : > { %p938_p1 = scmp.lt.s32.totalorder %s936_s11, %s930_s7 }
 0x22d   : > { %p939_p2 = por %p938_p1, %p937_p0 }
 0x22f   : > { %p940_p3 = pnand %p939_p2, %p933_p13 }
 0x28d   : > { %v651_v63 = vpop.permute.xlu0 %650 }
 0x28e   : > { %653 = vst.msk [vmem:[%s237_s15] sm:$0xf] %vm647_vm1, %v651_v63 }
 0x28f   : > { %943 = shalt.err (!%p940_p3)
}
 0x290   : > { %s944_s22 = scalar_lea.hbm %s673_s26, 64  ;;  %s948_s15 = scalar_lea.hbm %s1252_s5, 128 }
 0x291   : > { %p945_p4 = scmp.ne.s32.totalorder %s673_s26, %s944_s22  ;;  %p949_p9 = scmp.lt.s32.totalorder %s673_s26, %s1252_s5 }
 0x292   : > { %p950_p10 = scmp.lt.s32.totalorder %s948_s15, %s944_s22 }
 0x293   : > { %p946_p7 = pnand %p945_p4, %p1065_p5 }
 0x294   : > { %p951_p11 = por %p950_p10, %p949_p9 }
 0x295   : > { %p947_p8 = pneg %p946_p7 }
 0x297   : > { %p952_p12 = pnand %p951_p11, %p947_p8 }
 0x299   : > { %955 = shalt.err (!%p952_p12)
}
 0x29a   : > { %852 = dma.vmem_to_hbm [thread:$0]  (%p1065_p5), %s676_s23, 64, %s673_s26, %s659_s6  }
 0x29b   : > { %v640_v0 = vpop.permute.xlu1 %639  ;;  %s250_s8 = scalar_lea.vmem %s1251_s4, %s777_s30 }
 0x29c   : > { %v642_v1 = vmul.f32 %v927_v55, %v640_v0 }
 0x29e   : > { %644 = vrot.lane.b32.xlu1 %v642_v1, %s994_s10 }
 0x310   : > { %v645_v2 = vpop.permute.xlu1 %644 }
 0x311   : > { %648 = vst.msk [vmem:[%s250_s8] sm:$0xf] %vm647_vm1, %v645_v2 }
 0x312 PF: > { %p858_p13 = scmp.ge.s32.totalorder %s990_s21, 2  ;;  %s694_s28 = sand.u32 1, %s978_s18  }
 0x313   : > { %s695_s23 = scalar_lea.sflag [#allocation3], %s694_s28 }
 0x314   : > { %p855_p5 = pnand %p858_p13, %p1069_p6 }
 0x316   : > { %p856_p0 = pneg %p855_p5 }
 0x318   : > { %973 = dma.done.wait (%p856_p0), %s695_s23, 64  }
 0x319   : > { %975 = vsyncadd (%p856_p0), %s695_s23, 4294967232  ;;  %p16_p1 = scmp.ge.s32.totalorder %s1052_s24, 4   ;;  %s1255_s18 = smov %s982_s19 }
 0x31a   : > { %s1256_s19 = smov %s986_s20  ;;  %s1257_s20 = smov %s1063_s27 }
 0x31b   : > { %s1258_s21 = smov %s1052_s24  ;;  %18 = sbr.rel (!%p16_p1) target bundleno = 3 (0x3), region = 88 }
 0x320   :  { %700 = vsyncpa [#allocation3], 1 }
 0x321   :  { %702 = vsyncpa [#allocation3 + $0x1], 1 }

// kernel: prednet_forward.31
= control target key start
LH: loop header
LB: loop body
LE: loop exit
PB: predicated region body
PF: predicated region fallthrough
CT: control target
= control target key end

     0   :  { %s812_s12 = smov 0   ;;  %s967_s0 = inlined_call_operand.vmem [shape: f32[2,18,144], index: 0, kind: input, shape index: {}]   ;;  %s968_s1 = inlined_call_operand.vmem [shape: bf16[3,144,64], index: 1, kind: input, shape index: {}]   ;;  %s969_s2 = inlined_call_operand.vmem [shape: f32[1,64], index: 2, kind: input, shape index: {}]   ;;  %s970_s3 = inlined_call_operand.vmem [shape: f32[2,16,64], index: 3, kind: output, shape index: {}]  }
   0x1 LB: > { %s647_s13 = sadd.s32 4294967295, %s789_s12   ;;  %p651_p0 = scmp.ge.s32.totalorder %s789_s12, 1  ;;  %s789_s12 = sphi %s812_s12, %s13_s12  }
   0x2   : > { %p137_p1 = scmp.lt.s32.totalorder %s789_s12, 3 }
   0x4   : > { %p138_p2 = pnand %p651_p0, %p137_p1 }
   0x5   : > { %p161_p3 = scmp.lt.s32.totalorder (!%p138_p2), %s647_s13, 1 }
   0x6   : > { %141 = sbr.rel (%p138_p2) target bundleno = 293 (0x125), region = 32 }
   0xb   : > { %v756_v0 = vld [vmem:[%s968_s1 + $0x38] sm:$0xff]   ;;  %v791_v1 = vmov 0   ;;  %v757_v2 = vld [vmem:[%s968_s1 + $0x80] sm:$0xff]   ;;  %v758_v3 = vld [vmem:[%s968_s1 + $0x30] sm:$0xff]   ;;  %s972_s13 = smov (!%p161_p3, %s647_s13), 1  ;;  %vm254_vm0 = vcmask 130048  }
   0xc   : > { %261 = vmatprep.subr.bf16.mxu0 %v791_v1  ;;  %381 = vmatprep.subr.bf16.mxu1 %v791_v1  ;;  %v759_v4 = vld [vmem:[%s968_s1 + $0x78] sm:$0xff]   ;;  %v760_v5 = vld [vmem:[%s968_s1 + $0x28] sm:$0xff]   ;;  %v761_v6 = vld [vmem:[%s968_s1 + $0x70] sm:$0xff]   ;;  %s746_s30 = smul.u32 48, %s972_s13  ;;  %vm432_vm1 = vcmask 1046528   ;;  %vm566_vm2 = vcmask 1045504  }
   0xd   : > { %262 = vmatpush1.bf16.msra.mxu0 %v756_v0  ;;  %382 = vmatpush1.bf16.msra.mxu1 %v757_v2  ;;  %v762_v7 = vld [vmem:[%s968_s1 + $0x20] sm:$0xff]   ;;  %v763_v8 = vld [vmem:[%s968_s1 + $0x68] sm:$0xff]   ;;  %v764_v9 = vld [vmem:[%s968_s1 + $0x18] sm:$0xff]   ;;  %s727_s24 = sshll.u32 %s972_s13, 4  ;;  %vm589_vm3 = vcmask 523264  }
   0xe   : > { %263 = vmatprep.subr.bf16.mxu0 %v791_v1  ;;  %383 = vmatprep.subr.bf16.mxu1 %v791_v1  ;;  %v765_v10 = vld [vmem:[%s968_s1 + $0x60] sm:$0xff]   ;;  %s865_s10 = scalar_lea.vmem %s967_s0, %s746_s30  ;;  %v766_v11 = vld [vmem:[%s968_s1 + $0x10] sm:$0xff]   ;;  %v767_v14 = vld [vmem:[%s968_s1 + $0x58] sm:$0xff]   ;;  %s170_s27 = scalar_lea.vmem %s970_s3, %s727_s24 }
   0xf   : > { %v173_v12 = vld [vmem:[%s865_s10 + $0x8] sm:$0xff]  ;;  %v175_v13 = vld [vmem:[%s865_s10 + $0x18] sm:$0xff]  ;;  %v769_v17 = vld [vmem:[%s968_s1 + $0x50] sm:$0xff]  }
  0x10   : > { %v179_v15 = vpack.c.bf16 %v175_v13, %v173_v12  ;;  %v768_v16 = vld [vmem:[%s968_s1 + $0x8] sm:$0xff]   ;;  %v770_v18 = vld [vmem:[%s968_s1] sm:$0xff]   ;;  %v174_v22 = vld [vmem:[%s865_s10 + $0x10] sm:$0xff] }
  0x11   : > { %264 = vmatpush1.bf16.msra.mxu0 %v758_v3  ;;  %384 = vmatpush1.bf16.msra.mxu1 %v759_v4  ;;  %v771_v19 = vld [vmem:[%s968_s1 + $0x48] sm:$0xff]   ;;  %v772_v20 = vld [vmem:[%s968_s1 + $0x40] sm:$0xff]   ;;  %v776_v31 = vld [vmem:[%s968_s1 + $0xb8] sm:$0xff]  }
  0x12   : > { %265 = vmatprep.subr.bf16.mxu0 %v791_v1  ;;  %385 = vmatprep.subr.bf16.mxu1 %v791_v1  ;;  %v172_v21 = vld [vmem:[%s865_s10] sm:$0xff]  ;;  %v773_v23 = vld [vmem:[%s968_s1 + $0x88] sm:$0xff]   ;;  %v777_v32 = vld [vmem:[%s968_s1 + $0xb0] sm:$0xff]  }
  0x13   : > { %664 = vmatprep.mubr.msk.bf16.mxu0 %vm254_vm0, %v179_v15  ;;  %693 = vmatprep.mubr.msk.bf16.mxu1 %vm254_vm0, %v179_v15  ;;  %v178_v24 = vpack.c.bf16 %v174_v22, %v172_v21  ;;  %v177_v25 = vld [vmem:[%s865_s10 + $0x28] sm:$0x3]  ;;  %v775_v28 = vld [vmem:[%s968_s1 + $0xc0] sm:$0xff]   ;;  %v780_v35 = vld [vmem:[%s968_s1 + $0x98] sm:$0xff]  }
  0x14   : > { %v774_v26 = vld [vmem:[%s968_s1 + $0xc8] sm:$0xff]   ;;  %v181_v27 = vpack.c.bf16 %v177_v25, %v177_v25  ;;  %v176_v29 = vld [vmem:[%s865_s10 + $0x20] sm:$0x3]  ;;  %v781_v36 = vld [vmem:[%s968_s1 + $0x90] sm:$0xff]  }
  0x15   : > { %266 = vmatpush1.bf16.msra.mxu0 %v760_v5  ;;  %386 = vmatpush1.bf16.msra.mxu1 %v761_v6  ;;  %v180_v30 = vpack.c.bf16 %v176_v29, %v176_v29  ;;  %v778_v33 = vld [vmem:[%s968_s1 + $0xa8] sm:$0xff]   ;;  %v779_v34 = vld [vmem:[%s968_s1 + $0xa0] sm:$0xff]   ;;  %v782_v37 = vld [vmem:[%s968_s1 + $0xd0] sm:$0xff]  }
  0x16   : > { %267 = vmatprep.subr.bf16.mxu0 %v791_v1  ;;  %387 = vmatprep.subr.bf16.mxu1 %v791_v1 }
  0x19   : > { %268 = vmatpush1.bf16.msra.mxu0 %v762_v7  ;;  %388 = vmatpush1.bf16.msra.mxu1 %v763_v8 }
  0x1a   : > { %269 = vmatprep.subr.bf16.mxu0 %v791_v1  ;;  %389 = vmatprep.subr.bf16.mxu1 %v791_v1 }
  0x1d   : > { %270 = vmatpush1.bf16.msra.mxu0 %v764_v9  ;;  %390 = vmatpush1.bf16.msra.mxu1 %v765_v10  ;;  %v724_v9 = vld [vmem:[%s969_s2] ss:$0 sm:$0xff] }
  0x1e   : > { %271 = vmatprep.subr.bf16.mxu0 %v791_v1  ;;  %391 = vmatprep.subr.bf16.mxu1 %v791_v1 }
  0x21   : > { %272 = vmatpush1.bf16.msra.mxu0 %v766_v11  ;;  %392 = vmatpush1.bf16.msra.mxu1 %v767_v14 }
  0x22   : > { %273 = vmatprep.subr.bf16.mxu0 %v791_v1  ;;  %393 = vmatprep.subr.bf16.mxu1 %v791_v1 }
  0x25   : > { %274 = vmatpush1.bf16.msra.mxu0 %v768_v16  ;;  %394 = vmatpush1.bf16.msra.mxu1 %v769_v17 }
  0x26   : > { %275 = vmatprep.subr.bf16.mxu0 %v791_v1  ;;  %395 = vmatprep.subr.bf16.mxu1 %v791_v1 }
  0x29   : > { %276 = vmatpush1.bf16.msra.mxu0 %v770_v18  ;;  %396 = vmatpush1.bf16.msra.mxu1 %v771_v19 }
  0x2a   : > { %291 = vmatprep.subr.bf16.mxu0 %v791_v1  ;;  %411 = vmatprep.subr.bf16.mxu1 %v791_v1 }
  0x2d   : > { %292 = vmatpush2.bf16.msra.mxu0 %v772_v20  ;;  %412 = vmatpush2.bf16.msra.mxu1 %v773_v23 }
  0x2e   : > { %515 = vmatprep.subr.bf16.mxu0 %v791_v1  ;;  %728 = vmatprep.subr.bf16.mxu1 %v791_v1 }
  0x30   : > { %294 = vmatmul.mubr.bf16.vlgmr.msra.gmra.mxu0 %v178_v24  ;;  %414 = vmatmul.mubr.bf16.vlgmr.msra.gmra.mxu1 %v178_v24 }
  0x31   : > { %516 = vmatpush1.bf16.msra.mxu0 %v774_v26  ;;  %737 = vmatpush1.bf16.msra.mxu1 %v774_v26 }
  0x32   : > { %517 = vmatprep.subr.bf16.mxu0 %v791_v1  ;;  %729 = vmatprep.subr.bf16.mxu1 %v791_v1 }
  0x33   : > { %694 = vmatprep.mubr.msk.bf16.mxu1 %vm254_vm0, %v181_v27  ;;  %665 = vmatprep.mubr.msk.bf16.mxu0 %vm254_vm0, %v181_v27 }
  0x35   : > { %518 = vmatpush1.bf16.msra.mxu0 %v775_v28  ;;  %738 = vmatpush1.bf16.msra.mxu1 %v775_v28 }
  0x36   : > { %519 = vmatprep.subr.bf16.mxu0 %v791_v1  ;;  %730 = vmatprep.subr.bf16.mxu1 %v791_v1 }
  0x38   : > { %302 = vmatmul.mubr.bf16.gmra.mxu0 %v180_v30  ;;  %422 = vmatmul.mubr.bf16.gmra.mxu1 %v180_v30 }
  0x39   : > { %520 = vmatpush1.bf16.msra.mxu0 %v776_v31  ;;  %739 = vmatpush1.bf16.msra.mxu1 %v776_v31 }
  0x3a   : > { %521 = vmatprep.subr.bf16.mxu0 %v791_v1  ;;  %731 = vmatprep.subr.bf16.mxu1 %v791_v1 }
  0x3b   : > { %722 = vmatprep.mubr.msk.bf16.mxu0 %vm254_vm0, %v179_v15  ;;  %723 = vmatprep.mubr.msk.bf16.mxu1 %vm254_vm0, %v181_v27 }
  0x3d   : > { %522 = vmatpush1.bf16.msra.mxu0 %v777_v32  ;;  %740 = vmatpush1.bf16.msra.mxu1 %v777_v32 }
  0x3e   : > { %523 = vmatprep.subr.bf16.mxu0 %v791_v1  ;;  %732 = vmatprep.subr.bf16.mxu1 %v791_v1 }
  0x41   : > { %524 = vmatpush1.bf16.msra.mxu0 %v778_v33  ;;  %741 = vmatpush1.bf16.msra.mxu1 %v778_v33 }
  0x42   : > { %525 = vmatprep.subr.bf16.mxu0 %v791_v1  ;;  %733 = vmatprep.subr.bf16.mxu1 %v791_v1 }
  0x45   : > { %526 = vmatpush1.bf16.msra.mxu0 %v779_v34  ;;  %742 = vmatpush1.bf16.msra.mxu1 %v779_v34 }
  0x46   : > { %527 = vmatprep.subr.bf16.mxu0 %v791_v1  ;;  %734 = vmatprep.subr.bf16.mxu1 %v791_v1 }
  0x49   : > { %528 = vmatpush1.bf16.msra.mxu0 %v780_v35  ;;  %743 = vmatpush1.bf16.msra.mxu1 %v780_v35 }
  0x4a   : > { %529 = vmatprep.subr.bf16.mxu0 %v791_v1  ;;  %735 = vmatprep.subr.bf16.mxu1 %v791_v1 }
  0x4d   : > { %530 = vmatpush1.bf16.msra.mxu0 %v781_v36  ;;  %744 = vmatpush1.bf16.msra.mxu1 %v781_v36 }
  0x4e   : > { %545 = vmatprep.subr.bf16.mxu0 %v791_v1  ;;  %736 = vmatprep.subr.bf16.mxu1 %v791_v1 }
  0x51   : > { %546 = vmatpush2.bf16.msra.mxu0 %v782_v37  ;;  %745 = vmatpush2.bf16.msra.mxu1 %v782_v37 }
  0x54   : > { %548 = vmatmul.mubr.bf16.vlgmr.msra.gmra.mxu0 %v178_v24  ;;  %556 = vmatmul.mubr.bf16.vlgmr.msra.gmra.mxu1 %v180_v30 }
  0xf0   : > { %v295_v38 = vpop.f32.mrf.mxu0  ;;  %v415_v39 = vpop.f32.mrf.mxu1 }
  0xf1   : > { %v433_v54 = vrot.slane %v415_v39, 1 }
  0xf2   : > { %v297_v40 = vpop.f32.mrf.mxu0  ;;  %v417_v41 = vpop.f32.mrf.mxu1 }
  0xf4   : > { %v298_v42 = vpop.f32.mrf.mxu0  ;;  %v418_v43 = vpop.f32.mrf.mxu1 }
  0xf5   : > { %v434_v55 = vrot.slane %v418_v43, 1 }
  0xf6   : > { %v300_v44 = vpop.f32.mrf.mxu0  ;;  %v420_v45 = vpop.f32.mrf.mxu1 }
  0xf7   : > { %v435_v60 = vsel %vm432_vm1, %v433_v54, %v434_v55 }
  0xf8   : > { %v303_v46 = vpop.f32.mrf.mxu0  ;;  %v423_v47 = vpop.f32.mrf.mxu1  ;;  %v440_v4 = vadd.f32 %v435_v60, %v295_v38 }
  0xf9   : > { %v436_v56 = vrot.slane %v423_v47, 1 }
  0xfa   : > { %v304_v48 = vpop.f32.mrf.mxu0  ;;  %v425_v49 = vpop.f32.mrf.mxu1 }
  0xfb   : > { %v437_v61 = vsel %vm432_vm1, %v434_v55, %v436_v56 }
  0xfc   : > { %v305_v50 = vpop.f32.mrf.mxu0  ;;  %v426_v51 = vpop.f32.mrf.mxu1  ;;  %v441_v5 = vadd.f32 %v437_v61, %v298_v42 }
  0xfe   : > { %v306_v52 = vpop.f32.mrf.mxu0  ;;  %v427_v53 = vpop.f32.mrf.mxu1 }
 0x114   : > { %v549_v57 = vpop.f32.mrf.mxu0  ;;  %v557_v58 = vpop.f32.mrf.mxu1 }
 0x115   : > { %v570_v62 = vrot.slane %v557_v58, 2  ;;  %v567_v1 = vrot.slane %v549_v57, 2 }
 0x116   : > { %v551_v59 = vpop.f32.mrf.mxu0  ;;  %v559_v63 = vpop.f32.mrf.mxu1 }
 0x118   : > { %v552_v0 = vpop.f32.mrf.mxu0  ;;  %v560_v3 = vpop.f32.mrf.mxu1 }
 0x119   : > { %v568_v2 = vrot.slane %v552_v0, 2 }
 0x11a   : > { %v554_v6 = vpop.f32.mrf.mxu0  ;;  %v561_v10 = vpop.f32.mrf.mxu1 }
 0x11b   : > { %v569_v7 = vsel %vm566_vm2, %v567_v1, %v568_v2  ;;  %v571_v8 = vsel %vm566_vm2, %v568_v2, %v570_v62 }
 0x11c   : > { %v574_v11 = vadd.f32 %v569_v7, %v440_v4  ;;  %v575_v12 = vadd.f32 %v571_v8, %v441_v5 }
 0x11e   : > { %v583_v13 = vadd.f32 %v724_v9, %v574_v11  ;;  %v584_v14 = vadd.f32 %v724_v9, %v575_v12 }
 0x120   : > { %v585_v15 = vmax.f32 %v583_v13, 0.0  ;;  %v586_v16 = vmax.f32 %v584_v14, 0.0 }
 0x122   : > { %v587_v17 = vmin.f32 %v585_v15, 255.0  ;;  %v588_v18 = vmin.f32 %v586_v16, 255.0 }
 0x124   : > { %590 = vst.msk [vmem:[%s170_s27] sm:$0xff] %vm589_vm3, %v587_v17  ;;  %591 = vst.msk [vmem:[%s170_s27 + $0x8] sm:$0xff] %vm589_vm3, %v588_v18 }
 0x125 PF: > { %s13_s12 = sadd.s32 1, %s789_s12  }
 0x126   : > { %p10_p4 = scmp.ge.s32.totalorder %s13_s12, 4  }
 0x128   :  { %12 = sbr.rel (!%p10_p4) target bundleno = 1 (0x1), region = 64 }

// kernel: prednet_forward.30
= control target key start
LH: loop header
LB: loop body
LE: loop exit
PB: predicated region body
PF: predicated region fallthrough
CT: control target
= control target key end

     0   :  { %11 = vsyncpa [#allocation3], 0  ;;  %s5623_s0 = inlined_call_operand.vmem [shape: f32[2,18,432], index: 0, kind: input, shape index: {}]   ;;  %s5624_s1 = inlined_call_operand.vmem [shape: f32[2,16,128], index: 1, kind: input, shape index: {}]   ;;  %s5625_s2 = inlined_call_operand.vmem [shape: bf16[3,432,512], index: 2, kind: input, shape index: {}]   ;;  %s5626_s3 = inlined_call_operand.vmem [shape: f32[1,512], index: 3, kind: input, shape index: {}]   ;;  %s5627_s4 = inlined_call_operand.vmem [shape: f32[2,16,128], index: 4, kind: output, shape index: {0}]   ;;  %s5628_s5 = inlined_call_operand.hbm [shape: f32[2,16,128], index: 5, kind: output, shape index: {1}]  }
   0x1   :  { %13 = vsyncpa [#allocation3 + $0x1], 0  ;;  %s4368_s18 = smov 0   ;;  %s4370_s19 = smov 0  }
   0x2   :  { %s4372_s20 = smov 0   ;;  %s4374_s21 = smov 0  }
   0x3 LB: > { %s4389_s22 = sadd.s32 4294967295, %s4333_s21   ;;  %s3137_s23 = sadd.s32 4294967294, %s4333_s21   ;;  %s4333_s21 = sphi %s4374_s21, %s5634_s21   ;;  %s4329_s20 = sphi %s4372_s20, %s5633_s20   ;;  %s4325_s19 = sphi %s4370_s19, %s5632_s19   ;;  %s4321_s18 = sphi %s4368_s18, %s5631_s18  }
   0x4   : > { %s4393_s24 = sadd.s32 1, %s4333_s21   ;;  %s146_s25 = sadd.s32 1, %s4329_s20 }
   0x5   : > { %s143_s26 = ssub.s32 %s4333_s21, %s4393_s24  ;;  %p156_p0 = scmp.ne.s32.totalorder %s4329_s20, %s4325_s19 }
   0x6   : > { %p144_p1 = scmp.eq.s32.totalorder %s143_s26, 0  ;;  %p157_p2 = scmp.eq.s32.totalorder %s4389_s22, 1 }
   0x7   : > { %p162_p3 = scmp.ne.s32.totalorder %s4325_s19, %s4321_s18  ;;  %p163_p4 = scmp.eq.s32.totalorder %s3137_s23, 1 }
   0x8   : > { %s4404_s27 = scalar_select %p144_p1, %s4329_s20, %s146_s25  }
   0x9   : > { %p4406_p5 = por %p157_p2, %p156_p0  ;;  %p4410_p6 = por %p163_p4, %p162_p3 }
   0xa   : > { %p3140_p7 = scmp.ge.s32.totalorder %s4333_s21, 1  ;;  %p203_p8 = scmp.lt.s32.totalorder %s4333_s21, 3 }
   0xc   : > { %p204_p9 = pnand %p3140_p7, %p203_p8 }
   0xd   : > { %p241_p10 = scmp.lt.s32.totalorder (!%p204_p9), %s4389_s22, 1  ;;  %s238_s7 = sand.u32 (!%p204_p9), 1, %s4325_s19  }
   0xe   : > { %207 = sbr.rel (%p204_p9) target bundleno = 594 (0x252), region = 36  ;;  %s3141_s8 = sshll.u32 (!%p204_p9), %s238_s7, 4 }
   0xf   : > { %s3712_s9 = sshll.u32 (!%p204_p9), %s4389_s22, 8  ;;  %s240_s11 = scalar_lea.vmem (!%p204_p9), [#allocation2], %s3141_s8 }
  0x10   : > { %s3038_s12 = sshll.u32 (!%p204_p9), %s240_s11, 4  ;;  %s5572_s14 = scalar_lea.hbm (!%p204_p9), %s5628_s5, %s3712_s9  ;;  %s5574_s12 = int_to_ptr.vmem [resolvable:$true] %s3038_s12 }
  0x11   : > { %s4335_s15 = smov (!%p204_p9), [#allocation2]  }
  0x12   : > { %s4277_s16 = sshll.u32 (!%p204_p9), %s4335_s15, 4  ;;  %s4278_s16 = int_to_ptr.vmem [resolvable:$false] %s4277_s16 }
  0x13   : > { %v3755_v0 = vld [vmem:[%s5625_s2 + $0xe4] ss:$16 sps:$4 sm:$0xff]   ;;  %v3759_v2 = vld [vmem:[%s5625_s2 + $0xe0] ss:$16 sps:$4 sm:$0xff]   ;;  %s4484_s17 = scalar_select %p241_p10, %s4389_s22, 1  ;;  %vm925_vm0 = vcmask 392192  }
  0x14   : > { %v3757_v1 = vld [vmem:[%s5625_s2 + $0x2e4] ss:$16 sps:$4 sm:$0xff]   ;;  %932 = vmatprep.subr.bf16.mxu0 %v3755_v0  ;;  %v3760_v3 = vld [vmem:[%s5625_s2 + $0x2e0] ss:$16 sps:$4 sm:$0xff]   ;;  %v3825_v50 = vld [vmem:[%s5625_s2 + $0xec] ss:$16 sps:$4 sm:$0xff]   ;;  %p4280_p0 = scmp.lt.s32.totalorder %s5574_s12, %s4278_s16 }
  0x15   : > { %981 = vmatprep.subr.bf16.mxu1 %v3757_v1  ;;  %v3761_v4 = vld [vmem:[%s5625_s2 + $0xc4] ss:$16 sps:$4 sm:$0xff]   ;;  %933 = vmatpush1.bf16.msra.mxu0 %v3759_v2  ;;  %v3765_v6 = vld [vmem:[%s5625_s2 + $0xc0] ss:$16 sps:$4 sm:$0xff]   ;;  %s3713_s10 = smul.u32 96, %s4484_s17  ;;  %vm1993_vm1 = vcmask 1046528  }
  0x16   : > { %982 = vmatpush1.bf16.msra.mxu1 %v3760_v3  ;;  %v3763_v5 = vld [vmem:[%s5625_s2 + $0x2c4] ss:$16 sps:$4 sm:$0xff]   ;;  %934 = vmatprep.subr.bf16.mxu0 %v3761_v4  ;;  %v3766_v7 = vld [vmem:[%s5625_s2 + $0x2c0] ss:$16 sps:$4 sm:$0xff]   ;;  %v3823_v52 = vld [vmem:[%s5625_s2 + $0xe8] ss:$16 sps:$4 sm:$0xff]  }
  0x17   : > { %983 = vmatprep.subr.bf16.mxu1 %v3763_v5  ;;  %v3767_v8 = vld [vmem:[%s5625_s2 + $0xa4] ss:$16 sps:$4 sm:$0xff]   ;;  %v3771_v10 = vld [vmem:[%s5625_s2 + $0xa0] ss:$16 sps:$4 sm:$0xff]   ;;  %s4514_s6 = scalar_lea.vmem %s5623_s0, %s3713_s10  ;;  %v3831_v57 = vld [vmem:[%s5625_s2 + $0xcc] ss:$16 sps:$4 sm:$0xff]  }
  0x18   : > { %v3769_v9 = vld [vmem:[%s5625_s2 + $0x2a4] ss:$16 sps:$4 sm:$0xff]   ;;  %v3772_v11 = vld [vmem:[%s5625_s2 + $0x2a0] ss:$16 sps:$4 sm:$0xff]   ;;  %v260_v34 = vld [vmem:[%s4514_s6 + $0x18] sm:$0xff]  ;;  %vm2895_vm2 = vcmask 1045504  }
  0x19   : > { %935 = vmatpush1.bf16.msra.mxu0 %v3765_v6  ;;  %v3773_v12 = vld [vmem:[%s5625_s2 + $0x84] ss:$16 sps:$4 sm:$0xff]   ;;  %v3777_v14 = vld [vmem:[%s5625_s2 + $0x80] ss:$16 sps:$4 sm:$0xff]   ;;  %v264_v35 = vld [vmem:[%s4514_s6 + $0x38] sm:$0xff]  ;;  %s3710_s23 = sshll.u32 %s4484_s17, 4 }
  0x1a   : > { %984 = vmatpush1.bf16.msra.mxu1 %v3766_v7  ;;  %936 = vmatprep.subr.bf16.mxu0 %v3767_v8  ;;  %v3775_v13 = vld [vmem:[%s5625_s2 + $0x284] ss:$16 sps:$4 sm:$0xff]   ;;  %v3778_v15 = vld [vmem:[%s5625_s2 + $0x280] ss:$16 sps:$4 sm:$0xff]   ;;  %v4530_v36 = vpack.c.bf16 %v264_v35, %v260_v34  ;;  %v258_v55 = vld [vmem:[%s4514_s6 + $0x8] sm:$0xff]  ;;  %s250_s30 = scalar_lea.vmem %s5624_s1, %s3710_s23  ;;  %s5578_s22 = scalar_lea.sflag [#allocation3], %s238_s7 }
  0x1b   : > { %985 = vmatprep.subr.bf16.mxu1 %v3769_v9  ;;  %v3779_v16 = vld [vmem:[%s5625_s2 + $0x64] ss:$16 sps:$4 sm:$0xff]   ;;  %v3783_v18 = vld [vmem:[%s5625_s2 + $0x60] ss:$16 sps:$4 sm:$0xff]   ;;  %v262_v56 = vld [vmem:[%s4514_s6 + $0x28] sm:$0xff]  ;;  %s4279_s25 = scalar_lea.vmem %s4278_s16, 512 }
  0x1c   : > { %v3781_v17 = vld [vmem:[%s5625_s2 + $0x264] ss:$16 sps:$4 sm:$0xff]   ;;  %v3784_v19 = vld [vmem:[%s5625_s2 + $0x260] ss:$16 sps:$4 sm:$0xff]   ;;  %3255 = vmatprep.mubr.msk.bf16.mxu1 %vm925_vm0, %v4530_v36  ;;  %v4588_v58 = vpack.c.bf16 %v262_v56, %v258_v55  ;;  %v3829_v59 = vld [vmem:[%s5625_s2 + $0xc8] ss:$16 sps:$4 sm:$0xff]  }
  0x1d   : > { %937 = vmatpush1.bf16.msra.mxu0 %v3771_v10  ;;  %v3785_v20 = vld [vmem:[%s5625_s2 + $0x44] ss:$16 sps:$4 sm:$0xff]   ;;  %v3789_v22 = vld [vmem:[%s5625_s2 + $0x40] ss:$16 sps:$4 sm:$0xff]   ;;  %v3837_v62 = vld [vmem:[%s5625_s2 + $0xac] ss:$16 sps:$4 sm:$0xff]  }
  0x1e   : > { %986 = vmatpush1.bf16.msra.mxu1 %v3772_v11  ;;  %938 = vmatprep.subr.bf16.mxu0 %v3773_v12  ;;  %v3787_v21 = vld [vmem:[%s5625_s2 + $0x244] ss:$16 sps:$4 sm:$0xff]   ;;  %v3790_v23 = vld [vmem:[%s5625_s2 + $0x240] ss:$16 sps:$4 sm:$0xff]   ;;  %v3835_v63 = vld [vmem:[%s5625_s2 + $0xa8] ss:$16 sps:$4 sm:$0xff]  }
  0x1f   : > { %987 = vmatprep.subr.bf16.mxu1 %v3775_v13  ;;  %v3791_v24 = vld [vmem:[%s5625_s2 + $0x24] ss:$16 sps:$4 sm:$0xff]   ;;  %v3795_v26 = vld [vmem:[%s5625_s2 + $0x20] ss:$16 sps:$4 sm:$0xff]   ;;  %964 = vmatprep.mubr.bf16.mxu0 %v4588_v58  ;;  %v3843_v2 = vld [vmem:[%s5625_s2 + $0x8c] ss:$16 sps:$4 sm:$0xff]  }
  0x20   : > { %v3793_v25 = vld [vmem:[%s5625_s2 + $0x224] ss:$16 sps:$4 sm:$0xff]   ;;  %v3796_v27 = vld [vmem:[%s5625_s2 + $0x220] ss:$16 sps:$4 sm:$0xff]   ;;  %v3841_v3 = vld [vmem:[%s5625_s2 + $0x88] ss:$16 sps:$4 sm:$0xff]  }
  0x21   : > { %939 = vmatpush1.bf16.msra.mxu0 %v3777_v14  ;;  %v3797_v28 = vld [vmem:[%s5625_s2 + $0x4] ss:$16 sps:$4 sm:$0xff]   ;;  %v3801_v30 = vld [vmem:[%s5625_s2] ss:$16 sps:$4 sm:$0xff]   ;;  %v3849_v6 = vld [vmem:[%s5625_s2 + $0x6c] ss:$16 sps:$4 sm:$0xff]  }
  0x22   : > { %988 = vmatpush1.bf16.msra.mxu1 %v3778_v15  ;;  %940 = vmatprep.subr.bf16.mxu0 %v3779_v16  ;;  %v3799_v29 = vld [vmem:[%s5625_s2 + $0x204] ss:$16 sps:$4 sm:$0xff]   ;;  %v3802_v31 = vld [vmem:[%s5625_s2 + $0x200] ss:$16 sps:$4 sm:$0xff]   ;;  %v3847_v7 = vld [vmem:[%s5625_s2 + $0x68] ss:$16 sps:$4 sm:$0xff]  }
  0x23   : > { %989 = vmatprep.subr.bf16.mxu1 %v3781_v17  ;;  %v3803_v32 = vld [vmem:[%s5625_s2 + $0x1e4] ss:$16 sps:$4 sm:$0xff]   ;;  %v3807_v37 = vld [vmem:[%s5625_s2 + $0x1e0] ss:$16 sps:$4 sm:$0xff]   ;;  %v3853_v11 = vld [vmem:[%s5625_s2 + $0x4c] ss:$16 sps:$4 sm:$0xff]  }
  0x24   : > { %v3805_v33 = vld [vmem:[%s5625_s2 + $0x344] ss:$16 sps:$4 sm:$0xff]   ;;  %v3808_v38 = vld [vmem:[%s5625_s2 + $0x340] ss:$16 sps:$4 sm:$0xff]   ;;  %v3856_v12 = vld [vmem:[%s5625_s2 + $0x2ec] ss:$16 sps:$4 sm:$0xff]  }
  0x25   : > { %941 = vmatpush1.bf16.msra.mxu0 %v3783_v18  ;;  %v3809_v39 = vld [vmem:[%s5625_s2 + $0x1c4] ss:$16 sps:$4 sm:$0xff]   ;;  %v3813_v41 = vld [vmem:[%s5625_s2 + $0x1c0] ss:$16 sps:$4 sm:$0xff]   ;;  %v3851_v14 = vld [vmem:[%s5625_s2 + $0x48] ss:$16 sps:$4 sm:$0xff]  }
  0x26   : > { %990 = vmatpush1.bf16.msra.mxu1 %v3784_v19  ;;  %942 = vmatprep.subr.bf16.mxu0 %v3785_v20  ;;  %v3811_v40 = vld [vmem:[%s5625_s2 + $0x324] ss:$16 sps:$4 sm:$0xff]   ;;  %v3814_v42 = vld [vmem:[%s5625_s2 + $0x320] ss:$16 sps:$4 sm:$0xff]   ;;  %v3854_v15 = vld [vmem:[%s5625_s2 + $0x2e8] ss:$16 sps:$4 sm:$0xff]  }
  0x27   : > { %991 = vmatprep.subr.bf16.mxu1 %v3787_v21  ;;  %v3815_v43 = vld [vmem:[%s5625_s2 + $0x1a4] ss:$16 sps:$4 sm:$0xff]   ;;  %v3819_v45 = vld [vmem:[%s5625_s2 + $0x1a0] ss:$16 sps:$4 sm:$0xff]   ;;  %v3859_v16 = vld [vmem:[%s5625_s2 + $0x2c] ss:$16 sps:$4 sm:$0xff]  }
  0x28   : > { %v3817_v44 = vld [vmem:[%s5625_s2 + $0x304] ss:$16 sps:$4 sm:$0xff]   ;;  %v3820_v46 = vld [vmem:[%s5625_s2 + $0x300] ss:$16 sps:$4 sm:$0xff]   ;;  %v3862_v17 = vld [vmem:[%s5625_s2 + $0x2cc] ss:$16 sps:$4 sm:$0xff]  }
  0x29   : > { %943 = vmatpush1.bf16.msra.mxu0 %v3789_v22  ;;  %v3821_v47 = vld [vmem:[%s5625_s2 + $0x184] ss:$16 sps:$4 sm:$0xff]   ;;  %v3826_v53 = vld [vmem:[%s5625_s2 + $0x180] ss:$16 sps:$4 sm:$0xff]   ;;  %v3857_v18 = vld [vmem:[%s5625_s2 + $0x28] ss:$16 sps:$4 sm:$0xff]  }
  0x2a   : > { %992 = vmatpush1.bf16.msra.mxu1 %v3790_v23  ;;  %944 = vmatprep.subr.bf16.mxu0 %v3791_v24  ;;  %v259_v48 = vld [vmem:[%s4514_s6 + $0x10] sm:$0xff]  ;;  %v257_v9 = vld [vmem:[%s4514_s6] sm:$0xff]  ;;  %v3860_v19 = vld [vmem:[%s5625_s2 + $0x2c8] ss:$16 sps:$4 sm:$0xff]  }
  0x2b   : > { %993 = vmatprep.subr.bf16.mxu1 %v3793_v25  ;;  %v263_v49 = vld [vmem:[%s4514_s6 + $0x30] sm:$0xff]  ;;  %v261_v10 = vld [vmem:[%s4514_s6 + $0x20] sm:$0xff]  ;;  %v266_v20 = vld [vmem:[%s4514_s6 + $0x48] sm:$0x3] }
  0x2c   : > { %v4572_v51 = vpack.c.bf16 %v263_v49, %v259_v48  ;;  %v3827_v54 = vld [vmem:[%s5625_s2 + $0x164] ss:$16 sps:$4 sm:$0xff]   ;;  %v3832_v60 = vld [vmem:[%s5625_s2 + $0x160] ss:$16 sps:$4 sm:$0xff]   ;;  %v4642_v13 = vpack.c.bf16 %v261_v10, %v257_v9  ;;  %v3865_v21 = vld [vmem:[%s5625_s2 + $0xc] ss:$16 sps:$4 sm:$0xff]   ;;  %v4667_v22 = vpack.c.bf16 %v266_v20, %v266_v20 }
  0x2d   : > { %945 = vmatpush1.bf16.msra.mxu0 %v3795_v26  ;;  %v3833_v61 = vld [vmem:[%s5625_s2 + $0x144] ss:$16 sps:$4 sm:$0xff]   ;;  %v3838_v0 = vld [vmem:[%s5625_s2 + $0x140] ss:$16 sps:$4 sm:$0xff]   ;;  %v268_v23 = vld [vmem:[%s4514_s6 + $0x58] sm:$0x3] }
  0x2e   : > { %994 = vmatpush1.bf16.msra.mxu1 %v3796_v27  ;;  %946 = vmatprep.subr.bf16.mxu0 %v3797_v28  ;;  %v3839_v1 = vld [vmem:[%s5625_s2 + $0x124] ss:$16 sps:$4 sm:$0xff]   ;;  %v3844_v4 = vld [vmem:[%s5625_s2 + $0x120] ss:$16 sps:$4 sm:$0xff]   ;;  %v4671_v25 = vpack.c.bf16 %v268_v23, %v268_v23  ;;  %v3868_v28 = vld [vmem:[%s5625_s2 + $0x2ac] ss:$16 sps:$4 sm:$0xff]  }
  0x2f   : > { %995 = vmatprep.subr.bf16.mxu1 %v3799_v29  ;;  %v3845_v5 = vld [vmem:[%s5625_s2 + $0x104] ss:$16 sps:$4 sm:$0xff]   ;;  %v3850_v8 = vld [vmem:[%s5625_s2 + $0x100] ss:$16 sps:$4 sm:$0xff]   ;;  %v3863_v29 = vld [vmem:[%s5625_s2 + $0x8] ss:$16 sps:$4 sm:$0xff]  }
  0x30   : > { %v267_v24 = vld [vmem:[%s4514_s6 + $0x50] sm:$0x3]  ;;  %v265_v26 = vld [vmem:[%s4514_s6 + $0x40] sm:$0x3]  ;;  %v3869_v34 = vld [vmem:[%s5625_s2 + $0x1e8] ss:$16 sps:$4 sm:$0xff]  }
  0x31   : > { %947 = vmatpush1.bf16.msra.mxu0 %v3801_v30  ;;  %v4674_v27 = vpack.c.bf16 %v267_v24, %v267_v24  ;;  %v3866_v30 = vld [vmem:[%s5625_s2 + $0x2a8] ss:$16 sps:$4 sm:$0xff]   ;;  %v3895_v49 = vld [vmem:[%s5625_s2 + $0x16c] ss:$16 sps:$4 sm:$0xff]   ;;  %v3923_v9 = vld [vmem:[%s5625_s2 + $0x420] ss:$16 sps:$4 sm:$0xff]  }
  0x32   : > { %996 = vmatpush1.bf16.msra.mxu1 %v3802_v31  ;;  %948 = vmatprep.subr.bf16.mxu0 %v3803_v32  ;;  %v4688_v31 = vpack.c.bf16 %v265_v26, %v265_v26  ;;  %v3871_v32 = vld [vmem:[%s5625_s2 + $0x1ec] ss:$16 sps:$4 sm:$0xff]   ;;  %v3872_v35 = vld [vmem:[%s5625_s2 + $0x288] ss:$16 sps:$4 sm:$0xff]   ;;  %v3926_v10 = vld [vmem:[%s5625_s2 + $0x620] ss:$16 sps:$4 sm:$0xff]  }
  0x33   : > { %1007 = vmatprep.subr.bf16.mxu1 %v3805_v33  ;;  %v3874_v33 = vld [vmem:[%s5625_s2 + $0x28c] ss:$16 sps:$4 sm:$0xff]   ;;  %v3890_v48 = vld [vmem:[%s5625_s2 + $0x228] ss:$16 sps:$4 sm:$0xff]   ;;  %v3943_v20 = vld [vmem:[%s5625_s2 + $0x3c4] ss:$16 sps:$4 sm:$0xff]  }
  0x34   : > { %v3904_v55 = vld [vmem:[%s5625_s2 + $0x34c] ss:$16 sps:$4 sm:$0xff]   ;;  %v3899_v56 = vld [vmem:[%s5625_s2 + $0x148] ss:$16 sps:$4 sm:$0xff]   ;;  %v3941_v23 = vld [vmem:[%s5625_s2 + $0x3c0] ss:$16 sps:$4 sm:$0xff]  }
  0x35   : > { %949 = vmatpush2.bf16.msra.mxu0 %v3807_v37  ;;  %v3877_v37 = vld [vmem:[%s5625_s2 + $0x1cc] ss:$16 sps:$4 sm:$0xff]   ;;  %v3944_v24 = vld [vmem:[%s5625_s2 + $0x5c0] ss:$16 sps:$4 sm:$0xff]   ;;  %v3949_v26 = vld [vmem:[%s5625_s2 + $0x3a4] ss:$16 sps:$4 sm:$0xff]  }
  0x36   : > { %1008 = vmatpush2.bf16.msra.mxu1 %v3808_v38  ;;  %950 = vmatprep.subr.bf16.mxu0 %v3809_v39  ;;  %v3880_v38 = vld [vmem:[%s5625_s2 + $0x26c] ss:$16 sps:$4 sm:$0xff]   ;;  %v3875_v39 = vld [vmem:[%s5625_s2 + $0x1c8] ss:$16 sps:$4 sm:$0xff]   ;;  %s4273_s6 = scalar_lea.vmem %s5574_s12, 256 }
  0x37   : > { %1009 = vmatprep.subr.bf16.mxu1 %v3811_v40  ;;  %v3878_v40 = vld [vmem:[%s5625_s2 + $0x268] ss:$16 sps:$4 sm:$0xff]   ;;  %p4274_p11 = scmp.ne.s32.totalorder %s5574_s12, %s4273_s6  ;;  %p4281_p1 = scmp.lt.s32.totalorder %s4279_s25, %s4273_s6 }
  0x39   : > { %951 = vmatpush2.bf16.msra.mxu0 %v3813_v41  ;;  %v3883_v41 = vld [vmem:[%s5625_s2 + $0x1ac] ss:$16 sps:$4 sm:$0xff]   ;;  %p4275_p12 = pnand %p4274_p11, %p4406_p5  ;;  %p4282_p2 = por %p4281_p1, %p4280_p0 }
  0x3a   : > { %1010 = vmatpush2.bf16.msra.mxu1 %v3814_v42  ;;  %952 = vmatprep.subr.bf16.mxu0 %v3815_v43  ;;  %v3886_v42 = vld [vmem:[%s5625_s2 + $0x24c] ss:$16 sps:$4 sm:$0xff]   ;;  %v3881_v43 = vld [vmem:[%s5625_s2 + $0x1a8] ss:$16 sps:$4 sm:$0xff]  }
  0x3b   : > { %1011 = vmatprep.subr.bf16.mxu1 %v3817_v44  ;;  %v3884_v44 = vld [vmem:[%s5625_s2 + $0x248] ss:$16 sps:$4 sm:$0xff]   ;;  %p4276_p13 = pneg %p4275_p12 }
  0x3d   : > { %953 = vmatpush2.bf16.msra.mxu0 %v3819_v45  ;;  %v3889_v45 = vld [vmem:[%s5625_s2 + $0x18c] ss:$16 sps:$4 sm:$0xff]   ;;  %p4283_p3 = pnand %p4282_p2, %p4276_p13 }
  0x3e   : > { %1012 = vmatpush2.bf16.msra.mxu1 %v3820_v46  ;;  %954 = vmatprep.subr.bf16.mxu0 %v3821_v47  ;;  %v3892_v46 = vld [vmem:[%s5625_s2 + $0x22c] ss:$16 sps:$4 sm:$0xff]   ;;  %v3887_v47 = vld [vmem:[%s5625_s2 + $0x188] ss:$16 sps:$4 sm:$0xff]  }
  0x3f   : > { %1030 = vmatprep.subr.bf16.mxu1 %v3825_v50  ;;  %v3898_v50 = vld [vmem:[%s5625_s2 + $0x20c] ss:$16 sps:$4 sm:$0xff]  }
  0x41   : > { %1014 = vmatmul.mubr.bf16.vlgmr.msra.gmra.mxu1 %v4572_v51  ;;  %955 = vmatpush2.bf16.msra.mxu0 %v3826_v53  ;;  %v3896_v53 = vld [vmem:[%s5625_s2 + $0x208] ss:$16 sps:$4 sm:$0xff]  }
  0x42   : > { %1031 = vmatpush1.bf16.msra.mxu1 %v3823_v52  ;;  %956 = vmatprep.subr.bf16.mxu0 %v3827_v54  ;;  %v3893_v52 = vld [vmem:[%s5625_s2 + $0x168] ss:$16 sps:$4 sm:$0xff]   ;;  %v3901_v54 = vld [vmem:[%s5625_s2 + $0x14c] ss:$16 sps:$4 sm:$0xff]  }
  0x43   : > { %1032 = vmatprep.subr.bf16.mxu1 %v3831_v57  ;;  %3256 = vmatprep.mubr.msk.bf16.mxu1 %vm925_vm0, %v4671_v25  ;;  %v3902_v57 = vld [vmem:[%s5625_s2 + $0x348] ss:$16 sps:$4 sm:$0xff]  }
  0x45   : > { %957 = vmatpush2.bf16.msra.mxu0 %v3832_v60  ;;  %v3910_v60 = vld [vmem:[%s5625_s2 + $0x32c] ss:$16 sps:$4 sm:$0xff]  }
  0x46   : > { %1033 = vmatpush1.bf16.msra.mxu1 %v3829_v59  ;;  %958 = vmatprep.subr.bf16.mxu0 %v3833_v61  ;;  %v3907_v59 = vld [vmem:[%s5625_s2 + $0x12c] ss:$16 sps:$4 sm:$0xff]   ;;  %v3905_v61 = vld [vmem:[%s5625_s2 + $0x128] ss:$16 sps:$4 sm:$0xff]  }
  0x47   : > { %1034 = vmatprep.subr.bf16.mxu1 %v3837_v62  ;;  %v3908_v62 = vld [vmem:[%s5625_s2 + $0x328] ss:$16 sps:$4 sm:$0xff]  }
  0x49   : > { %959 = vmatpush2.bf16.msra.mxu0 %v3838_v0  ;;  %1024 = vmatmul.mubr.bf16.gmra.mxu1 %v4674_v27  ;;  %v3916_v0 = vld [vmem:[%s5625_s2 + $0x30c] ss:$16 sps:$4 sm:$0xff]  }
  0x4a   : > { %1035 = vmatpush1.bf16.msra.mxu1 %v3835_v63  ;;  %960 = vmatprep.subr.bf16.mxu0 %v3839_v1  ;;  %v3913_v63 = vld [vmem:[%s5625_s2 + $0x10c] ss:$16 sps:$4 sm:$0xff]   ;;  %v3911_v1 = vld [vmem:[%s5625_s2 + $0x108] ss:$16 sps:$4 sm:$0xff]  }
  0x4b   : > { %1036 = vmatprep.subr.bf16.mxu1 %v3843_v2  ;;  %1062 = vmatprep.mubr.bf16.mxu1 %v4588_v58  ;;  %v3914_v2 = vld [vmem:[%s5625_s2 + $0x308] ss:$16 sps:$4 sm:$0xff]  }
  0x4d   : > { %961 = vmatpush2.bf16.msra.mxu0 %v3844_v4  ;;  %v3922_v4 = vld [vmem:[%s5625_s2 + $0x644] ss:$16 sps:$4 sm:$0xff]  }
  0x4e   : > { %1037 = vmatpush1.bf16.msra.mxu1 %v3841_v3  ;;  %962 = vmatprep.subr.bf16.mxu0 %v3845_v5  ;;  %v3919_v3 = vld [vmem:[%s5625_s2 + $0x444] ss:$16 sps:$4 sm:$0xff]   ;;  %v3917_v5 = vld [vmem:[%s5625_s2 + $0x440] ss:$16 sps:$4 sm:$0xff]  }
  0x4f   : > { %1038 = vmatprep.subr.bf16.mxu1 %v3849_v6  ;;  %v3920_v6 = vld [vmem:[%s5625_s2 + $0x640] ss:$16 sps:$4 sm:$0xff]  }
  0x51   : > { %963 = vmatpush2.bf16.msra.mxu0 %v3850_v8  ;;  %v3928_v8 = vld [vmem:[%s5625_s2 + $0x624] ss:$16 sps:$4 sm:$0xff]  }
  0x52   : > { %1039 = vmatpush1.bf16.msra.mxu1 %v3847_v7  ;;  %1079 = vmatprep.subr.bf16.mxu0 %v3856_v12  ;;  %v3925_v7 = vld [vmem:[%s5625_s2 + $0x424] ss:$16 sps:$4 sm:$0xff]  }
  0x53   : > { %1040 = vmatprep.subr.bf16.mxu1 %v3853_v11  ;;  %v3931_v11 = vld [vmem:[%s5625_s2 + $0x404] ss:$16 sps:$4 sm:$0xff]  }
  0x54   : > { %965 = vmatmul.mubr.bf16.vlgmr.msra.gmra.mxu0 %v4642_v13  ;;  %v3934_v12 = vld [vmem:[%s5625_s2 + $0x604] ss:$16 sps:$4 sm:$0xff]  }
  0x55   : > { %1080 = vmatpush1.bf16.msra.mxu0 %v3854_v15  ;;  %974 = vmatprep.mubr.bf16.mxu0 %v4667_v22  ;;  %v3932_v15 = vld [vmem:[%s5625_s2 + $0x600] ss:$16 sps:$4 sm:$0xff]  }
  0x56   : > { %1041 = vmatpush1.bf16.msra.mxu1 %v3851_v14  ;;  %1081 = vmatprep.subr.bf16.mxu0 %v3862_v17  ;;  %v3929_v14 = vld [vmem:[%s5625_s2 + $0x400] ss:$16 sps:$4 sm:$0xff]   ;;  %v3940_v17 = vld [vmem:[%s5625_s2 + $0x5e4] ss:$16 sps:$4 sm:$0xff]  }
  0x57   : > { %1042 = vmatprep.subr.bf16.mxu1 %v3859_v16  ;;  %v3937_v16 = vld [vmem:[%s5625_s2 + $0x3e4] ss:$16 sps:$4 sm:$0xff]  }
  0x59   : > { %1082 = vmatpush1.bf16.msra.mxu0 %v3860_v19  ;;  %v3938_v19 = vld [vmem:[%s5625_s2 + $0x5e0] ss:$16 sps:$4 sm:$0xff]  }
  0x5a   : > { %1043 = vmatpush1.bf16.msra.mxu1 %v3857_v18  ;;  %1083 = vmatprep.subr.bf16.mxu0 %v3868_v28  ;;  %v3935_v18 = vld [vmem:[%s5625_s2 + $0x3e0] ss:$16 sps:$4 sm:$0xff]   ;;  %v3952_v28 = vld [vmem:[%s5625_s2 + $0x5a4] ss:$16 sps:$4 sm:$0xff]  }
  0x5b   : > { %1044 = vmatprep.subr.bf16.mxu1 %v3865_v21  ;;  %v3946_v21 = vld [vmem:[%s5625_s2 + $0x5c4] ss:$16 sps:$4 sm:$0xff]  }
  0x5c   : > { %975 = vmatmul.mubr.bf16.gmra.mxu0 %v4688_v31 }
  0x5d   : > { %1084 = vmatpush1.bf16.msra.mxu0 %v3866_v30  ;;  %3257 = vmatprep.mubr.msk.bf16.mxu0 %vm925_vm0, %v4530_v36  ;;  %v3950_v30 = vld [vmem:[%s5625_s2 + $0x5a0] ss:$16 sps:$4 sm:$0xff]  }
  0x5e   : > { %1045 = vmatpush1.bf16.msra.mxu1 %v3863_v29  ;;  %1085 = vmatprep.subr.bf16.mxu0 %v3874_v33  ;;  %v3947_v29 = vld [vmem:[%s5625_s2 + $0x3a0] ss:$16 sps:$4 sm:$0xff]   ;;  %v3958_v33 = vld [vmem:[%s5625_s2 + $0x584] ss:$16 sps:$4 sm:$0xff]  }
  0x5f   : > { %1046 = vmatprep.subr.bf16.mxu1 %v3871_v32  ;;  %v3955_v32 = vld [vmem:[%s5625_s2 + $0x384] ss:$16 sps:$4 sm:$0xff]  }
  0x61   : > { %1086 = vmatpush1.bf16.msra.mxu0 %v3872_v35  ;;  %v3956_v35 = vld [vmem:[%s5625_s2 + $0x580] ss:$16 sps:$4 sm:$0xff]  }
  0x62   : > { %1047 = vmatpush2.bf16.msra.mxu1 %v3869_v34  ;;  %1087 = vmatprep.subr.bf16.mxu0 %v3880_v38  ;;  %v3953_v34 = vld [vmem:[%s5625_s2 + $0x380] ss:$16 sps:$4 sm:$0xff]   ;;  %v3964_v38 = vld [vmem:[%s5625_s2 + $0x564] ss:$16 sps:$4 sm:$0xff]  }
  0x63   : > { %1048 = vmatprep.subr.bf16.mxu1 %v3877_v37  ;;  %v3961_v37 = vld [vmem:[%s5625_s2 + $0x364] ss:$16 sps:$4 sm:$0xff]  }
  0x65   : > { %1088 = vmatpush1.bf16.msra.mxu0 %v3878_v40  ;;  %v3962_v40 = vld [vmem:[%s5625_s2 + $0x560] ss:$16 sps:$4 sm:$0xff]  }
  0x66   : > { %1049 = vmatpush2.bf16.msra.mxu1 %v3875_v39  ;;  %1089 = vmatprep.subr.bf16.mxu0 %v3886_v42  ;;  %v3959_v39 = vld [vmem:[%s5625_s2 + $0x360] ss:$16 sps:$4 sm:$0xff]   ;;  %v3970_v42 = vld [vmem:[%s5625_s2 + $0x6a4] ss:$16 sps:$4 sm:$0xff]  }
  0x67   : > { %1050 = vmatprep.subr.bf16.mxu1 %v3883_v41  ;;  %v3967_v41 = vld [vmem:[%s5625_s2 + $0x544] ss:$16 sps:$4 sm:$0xff]  }
  0x69   : > { %1090 = vmatpush1.bf16.msra.mxu0 %v3884_v44  ;;  %v3968_v44 = vld [vmem:[%s5625_s2 + $0x6a0] ss:$16 sps:$4 sm:$0xff]  }
  0x6a   : > { %1051 = vmatpush2.bf16.msra.mxu1 %v3881_v43  ;;  %1091 = vmatprep.subr.bf16.mxu0 %v3892_v46  ;;  %v3965_v43 = vld [vmem:[%s5625_s2 + $0x540] ss:$16 sps:$4 sm:$0xff]   ;;  %v3976_v46 = vld [vmem:[%s5625_s2 + $0x684] ss:$16 sps:$4 sm:$0xff]  }
  0x6b   : > { %1052 = vmatprep.subr.bf16.mxu1 %v3889_v45  ;;  %v3973_v45 = vld [vmem:[%s5625_s2 + $0x524] ss:$16 sps:$4 sm:$0xff]  }
  0x6d   : > { %1092 = vmatpush1.bf16.msra.mxu0 %v3890_v48  ;;  %v3974_v48 = vld [vmem:[%s5625_s2 + $0x680] ss:$16 sps:$4 sm:$0xff]  }
  0x6e   : > { %1053 = vmatpush2.bf16.msra.mxu1 %v3887_v47  ;;  %1093 = vmatprep.subr.bf16.mxu0 %v3898_v50  ;;  %v3971_v47 = vld [vmem:[%s5625_s2 + $0x520] ss:$16 sps:$4 sm:$0xff]   ;;  %v3982_v50 = vld [vmem:[%s5625_s2 + $0x664] ss:$16 sps:$4 sm:$0xff]  }
  0x6f   : > { %1054 = vmatprep.subr.bf16.mxu1 %v3895_v49  ;;  %v3979_v49 = vld [vmem:[%s5625_s2 + $0x504] ss:$16 sps:$4 sm:$0xff]  }
  0x71   : > { %1094 = vmatpush1.bf16.msra.mxu0 %v3896_v53  ;;  %v3980_v53 = vld [vmem:[%s5625_s2 + $0x660] ss:$16 sps:$4 sm:$0xff]  }
  0x72   : > { %1055 = vmatpush2.bf16.msra.mxu1 %v3893_v52  ;;  %1105 = vmatprep.subr.bf16.mxu0 %v3904_v55  ;;  %v3977_v52 = vld [vmem:[%s5625_s2 + $0x500] ss:$16 sps:$4 sm:$0xff]   ;;  %v3988_v55 = vld [vmem:[%s5625_s2 + $0x44c] ss:$16 sps:$4 sm:$0xff]  }
  0x73   : > { %1056 = vmatprep.subr.bf16.mxu1 %v3901_v54  ;;  %v3985_v54 = vld [vmem:[%s5625_s2 + $0x4e4] ss:$16 sps:$4 sm:$0xff]  }
  0x75   : > { %1106 = vmatpush2.bf16.msra.mxu0 %v3902_v57  ;;  %v3986_v57 = vld [vmem:[%s5625_s2 + $0x448] ss:$16 sps:$4 sm:$0xff]  }
  0x76   : > { %1057 = vmatpush2.bf16.msra.mxu1 %v3899_v56  ;;  %1107 = vmatprep.subr.bf16.mxu0 %v3910_v60  ;;  %v3983_v56 = vld [vmem:[%s5625_s2 + $0x4e0] ss:$16 sps:$4 sm:$0xff]   ;;  %v3994_v60 = vld [vmem:[%s5625_s2 + $0x42c] ss:$16 sps:$4 sm:$0xff]  }
  0x77   : > { %1058 = vmatprep.subr.bf16.mxu1 %v3907_v59  ;;  %v3991_v59 = vld [vmem:[%s5625_s2 + $0x4c4] ss:$16 sps:$4 sm:$0xff]  }
  0x79   : > { %1108 = vmatpush2.bf16.msra.mxu0 %v3908_v62  ;;  %v3992_v62 = vld [vmem:[%s5625_s2 + $0x428] ss:$16 sps:$4 sm:$0xff]  }
  0x7a   : > { %1059 = vmatpush2.bf16.msra.mxu1 %v3905_v61  ;;  %1109 = vmatprep.subr.bf16.mxu0 %v3916_v0  ;;  %v3989_v61 = vld [vmem:[%s5625_s2 + $0x4c0] ss:$16 sps:$4 sm:$0xff]   ;;  %v4000_v0 = vld [vmem:[%s5625_s2 + $0x40c] ss:$16 sps:$4 sm:$0xff]  }
  0x7b   : > { %1060 = vmatprep.subr.bf16.mxu1 %v3913_v63  ;;  %v3997_v63 = vld [vmem:[%s5625_s2 + $0x4a4] ss:$16 sps:$4 sm:$0xff]  }
  0x7d   : > { %1110 = vmatpush2.bf16.msra.mxu0 %v3914_v2  ;;  %v3998_v2 = vld [vmem:[%s5625_s2 + $0x408] ss:$16 sps:$4 sm:$0xff]  }
  0x7e   : > { %1061 = vmatpush2.bf16.msra.mxu1 %v3911_v1  ;;  %1777 = vmatprep.subr.bf16.mxu0 %v3919_v3  ;;  %v3995_v1 = vld [vmem:[%s5625_s2 + $0x4a0] ss:$16 sps:$4 sm:$0xff]   ;;  %v4003_v3 = vld [vmem:[%s5625_s2 + $0x484] ss:$16 sps:$4 sm:$0xff]  }
  0x7f   : > { %1828 = vmatprep.subr.bf16.mxu1 %v3922_v4  ;;  %v4006_v4 = vld [vmem:[%s5625_s2 + $0x3ec] ss:$16 sps:$4 sm:$0xff]  }
  0x80   : > { %1112 = vmatmul.mubr.bf16.vlgmr.msra.gmra.mxu0 %v4572_v51 }
  0x81   : > { %1063 = vmatmul.mubr.bf16.vlgmr.msra.gmra.mxu1 %v4642_v13  ;;  %1778 = vmatpush1.bf16.msra.mxu0 %v3917_v5  ;;  %v4001_v5 = vld [vmem:[%s5625_s2 + $0x480] ss:$16 sps:$4 sm:$0xff]  }
  0x82   : > { %1829 = vmatpush1.bf16.msra.mxu1 %v3920_v6  ;;  %1779 = vmatprep.subr.bf16.mxu0 %v3925_v7  ;;  %v4004_v6 = vld [vmem:[%s5625_s2 + $0x3e8] ss:$16 sps:$4 sm:$0xff]   ;;  %v4009_v7 = vld [vmem:[%s5625_s2 + $0x464] ss:$16 sps:$4 sm:$0xff]  }
  0x83   : > { %1830 = vmatprep.subr.bf16.mxu1 %v3928_v8  ;;  %1072 = vmatprep.mubr.bf16.mxu1 %v4667_v22  ;;  %v4012_v8 = vld [vmem:[%s5625_s2 + $0x3cc] ss:$16 sps:$4 sm:$0xff]  }
  0x84   : > { %3258 = vmatprep.mubr.msk.bf16.mxu0 %vm925_vm0, %v4671_v25 }
  0x85   : > { %1780 = vmatpush1.bf16.msra.mxu0 %v3923_v9  ;;  %v4007_v9 = vld [vmem:[%s5625_s2 + $0x460] ss:$16 sps:$4 sm:$0xff]  }
  0x86   : > { %1831 = vmatpush1.bf16.msra.mxu1 %v3926_v10  ;;  %1781 = vmatprep.subr.bf16.mxu0 %v3931_v11  ;;  %v4010_v10 = vld [vmem:[%s5625_s2 + $0x3c8] ss:$16 sps:$4 sm:$0xff]   ;;  %v4015_v11 = vld [vmem:[%s5625_s2 + $0x3ac] ss:$16 sps:$4 sm:$0xff]  }
  0x87   : > { %1832 = vmatprep.subr.bf16.mxu1 %v3934_v12  ;;  %v4018_v12 = vld [vmem:[%s5625_s2 + $0x64c] ss:$16 sps:$4 sm:$0xff]  }
  0x88   : > { %1122 = vmatmul.mubr.bf16.gmra.mxu0 %v4674_v27 }
  0x89   : > { %1073 = vmatmul.mubr.bf16.gmra.mxu1 %v4688_v31  ;;  %1782 = vmatpush1.bf16.msra.mxu0 %v3929_v14  ;;  %v4013_v14 = vld [vmem:[%s5625_s2 + $0x3a8] ss:$16 sps:$4 sm:$0xff]  }
  0x8a   : > { %1833 = vmatpush1.bf16.msra.mxu1 %v3932_v15  ;;  %1783 = vmatprep.subr.bf16.mxu0 %v3937_v16  ;;  %v4016_v15 = vld [vmem:[%s5625_s2 + $0x648] ss:$16 sps:$4 sm:$0xff]   ;;  %v4021_v16 = vld [vmem:[%s5625_s2 + $0x38c] ss:$16 sps:$4 sm:$0xff]  }
  0x8b   : > { %1834 = vmatprep.subr.bf16.mxu1 %v3940_v17  ;;  %3475 = vmatprep.mubr.msk.bf16.mxu1 %vm925_vm0, %v4530_v36  ;;  %v4024_v17 = vld [vmem:[%s5625_s2 + $0x62c] ss:$16 sps:$4 sm:$0xff]  }
  0x8c   : > { %1809 = vmatprep.mubr.bf16.mxu0 %v4588_v58 }
  0x8d   : > { %1784 = vmatpush1.bf16.msra.mxu0 %v3935_v18  ;;  %v4019_v18 = vld [vmem:[%s5625_s2 + $0x388] ss:$16 sps:$4 sm:$0xff]  }
  0x8e   : > { %1835 = vmatpush1.bf16.msra.mxu1 %v3938_v19  ;;  %1785 = vmatprep.subr.bf16.mxu0 %v3943_v20  ;;  %v4022_v19 = vld [vmem:[%s5625_s2 + $0x628] ss:$16 sps:$4 sm:$0xff]   ;;  %v4027_v20 = vld [vmem:[%s5625_s2 + $0x36c] ss:$16 sps:$4 sm:$0xff]  }
  0x8f   : > { %1836 = vmatprep.subr.bf16.mxu1 %v3946_v21  ;;  %v4030_v21 = vld [vmem:[%s5625_s2 + $0x60c] ss:$16 sps:$4 sm:$0xff]  }
  0x91   : > { %1786 = vmatpush1.bf16.msra.mxu0 %v3941_v23  ;;  %v4025_v23 = vld [vmem:[%s5625_s2 + $0x368] ss:$16 sps:$4 sm:$0xff]  }
  0x92   : > { %1837 = vmatpush1.bf16.msra.mxu1 %v3944_v24  ;;  %1787 = vmatprep.subr.bf16.mxu0 %v3949_v26  ;;  %v4028_v24 = vld [vmem:[%s5625_s2 + $0x608] ss:$16 sps:$4 sm:$0xff]   ;;  %v4033_v26 = vld [vmem:[%s5625_s2 + $0x54c] ss:$16 sps:$4 sm:$0xff]  }
  0x93   : > { %1838 = vmatprep.subr.bf16.mxu1 %v3952_v28  ;;  %v4036_v28 = vld [vmem:[%s5625_s2 + $0x5ec] ss:$16 sps:$4 sm:$0xff]  }
  0x95   : > { %1788 = vmatpush1.bf16.msra.mxu0 %v3947_v29  ;;  %v4031_v29 = vld [vmem:[%s5625_s2 + $0x548] ss:$16 sps:$4 sm:$0xff]  }
  0x96   : > { %1839 = vmatpush1.bf16.msra.mxu1 %v3950_v30  ;;  %1789 = vmatprep.subr.bf16.mxu0 %v3955_v32  ;;  %v4034_v30 = vld [vmem:[%s5625_s2 + $0x5e8] ss:$16 sps:$4 sm:$0xff]   ;;  %v4039_v32 = vld [vmem:[%s5625_s2 + $0x52c] ss:$16 sps:$4 sm:$0xff]  }
  0x97   : > { %1840 = vmatprep.subr.bf16.mxu1 %v3958_v33  ;;  %v4042_v33 = vld [vmem:[%s5625_s2 + $0x5cc] ss:$16 sps:$4 sm:$0xff]  }
  0x99   : > { %1790 = vmatpush1.bf16.msra.mxu0 %v3953_v34  ;;  %v4037_v34 = vld [vmem:[%s5625_s2 + $0x528] ss:$16 sps:$4 sm:$0xff]  }
  0x9a   : > { %1841 = vmatpush1.bf16.msra.mxu1 %v3956_v35  ;;  %1791 = vmatprep.subr.bf16.mxu0 %v3961_v37  ;;  %v4040_v35 = vld [vmem:[%s5625_s2 + $0x5c8] ss:$16 sps:$4 sm:$0xff]   ;;  %v4045_v37 = vld [vmem:[%s5625_s2 + $0x50c] ss:$16 sps:$4 sm:$0xff]  }
  0x9b   : > { %1842 = vmatprep.subr.bf16.mxu1 %v3964_v38  ;;  %v4048_v38 = vld [vmem:[%s5625_s2 + $0x5ac] ss:$16 sps:$4 sm:$0xff]  }
  0x9d   : > { %1792 = vmatpush1.bf16.msra.mxu0 %v3959_v39  ;;  %v4043_v39 = vld [vmem:[%s5625_s2 + $0x508] ss:$16 sps:$4 sm:$0xff]  }
  0x9e   : > { %1843 = vmatpush1.bf16.msra.mxu1 %v3962_v40  ;;  %1793 = vmatprep.subr.bf16.mxu0 %v3967_v41  ;;  %v4046_v40 = vld [vmem:[%s5625_s2 + $0x5a8] ss:$16 sps:$4 sm:$0xff]   ;;  %v4051_v41 = vld [vmem:[%s5625_s2 + $0x4ec] ss:$16 sps:$4 sm:$0xff]  }
  0x9f   : > { %1854 = vmatprep.subr.bf16.mxu1 %v3970_v42  ;;  %v4054_v42 = vld [vmem:[%s5625_s2 + $0x58c] ss:$16 sps:$4 sm:$0xff]  }
  0xa1   : > { %1794 = vmatpush2.bf16.msra.mxu0 %v3965_v43  ;;  %v4049_v43 = vld [vmem:[%s5625_s2 + $0x4e8] ss:$16 sps:$4 sm:$0xff]  }
  0xa2   : > { %1855 = vmatpush2.bf16.msra.mxu1 %v3968_v44  ;;  %1795 = vmatprep.subr.bf16.mxu0 %v3973_v45  ;;  %v4052_v44 = vld [vmem:[%s5625_s2 + $0x588] ss:$16 sps:$4 sm:$0xff]   ;;  %v4057_v45 = vld [vmem:[%s5625_s2 + $0x4cc] ss:$16 sps:$4 sm:$0xff]  }
  0xa3   : > { %1856 = vmatprep.subr.bf16.mxu1 %v3976_v46  ;;  %v4060_v46 = vld [vmem:[%s5625_s2 + $0x56c] ss:$16 sps:$4 sm:$0xff]  }
  0xa5   : > { %1796 = vmatpush2.bf16.msra.mxu0 %v3971_v47  ;;  %v4055_v47 = vld [vmem:[%s5625_s2 + $0x4c8] ss:$16 sps:$4 sm:$0xff]  }
  0xa6   : > { %1857 = vmatpush2.bf16.msra.mxu1 %v3974_v48  ;;  %1797 = vmatprep.subr.bf16.mxu0 %v3979_v49  ;;  %v4058_v48 = vld [vmem:[%s5625_s2 + $0x568] ss:$16 sps:$4 sm:$0xff]   ;;  %v4063_v49 = vld [vmem:[%s5625_s2 + $0x4ac] ss:$16 sps:$4 sm:$0xff]  }
  0xa7   : > { %1858 = vmatprep.subr.bf16.mxu1 %v3982_v50  ;;  %v4066_v50 = vld [vmem:[%s5625_s2 + $0x6ac] ss:$16 sps:$4 sm:$0xff]  }
  0xa9   : > { %1798 = vmatpush2.bf16.msra.mxu0 %v3977_v52  ;;  %v4061_v52 = vld [vmem:[%s5625_s2 + $0x4a8] ss:$16 sps:$4 sm:$0xff]  }
  0xaa   : > { %1859 = vmatpush2.bf16.msra.mxu1 %v3980_v53  ;;  %1799 = vmatprep.subr.bf16.mxu0 %v3985_v54  ;;  %v4064_v53 = vld [vmem:[%s5625_s2 + $0x6a8] ss:$16 sps:$4 sm:$0xff]   ;;  %v4069_v54 = vld [vmem:[%s5625_s2 + $0x48c] ss:$16 sps:$4 sm:$0xff]  }
  0xab   : > { %1879 = vmatprep.subr.bf16.mxu1 %v3988_v55  ;;  %v4072_v55 = vld [vmem:[%s5625_s2 + $0x68c] ss:$16 sps:$4 sm:$0xff]  }
  0xad   : > { %1861 = vmatmul.mubr.bf16.vlgmr.msra.gmra.mxu1 %v4572_v51  ;;  %1800 = vmatpush2.bf16.msra.mxu0 %v3983_v56  ;;  %v4067_v56 = vld [vmem:[%s5625_s2 + $0x488] ss:$16 sps:$4 sm:$0xff]  }
  0xae   : > { %1880 = vmatpush1.bf16.msra.mxu1 %v3986_v57  ;;  %1801 = vmatprep.subr.bf16.mxu0 %v3991_v59  ;;  %v4070_v57 = vld [vmem:[%s5625_s2 + $0x688] ss:$16 sps:$4 sm:$0xff]   ;;  %v4075_v59 = vld [vmem:[%s5625_s2 + $0x46c] ss:$16 sps:$4 sm:$0xff]  }
  0xaf   : > { %1881 = vmatprep.subr.bf16.mxu1 %v3994_v60  ;;  %3476 = vmatprep.mubr.msk.bf16.mxu1 %vm925_vm0, %v4671_v25  ;;  %v4078_v60 = vld [vmem:[%s5625_s2 + $0x66c] ss:$16 sps:$4 sm:$0xff]  }
  0xb1   : > { %1802 = vmatpush2.bf16.msra.mxu0 %v3989_v61  ;;  %v4073_v61 = vld [vmem:[%s5625_s2 + $0x468] ss:$16 sps:$4 sm:$0xff]  }
  0xb2   : > { %1882 = vmatpush1.bf16.msra.mxu1 %v3992_v62  ;;  %1803 = vmatprep.subr.bf16.mxu0 %v3997_v63  ;;  %v4076_v62 = vld [vmem:[%s5625_s2 + $0x668] ss:$16 sps:$4 sm:$0xff]   ;;  %v4081_v63 = vld [vmem:[%s5625_s2 + $0x7a4] ss:$16 sps:$4 sm:$0xff]  }
  0xb3   : > { %1883 = vmatprep.subr.bf16.mxu1 %v4000_v0  ;;  %v4084_v0 = vld [vmem:[%s5625_s2 + $0x9a4] ss:$16 sps:$4 sm:$0xff]  }
  0xb5   : > { %1871 = vmatmul.mubr.bf16.gmra.mxu1 %v4674_v27  ;;  %1804 = vmatpush2.bf16.msra.mxu0 %v3995_v1  ;;  %v4079_v1 = vld [vmem:[%s5625_s2 + $0x7a0] ss:$16 sps:$4 sm:$0xff]  }
  0xb6   : > { %1884 = vmatpush1.bf16.msra.mxu1 %v3998_v2  ;;  %1805 = vmatprep.subr.bf16.mxu0 %v4003_v3  ;;  %v4082_v2 = vld [vmem:[%s5625_s2 + $0x9a0] ss:$16 sps:$4 sm:$0xff]   ;;  %v4087_v3 = vld [vmem:[%s5625_s2 + $0x784] ss:$16 sps:$4 sm:$0xff]  }
  0xb7   : > { %1885 = vmatprep.subr.bf16.mxu1 %v4006_v4  ;;  %1911 = vmatprep.mubr.bf16.mxu1 %v4588_v58  ;;  %v4090_v4 = vld [vmem:[%s5625_s2 + $0x984] ss:$16 sps:$4 sm:$0xff]  }
  0xb9   : > { %1806 = vmatpush2.bf16.msra.mxu0 %v4001_v5  ;;  %v4085_v5 = vld [vmem:[%s5625_s2 + $0x780] ss:$16 sps:$4 sm:$0xff]  }
  0xba   : > { %1886 = vmatpush1.bf16.msra.mxu1 %v4004_v6  ;;  %1807 = vmatprep.subr.bf16.mxu0 %v4009_v7  ;;  %v4088_v6 = vld [vmem:[%s5625_s2 + $0x980] ss:$16 sps:$4 sm:$0xff]   ;;  %v4093_v7 = vld [vmem:[%s5625_s2 + $0x764] ss:$16 sps:$4 sm:$0xff]  }
  0xbb   : > { %1887 = vmatprep.subr.bf16.mxu1 %v4012_v8  ;;  %v4096_v8 = vld [vmem:[%s5625_s2 + $0x964] ss:$16 sps:$4 sm:$0xff]  }
  0xbd   : > { %1808 = vmatpush2.bf16.msra.mxu0 %v4007_v9  ;;  %v4091_v9 = vld [vmem:[%s5625_s2 + $0x760] ss:$16 sps:$4 sm:$0xff]  }
  0xbe   : > { %1888 = vmatpush1.bf16.msra.mxu1 %v4010_v10  ;;  %1930 = vmatprep.subr.bf16.mxu0 %v4018_v12  ;;  %v4094_v10 = vld [vmem:[%s5625_s2 + $0x960] ss:$16 sps:$4 sm:$0xff]   ;;  %v4102_v12 = vld [vmem:[%s5625_s2 + $0x944] ss:$16 sps:$4 sm:$0xff]  }
  0xbf   : > { %1889 = vmatprep.subr.bf16.mxu1 %v4015_v11  ;;  %v4099_v11 = vld [vmem:[%s5625_s2 + $0x744] ss:$16 sps:$4 sm:$0xff]  }
  0xc0   : > { %1810 = vmatmul.mubr.bf16.vlgmr.msra.gmra.mxu0 %v4642_v13 }
  0xc1   : > { %1931 = vmatpush1.bf16.msra.mxu0 %v4016_v15  ;;  %1819 = vmatprep.mubr.bf16.mxu0 %v4667_v22  ;;  %v4100_v15 = vld [vmem:[%s5625_s2 + $0x940] ss:$16 sps:$4 sm:$0xff]  }
  0xc2   : > { %1890 = vmatpush1.bf16.msra.mxu1 %v4013_v14  ;;  %1932 = vmatprep.subr.bf16.mxu0 %v4024_v17  ;;  %v4097_v14 = vld [vmem:[%s5625_s2 + $0x740] ss:$16 sps:$4 sm:$0xff]   ;;  %v4108_v17 = vld [vmem:[%s5625_s2 + $0x924] ss:$16 sps:$4 sm:$0xff]  }
  0xc3   : > { %1891 = vmatprep.subr.bf16.mxu1 %v4021_v16  ;;  %v4105_v16 = vld [vmem:[%s5625_s2 + $0x724] ss:$16 sps:$4 sm:$0xff]  }
  0xc5   : > { %1933 = vmatpush1.bf16.msra.mxu0 %v4022_v19  ;;  %v4106_v19 = vld [vmem:[%s5625_s2 + $0x920] ss:$16 sps:$4 sm:$0xff]  }
  0xc6   : > { %1892 = vmatpush1.bf16.msra.mxu1 %v4019_v18  ;;  %1934 = vmatprep.subr.bf16.mxu0 %v4030_v21  ;;  %v4103_v18 = vld [vmem:[%s5625_s2 + $0x720] ss:$16 sps:$4 sm:$0xff]   ;;  %v4114_v21 = vld [vmem:[%s5625_s2 + $0x904] ss:$16 sps:$4 sm:$0xff]  }
  0xc7   : > { %1893 = vmatprep.subr.bf16.mxu1 %v4027_v20  ;;  %v4111_v20 = vld [vmem:[%s5625_s2 + $0x704] ss:$16 sps:$4 sm:$0xff]  }
  0xc8   : > { %1820 = vmatmul.mubr.bf16.gmra.mxu0 %v4688_v31 }
  0xc9   : > { %1935 = vmatpush1.bf16.msra.mxu0 %v4028_v24  ;;  %3477 = vmatprep.mubr.msk.bf16.mxu0 %vm925_vm0, %v4530_v36  ;;  %v4112_v24 = vld [vmem:[%s5625_s2 + $0x900] ss:$16 sps:$4 sm:$0xff]  }
  0xca   : > { %1894 = vmatpush1.bf16.msra.mxu1 %v4025_v23  ;;  %1936 = vmatprep.subr.bf16.mxu0 %v4036_v28  ;;  %v4109_v23 = vld [vmem:[%s5625_s2 + $0x700] ss:$16 sps:$4 sm:$0xff]   ;;  %v4120_v28 = vld [vmem:[%s5625_s2 + $0x8e4] ss:$16 sps:$4 sm:$0xff]  }
  0xcb   : > { %1895 = vmatprep.subr.bf16.mxu1 %v4033_v26  ;;  %v4117_v26 = vld [vmem:[%s5625_s2 + $0x6e4] ss:$16 sps:$4 sm:$0xff]  }
  0xcd   : > { %1937 = vmatpush1.bf16.msra.mxu0 %v4034_v30  ;;  %v4118_v30 = vld [vmem:[%s5625_s2 + $0x8e0] ss:$16 sps:$4 sm:$0xff]  }
  0xce   : > { %1896 = vmatpush2.bf16.msra.mxu1 %v4031_v29  ;;  %1938 = vmatprep.subr.bf16.mxu0 %v4042_v33  ;;  %v4115_v29 = vld [vmem:[%s5625_s2 + $0x6e0] ss:$16 sps:$4 sm:$0xff]   ;;  %v4126_v33 = vld [vmem:[%s5625_s2 + $0x8c4] ss:$16 sps:$4 sm:$0xff]  }
  0xcf   : > { %1897 = vmatprep.subr.bf16.mxu1 %v4039_v32  ;;  %v4123_v32 = vld [vmem:[%s5625_s2 + $0x6c4] ss:$16 sps:$4 sm:$0xff]  }
  0xd1   : > { %1939 = vmatpush1.bf16.msra.mxu0 %v4040_v35  ;;  %v4124_v35 = vld [vmem:[%s5625_s2 + $0x8c0] ss:$16 sps:$4 sm:$0xff]  }
  0xd2   : > { %1898 = vmatpush2.bf16.msra.mxu1 %v4037_v34  ;;  %1940 = vmatprep.subr.bf16.mxu0 %v4048_v38  ;;  %v4121_v34 = vld [vmem:[%s5625_s2 + $0x6c0] ss:$16 sps:$4 sm:$0xff]   ;;  %v4132_v38 = vld [vmem:[%s5625_s2 + $0xa04] ss:$16 sps:$4 sm:$0xff]  }
  0xd3   : > { %1899 = vmatprep.subr.bf16.mxu1 %v4045_v37  ;;  %v4129_v37 = vld [vmem:[%s5625_s2 + $0x8a4] ss:$16 sps:$4 sm:$0xff]  }
  0xd5   : > { %1941 = vmatpush1.bf16.msra.mxu0 %v4046_v40  ;;  %v4130_v40 = vld [vmem:[%s5625_s2 + $0xa00] ss:$16 sps:$4 sm:$0xff]  }
  0xd6   : > { %1900 = vmatpush2.bf16.msra.mxu1 %v4043_v39  ;;  %1942 = vmatprep.subr.bf16.mxu0 %v4054_v42  ;;  %v4127_v39 = vld [vmem:[%s5625_s2 + $0x8a0] ss:$16 sps:$4 sm:$0xff]   ;;  %v4135_v42 = vld [vmem:[%s5625_s2 + $0x884] ss:$16 sps:$4 sm:$0xff]  }
  0xd7   : > { %1901 = vmatprep.subr.bf16.mxu1 %v4051_v41 }
  0xd9   : > { %1943 = vmatpush1.bf16.msra.mxu0 %v4052_v44  ;;  %v4133_v44 = vld [vmem:[%s5625_s2 + $0x880] ss:$16 sps:$4 sm:$0xff]  }
  0xda   : > { %1902 = vmatpush2.bf16.msra.mxu1 %v4049_v43  ;;  %1944 = vmatprep.subr.bf16.mxu0 %v4060_v46  ;;  %v4138_v43 = vld [vmem:[%s5625_s2 + $0x9e4] ss:$16 sps:$4 sm:$0xff]  }
  0xdb   : > { %1903 = vmatprep.subr.bf16.mxu1 %v4057_v45  ;;  %v4136_v45 = vld [vmem:[%s5625_s2 + $0x9e0] ss:$16 sps:$4 sm:$0xff]  }
  0xdd   : > { %1945 = vmatpush1.bf16.msra.mxu0 %v4058_v48  ;;  %v4144_v48 = vld [vmem:[%s5625_s2 + $0x9c4] ss:$16 sps:$4 sm:$0xff]  }
  0xde   : > { %1904 = vmatpush2.bf16.msra.mxu1 %v4055_v47  ;;  %1956 = vmatprep.subr.bf16.mxu0 %v4066_v50  ;;  %v4141_v47 = vld [vmem:[%s5625_s2 + $0x864] ss:$16 sps:$4 sm:$0xff]   ;;  %v4142_v50 = vld [vmem:[%s5625_s2 + $0x9c0] ss:$16 sps:$4 sm:$0xff]  }
  0xdf   : > { %1905 = vmatprep.subr.bf16.mxu1 %v4063_v49  ;;  %v4139_v49 = vld [vmem:[%s5625_s2 + $0x860] ss:$16 sps:$4 sm:$0xff]  }
  0xe1   : > { %1957 = vmatpush2.bf16.msra.mxu0 %v4064_v53  ;;  %v4147_v53 = vld [vmem:[%s5625_s2 + $0x844] ss:$16 sps:$4 sm:$0xff]  }
  0xe2   : > { %1906 = vmatpush2.bf16.msra.mxu1 %v4061_v52  ;;  %1958 = vmatprep.subr.bf16.mxu0 %v4072_v55 }
  0xe3   : > { %1907 = vmatprep.subr.bf16.mxu1 %v4069_v54  ;;  %v4150_v54 = vld [vmem:[%s5625_s2 + $0x7ac] ss:$16 sps:$4 sm:$0xff]  }
  0xe5   : > { %1959 = vmatpush2.bf16.msra.mxu0 %v4070_v57  ;;  %v4145_v57 = vld [vmem:[%s5625_s2 + $0x840] ss:$16 sps:$4 sm:$0xff]  }
  0xe6   : > { %1908 = vmatpush2.bf16.msra.mxu1 %v4067_v56  ;;  %1960 = vmatprep.subr.bf16.mxu0 %v4078_v60 }
  0xe7   : > { %1909 = vmatprep.subr.bf16.mxu1 %v4075_v59  ;;  %v4148_v59 = vld [vmem:[%s5625_s2 + $0x7a8] ss:$16 sps:$4 sm:$0xff]  }
  0xe9   : > { %1961 = vmatpush2.bf16.msra.mxu0 %v4076_v62  ;;  %v4153_v62 = vld [vmem:[%s5625_s2 + $0x824] ss:$16 sps:$4 sm:$0xff]  }
  0xea   : > { %1910 = vmatpush2.bf16.msra.mxu1 %v4073_v61  ;;  %2679 = vmatprep.subr.bf16.mxu0 %v4081_v63  ;;  %v4156_v63 = vld [vmem:[%s5625_s2 + $0x78c] ss:$16 sps:$4 sm:$0xff]  }
  0xeb   : > { %2730 = vmatprep.subr.bf16.mxu1 %v4084_v0 }
  0xec   : > { %1963 = vmatmul.mubr.bf16.vlgmr.msra.gmra.mxu0 %v4572_v51 }
  0xed   : > { %1912 = vmatmul.mubr.bf16.vlgmr.msra.gmra.mxu1 %v4642_v13  ;;  %2680 = vmatpush1.bf16.msra.mxu0 %v4079_v1 }
  0xee   : > { %2731 = vmatpush1.bf16.msra.mxu1 %v4082_v2  ;;  %2681 = vmatprep.subr.bf16.mxu0 %v4087_v3 }
  0xef   : > { %2732 = vmatprep.subr.bf16.mxu1 %v4090_v4  ;;  %1921 = vmatprep.mubr.bf16.mxu1 %v4667_v22  ;;  %v4151_v4 = vld [vmem:[%s5625_s2 + $0x820] ss:$16 sps:$4 sm:$0xff]  }
  0xf0   : > { %3478 = vmatprep.mubr.msk.bf16.mxu0 %vm925_vm0, %v4671_v25 }
  0xf1   : > { %2682 = vmatpush1.bf16.msra.mxu0 %v4085_v5  ;;  %v4154_v5 = vld [vmem:[%s5625_s2 + $0x788] ss:$16 sps:$4 sm:$0xff]  }
  0xf2   : > { %2733 = vmatpush1.bf16.msra.mxu1 %v4088_v6  ;;  %2683 = vmatprep.subr.bf16.mxu0 %v4093_v7  ;;  %v4159_v7 = vld [vmem:[%s5625_s2 + $0x804] ss:$16 sps:$4 sm:$0xff]  }
  0xf3   : > { %2734 = vmatprep.subr.bf16.mxu1 %v4096_v8  ;;  %v4162_v8 = vld [vmem:[%s5625_s2 + $0x76c] ss:$16 sps:$4 sm:$0xff]  }
  0xf4   : > { %1973 = vmatmul.mubr.bf16.gmra.mxu0 %v4674_v27 }
  0xf5   : > { %1922 = vmatmul.mubr.bf16.gmra.mxu1 %v4688_v31  ;;  %2684 = vmatpush1.bf16.msra.mxu0 %v4091_v9 }
  0xf6   : > { %2735 = vmatpush1.bf16.msra.mxu1 %v4094_v10  ;;  %2685 = vmatprep.subr.bf16.mxu0 %v4099_v11 }
  0xf7   : > { %2736 = vmatprep.subr.bf16.mxu1 %v4102_v12  ;;  %3695 = vmatprep.mubr.msk.bf16.mxu1 %vm925_vm0, %v4530_v36 }
  0xf8   : > { %2711 = vmatprep.mubr.bf16.mxu0 %v4588_v58 }
  0xf9   : > { %2686 = vmatpush1.bf16.msra.mxu0 %v4097_v14  ;;  %v4157_v14 = vld [vmem:[%s5625_s2 + $0x800] ss:$16 sps:$4 sm:$0xff]  }
  0xfa   : > { %2737 = vmatpush1.bf16.msra.mxu1 %v4100_v15  ;;  %2687 = vmatprep.subr.bf16.mxu0 %v4105_v16  ;;  %v4160_v15 = vld [vmem:[%s5625_s2 + $0x768] ss:$16 sps:$4 sm:$0xff]   ;;  %v4165_v16 = vld [vmem:[%s5625_s2 + $0x7e4] ss:$16 sps:$4 sm:$0xff]  }
  0xfb   : > { %2738 = vmatprep.subr.bf16.mxu1 %v4108_v17  ;;  %v4168_v17 = vld [vmem:[%s5625_s2 + $0x74c] ss:$16 sps:$4 sm:$0xff]  }
  0xfd   : > { %2688 = vmatpush1.bf16.msra.mxu0 %v4103_v18 }
  0xfe   : > { %2739 = vmatpush1.bf16.msra.mxu1 %v4106_v19  ;;  %2689 = vmatprep.subr.bf16.mxu0 %v4111_v20 }
  0xff   : > { %2740 = vmatprep.subr.bf16.mxu1 %v4114_v21  ;;  %v4163_v21 = vld [vmem:[%s5625_s2 + $0x7e0] ss:$16 sps:$4 sm:$0xff]  }
 0x101   : > { %2690 = vmatpush1.bf16.msra.mxu0 %v4109_v23  ;;  %v1015_v41 = vpop.f32.mrf.mxu1  ;;  %v4166_v23 = vld [vmem:[%s5625_s2 + $0x748] ss:$16 sps:$4 sm:$0xff]  }
 0x102   : > { %2741 = vmatpush1.bf16.msra.mxu1 %v4112_v24  ;;  %2691 = vmatprep.subr.bf16.mxu0 %v4117_v26  ;;  %v4171_v24 = vld [vmem:[%s5625_s2 + $0x7c4] ss:$16 sps:$4 sm:$0xff]   ;;  %v4174_v26 = vld [vmem:[%s5625_s2 + $0x72c] ss:$16 sps:$4 sm:$0xff]  }
 0x103   : > { %2742 = vmatprep.subr.bf16.mxu1 %v4120_v28  ;;  %v1017_v46 = vpop.f32.mrf.mxu1 }
 0x105   : > { %2692 = vmatpush1.bf16.msra.mxu0 %v4115_v29  ;;  %v1019_v52 = vpop.f32.mrf.mxu1  ;;  %v4169_v29 = vld [vmem:[%s5625_s2 + $0x7c0] ss:$16 sps:$4 sm:$0xff]  }
 0x106   : > { %2743 = vmatpush1.bf16.msra.mxu1 %v4118_v30  ;;  %2693 = vmatprep.subr.bf16.mxu0 %v4123_v32  ;;  %v4172_v30 = vld [vmem:[%s5625_s2 + $0x728] ss:$16 sps:$4 sm:$0xff]   ;;  %v4177_v32 = vld [vmem:[%s5625_s2 + $0x70c] ss:$16 sps:$4 sm:$0xff]  }
 0x107   : > { %2744 = vmatprep.subr.bf16.mxu1 %v4126_v33  ;;  %v1021_v60 = vpop.f32.mrf.mxu1  ;;  %v4175_v33 = vld [vmem:[%s5625_s2 + $0x708] ss:$16 sps:$4 sm:$0xff]  }
 0x109   : > { %2694 = vmatpush1.bf16.msra.mxu0 %v4121_v34  ;;  %v1025_v2 = vpop.f32.mrf.mxu1  ;;  %v4178_v34 = vld [vmem:[%s5625_s2 + $0x9a8] ss:$16 sps:$4 sm:$0xff]  }
 0x10a   : > { %2745 = vmatpush1.bf16.msra.mxu1 %v4124_v35  ;;  %2695 = vmatprep.subr.bf16.mxu0 %v4129_v37  ;;  %v4183_v35 = vld [vmem:[%s5625_s2 + $0x6ec] ss:$16 sps:$4 sm:$0xff]  }
 0x10b   : > { %2756 = vmatprep.subr.bf16.mxu1 %v4132_v38  ;;  %v1026_v9 = vpop.f32.mrf.mxu1  ;;  %v4186_v37 = vld [vmem:[%s5625_s2 + $0x98c] ss:$16 sps:$4 sm:$0xff]   ;;  %v4181_v38 = vld [vmem:[%s5625_s2 + $0x6e8] ss:$16 sps:$4 sm:$0xff]  }
 0x10d   : > { %2696 = vmatpush2.bf16.msra.mxu0 %v4127_v39  ;;  %v1027_v12 = vpop.f32.mrf.mxu1  ;;  %v4184_v39 = vld [vmem:[%s5625_s2 + $0x988] ss:$16 sps:$4 sm:$0xff]  }
 0x10e   : > { %2757 = vmatpush2.bf16.msra.mxu1 %v4130_v40  ;;  %2697 = vmatprep.subr.bf16.mxu0 %v4135_v42  ;;  %v4189_v40 = vld [vmem:[%s5625_s2 + $0x6cc] ss:$16 sps:$4 sm:$0xff]   ;;  %v4187_v42 = vld [vmem:[%s5625_s2 + $0x6c8] ss:$16 sps:$4 sm:$0xff]  }
 0x10f   : > { %2758 = vmatprep.subr.bf16.mxu1 %v4138_v43  ;;  %v1028_v19 = vpop.f32.mrf.mxu1  ;;  %v4190_v43 = vld [vmem:[%s5625_s2 + $0x968] ss:$16 sps:$4 sm:$0xff]  }
 0x110   : > { %v4217_v12 = vld [vmem:[%s5625_s2 + $0x828] ss:$16 sps:$4 sm:$0xff]  }
 0x111   : > { %2698 = vmatpush2.bf16.msra.mxu0 %v4133_v44  ;;  %v4195_v44 = vld [vmem:[%s5625_s2 + $0x8ac] ss:$16 sps:$4 sm:$0xff]  }
 0x112   : > { %2759 = vmatpush2.bf16.msra.mxu1 %v4136_v45  ;;  %2699 = vmatprep.subr.bf16.mxu0 %v4141_v47  ;;  %v4198_v45 = vld [vmem:[%s5625_s2 + $0x94c] ss:$16 sps:$4 sm:$0xff]   ;;  %v4196_v47 = vld [vmem:[%s5625_s2 + $0x948] ss:$16 sps:$4 sm:$0xff]  }
 0x113   : > { %2760 = vmatprep.subr.bf16.mxu1 %v4144_v48  ;;  %v4201_v48 = vld [vmem:[%s5625_s2 + $0x88c] ss:$16 sps:$4 sm:$0xff]  }
 0x114   : > { %v966_v55 = vpop.f32.mrf.mxu0 }
 0x115   : > { %v5283_v56 = vadd.f32 %v1015_v41, %v966_v55  ;;  %2700 = vmatpush2.bf16.msra.mxu0 %v4139_v49  ;;  %v4192_v41 = vld [vmem:[%s5625_s2 + $0x96c] ss:$16 sps:$4 sm:$0xff]   ;;  %v4208_v55 = vld [vmem:[%s5625_s2 + $0x908] ss:$16 sps:$4 sm:$0xff]  }
 0x116   : > { %2761 = vmatpush2.bf16.msra.mxu1 %v4142_v50  ;;  %v968_v61 = vpop.f32.mrf.mxu0  ;;  %2701 = vmatprep.subr.bf16.mxu0 %v4147_v53  ;;  %v4204_v49 = vld [vmem:[%s5625_s2 + $0x92c] ss:$16 sps:$4 sm:$0xff]   ;;  %v4199_v50 = vld [vmem:[%s5625_s2 + $0x888] ss:$16 sps:$4 sm:$0xff]  }
 0x117   : > { %2781 = vmatprep.subr.bf16.mxu1 %v4150_v54  ;;  %v5297_v0 = vadd.f32 %v1017_v46, %v968_v61  ;;  %v4193_v46 = vld [vmem:[%s5625_s2 + $0x8a8] ss:$16 sps:$4 sm:$0xff]   ;;  %v4207_v53 = vld [vmem:[%s5625_s2 + $0x86c] ss:$16 sps:$4 sm:$0xff]  }
 0x118   : > { %v970_v1 = vpop.f32.mrf.mxu0  ;;  %v4205_v54 = vld [vmem:[%s5625_s2 + $0x868] ss:$16 sps:$4 sm:$0xff]  }
 0x119   : > { %2763 = vmatmul.mubr.bf16.vlgmr.msra.gmra.mxu1 %v4572_v51  ;;  %v5300_v3 = vadd.f32 %v1019_v52, %v970_v1  ;;  %2702 = vmatpush2.bf16.msra.mxu0 %v4145_v57  ;;  %v4202_v52 = vld [vmem:[%s5625_s2 + $0x928] ss:$16 sps:$4 sm:$0xff]   ;;  %v4213_v57 = vld [vmem:[%s5625_s2 + $0x84c] ss:$16 sps:$4 sm:$0xff]  }
 0x11a   : > { %2782 = vmatpush1.bf16.msra.mxu1 %v4148_v59  ;;  %v972_v6 = vpop.f32.mrf.mxu0  ;;  %2703 = vmatprep.subr.bf16.mxu0 %v4153_v62  ;;  %v4216_v59 = vld [vmem:[%s5625_s2 + $0x8ec] ss:$16 sps:$4 sm:$0xff]   ;;  %v4214_v1 = vld [vmem:[%s5625_s2 + $0x8e8] ss:$16 sps:$4 sm:$0xff]  }
 0x11b   : > { %2783 = vmatprep.subr.bf16.mxu1 %v4156_v63  ;;  %v5314_v10 = vadd.f32 %v1021_v60, %v972_v6  ;;  %3696 = vmatprep.mubr.msk.bf16.mxu1 %vm925_vm0, %v4671_v25  ;;  %v4211_v63 = vld [vmem:[%s5625_s2 + $0x848] ss:$16 sps:$4 sm:$0xff]   ;;  %v4222_v6 = vld [vmem:[%s5625_s2 + $0x8cc] ss:$16 sps:$4 sm:$0xff]  }
 0x11c   : > { %v976_v11 = vpop.f32.mrf.mxu0 }
 0x11d   : > { %2704 = vmatpush2.bf16.msra.mxu0 %v4151_v4 }
 0x11e   : > { %2784 = vmatpush1.bf16.msra.mxu1 %v4154_v5  ;;  %2705 = vmatprep.subr.bf16.mxu0 %v4159_v7  ;;  %v977_v18 = vpop.f32.mrf.mxu0  ;;  %v4219_v5 = vld [vmem:[%s5625_s2 + $0x82c] ss:$16 sps:$4 sm:$0xff]  }
 0x11f   : > { %2785 = vmatprep.subr.bf16.mxu1 %v4162_v8  ;;  %v4228_v18 = vld [vmem:[%s5625_s2 + $0xa0c] ss:$16 sps:$4 sm:$0xff]  }
 0x120   : > { %v978_v20 = vpop.f32.mrf.mxu0 }
 0x121   : > { %2773 = vmatmul.mubr.bf16.gmra.mxu1 %v4674_v27  ;;  %2706 = vmatpush2.bf16.msra.mxu0 %v4157_v14  ;;  %v4220_v14 = vld [vmem:[%s5625_s2 + $0x8c8] ss:$16 sps:$4 sm:$0xff]  }
 0x122   : > { %2786 = vmatpush1.bf16.msra.mxu1 %v4160_v15  ;;  %2707 = vmatprep.subr.bf16.mxu0 %v4165_v16  ;;  %v979_v28 = vpop.f32.mrf.mxu0 }
 0x123   : > { %2787 = vmatprep.subr.bf16.mxu1 %v4168_v17  ;;  %2813 = vmatprep.mubr.bf16.mxu1 %v4588_v58  ;;  %v4180_v58 = vld [vmem:[%s5625_s2 + $0x9ac] ss:$16 sps:$4 sm:$0xff]  }
 0x124   : > { %v4225_v17 = vld [vmem:[%s5625_s2 + $0x80c] ss:$16 sps:$4 sm:$0xff]  }
 0x125   : > { %2708 = vmatpush2.bf16.msra.mxu0 %v4163_v21  ;;  %v4234_v28 = vld [vmem:[%s5625_s2 + $0x9ec] ss:$16 sps:$4 sm:$0xff]  }
 0x126   : > { %2788 = vmatpush1.bf16.msra.mxu1 %v4166_v23  ;;  %2709 = vmatprep.subr.bf16.mxu0 %v4171_v24  ;;  %v4223_v23 = vld [vmem:[%s5625_s2 + $0x808] ss:$16 sps:$4 sm:$0xff]  }
 0x127   : > { %2789 = vmatprep.subr.bf16.mxu1 %v4174_v26  ;;  %v4226_v24 = vld [vmem:[%s5625_s2 + $0xa08] ss:$16 sps:$4 sm:$0xff]   ;;  %v4231_v26 = vld [vmem:[%s5625_s2 + $0x7ec] ss:$16 sps:$4 sm:$0xff]  }
 0x129   : > { %2710 = vmatpush2.bf16.msra.mxu0 %v4169_v29 }
 0x12a   : > { %2790 = vmatpush1.bf16.msra.mxu1 %v4172_v30  ;;  %2832 = vmatprep.subr.bf16.mxu0 %v4180_v58 }
 0x12b   : > { %2791 = vmatprep.subr.bf16.mxu1 %v4177_v32 }
 0x12c   : > { %2712 = vmatmul.mubr.bf16.vlgmr.msra.gmra.mxu0 %v4642_v13 }
 0x12d   : > { %2833 = vmatpush1.bf16.msra.mxu0 %v4178_v34  ;;  %2721 = vmatprep.mubr.bf16.mxu0 %v4667_v22  ;;  %v4232_v34 = vld [vmem:[%s5625_s2 + $0x9e8] ss:$16 sps:$4 sm:$0xff]  }
 0x12e   : > { %2792 = vmatpush1.bf16.msra.mxu1 %v4175_v33  ;;  %2834 = vmatprep.subr.bf16.mxu0 %v4186_v37  ;;  %v4229_v33 = vld [vmem:[%s5625_s2 + $0x7e8] ss:$16 sps:$4 sm:$0xff]   ;;  %v4240_v37 = vld [vmem:[%s5625_s2 + $0x9cc] ss:$16 sps:$4 sm:$0xff]  }
 0x12f   : > { %2793 = vmatprep.subr.bf16.mxu1 %v4183_v35  ;;  %v4237_v35 = vld [vmem:[%s5625_s2 + $0x7cc] ss:$16 sps:$4 sm:$0xff]  }
 0x131   : > { %2835 = vmatpush1.bf16.msra.mxu0 %v4184_v39 }
 0x132   : > { %2794 = vmatpush1.bf16.msra.mxu1 %v4181_v38  ;;  %2836 = vmatprep.subr.bf16.mxu0 %v4192_v41  ;;  %v4238_v41 = vld [vmem:[%s5625_s2 + $0x9c8] ss:$16 sps:$4 sm:$0xff]  }
 0x133   : > { %2795 = vmatprep.subr.bf16.mxu1 %v4189_v40  ;;  %v4235_v40 = vld [vmem:[%s5625_s2 + $0x7c8] ss:$16 sps:$4 sm:$0xff]  }
 0x134   : > { %2722 = vmatmul.mubr.bf16.gmra.mxu0 %v4688_v31 }
 0x135   : > { %2837 = vmatpush1.bf16.msra.mxu0 %v4190_v43  ;;  %3697 = vmatprep.mubr.msk.bf16.mxu0 %vm925_vm0, %v4530_v36  ;;  %v4210_v36 = vld [vmem:[%s5625_s2 + $0x90c] ss:$16 sps:$4 sm:$0xff]  }
 0x136   : > { %2796 = vmatpush1.bf16.msra.mxu1 %v4187_v42  ;;  %2838 = vmatprep.subr.bf16.mxu0 %v4198_v45 }
 0x137   : > { %2797 = vmatprep.subr.bf16.mxu1 %v4195_v44 }
 0x139   : > { %2839 = vmatpush1.bf16.msra.mxu0 %v4196_v47 }
 0x13a   : > { %2798 = vmatpush2.bf16.msra.mxu1 %v4193_v46  ;;  %2840 = vmatprep.subr.bf16.mxu0 %v4204_v49 }
 0x13b   : > { %2799 = vmatprep.subr.bf16.mxu1 %v4201_v48 }
 0x13d   : > { %2841 = vmatpush1.bf16.msra.mxu0 %v4202_v52 }
 0x13e   : > { %2800 = vmatpush2.bf16.msra.mxu1 %v4199_v50  ;;  %2842 = vmatprep.subr.bf16.mxu0 %v4210_v36 }
 0x13f   : > { %2801 = vmatprep.subr.bf16.mxu1 %v4207_v53 }
 0x140   : > { %v1113_v61 = vpop.f32.mrf.mxu0 }
 0x141   : > { %v1064_v60 = vpop.f32.mrf.mxu1  ;;  %2843 = vmatpush1.bf16.msra.mxu0 %v4208_v55 }
 0x142   : > { %v5433_v62 = vadd.f32 %v1113_v61, %v1064_v60  ;;  %2802 = vmatpush2.bf16.msra.mxu1 %v4205_v54  ;;  %v1115_v4 = vpop.f32.mrf.mxu0  ;;  %2844 = vmatprep.subr.bf16.mxu0 %v4216_v59 }
 0x143   : > { %v1066_v2 = vpop.f32.mrf.mxu1  ;;  %2803 = vmatprep.subr.bf16.mxu1 %v4213_v57 }
 0x144   : > { %v5447_v7 = vadd.f32 %v1115_v4, %v1066_v2  ;;  %v1117_v9 = vpop.f32.mrf.mxu0 }
 0x145   : > { %v1068_v8 = vpop.f32.mrf.mxu1  ;;  %2845 = vmatpush1.bf16.msra.mxu0 %v4214_v1 }
 0x146   : > { %v5449_v11 = vadd.f32 %v1117_v9, %v1068_v8  ;;  %2804 = vmatpush2.bf16.msra.mxu1 %v4211_v63  ;;  %v1119_v16 = vpop.f32.mrf.mxu0  ;;  %2846 = vmatprep.subr.bf16.mxu0 %v4222_v6 }
 0x147   : > { %v1070_v15 = vpop.f32.mrf.mxu1  ;;  %2805 = vmatprep.subr.bf16.mxu1 %v4219_v5 }
 0x148   : > { %v5463_v19 = vadd.f32 %v1119_v16, %v1070_v15  ;;  %v1123_v21 = vpop.f32.mrf.mxu0 }
 0x149   : > { %v1074_v20 = vpop.f32.mrf.mxu1  ;;  %2847 = vmatpush1.bf16.msra.mxu0 %v4220_v14 }
 0x14a   : > { %2806 = vmatpush2.bf16.msra.mxu1 %v4217_v12  ;;  %2858 = vmatprep.subr.bf16.mxu0 %v4228_v18  ;;  %v1124_v30 = vpop.f32.mrf.mxu0 }
 0x14b   : > { %2807 = vmatprep.subr.bf16.mxu1 %v4225_v17  ;;  %v1075_v29 = vpop.f32.mrf.mxu1 }
 0x14c   : > { %v1125_v58 = vpop.f32.mrf.mxu0 }
 0x14d   : > { %v1076_v32 = vpop.f32.mrf.mxu1  ;;  %2859 = vmatpush2.bf16.msra.mxu0 %v4226_v24 }
 0x14e   : > { %2808 = vmatpush2.bf16.msra.mxu1 %v4223_v23  ;;  %2860 = vmatprep.subr.bf16.mxu0 %v4234_v28  ;;  %v1126_v39 = vpop.f32.mrf.mxu0 }
 0x14f   : > { %2809 = vmatprep.subr.bf16.mxu1 %v4231_v26  ;;  %v1077_v38 = vpop.f32.mrf.mxu1 }
 0x151   : > { %2861 = vmatpush2.bf16.msra.mxu0 %v4232_v34 }
 0x152   : > { %2810 = vmatpush2.bf16.msra.mxu1 %v4229_v33  ;;  %2862 = vmatprep.subr.bf16.mxu0 %v4240_v37 }
 0x153   : > { %2811 = vmatprep.subr.bf16.mxu1 %v4237_v35 }
 0x155   : > { %2863 = vmatpush2.bf16.msra.mxu0 %v4238_v41 }
 0x156   : > { %2812 = vmatpush2.bf16.msra.mxu1 %v4235_v40 }
 0x158   : > { %2865 = vmatmul.mubr.bf16.vlgmr.msra.gmra.mxu0 %v4572_v51 }
 0x159   : > { %2814 = vmatmul.mubr.bf16.vlgmr.msra.gmra.mxu1 %v4642_v13  ;;  %3698 = vmatprep.mubr.msk.bf16.mxu0 %vm925_vm0, %v4671_v25 }
 0x15a   : > { %2823 = vmatprep.mubr.bf16.mxu1 %v4667_v22 }
 0x160   : > { %2875 = vmatmul.mubr.bf16.gmra.mxu0 %v4674_v27 }
 0x161   : > { %2824 = vmatmul.mubr.bf16.gmra.mxu1 %v4688_v31 }
 0x16d   : > { %v1862_v42 = vpop.f32.mrf.mxu1 }
 0x16f   : > { %v1864_v43 = vpop.f32.mrf.mxu1 }
 0x171   : > { %v1866_v44 = vpop.f32.mrf.mxu1 }
 0x173   : > { %v1868_v45 = vpop.f32.mrf.mxu1 }
 0x175   : > { %v1872_v46 = vpop.f32.mrf.mxu1 }
 0x177   : > { %v1874_v47 = vpop.f32.mrf.mxu1 }
 0x179   : > { %v1876_v48 = vpop.f32.mrf.mxu1 }
 0x17b   : > { %v1877_v49 = vpop.f32.mrf.mxu1 }
 0x180   : > { %v1811_v13 = vpop.f32.mrf.mxu0 }
 0x181   : > { %v1863_v50 = vadd.f32 %v1862_v42, %v1811_v13 }
 0x182   : > { %v1813_v51 = vpop.f32.mrf.mxu0 }
 0x183   : > { %v1865_v52 = vadd.f32 %v1864_v43, %v1813_v51  ;;  %v1994_v36 = vrot.slane %v1863_v50, 1 }
 0x184   : > { %v1815_v22 = vpop.f32.mrf.mxu0 }
 0x185   : > { %v1867_v53 = vadd.f32 %v1866_v44, %v1815_v22  ;;  %v1997_v55 = vrot.slane %v1865_v52, 1 }
 0x186   : > { %v1817_v25 = vpop.f32.mrf.mxu0 }
 0x187   : > { %v1995_v31 = vrot.slane %v1867_v53, 1  ;;  %v1869_v54 = vadd.f32 %v1868_v45, %v1817_v25 }
 0x188   : > { %v1821_v27 = vpop.f32.mrf.mxu0 }
 0x189   : > { %v1996_v57 = vsel %vm1993_vm1, %v1994_v36, %v1995_v31  ;;  %v1998_v59 = vrot.slane %v1869_v54, 1  ;;  %v1873_v60 = vadd.f32 %v1872_v46, %v1821_v27 }
 0x18a   : > { %v5504_v61 = vadd.f32 %v1996_v57, %v5283_v56  ;;  %v1823_v63 = vpop.f32.mrf.mxu0 }
 0x18b   : > { %v1999_v1 = vsel %vm1993_vm1, %v1997_v55, %v1998_v59  ;;  %v2006_v2 = vrot.slane %v1873_v60, 1  ;;  %v1875_v4 = vadd.f32 %v1874_v47, %v1823_v63  ;;  %v2934_v63 = vlaneseq }
 0x18c   : > { %v5508_v5 = vadd.f32 %v1999_v1, %v5297_v0  ;;  %v1825_v6 = vpop.f32.mrf.mxu0 }
 0x18d   : > { %v2007_v8 = vsel %vm1993_vm1, %v1995_v31, %v2006_v2  ;;  %v2008_v9 = vrot.slane %v1875_v4, 1 }
 0x18e   : > { %v5512_v12 = vadd.f32 %v2007_v8, %v5300_v3  ;;  %v1826_v14 = vpop.f32.mrf.mxu0 }
 0x18f   : > { %v2009_v15 = vsel %vm1993_vm1, %v1998_v59, %v2008_v9  ;;  %v5534_v9 = vshrl.u32 %v2934_v63, 7 }
 0x190   : > { %v5516_v56 = vadd.f32 %v2009_v15, %v5314_v10 }
 0x1ac   : > { %v1964_v17 = vpop.f32.mrf.mxu0 }
 0x1ad   : > { %v1913_v16 = vpop.f32.mrf.mxu1 }
 0x1ae   : > { %v1965_v18 = vadd.f32 %v1964_v17, %v1913_v16  ;;  %v1966_v21 = vpop.f32.mrf.mxu0 }
 0x1af   : > { %v1915_v20 = vpop.f32.mrf.mxu1 }
 0x1b0   : > { %v1967_v0 = vadd.f32 %v1966_v21, %v1915_v20  ;;  %v1968_v24 = vpop.f32.mrf.mxu0  ;;  %v2000_v30 = vrot.slane %v1965_v18, 1  ;;  %v2936_v21 = vsub.s32 0, %v5534_v9 }
 0x1b1   : > { %v1917_v23 = vpop.f32.mrf.mxu1 }
 0x1b2   : > { %v1969_v26 = vadd.f32 %v1968_v24, %v1917_v23  ;;  %v1970_v29 = vpop.f32.mrf.mxu0  ;;  %v2003_v34 = vrot.slane %v1967_v0, 1  ;;  %v2932_v23 = vld [vmem:[%s5626_s3] sm:$0xf]  ;;  %v2940_v24 = vsub.s32 1, %v5534_v9 }
 0x1b3   : > { %v1919_v28 = vpop.f32.mrf.mxu1 }
 0x1b4   : > { %v2001_v3 = vrot.slane %v1969_v26, 1  ;;  %v1971_v32 = vadd.f32 %v1970_v29, %v1919_v28  ;;  %v1974_v33 = vpop.f32.mrf.mxu0 }
 0x1b5   : > { %v1923_v58 = vpop.f32.mrf.mxu1 }
 0x1b6   : > { %v2002_v10 = vsel %vm1993_vm1, %v2000_v30, %v2001_v3  ;;  %v2004_v35 = vrot.slane %v1971_v32, 1  ;;  %v1975_v37 = vadd.f32 %v1974_v33, %v1923_v58  ;;  %v1976_v40 = vpop.f32.mrf.mxu0  ;;  %v2941_v58 = vrot.slane %v2932_v23, %v2940_v24 }
 0x1b7   : > { %v5520_v38 = vadd.f32 %v2002_v10, %v5433_v62  ;;  %v1925_v39 = vpop.f32.mrf.mxu1 }
 0x1b8   : > { %v2005_v41 = vsel %vm1993_vm1, %v2003_v34, %v2004_v35  ;;  %v2010_v42 = vrot.slane %v1975_v37, 1  ;;  %v1977_v43 = vadd.f32 %v1976_v40, %v1925_v39  ;;  %v1978_v46 = vpop.f32.mrf.mxu0 }
 0x1b9   : > { %v5524_v44 = vadd.f32 %v2005_v41, %v5447_v7  ;;  %v1927_v45 = vpop.f32.mrf.mxu1 }
 0x1ba   : > { %v2011_v47 = vsel %vm1993_vm1, %v2001_v3, %v2010_v42  ;;  %v2012_v48 = vrot.slane %v1977_v43, 1  ;;  %v1979_v62 = vpop.f32.mrf.mxu0  ;;  %v2937_v3 = vrot.slane %v2932_v23, %v2936_v21 }
 0x1bb   : > { %v5528_v49 = vadd.f32 %v2011_v47, %v5449_v11  ;;  %v1928_v13 = vpop.f32.mrf.mxu1 }
 0x1bc   : > { %v2013_v50 = vsel %vm1993_vm1, %v2004_v35, %v2012_v48 }
 0x1bd   : > { %v5532_v51 = vadd.f32 %v2013_v50, %v5463_v19 }
 0x1d9   : > { %v2764_v52 = vpop.f32.mrf.mxu1 }
 0x1db   : > { %v2766_v22 = vpop.f32.mrf.mxu1 }
 0x1dd   : > { %v2768_v53 = vpop.f32.mrf.mxu1 }
 0x1df   : > { %v2770_v7 = vpop.f32.mrf.mxu1 }
 0x1e1   : > { %v2774_v25 = vpop.f32.mrf.mxu1 }
 0x1e3   : > { %v2776_v36 = vpop.f32.mrf.mxu1 }
 0x1e5   : > { %v2778_v31 = vpop.f32.mrf.mxu1 }
 0x1e7   : > { %v2779_v54 = vpop.f32.mrf.mxu1 }
 0x1ec   : > { %v2713_v27 = vpop.f32.mrf.mxu0 }
 0x1ed   : > { %v2765_v19 = vadd.f32 %v2764_v52, %v2713_v27 }
 0x1ee   : > { %v2715_v55 = vpop.f32.mrf.mxu0 }
 0x1ef   : > { %v2767_v8 = vadd.f32 %v2766_v22, %v2715_v55  ;;  %v2896_v17 = vrot.slane %v2765_v19, 2 }
 0x1f0   : > { %v2717_v57 = vpop.f32.mrf.mxu0 }
 0x1f1   : > { %v2769_v1 = vadd.f32 %v2768_v53, %v2717_v57  ;;  %v2899_v20 = vrot.slane %v2767_v8, 2 }
 0x1f2   : > { %v2719_v11 = vpop.f32.mrf.mxu0 }
 0x1f3   : > { %v2771_v4 = vadd.f32 %v2770_v7, %v2719_v11  ;;  %v2897_v14 = vrot.slane %v2769_v1, 2 }
 0x1f4   : > { %v2723_v59 = vpop.f32.mrf.mxu0 }
 0x1f5   : > { %v2900_v15 = vrot.slane %v2771_v4, 2  ;;  %v2775_v16 = vadd.f32 %v2774_v25, %v2723_v59  ;;  %v2898_v0 = vsel %vm2895_vm2, %v2896_v17, %v2897_v14 }
 0x1f6   : > { %v2725_v60 = vpop.f32.mrf.mxu0  ;;  %v2924_v30 = vadd.f32 %v2898_v0, %v5504_v61 }
 0x1f7   : > { %v2777_v18 = vadd.f32 %v2776_v36, %v2725_v60  ;;  %v2901_v26 = vsel %vm2895_vm2, %v2899_v20, %v2900_v15  ;;  %v2908_v28 = vrot.slane %v2775_v16, 2  ;;  %v2948_v36 = vsub.s32 3, %v5534_v9 }
 0x1f8   : > { %v2727_v2 = vpop.f32.mrf.mxu0  ;;  %v2925_v32 = vadd.f32 %v2901_v26, %v5508_v5  ;;  %v2954_v10 = vadd.f32 %v2937_v3, %v2924_v30 }
 0x1f9   : > { %v2910_v29 = vrot.slane %v2777_v18, 2  ;;  %v2909_v33 = vsel %vm2895_vm2, %v2897_v14, %v2908_v28  ;;  %v2949_v14 = vrot.slane %v2932_v23, %v2948_v36 }
 0x1fa   : > { %v2728_v6 = vpop.f32.mrf.mxu0  ;;  %v2955_v35 = vadd.f32 %v2941_v58, %v2925_v32  ;;  %v2928_v37 = vadd.f32 %v2909_v33, %v5512_v12  ;;  %v3699_v40 = vmul.f32 -1.442695, %v2954_v10 }
 0x1fb   : > { %v2911_v34 = vsel %vm2895_vm2, %v2900_v15, %v2910_v29 }
 0x1fc   : > { %v2929_v39 = vadd.f32 %v2911_v34, %v5516_v56  ;;  %v3701_v41 = vmul.f32 -1.442695, %v2955_v35  ;;  %v2958_v42 = vadd.f32 %v2937_v3, %v2928_v37  ;;  %4241 = vpow2.f32 %v3699_v40  ;;  %v3000_v37 = vld [vmem:[%s250_s30] sm:$0xff] }
 0x1fd   : > { %v2944_v56 = vsub.s32 2, %v5534_v9 }
 0x1fe   : > { %v2959_v43 = vadd.f32 %v2941_v58, %v2929_v39  ;;  %4243 = vpow2.f32 %v3701_v41  ;;  %v3700_v61 = vmul.f32 -1.442695, %v2958_v42 }
 0x1ff   : > { %v2945_v11 = vrot.slane %v2932_v23, %v2944_v56 }
 0x200   : > { %v3702_v45 = vmul.f32 -1.442695, %v2959_v43  ;;  %4245 = vpow2.f32 %v3700_v61  ;;  %v3001_v61 = vld [vmem:[%s250_s30 + $0x8] sm:$0xff] }
 0x202   : > { %4247 = vpow2.f32 %v3702_v45 }
 0x209   : > { %v4242_v62 = vpop.eup %4241 }
 0x20a   : > { %v2968_v55 = vadd.f32 1.0, %v4242_v62 }
 0x20b   : > { %v4244_v52 = vpop.eup %4243 }
 0x20c   : > { %v2980_v57 = vadd.f32 1.0, %v4244_v52 }
 0x20d   : > { %v4246_v63 = vpop.eup %4245 }
 0x20e   : > { %4249 = vrcp.f32 %v2980_v57  ;;  %v2969_v20 = vadd.f32 1.0, %v4246_v63 }
 0x20f   : > { %v4248_v6 = vpop.eup %4247  ;;  %4251 = vrcp.f32 %v2968_v55 }
 0x210   : > { %v2981_v28 = vadd.f32 1.0, %v4248_v6 }
 0x218   : > { %v2866_v46 = vpop.f32.mrf.mxu0 }
 0x219   : > { %v2815_v5 = vpop.f32.mrf.mxu1 }
 0x21a   : > { %v2868_v48 = vpop.f32.mrf.mxu0  ;;  %v2867_v13 = vadd.f32 %v2866_v46, %v2815_v5 }
 0x21b   : > { %v2817_v47 = vpop.f32.mrf.mxu1 }
 0x21c   : > { %v2870_v12 = vpop.f32.mrf.mxu0  ;;  %v2869_v22 = vadd.f32 %v2868_v48, %v2817_v47  ;;  %v2902_v31 = vrot.slane %v2867_v13, 2 }
 0x21d   : > { %v2819_v50 = vpop.f32.mrf.mxu1 }
 0x21e   : > { %v2871_v53 = vadd.f32 %v2870_v12, %v2819_v50  ;;  %v2872_v25 = vpop.f32.mrf.mxu0  ;;  %v2905_v1 = vrot.slane %v2869_v22, 2 }
 0x21f   : > { %v2821_v7 = vpop.f32.mrf.mxu1 }
 0x220   : > { %v2903_v54 = vrot.slane %v2871_v53, 2  ;;  %v2873_v27 = vadd.f32 %v2872_v25, %v2821_v7  ;;  %v2876_v60 = vpop.f32.mrf.mxu0 }
 0x221   : > { %v2825_v59 = vpop.f32.mrf.mxu1 }
 0x222   : > { %v2904_v2 = vsel %vm2895_vm2, %v2902_v31, %v2903_v54  ;;  %v2906_v4 = vrot.slane %v2873_v27, 2  ;;  %v2877_v19 = vadd.f32 %v2876_v60, %v2825_v59  ;;  %v2878_v9 = vpop.f32.mrf.mxu0 }
 0x223   : > { %v2926_v8 = vadd.f32 %v2904_v2, %v5520_v38  ;;  %v2827_v15 = vpop.f32.mrf.mxu1 }
 0x224   : > { %v2907_v16 = vsel %vm2895_vm2, %v2905_v1, %v2906_v4  ;;  %v2912_v17 = vrot.slane %v2877_v19, 2  ;;  %v2879_v18 = vadd.f32 %v2878_v9, %v2827_v15  ;;  %v2880_v26 = vpop.f32.mrf.mxu0 }
 0x225   : > { %v2956_v21 = vadd.f32 %v2945_v11, %v2926_v8  ;;  %v2927_v0 = vadd.f32 %v2907_v16, %v5524_v44  ;;  %v2829_v24 = vpop.f32.mrf.mxu1 }
 0x226   : > { %v2913_v29 = vsel %vm2895_vm2, %v2903_v54, %v2912_v17  ;;  %v2914_v38 = vrot.slane %v2879_v18, 2  ;;  %v2881_v32 = vpop.f32.mrf.mxu0 }
 0x227   : > { %4253 = vtanh.f32 %v2956_v21  ;;  %v2957_v23 = vadd.f32 %v2949_v14, %v2927_v0  ;;  %v2930_v30 = vadd.f32 %v2913_v29, %v5528_v49  ;;  %v2830_v3 = vpop.f32.mrf.mxu1  ;;  %v4250_v49 = vpop.eup %4249 }
 0x228   : > { %v2915_v58 = vsel %vm2895_vm2, %v2906_v4, %v2914_v38  ;;  %4255 = vrcp.f32 %v2969_v20  ;;  %v4252_v39 = vpop.eup %4251  ;;  %v3002_v40 = vmul.f32 %v4250_v49, %v3000_v37 }
 0x229   : > { %v3703_v44 = vmul.f32 -1.442695, %v2957_v23  ;;  %v2960_v33 = vadd.f32 %v2945_v11, %v2930_v30  ;;  %v2931_v34 = vadd.f32 %v2915_v58, %v5532_v51  ;;  %4257 = vrcp.f32 %v2981_v28 }
 0x22b   : > { %4259 = vpow2.f32 %v3703_v44  ;;  %v2961_v10 = vadd.f32 %v2949_v14, %v2931_v34 }
 0x22c   : > { %4261 = vtanh.f32 %v2960_v33 }
 0x22d   : > { %v3704_v35 = vmul.f32 -1.442695, %v2961_v10 }
 0x22f   : > { %4263 = vpow2.f32 %v3704_v35 }
 0x234   : > { %v4254_v51 = vpop.eup %4253 }
 0x235   : > { %v3004_v41 = vmul.f32 %v4254_v51, %v4252_v39  ;;  %v4256_v42 = vpop.eup %4255 }
 0x236   : > { %v4258_v43 = vpop.eup %4257 }
 0x237   : > { %v3006_v45 = vadd.f32 %v3004_v41, %v3002_v40  ;;  %v3003_v48 = vmul.f32 %v4258_v43, %v3001_v61 }
 0x238   : > { %v4260_v5 = vpop.eup %4259 }
 0x239   : > { %v4262_v46 = vpop.eup %4261  ;;  %v2994_v47 = vadd.f32 1.0, %v4260_v5  ;;  %3014 = vst [vmem:[%s240_s11] sm:$0xff] %v3006_v45  ;;  %4265 = vtanh.f32 %v3006_v45 }
 0x23a   : > { %v3005_v13 = vmul.f32 %v4262_v46, %v4256_v42 }
 0x23b   : > { %4267 = vrcp.f32 %v2994_v47 }
 0x23c   : > { %v4264_v62 = vpop.eup %4263  ;;  %v3007_v50 = vadd.f32 %v3005_v13, %v3003_v48 }
 0x23d   : > { %v2995_v12 = vadd.f32 1.0, %v4264_v62 }
 0x23e   : > { %4269 = vtanh.f32 %v3007_v50  ;;  %3015 = vst [vmem:[%s240_s11 + $0x8] sm:$0xff] %v3007_v50 }
 0x23f   : > { %4271 = vrcp.f32 %v2995_v12 }
 0x240   : > { %4286 = shalt.err (!%p4283_p3)
}
 0x241   : > { %s4287_s26 = scalar_lea.hbm %s5572_s14, 256  ;;  %s4291_s8 = scalar_lea.hbm %s5628_s5, 512 }
 0x242   : > { %p4288_p4 = scmp.ne.s32.totalorder %s5572_s14, %s4287_s26  ;;  %p4292_p9 = scmp.lt.s32.totalorder %s5572_s14, %s5628_s5 }
 0x243   : > { %p4293_p10 = scmp.lt.s32.totalorder %s4291_s8, %s4287_s26 }
 0x244   : > { %p4289_p7 = pnand %p4288_p4, %p4406_p5 }
 0x245   : > { %p4294_p11 = por %p4293_p10, %p4292_p9 }
 0x246   : > { %p4290_p8 = pneg %p4289_p7 }
 0x248   : > { %p4295_p12 = pnand %p4294_p11, %p4290_p8 }
 0x24a   : > { %4298 = shalt.err (!%p4295_p12)
}
 0x24b   : > { %s4336_s13 = smov 128   ;;  %s4337_s10 = smov 8   ;;  %v4266_v56 = vpop.eup %4265 }
 0x24c   : > { %3714 = dma.vmem_to_hbm [thread:$0]  (%p4406_p5), %s5574_s12, 256, %s5572_s14, %s5578_s22, %s4336_s13, %s4336_s13, %s4337_s10   ;;  %v4268_v52 = vpop.eup %4267 }
 0x24d   : > { %s255_s16 = scalar_lea.vmem %s5627_s4, %s3710_s23  ;;  %v3010_v22 = vmul.f32 %v4268_v52, %v4266_v56  ;;  %v4270_v53 = vpop.eup %4269 }
 0x24e   : > { %v4272_v7 = vpop.eup %4271 }
 0x24f   : > { %3012 = vst [vmem:[%s255_s16] sm:$0xff] %v3010_v22  ;;  %v3011_v25 = vmul.f32 %v4272_v7, %v4270_v53 }
 0x251   : > { %3013 = vst [vmem:[%s255_s16 + $0x8] sm:$0xff] %v3011_v25 }
 0x252 PF: > { %p3720_p13 = scmp.ge.s32.totalorder %s4333_s21, 2  ;;  %s3061_s28 = sand.u32 1, %s4321_s18  }
 0x253   : > { %s3062_s17 = scalar_lea.sflag [#allocation3], %s3061_s28 }
 0x254   : > { %p3717_p5 = pnand %p3720_p13, %p4410_p6 }
 0x256   : > { %p3718_p0 = pneg %p3717_p5 }
 0x258   : > { %4316 = dma.done.wait (%p3718_p0), %s3062_s17, 256  }
 0x259   : > { %4318 = vsyncadd (%p3718_p0), %s3062_s17, 4294967040  ;;  %p16_p1 = scmp.ge.s32.totalorder %s4393_s24, 4   ;;  %s5631_s18 = smov %s4325_s19 }
 0x25a   : > { %s5632_s19 = smov %s4329_s20  ;;  %s5633_s20 = smov %s4404_s27 }
 0x25b   : > { %s5634_s21 = smov %s4393_s24  ;;  %18 = sbr.rel (!%p16_p1) target bundleno = 3 (0x3), region = 88 }
 0x260   :  { %3067 = vsyncpa [#allocation3], 1 }
 0x261   :  { %3069 = vsyncpa [#allocation3 + $0x1], 1 }

</bundles_post_ra>
